<compile_context>
chip_gen: v5e
topology: v5e:2x2
jax: 0.10.0
libtpu: 0.0.40
codegen_flags: <defaults>
</compile_context>

<pallas_src>
import functools
import math

import jax
import jax.numpy as jnp
from jax.experimental import pallas as pl
from jax.experimental.pallas import tpu as pltpu

BF16 = jnp.bfloat16
VMEM_LIMIT = 48 * 1024 * 1024   # below v7x 64 MiB physical, above 16/32 MiB defaults


# ----------------------------------------------------------------------------
# Tile-size helpers
# ----------------------------------------------------------------------------
def _divisors_desc(n):
    return [d for d in range(n, 0, -1) if n % d == 0]


def _row_budget(cout):
    """Rows per grid step: large enough to amortize ~0.35us/step overhead,
    small enough that the f32 accumulator (rows*cout*4B) stays ~<=128 KiB."""
    return max(128, min(1024, (128 * 1024) // (4 * max(int(cout), 1))))


def _pick_row_tile(H, W, budget):
    """Largest th dividing H with th*W <= budget and th*W % 8 == 0."""
    for th in _divisors_desc(H):
        r = th * W
        if r % 8 == 0 and r <= budget:
            return th
    if W % 8 == 0:
        return 1     # one output row per step: bounded even for very wide images
    # TODO(synk): add W-axis tiling for W % 8 != 0 and very wide images.
    return H         # tiny odd shapes only: whole image (block == full dims)


def _pick_m_tile(M, budget):
    for tm in _divisors_desc(M):
        if tm % 8 == 0 and tm <= budget:
            return tm
    return M


def _pick_cout_tile(cout):
    if cout <= 256:
        return cout
    for t in (256, 128):
        if cout % t == 0:
            return t
    return cout


# ----------------------------------------------------------------------------
# 3x3 "same" conv (stride 1, pad 1, no bias) -- direct Pallas conv kernel.
#   input : channel-concat of the three width-shifted, height-padded views,
#           shape (N, (H+2)*W, 3*Cin); weights reshaped to (3, 3*Cin, Cout).
#   kernel: per (image, row-tile, cout-tile) accumulates 3 shifted MXU matmuls
#           (K=3*Cin) in f32, fusing optional ReLU / residual in the epilogue.
# ----------------------------------------------------------------------------
@functools.lru_cache(maxsize=None)
def _conv3x3_call(N, H, W, Cin, Cout, relu, has_res):
    tcout = _pick_cout_tile(Cout)
    n_ct = Cout // tcout
    th = _pick_row_tile(H, W, _row_budget(tcout))
    n_tiles = H // th
    rows = th * W
    PH = (H + 2) * W
    K = 3 * Cin
    aligned = (W % 8 == 0)

    def kernel(*refs):
        x_ref = refs[0]
        w_ref = refs[1]
        r_ref = refs[2] if has_res else None
        o_ref = refs[-1]

        acc = jnp.zeros((rows, tcout), jnp.float32)
        if n_tiles == 1:
            for dy in range(3):
                a = x_ref[0, dy * W:dy * W + rows, :]
                acc = acc + jnp.dot(a, w_ref[dy],
                                    preferred_element_type=jnp.float32)
        else:
            base = pl.program_id(1) * rows
            if rows % 8 == 0 and not aligned:
                base = pl.multiple_of(base, 8)
            for dy in range(3):
                s = base + dy * W
                if aligned:
                    s = pl.multiple_of(s, 8)
                a = x_ref[0, pl.ds(s, rows), :]
                acc = acc + jnp.dot(a, w_ref[dy],
                                    preferred_element_type=jnp.float32)
        if relu:
            acc = jnp.maximum(acc, 0.0)
        if has_res:
            acc = acc + r_ref[0].astype(jnp.float32)
        o_ref[0] = acc.astype(o_ref.dtype)

    in_specs = [
        # whole padded image resident per n; grid-invariant over (i, j)
        pl.BlockSpec((1, PH, K), lambda n, i, j: (n, 0, 0)),
        pl.BlockSpec((3, K, tcout), lambda n, i, j: (0, 0, j)),
    ]
    if has_res:
        in_specs.append(pl.BlockSpec((1, rows, tcout), lambda n, i, j: (n, i, j)))

    flops = 2 * 9 * N * H * W * Cin * Cout
    bytes_accessed = 2 * (N * PH * K + 3 * K * Cout
                          + (2 if has_res else 1) * N * H * W * Cout)

    return pl.pallas_call(
        kernel,
        out_shape=jax.ShapeDtypeStruct((N, H * W, Cout), BF16),
        grid=(N, n_tiles, n_ct),
        in_specs=in_specs,
        out_specs=pl.BlockSpec((1, rows, tcout), lambda n, i, j: (n, i, j)),
        compiler_params=pltpu.CompilerParams(
            dimension_semantics=("parallel", "parallel", "parallel"),
            vmem_limit_bytes=VMEM_LIMIT),
        cost_estimate=pl.CostEstimate(flops=flops, transcendentals=0,
                                      bytes_accessed=bytes_accessed),
    )


def conv3x3(x, w, *, relu=False, residual=None):
    """x: (N,H,W,Cin), w: (3,3,Cin,Cout).  out = [relu](conv3x3(x)) [+ residual]."""
    N, H, W, Cin = x.shape
    Cout = w.shape[-1]
    xp = jnp.pad(x.astype(BF16), ((0, 0), (1, 1), (1, 1), (0, 0)))   # (N,H+2,W+2,Cin)
    # one fused pad/slice/concat pass: the three dx taps side by side in channels
    x3 = jnp.concatenate([xp[:, :, dx:dx + W, :] for dx in range(3)],
                         axis=-1).reshape(N, (H + 2) * W, 3 * Cin)
    w3 = w.astype(BF16).reshape(3, 3 * Cin, Cout)
    args = [x3, w3]
    if residual is not None:
        args.append(residual.astype(BF16).reshape(N, H * W, Cout))
    call = _conv3x3_call(N, H, W, Cin, Cout, bool(relu), residual is not None)
    return call(*args).reshape(N, H, W, Cout)


# ----------------------------------------------------------------------------
# Generic tiled GEMM kernel (used by the stride-2 downsample conv and the
# small-Cin head conv expressed as im2col).
# ----------------------------------------------------------------------------
@functools.lru_cache(maxsize=None)
def _gemm_call(M, K, Cout):
    tm = _pick_m_tile(M, _row_budget(Cout))

    def kernel(x_ref, w_ref, o_ref):
        o_ref[...] = jnp.dot(x_ref[...], w_ref[...],
                             preferred_element_type=jnp.float32).astype(o_ref.dtype)

    return pl.pallas_call(
        kernel,
        out_shape=jax.ShapeDtypeStruct((M, Cout), BF16),
        grid=(M // tm,),
        in_specs=[pl.BlockSpec((tm, K), lambda i: (i, 0)),
                  pl.BlockSpec((K, Cout), lambda i: (0, 0))],
        out_specs=pl.BlockSpec((tm, Cout), lambda i: (i, 0)),
        compiler_params=pltpu.CompilerParams(
            dimension_semantics=("parallel",),
            vmem_limit_bytes=VMEM_LIMIT),
    )


def conv2x2_down(x, w):
    """downsample_strideconv: x (N,H,W,C), w (2,2,C,Cout) -> (N,H/2,W/2,Cout).
    Single K=4*C GEMM on one concatenated (dy,dx,c) operand."""
    N, H, W, C = x.shape
    Ho, Wo = H // 2, W // 2
    Cout = w.shape[-1]
    xb = x.astype(BF16)
    xe = xb[:, 0::2, :, :].reshape(N, Ho, Wo, 2 * C)       # dy=0 taps, cols (dx, c)
    xo = xb[:, 1::2, :, :].reshape(N, Ho, Wo, 2 * C)       # dy=1 taps
    x4 = jnp.concatenate([xe, xo], axis=-1).reshape(N * Ho * Wo, 4 * C)
    w4 = w.astype(BF16).reshape(4 * C, Cout)               # rows ordered (dy, dx, c)
    out = _gemm_call(N * Ho * Wo, 4 * C, Cout)(x4, w4)
    return out.reshape(N, Ho, Wo, Cout)


def conv3x3_im2col(x, w):
    """3x3 same conv as one GEMM with K=9*Cin -- for tiny Cin (head, Cin=6)."""
    N, H, W, Cin = x.shape
    Cout = w.shape[-1]
    xp = jnp.pad(x.astype(BF16), ((0, 0), (1, 1), (1, 1), (0, 0)))
    cols = [xp[:, dy:dy + H, dx:dx + W, :] for dy in range(3) for dx in range(3)]
    patches = jnp.concatenate(cols, axis=-1).reshape(N * H * W, 9 * Cin)
    wf = w.astype(BF16).reshape(9 * Cin, Cout)
    out = _gemm_call(N * H * W, 9 * Cin, Cout)(patches, wf)
    return out.reshape(N, H, W, Cout)


# ----------------------------------------------------------------------------
# 2x2 / stride-2 transposed conv (upsample_convtranspose) with fused skip add.
# dy is folded into the kernel body; output is written directly in its final
# memory layout via the (N, H, 2, W, 2*Co) view -- no host-side transpose.
# ----------------------------------------------------------------------------
@functools.lru_cache(maxsize=None)
def _up_call(N, H, W, C, Co, has_skip):
    two_co = 2 * Co
    tho = _pick_row_tile(H, W, _row_budget(two_co))
    nt = H // tho
    rows = tho * W

    def kernel(*refs):
        x_ref = refs[0]
        idx = 1
        if has_skip:
            s_ref = refs[idx]
            idx += 1
        w_ref = refs[idx]
        o_ref = refs[-1]
        xb = x_ref[0]                                   # (rows, C)
        if has_skip:
            xb = xb + s_ref[0]                          # fused UNet skip add (once)
        for dy in range(2):
            y = jnp.dot(xb, w_ref[dy], preferred_element_type=jnp.float32)
            y = y.astype(o_ref.dtype)                   # (rows, 2*Co), cols (dx, o)
            # TODO(synk): single reshape-store of y as (tho, W, 2*Co) once the
            # aligned sublane-split reshape is validated on all Mosaic targets.
            for r in range(tho):
                o_ref[0, r, dy, :, :] = y[r * W:(r + 1) * W, :]

    in_specs = [pl.BlockSpec((1, rows, C), lambda n, i: (n, i, 0))]
    if has_skip:
        in_specs.append(pl.BlockSpec((1, rows, C), lambda n, i: (n, i, 0)))
    in_specs.append(pl.BlockSpec((2, C, two_co), lambda n, i: (0, 0, 0)))

    return pl.pallas_call(
        kernel,
        out_shape=jax.ShapeDtypeStruct((N, H, 2, W, two_co), BF16),
        grid=(N, nt),
        in_specs=in_specs,
        out_specs=pl.BlockSpec((1, tho, 2, W, two_co),
                               lambda n, i: (n, i, 0, 0, 0)),
        compiler_params=pltpu.CompilerParams(
            dimension_semantics=("parallel", "parallel"),
            vmem_limit_bytes=VMEM_LIMIT),
    )


def convT2x2_up(x, w, skip=None):
    """x: (N,H,W,C), w: (C,2,2,Co) -> (N,2H,2W,Co).  skip (same shape as x) fused."""
    N, H, W, C = x.shape
    Co = w.shape[-1]
    w2 = w.astype(BF16).transpose(1, 0, 2, 3).reshape(2, C, 2 * Co)  # per dy: (C,(dx,o))
    args = [x.astype(BF16).reshape(N, H * W, C)]
    if skip is not None:
        args.append(skip.astype(BF16).reshape(N, H * W, C))
    args.append(w2)
    out = _up_call(N, H, W, C, Co, skip is not None)(*args)
    return out.reshape(N, 2 * H, 2 * W, Co)


def resblock(x, w1, w2):
    """B.ResBlock mode 'CRC': x + conv3x3(relu(conv3x3(x))), residual add fused."""
    r = conv3x3(x, w1, relu=True)
    return conv3x3(r, w2, relu=False, residual=x)


# ----------------------------------------------------------------------------
# Parameter init (matches UNetRes.weight_init: U(-1/sqrt(n), 1/sqrt(n)))
# ----------------------------------------------------------------------------
def _init_conv3x3(key, cin, cout):
    stdv = 1.0 / math.sqrt(cin * 9)
    return jax.random.uniform(key, (3, 3, cin, cout), jnp.float32, -stdv, stdv)


def _init_conv2x2(key, cin, cout):
    stdv = 1.0 / math.sqrt(cin * 4)
    return jax.random.uniform(key, (2, 2, cin, cout), jnp.float32, -stdv, stdv)


def _init_convT2x2(key, cin, cout):
    stdv = 1.0 / math.sqrt(cin * 4)
    return jax.random.uniform(key, (cin, 2, 2, cout), jnp.float32, -stdv, stdv)


def init_unetres_params(key, io_nc=1, nc=(16, 32, 64, 128), nb=2):
    keys = iter(jax.random.split(key, 512))
    p = {}
    p["head"] = _init_conv3x3(next(keys), (io_nc + 1) * 3, nc[0])
    for lvl in range(3):
        blocks = [(_init_conv3x3(next(keys), nc[lvl], nc[lvl]),
                   _init_conv3x3(next(keys), nc[lvl], nc[lvl])) for _ in range(nb)]
        p[f"down{lvl + 1}"] = {
            "res": blocks,
            "down": _init_conv2x2(next(keys), nc[lvl], nc[lvl + 1]),
        }
    p["body"] = [(_init_conv3x3(next(keys), nc[3], nc[3]),
                  _init_conv3x3(next(keys), nc[3], nc[3])) for _ in range(nb)]
    for lvl in range(3, 0, -1):
        blocks = [(_init_conv3x3(next(keys), nc[lvl - 1], nc[lvl - 1]),
                   _init_conv3x3(next(keys), nc[lvl - 1], nc[lvl - 1])) for _ in range(nb)]
        p[f"up{lvl}"] = {
            "up": _init_convT2x2(next(keys), nc[lvl], nc[lvl - 1]),
            "res": blocks,
        }
    p["tail"] = _init_conv3x3(next(keys), nc[0], io_nc)
    return p


# ----------------------------------------------------------------------------
# Forward pass (mirrors UNetRes.forward); bf16 activations, f32 accumulation.
# ----------------------------------------------------------------------------
def unetres_forward(params, in1, in2, in3, noise_map):
    x0 = jnp.concatenate([in1, noise_map, in2, noise_map, in3, noise_map],
                         axis=-1).astype(BF16)
    x1 = conv3x3_im2col(x0, params["head"])          # tiny Cin: single K=9*Cin GEMM

    def run_down(x, dp):
        for (w1, w2) in dp["res"]:
            x = resblock(x, w1, w2)
        return conv2x2_down(x, dp["down"])

    x2 = run_down(x1, params["down1"])
    x3 = run_down(x2, params["down2"])
    x4 = run_down(x3, params["down3"])

    x = x4
    for (w1, w2) in params["body"]:
        x = resblock(x, w1, w2)

    def run_up(x, skip, up):
        x = convT2x2_up(x, up["up"], skip=skip)      # skip add fused into the kernel
        for (w1, w2) in up["res"]:
            x = resblock(x, w1, w2)
        return x

    x = run_up(x, x4, params["up3"])
    x = run_up(x, x3, params["up2"])
    x = run_up(x, x2, params["up1"])

    # tail: pad Cout to 128 for lane-dense stores / non-degenerate MXU N,
    # slice outside the kernel; the (x + x1) add fuses with the conv glue.
    io_nc = params["tail"].shape[-1]
    pad_to = max(io_nc, 128)
    w_tail = jnp.pad(params["tail"],
                     ((0, 0), (0, 0), (0, 0), (0, pad_to - io_nc)))
    y = conv3x3(x + x1, w_tail)
    return y[..., :io_nc]


# ----------------------------------------------------------------------------
# Pure-JAX f32 reference (previously validated im2col formulation)
# ----------------------------------------------------------------------------
def _ref_conv3x3(x, w, relu=False):
    N, H, W, C = x.shape
    xp = jnp.pad(x, ((0, 0), (1, 1), (1, 1), (0, 0)))
    cols = [xp[:, dy:dy + H, dx:dx + W, :] for dy in range(3) for dx in range(3)]
    patches = jnp.concatenate(cols, axis=-1).reshape(N * H * W, 9 * C)
    y = patches @ w.reshape(9 * C, -1)
    if relu:
        y = jnp.maximum(y, 0.0)
    return y.reshape(N, H, W, -1)


def _ref_down(x, w):
    N, H, W, C = x.shape
    Ho, Wo = H // 2, W // 2
    p = x.reshape(N, Ho, 2, Wo, 2, C).transpose(0, 1, 3, 2, 4, 5)
    y = p.reshape(N * Ho * Wo, 4 * C) @ w.reshape(4 * C, -1)
    return y.reshape(N, Ho, Wo, -1)


def _ref_up(x, w):
    N, H, W, C = x.shape
    Co = w.shape[-1]
    y = x.reshape(N * H * W, C) @ w.reshape(C, 4 * Co)
    y = y.reshape(N, H, W, 2, 2, Co).transpose(0, 1, 3, 2, 4, 5)
    return y.reshape(N, 2 * H, 2 * W, Co)


def _ref_resblock(x, w1, w2):
    return x + _ref_conv3x3(_ref_conv3x3(x, w1, relu=True), w2)


def unetres_reference(params, in1, in2, in3, noise_map):
    x0 = jnp.concatenate([in1, noise_map, in2, noise_map, in3, noise_map], axis=-1)
    x1 = _ref_conv3x3(x0, params["head"])

    def run_down(x, dp):
        for (w1, w2) in dp["res"]:
            x = _ref_resblock(x, w1, w2)
        return _ref_down(x, dp["down"])

    x2 = run_down(x1, params["down1"])
    x3 = run_down(x2, params["down2"])
    x4 = run_down(x3, params["down3"])

    x = x4
    for (w1, w2) in params["body"]:
        x = _ref_resblock(x, w1, w2)

    def run_up(x, skip, up):
        x = _ref_up(x + skip, up["up"])
        for (w1, w2) in up["res"]:
            x = _ref_resblock(x, w1, w2)
        return x

    x = run_up(x, x4, params["up3"])
    x = run_up(x, x3, params["up2"])
    x = run_up(x, x2, params["up1"])
    return _ref_conv3x3(x + x1, params["tail"])


# ----------------------------------------------------------------------------
# Self-test
# ----------------------------------------------------------------------------
if __name__ == "__main__":
    io_nc = 1
    nc = (16, 32, 64, 128)   # reduced from the default (64,128,256,512) for the test
    nb = 2                   # reduced from the default 4
    B, H, W = 2, 16, 16      # spatial must be divisible by 8 (3 stride-2 downsamples)

    key = jax.random.PRNGKey(0)
    kp, k1, k2, k3, kn = jax.random.split(key, 5)

    params = init_unetres_params(kp, io_nc=io_nc, nc=nc, nb=nb)

    in1 = jax.random.normal(k1, (B, H, W, io_nc), jnp.float32)
    in2 = jax.random.normal(k2, (B, H, W, io_nc), jnp.float32)
    in3 = jax.random.normal(k3, (B, H, W, io_nc), jnp.float32)
    noise_map = jax.random.uniform(kn, (B, H, W, 1), jnp.float32)

    fwd = jax.jit(unetres_forward)
    out = jax.block_until_ready(fwd(params, in1, in2, in3, noise_map))

    assert out.shape == (B, H, W, io_nc), out.shape
    out_f32 = out.astype(jnp.float32)
    assert bool(jnp.all(jnp.isfinite(out_f32)))

    ref = jax.block_until_ready(
        jax.jit(unetres_reference)(params, in1, in2, in3, noise_map))
    err = float(jnp.max(jnp.abs(out_f32 - ref)))
    scale = float(jnp.max(jnp.abs(ref))) + 1e-6
    # generous bound: bf16 activations/weights vs f32 reference over ~36 conv layers
    assert err <= 0.15 * scale + 1e-3, (err, scale)

    print("KERNEL_OK")
</pallas_src>

<mosaic_0001>
module attributes {stable_mosaic.version = 11 : i64} {
  func.func @kernel(%arg0: i32, %arg1: memref<512x54xbf16, #tpu.memory_space<vmem>>, %arg2: memref<54x16xbf16, #tpu.memory_space<vmem>>, %arg3: memref<512x16xbf16, #tpu.memory_space<vmem>>) attributes {dimension_semantics = [#tpu.dimension_semantics<parallel>], iteration_bounds = array<i64: 1>, scalar_prefetch = 0 : i64, scratch_operands = 0 : i64, tpu.core_type = #tpu.core_type<tc>, window_params = [{transform_indices = @transform_0, window_bounds = array<i64: 512, 54>}, {pipeline_mode = #tpu.pipeline_mode<synchronous>, transform_indices = @transform_1, window_bounds = array<i64: 54, 16>}, {transform_indices = @transform_2, window_bounds = array<i64: 512, 16>}]} {
    %c0 = arith.constant 0 : index
    %c0_0 = arith.constant 0 : index
    %0 = vector.load %arg1[%c0, %c0_0] : memref<512x54xbf16, #tpu.memory_space<vmem>>, vector<512x54xbf16>
    %c0_1 = arith.constant 0 : index
    %c0_2 = arith.constant 0 : index
    %1 = vector.load %arg2[%c0_1, %c0_2] : memref<54x16xbf16, #tpu.memory_space<vmem>>, vector<54x16xbf16>
    %cst = arith.constant dense<0.000000e+00> : vector<512x16xf32>
    %2 = tpu.matmul %0, %1, %cst {dimension_numbers = #tpu.dot_dimension_numbers<[1], [0], [0], [1], [0, 0, 1, 1], [], []>} : vector<512x54xbf16>, vector<54x16xbf16>, vector<512x16xf32> -> vector<512x16xf32>
    %3 = arith.truncf %2 : vector<512x16xf32> to vector<512x16xbf16>
    %c0_3 = arith.constant 0 : index
    %c0_4 = arith.constant 0 : index
    %4 = vector.load %arg3[%c0_3, %c0_4] : memref<512x16xbf16, #tpu.memory_space<vmem>>, vector<512x16xbf16>
    tpu.vector_store %arg3[%c0_3, %c0_4], %3 {strides = array<i32>} : memref<512x16xbf16, #tpu.memory_space<vmem>>, vector<512x16xbf16>,
    return
  }
  func.func @transform_0(%arg0: i32) -> (i32, i32) {
    %c0_i32 = arith.constant 0 : i32
    %c0_i32_0 = arith.constant 0 : i32
    return %arg0, %c0_i32 : i32, i32
  }
  func.func @transform_1(%arg0: i32) -> (i32, i32) {
    %c0_i32 = arith.constant 0 : i32
    %c0_i32_0 = arith.constant 0 : i32
    %c0_i32_1 = arith.constant 0 : i32
    return %c0_i32, %c0_i32_0 : i32, i32
  }
  func.func @transform_2(%arg0: i32) -> (i32, i32) {
    %c0_i32 = arith.constant 0 : i32
    %c0_i32_0 = arith.constant 0 : i32
    return %arg0, %c0_i32 : i32, i32
  }
}

module attributes {stable_mosaic.version = 11 : i64} {
  func.func @kernel(%arg0: i32, %arg1: i32, %arg2: i32, %arg3: memref<1x288x48xbf16, #tpu.memory_space<vmem>>, %arg4: memref<3x48x16xbf16, #tpu.memory_space<vmem>>, %arg5: memref<1x256x16xbf16, #tpu.memory_space<vmem>>) attributes {dimension_semantics = [#tpu.dimension_semantics<parallel>, #tpu.dimension_semantics<parallel>, #tpu.dimension_semantics<parallel>], iteration_bounds = array<i64: 2, 1, 1>, scalar_prefetch = 0 : i64, scratch_operands = 0 : i64, tpu.core_type = #tpu.core_type<tc>, window_params = [{transform_indices = @transform_0, window_bounds = array<i64: 1, 288, 48>}, {transform_indices = @transform_1, window_bounds = array<i64: 3, 48, 16>}, {transform_indices = @transform_2, window_bounds = array<i64: 1, 256, 16>}]} {
    %cst = arith.constant 0.000000e+00 : f32
    %0 = vector.broadcast %cst : f32 to vector<256x16xf32>
    %c0 = arith.constant 0 : index
    %c0_0 = arith.constant 0 : index
    %c0_1 = arith.constant 0 : index
    %1 = vector.load %arg3[%c0, %c0_0, %c0_1] : memref<1x288x48xbf16, #tpu.memory_space<vmem>>, vector<1x256x48xbf16>
    %2 = vector.shape_cast %1 : vector<1x256x48xbf16> to vector<256x48xbf16>
    %c0_2 = arith.constant 0 : index
    %c0_3 = arith.constant 0 : index
    %c0_4 = arith.constant 0 : index
    %3 = vector.load %arg4[%c0_2, %c0_3, %c0_4] : memref<3x48x16xbf16, #tpu.memory_space<vmem>>, vector<1x48x16xbf16>
    %4 = vector.shape_cast %3 : vector<1x48x16xbf16> to vector<48x16xbf16>
    %cst_5 = arith.constant dense<0.000000e+00> : vector<256x16xf32>
    %5 = tpu.matmul %2, %4, %cst_5 {dimension_numbers = #tpu.dot_dimension_numbers<[1], [0], [0], [1], [0, 0, 1, 1], [], []>} : vector<256x48xbf16>, vector<48x16xbf16>, vector<256x16xf32> -> vector<256x16xf32>
    %6 = arith.addf %0, %5 : vector<256x16xf32>
    %c0_6 = arith.constant 0 : index
    %c16 = arith.constant 16 : index
    %c0_7 = arith.constant 0 : index
    %7 = vector.load %arg3[%c0_6, %c16, %c0_7] : memref<1x288x48xbf16, #tpu.memory_space<vmem>>, vector<1x256x48xbf16>
    %8 = vector.shape_cast %7 : vector<1x256x48xbf16> to vector<256x48xbf16>
    %c1 = arith.constant 1 : index
    %c0_8 = arith.constant 0 : index
    %c0_9 = arith.constant 0 : index
    %9 = vector.load %arg4[%c1, %c0_8, %c0_9] : memref<3x48x16xbf16, #tpu.memory_space<vmem>>, vector<1x48x16xbf16>
    %10 = vector.shape_cast %9 : vector<1x48x16xbf16> to vector<48x16xbf16>
    %cst_10 = arith.constant dense<0.000000e+00> : vector<256x16xf32>
    %11 = tpu.matmul %8, %10, %cst_10 {dimension_numbers = #tpu.dot_dimension_numbers<[1], [0], [0], [1], [0, 0, 1, 1], [], []>} : vector<256x48xbf16>, vector<48x16xbf16>, vector<256x16xf32> -> vector<256x16xf32>
    %12 = arith.addf %6, %11 : vector<256x16xf32>
    %c0_11 = arith.constant 0 : index
    %c32 = arith.constant 32 : index
    %c0_12 = arith.constant 0 : index
    %13 = vector.load %arg3[%c0_11, %c32, %c0_12] : memref<1x288x48xbf16, #tpu.memory_space<vmem>>, vector<1x256x48xbf16>
    %14 = vector.shape_cast %13 : vector<1x256x48xbf16> to vector<256x48xbf16>
    %c2 = arith.constant 2 : index
    %c0_13 = arith.constant 0 : index
    %c0_14 = arith.constant 0 : index
    %15 = vector.load %arg4[%c2, %c0_13, %c0_14] : memref<3x48x16xbf16, #tpu.memory_space<vmem>>, vector<1x48x16xbf16>
    %16 = vector.shape_cast %15 : vector<1x48x16xbf16> to vector<48x16xbf16>
    %cst_15 = arith.constant dense<0.000000e+00> : vector<256x16xf32>
    %17 = tpu.matmul %14, %16, %cst_15 {dimension_numbers = #tpu.dot_dimension_numbers<[1], [0], [0], [1], [0, 0, 1, 1], [], []>} : vector<256x48xbf16>, vector<48x16xbf16>, vector<256x16xf32> -> vector<256x16xf32>
    %18 = arith.addf %12, %17 : vector<256x16xf32>
    %cst_16 = arith.constant 0.000000e+00 : f32
    %19 = vector.broadcast %cst_16 : f32 to vector<256x16xf32>
    %20 = arith.maximumf %18, %19 : vector<256x16xf32>
    %21 = arith.truncf %20 : vector<256x16xf32> to vector<256x16xbf16>
    %c0_17 = arith.constant 0 : index
    %c0_18 = arith.constant 0 : index
    %c0_19 = arith.constant 0 : index
    %22 = vector.load %arg5[%c0_17, %c0_18, %c0_19] : memref<1x256x16xbf16, #tpu.memory_space<vmem>>, vector<1x256x16xbf16>
    %23 = vector.shape_cast %22 : vector<1x256x16xbf16> to vector<256x16xbf16>
    %24 = vector.shape_cast %21 : vector<256x16xbf16> to vector<1x256x16xbf16>
    tpu.vector_store %arg5[%c0_17, %c0_18, %c0_19], %24 {strides = array<i32>} : memref<1x256x16xbf16, #tpu.memory_space<vmem>>, vector<1x256x16xbf16>,
    return
  }
  func.func @transform_0(%arg0: i32, %arg1: i32, %arg2: i32) -> (i32, i32, i32) {
    %c0_i32 = arith.constant 0 : i32
    %c0_i32_0 = arith.constant 0 : i32
    %c0_i32_1 = arith.constant 0 : i32
    return %arg0, %c0_i32, %c0_i32_0 : i32, i32, i32
  }
  func.func @transform_1(%arg0: i32, %arg1: i32, %arg2: i32) -> (i32, i32, i32) {
    %c0_i32 = arith.constant 0 : i32
    %c0_i32_0 = arith.constant 0 : i32
    %c0_i32_1 = arith.constant 0 : i32
    return %c0_i32, %c0_i32_0, %arg2 : i32, i32, i32
  }
  func.func @transform_2(%arg0: i32, %arg1: i32, %arg2: i32) -> (i32, i32, i32) {
    %c0_i32 = arith.constant 0 : i32
    return %arg0, %arg1, %arg2 : i32, i32, i32
  }
}

module attributes {stable_mosaic.version = 11 : i64} {
  func.func @kernel(%arg0: i32, %arg1: i32, %arg2: i32, %arg3: memref<1x288x48xbf16, #tpu.memory_space<vmem>>, %arg4: memref<3x48x16xbf16, #tpu.memory_space<vmem>>, %arg5: memref<1x256x16xbf16, #tpu.memory_space<vmem>>, %arg6: memref<1x256x16xbf16, #tpu.memory_space<vmem>>) attributes {dimension_semantics = [#tpu.dimension_semantics<parallel>, #tpu.dimension_semantics<parallel>, #tpu.dimension_semantics<parallel>], iteration_bounds = array<i64: 2, 1, 1>, scalar_prefetch = 0 : i64, scratch_operands = 0 : i64, tpu.core_type = #tpu.core_type<tc>, window_params = [{transform_indices = @transform_0, window_bounds = array<i64: 1, 288, 48>}, {transform_indices = @transform_1, window_bounds = array<i64: 3, 48, 16>}, {transform_indices = @transform_2, window_bounds = array<i64: 1, 256, 16>}, {transform_indices = @transform_3, window_bounds = array<i64: 1, 256, 16>}]} {
    %cst = arith.constant 0.000000e+00 : f32
    %0 = vector.broadcast %cst : f32 to vector<256x16xf32>
    %c0 = arith.constant 0 : index
    %c0_0 = arith.constant 0 : index
    %c0_1 = arith.constant 0 : index
    %1 = vector.load %arg3[%c0, %c0_0, %c0_1] : memref<1x288x48xbf16, #tpu.memory_space<vmem>>, vector<1x256x48xbf16>
    %2 = vector.shape_cast %1 : vector<1x256x48xbf16> to vector<256x48xbf16>
    %c0_2 = arith.constant 0 : index
    %c0_3 = arith.constant 0 : index
    %c0_4 = arith.constant 0 : index
    %3 = vector.load %arg4[%c0_2, %c0_3, %c0_4] : memref<3x48x16xbf16, #tpu.memory_space<vmem>>, vector<1x48x16xbf16>
    %4 = vector.shape_cast %3 : vector<1x48x16xbf16> to vector<48x16xbf16>
    %cst_5 = arith.constant dense<0.000000e+00> : vector<256x16xf32>
    %5 = tpu.matmul %2, %4, %cst_5 {dimension_numbers = #tpu.dot_dimension_numbers<[1], [0], [0], [1], [0, 0, 1, 1], [], []>} : vector<256x48xbf16>, vector<48x16xbf16>, vector<256x16xf32> -> vector<256x16xf32>
    %6 = arith.addf %0, %5 : vector<256x16xf32>
    %c0_6 = arith.constant 0 : index
    %c16 = arith.constant 16 : index
    %c0_7 = arith.constant 0 : index
    %7 = vector.load %arg3[%c0_6, %c16, %c0_7] : memref<1x288x48xbf16, #tpu.memory_space<vmem>>, vector<1x256x48xbf16>
    %8 = vector.shape_cast %7 : vector<1x256x48xbf16> to vector<256x48xbf16>
    %c1 = arith.constant 1 : index
    %c0_8 = arith.constant 0 : index
    %c0_9 = arith.constant 0 : index
    %9 = vector.load %arg4[%c1, %c0_8, %c0_9] : memref<3x48x16xbf16, #tpu.memory_space<vmem>>, vector<1x48x16xbf16>
    %10 = vector.shape_cast %9 : vector<1x48x16xbf16> to vector<48x16xbf16>
    %cst_10 = arith.constant dense<0.000000e+00> : vector<256x16xf32>
    %11 = tpu.matmul %8, %10, %cst_10 {dimension_numbers = #tpu.dot_dimension_numbers<[1], [0], [0], [1], [0, 0, 1, 1], [], []>} : vector<256x48xbf16>, vector<48x16xbf16>, vector<256x16xf32> -> vector<256x16xf32>
    %12 = arith.addf %6, %11 : vector<256x16xf32>
    %c0_11 = arith.constant 0 : index
    %c32 = arith.constant 32 : index
    %c0_12 = arith.constant 0 : index
    %13 = vector.load %arg3[%c0_11, %c32, %c0_12] : memref<1x288x48xbf16, #tpu.memory_space<vmem>>, vector<1x256x48xbf16>
    %14 = vector.shape_cast %13 : vector<1x256x48xbf16> to vector<256x48xbf16>
    %c2 = arith.constant 2 : index
    %c0_13 = arith.constant 0 : index
    %c0_14 = arith.constant 0 : index
    %15 = vector.load %arg4[%c2, %c0_13, %c0_14] : memref<3x48x16xbf16, #tpu.memory_space<vmem>>, vector<1x48x16xbf16>
    %16 = vector.shape_cast %15 : vector<1x48x16xbf16> to vector<48x16xbf16>
    %cst_15 = arith.constant dense<0.000000e+00> : vector<256x16xf32>
    %17 = tpu.matmul %14, %16, %cst_15 {dimension_numbers = #tpu.dot_dimension_numbers<[1], [0], [0], [1], [0, 0, 1, 1], [], []>} : vector<256x48xbf16>, vector<48x16xbf16>, vector<256x16xf32> -> vector<256x16xf32>
    %18 = arith.addf %12, %17 : vector<256x16xf32>
    %c0_16 = arith.constant 0 : index
    %c0_17 = arith.constant 0 : index
    %c0_18 = arith.constant 0 : index
    %19 = vector.load %arg5[%c0_16, %c0_17, %c0_18] : memref<1x256x16xbf16, #tpu.memory_space<vmem>>, vector<1x256x16xbf16>
    %20 = vector.shape_cast %19 : vector<1x256x16xbf16> to vector<256x16xbf16>
    %21 = arith.extf %20 : vector<256x16xbf16> to vector<256x16xf32>
    %22 = arith.addf %18, %21 : vector<256x16xf32>
    %23 = arith.truncf %22 : vector<256x16xf32> to vector<256x16xbf16>
    %c0_19 = arith.constant 0 : index
    %c0_20 = arith.constant 0 : index
    %c0_21 = arith.constant 0 : index
    %24 = vector.load %arg6[%c0_19, %c0_20, %c0_21] : memref<1x256x16xbf16, #tpu.memory_space<vmem>>, vector<1x256x16xbf16>
    %25 = vector.shape_cast %24 : vector<1x256x16xbf16> to vector<256x16xbf16>
    %26 = vector.shape_cast %23 : vector<256x16xbf16> to vector<1x256x16xbf16>
    tpu.vector_store %arg6[%c0_19, %c0_20, %c0_21], %26 {strides = array<i32>} : memref<1x256x16xbf16, #tpu.memory_space<vmem>>, vector<1x256x16xbf16>,
    return
  }
  func.func @transform_0(%arg0: i32, %arg1: i32, %arg2: i32) -> (i32, i32, i32) {
    %c0_i32 = arith.constant 0 : i32
    %c0_i32_0 = arith.constant 0 : i32
    %c0_i32_1 = arith.constant 0 : i32
    return %arg0, %c0_i32, %c0_i32_0 : i32, i32, i32
  }
  func.func @transform_1(%arg0: i32, %arg1: i32, %arg2: i32) -> (i32, i32, i32) {
    %c0_i32 = arith.constant 0 : i32
    %c0_i32_0 = arith.constant 0 : i32
    %c0_i32_1 = arith.constant 0 : i32
    return %c0_i32, %c0_i32_0, %arg2 : i32, i32, i32
  }
  func.func @transform_2(%arg0: i32, %arg1: i32, %arg2: i32) -> (i32, i32, i32) {
    %c0_i32 = arith.constant 0 : i32
    return %arg0, %arg1, %arg2 : i32, i32, i32
  }
  func.func @transform_3(%arg0: i32, %arg1: i32, %arg2: i32) -> (i32, i32, i32) {
    %c0_i32 = arith.constant 0 : i32
    return %arg0, %arg1, %arg2 : i32, i32, i32
  }
}

module attributes {stable_mosaic.version = 11 : i64} {
  func.func @kernel(%arg0: i32, %arg1: memref<128x64xbf16, #tpu.memory_space<vmem>>, %arg2: memref<64x32xbf16, #tpu.memory_space<vmem>>, %arg3: memref<128x32xbf16, #tpu.memory_space<vmem>>) attributes {dimension_semantics = [#tpu.dimension_semantics<parallel>], iteration_bounds = array<i64: 1>, scalar_prefetch = 0 : i64, scratch_operands = 0 : i64, tpu.core_type = #tpu.core_type<tc>, window_params = [{transform_indices = @transform_0, window_bounds = array<i64: 128, 64>}, {pipeline_mode = #tpu.pipeline_mode<synchronous>, transform_indices = @transform_1, window_bounds = array<i64: 64, 32>}, {transform_indices = @transform_2, window_bounds = array<i64: 128, 32>}]} {
    %c0 = arith.constant 0 : index
    %c0_0 = arith.constant 0 : index
    %0 = vector.load %arg1[%c0, %c0_0] : memref<128x64xbf16, #tpu.memory_space<vmem>>, vector<128x64xbf16>
    %c0_1 = arith.constant 0 : index
    %c0_2 = arith.constant 0 : index
    %1 = vector.load %arg2[%c0_1, %c0_2] : memref<64x32xbf16, #tpu.memory_space<vmem>>, vector<64x32xbf16>
    %cst = arith.constant dense<0.000000e+00> : vector<128x32xf32>
    %2 = tpu.matmul %0, %1, %cst {dimension_numbers = #tpu.dot_dimension_numbers<[1], [0], [0], [1], [0, 0, 1, 1], [], []>} : vector<128x64xbf16>, vector<64x32xbf16>, vector<128x32xf32> -> vector<128x32xf32>
    %3 = arith.truncf %2 : vector<128x32xf32> to vector<128x32xbf16>
    %c0_3 = arith.constant 0 : index
    %c0_4 = arith.constant 0 : index
    %4 = vector.load %arg3[%c0_3, %c0_4] : memref<128x32xbf16, #tpu.memory_space<vmem>>, vector<128x32xbf16>
    tpu.vector_store %arg3[%c0_3, %c0_4], %3 {strides = array<i32>} : memref<128x32xbf16, #tpu.memory_space<vmem>>, vector<128x32xbf16>,
    return
  }
  func.func @transform_0(%arg0: i32) -> (i32, i32) {
    %c0_i32 = arith.constant 0 : i32
    %c0_i32_0 = arith.constant 0 : i32
    return %arg0, %c0_i32 : i32, i32
  }
  func.func @transform_1(%arg0: i32) -> (i32, i32) {
    %c0_i32 = arith.constant 0 : i32
    %c0_i32_0 = arith.constant 0 : i32
    %c0_i32_1 = arith.constant 0 : i32
    return %c0_i32, %c0_i32_0 : i32, i32
  }
  func.func @transform_2(%arg0: i32) -> (i32, i32) {
    %c0_i32 = arith.constant 0 : i32
    %c0_i32_0 = arith.constant 0 : i32
    return %arg0, %c0_i32 : i32, i32
  }
}

module attributes {stable_mosaic.version = 11 : i64} {
  func.func @kernel(%arg0: i32, %arg1: i32, %arg2: i32, %arg3: memref<1x80x96xbf16, #tpu.memory_space<vmem>>, %arg4: memref<3x96x32xbf16, #tpu.memory_space<vmem>>, %arg5: memref<1x64x32xbf16, #tpu.memory_space<vmem>>) attributes {dimension_semantics = [#tpu.dimension_semantics<parallel>, #tpu.dimension_semantics<parallel>, #tpu.dimension_semantics<parallel>], iteration_bounds = array<i64: 2, 1, 1>, scalar_prefetch = 0 : i64, scratch_operands = 0 : i64, tpu.core_type = #tpu.core_type<tc>, window_params = [{transform_indices = @transform_0, window_bounds = array<i64: 1, 80, 96>}, {transform_indices = @transform_1, window_bounds = array<i64: 3, 96, 32>}, {transform_indices = @transform_2, window_bounds = array<i64: 1, 64, 32>}]} {
    %cst = arith.constant 0.000000e+00 : f32
    %0 = vector.broadcast %cst : f32 to vector<64x32xf32>
    %c0 = arith.constant 0 : index
    %c0_0 = arith.constant 0 : index
    %c0_1 = arith.constant 0 : index
    %1 = vector.load %arg3[%c0, %c0_0, %c0_1] : memref<1x80x96xbf16, #tpu.memory_space<vmem>>, vector<1x64x96xbf16>
    %2 = vector.shape_cast %1 : vector<1x64x96xbf16> to vector<64x96xbf16>
    %c0_2 = arith.constant 0 : index
    %c0_3 = arith.constant 0 : index
    %c0_4 = arith.constant 0 : index
    %3 = vector.load %arg4[%c0_2, %c0_3, %c0_4] : memref<3x96x32xbf16, #tpu.memory_space<vmem>>, vector<1x96x32xbf16>
    %4 = vector.shape_cast %3 : vector<1x96x32xbf16> to vector<96x32xbf16>
    %cst_5 = arith.constant dense<0.000000e+00> : vector<64x32xf32>
    %5 = tpu.matmul %2, %4, %cst_5 {dimension_numbers = #tpu.dot_dimension_numbers<[1], [0], [0], [1], [0, 0, 1, 1], [], []>} : vector<64x96xbf16>, vector<96x32xbf16>, vector<64x32xf32> -> vector<64x32xf32>
    %6 = arith.addf %0, %5 : vector<64x32xf32>
    %c0_6 = arith.constant 0 : index
    %c8 = arith.constant 8 : index
    %c0_7 = arith.constant 0 : index
    %7 = vector.load %arg3[%c0_6, %c8, %c0_7] : memref<1x80x96xbf16, #tpu.memory_space<vmem>>, vector<1x64x96xbf16>
    %8 = vector.shape_cast %7 : vector<1x64x96xbf16> to vector<64x96xbf16>
    %c1 = arith.constant 1 : index
    %c0_8 = arith.constant 0 : index
    %c0_9 = arith.constant 0 : index
    %9 = vector.load %arg4[%c1, %c0_8, %c0_9] : memref<3x96x32xbf16, #tpu.memory_space<vmem>>, vector<1x96x32xbf16>
    %10 = vector.shape_cast %9 : vector<1x96x32xbf16> to vector<96x32xbf16>
    %cst_10 = arith.constant dense<0.000000e+00> : vector<64x32xf32>
    %11 = tpu.matmul %8, %10, %cst_10 {dimension_numbers = #tpu.dot_dimension_numbers<[1], [0], [0], [1], [0, 0, 1, 1], [], []>} : vector<64x96xbf16>, vector<96x32xbf16>, vector<64x32xf32> -> vector<64x32xf32>
    %12 = arith.addf %6, %11 : vector<64x32xf32>
    %c0_11 = arith.constant 0 : index
    %c16 = arith.constant 16 : index
    %c0_12 = arith.constant 0 : index
    %13 = vector.load %arg3[%c0_11, %c16, %c0_12] : memref<1x80x96xbf16, #tpu.memory_space<vmem>>, vector<1x64x96xbf16>
    %14 = vector.shape_cast %13 : vector<1x64x96xbf16> to vector<64x96xbf16>
    %c2 = arith.constant 2 : index
    %c0_13 = arith.constant 0 : index
    %c0_14 = arith.constant 0 : index
    %15 = vector.load %arg4[%c2, %c0_13, %c0_14] : memref<3x96x32xbf16, #tpu.memory_space<vmem>>, vector<1x96x32xbf16>
    %16 = vector.shape_cast %15 : vector<1x96x32xbf16> to vector<96x32xbf16>
    %cst_15 = arith.constant dense<0.000000e+00> : vector<64x32xf32>
    %17 = tpu.matmul %14, %16, %cst_15 {dimension_numbers = #tpu.dot_dimension_numbers<[1], [0], [0], [1], [0, 0, 1, 1], [], []>} : vector<64x96xbf16>, vector<96x32xbf16>, vector<64x32xf32> -> vector<64x32xf32>
    %18 = arith.addf %12, %17 : vector<64x32xf32>
    %cst_16 = arith.constant 0.000000e+00 : f32
    %19 = vector.broadcast %cst_16 : f32 to vector<64x32xf32>
    %20 = arith.maximumf %18, %19 : vector<64x32xf32>
    %21 = arith.truncf %20 : vector<64x32xf32> to vector<64x32xbf16>
    %c0_17 = arith.constant 0 : index
    %c0_18 = arith.constant 0 : index
    %c0_19 = arith.constant 0 : index
    %22 = vector.load %arg5[%c0_17, %c0_18, %c0_19] : memref<1x64x32xbf16, #tpu.memory_space<vmem>>, vector<1x64x32xbf16>
    %23 = vector.shape_cast %22 : vector<1x64x32xbf16> to vector<64x32xbf16>
    %24 = vector.shape_cast %21 : vector<64x32xbf16> to vector<1x64x32xbf16>
    tpu.vector_store %arg5[%c0_17, %c0_18, %c0_19], %24 {strides = array<i32>} : memref<1x64x32xbf16, #tpu.memory_space<vmem>>, vector<1x64x32xbf16>,
    return
  }
  func.func @transform_0(%arg0: i32, %arg1: i32, %arg2: i32) -> (i32, i32, i32) {
    %c0_i32 = arith.constant 0 : i32
    %c0_i32_0 = arith.constant 0 : i32
    %c0_i32_1 = arith.constant 0 : i32
    return %arg0, %c0_i32, %c0_i32_0 : i32, i32, i32
  }
  func.func @transform_1(%arg0: i32, %arg1: i32, %arg2: i32) -> (i32, i32, i32) {
    %c0_i32 = arith.constant 0 : i32
    %c0_i32_0 = arith.constant 0 : i32
    %c0_i32_1 = arith.constant 0 : i32
    return %c0_i32, %c0_i32_0, %arg2 : i32, i32, i32
  }
  func.func @transform_2(%arg0: i32, %arg1: i32, %arg2: i32) -> (i32, i32, i32) {
    %c0_i32 = arith.constant 0 : i32
    return %arg0, %arg1, %arg2 : i32, i32, i32
  }
}

module attributes {stable_mosaic.version = 11 : i64} {
  func.func @kernel(%arg0: i32, %arg1: i32, %arg2: i32, %arg3: memref<1x80x96xbf16, #tpu.memory_space<vmem>>, %arg4: memref<3x96x32xbf16, #tpu.memory_space<vmem>>, %arg5: memref<1x64x32xbf16, #tpu.memory_space<vmem>>, %arg6: memref<1x64x32xbf16, #tpu.memory_space<vmem>>) attributes {dimension_semantics = [#tpu.dimension_semantics<parallel>, #tpu.dimension_semantics<parallel>, #tpu.dimension_semantics<parallel>], iteration_bounds = array<i64: 2, 1, 1>, scalar_prefetch = 0 : i64, scratch_operands = 0 : i64, tpu.core_type = #tpu.core_type<tc>, window_params = [{transform_indices = @transform_0, window_bounds = array<i64: 1, 80, 96>}, {transform_indices = @transform_1, window_bounds = array<i64: 3, 96, 32>}, {transform_indices = @transform_2, window_bounds = array<i64: 1, 64, 32>}, {transform_indices = @transform_3, window_bounds = array<i64: 1, 64, 32>}]} {
    %cst = arith.constant 0.000000e+00 : f32
    %0 = vector.broadcast %cst : f32 to vector<64x32xf32>
    %c0 = arith.constant 0 : index
    %c0_0 = arith.constant 0 : index
    %c0_1 = arith.constant 0 : index
    %1 = vector.load %arg3[%c0, %c0_0, %c0_1] : memref<1x80x96xbf16, #tpu.memory_space<vmem>>, vector<1x64x96xbf16>
    %2 = vector.shape_cast %1 : vector<1x64x96xbf16> to vector<64x96xbf16>
    %c0_2 = arith.constant 0 : index
    %c0_3 = arith.constant 0 : index
    %c0_4 = arith.constant 0 : index
    %3 = vector.load %arg4[%c0_2, %c0_3, %c0_4] : memref<3x96x32xbf16, #tpu.memory_space<vmem>>, vector<1x96x32xbf16>
    %4 = vector.shape_cast %3 : vector<1x96x32xbf16> to vector<96x32xbf16>
    %cst_5 = arith.constant dense<0.000000e+00> : vector<64x32xf32>
    %5 = tpu.matmul %2, %4, %cst_5 {dimension_numbers = #tpu.dot_dimension_numbers<[1], [0], [0], [1], [0, 0, 1, 1], [], []>} : vector<64x96xbf16>, vector<96x32xbf16>, vector<64x32xf32> -> vector<64x32xf32>
    %6 = arith.addf %0, %5 : vector<64x32xf32>
    %c0_6 = arith.constant 0 : index
    %c8 = arith.constant 8 : index
    %c0_7 = arith.constant 0 : index
    %7 = vector.load %arg3[%c0_6, %c8, %c0_7] : memref<1x80x96xbf16, #tpu.memory_space<vmem>>, vector<1x64x96xbf16>
    %8 = vector.shape_cast %7 : vector<1x64x96xbf16> to vector<64x96xbf16>
    %c1 = arith.constant 1 : index
    %c0_8 = arith.constant 0 : index
    %c0_9 = arith.constant 0 : index
    %9 = vector.load %arg4[%c1, %c0_8, %c0_9] : memref<3x96x32xbf16, #tpu.memory_space<vmem>>, vector<1x96x32xbf16>
    %10 = vector.shape_cast %9 : vector<1x96x32xbf16> to vector<96x32xbf16>
    %cst_10 = arith.constant dense<0.000000e+00> : vector<64x32xf32>
    %11 = tpu.matmul %8, %10, %cst_10 {dimension_numbers = #tpu.dot_dimension_numbers<[1], [0], [0], [1], [0, 0, 1, 1], [], []>} : vector<64x96xbf16>, vector<96x32xbf16>, vector<64x32xf32> -> vector<64x32xf32>
    %12 = arith.addf %6, %11 : vector<64x32xf32>
    %c0_11 = arith.constant 0 : index
    %c16 = arith.constant 16 : index
    %c0_12 = arith.constant 0 : index
    %13 = vector.load %arg3[%c0_11, %c16, %c0_12] : memref<1x80x96xbf16, #tpu.memory_space<vmem>>, vector<1x64x96xbf16>
    %14 = vector.shape_cast %13 : vector<1x64x96xbf16> to vector<64x96xbf16>
    %c2 = arith.constant 2 : index
    %c0_13 = arith.constant 0 : index
    %c0_14 = arith.constant 0 : index
    %15 = vector.load %arg4[%c2, %c0_13, %c0_14] : memref<3x96x32xbf16, #tpu.memory_space<vmem>>, vector<1x96x32xbf16>
    %16 = vector.shape_cast %15 : vector<1x96x32xbf16> to vector<96x32xbf16>
    %cst_15 = arith.constant dense<0.000000e+00> : vector<64x32xf32>
    %17 = tpu.matmul %14, %16, %cst_15 {dimension_numbers = #tpu.dot_dimension_numbers<[1], [0], [0], [1], [0, 0, 1, 1], [], []>} : vector<64x96xbf16>, vector<96x32xbf16>, vector<64x32xf32> -> vector<64x32xf32>
    %18 = arith.addf %12, %17 : vector<64x32xf32>
    %c0_16 = arith.constant 0 : index
    %c0_17 = arith.constant 0 : index
    %c0_18 = arith.constant 0 : index
    %19 = vector.load %arg5[%c0_16, %c0_17, %c0_18] : memref<1x64x32xbf16, #tpu.memory_space<vmem>>, vector<1x64x32xbf16>
    %20 = vector.shape_cast %19 : vector<1x64x32xbf16> to vector<64x32xbf16>
    %21 = arith.extf %20 : vector<64x32xbf16> to vector<64x32xf32>
    %22 = arith.addf %18, %21 : vector<64x32xf32>
    %23 = arith.truncf %22 : vector<64x32xf32> to vector<64x32xbf16>
    %c0_19 = arith.constant 0 : index
    %c0_20 = arith.constant 0 : index
    %c0_21 = arith.constant 0 : index
    %24 = vector.load %arg6[%c0_19, %c0_20, %c0_21] : memref<1x64x32xbf16, #tpu.memory_space<vmem>>, vector<1x64x32xbf16>
    %25 = vector.shape_cast %24 : vector<1x64x32xbf16> to vector<64x32xbf16>
    %26 = vector.shape_cast %23 : vector<64x32xbf16> to vector<1x64x32xbf16>
    tpu.vector_store %arg6[%c0_19, %c0_20, %c0_21], %26 {strides = array<i32>} : memref<1x64x32xbf16, #tpu.memory_space<vmem>>, vector<1x64x32xbf16>,
    return
  }
  func.func @transform_0(%arg0: i32, %arg1: i32, %arg2: i32) -> (i32, i32, i32) {
    %c0_i32 = arith.constant 0 : i32
    %c0_i32_0 = arith.constant 0 : i32
    %c0_i32_1 = arith.constant 0 : i32
    return %arg0, %c0_i32, %c0_i32_0 : i32, i32, i32
  }
  func.func @transform_1(%arg0: i32, %arg1: i32, %arg2: i32) -> (i32, i32, i32) {
    %c0_i32 = arith.constant 0 : i32
    %c0_i32_0 = arith.constant 0 : i32
    %c0_i32_1 = arith.constant 0 : i32
    return %c0_i32, %c0_i32_0, %arg2 : i32, i32, i32
  }
  func.func @transform_2(%arg0: i32, %arg1: i32, %arg2: i32) -> (i32, i32, i32) {
    %c0_i32 = arith.constant 0 : i32
    return %arg0, %arg1, %arg2 : i32, i32, i32
  }
  func.func @transform_3(%arg0: i32, %arg1: i32, %arg2: i32) -> (i32, i32, i32) {
    %c0_i32 = arith.constant 0 : i32
    return %arg0, %arg1, %arg2 : i32, i32, i32
  }
}

module attributes {stable_mosaic.version = 11 : i64} {
  func.func @kernel(%arg0: i32, %arg1: memref<32x128xbf16, #tpu.memory_space<vmem>>, %arg2: memref<128x64xbf16, #tpu.memory_space<vmem>>, %arg3: memref<32x64xbf16, #tpu.memory_space<vmem>>) attributes {dimension_semantics = [#tpu.dimension_semantics<parallel>], iteration_bounds = array<i64: 1>, scalar_prefetch = 0 : i64, scratch_operands = 0 : i64, tpu.core_type = #tpu.core_type<tc>, window_params = [{transform_indices = @transform_0, window_bounds = array<i64: 32, 128>}, {pipeline_mode = #tpu.pipeline_mode<synchronous>, transform_indices = @transform_1, window_bounds = array<i64: 128, 64>}, {transform_indices = @transform_2, window_bounds = array<i64: 32, 64>}]} {
    %c0 = arith.constant 0 : index
    %c0_0 = arith.constant 0 : index
    %0 = vector.load %arg1[%c0, %c0_0] : memref<32x128xbf16, #tpu.memory_space<vmem>>, vector<32x128xbf16>
    %c0_1 = arith.constant 0 : index
    %c0_2 = arith.constant 0 : index
    %1 = vector.load %arg2[%c0_1, %c0_2] : memref<128x64xbf16, #tpu.memory_space<vmem>>, vector<128x64xbf16>
    %cst = arith.constant dense<0.000000e+00> : vector<32x64xf32>
    %2 = tpu.matmul %0, %1, %cst {dimension_numbers = #tpu.dot_dimension_numbers<[1], [0], [0], [1], [0, 0, 1, 1], [], []>} : vector<32x128xbf16>, vector<128x64xbf16>, vector<32x64xf32> -> vector<32x64xf32>
    %3 = arith.truncf %2 : vector<32x64xf32> to vector<32x64xbf16>
    %c0_3 = arith.constant 0 : index
    %c0_4 = arith.constant 0 : index
    %4 = vector.load %arg3[%c0_3, %c0_4] : memref<32x64xbf16, #tpu.memory_space<vmem>>, vector<32x64xbf16>
    tpu.vector_store %arg3[%c0_3, %c0_4], %3 {strides = array<i32>} : memref<32x64xbf16, #tpu.memory_space<vmem>>, vector<32x64xbf16>,
    return
  }
  func.func @transform_0(%arg0: i32) -> (i32, i32) {
    %c0_i32 = arith.constant 0 : i32
    %c0_i32_0 = arith.constant 0 : i32
    return %arg0, %c0_i32 : i32, i32
  }
  func.func @transform_1(%arg0: i32) -> (i32, i32) {
    %c0_i32 = arith.constant 0 : i32
    %c0_i32_0 = arith.constant 0 : i32
    %c0_i32_1 = arith.constant 0 : i32
    return %c0_i32, %c0_i32_0 : i32, i32
  }
  func.func @transform_2(%arg0: i32) -> (i32, i32) {
    %c0_i32 = arith.constant 0 : i32
    %c0_i32_0 = arith.constant 0 : i32
    return %arg0, %c0_i32 : i32, i32
  }
}

module attributes {stable_mosaic.version = 11 : i64} {
  func.func @kernel(%arg0: i32, %arg1: i32, %arg2: i32, %arg3: memref<1x24x192xbf16, #tpu.memory_space<vmem>>, %arg4: memref<3x192x64xbf16, #tpu.memory_space<vmem>>, %arg5: memref<1x16x64xbf16, #tpu.memory_space<vmem>>) attributes {dimension_semantics = [#tpu.dimension_semantics<parallel>, #tpu.dimension_semantics<parallel>, #tpu.dimension_semantics<parallel>], iteration_bounds = array<i64: 2, 1, 1>, scalar_prefetch = 0 : i64, scratch_operands = 0 : i64, tpu.core_type = #tpu.core_type<tc>, window_params = [{transform_indices = @transform_0, window_bounds = array<i64: 1, 24, 192>}, {transform_indices = @transform_1, window_bounds = array<i64: 3, 192, 64>}, {transform_indices = @transform_2, window_bounds = array<i64: 1, 16, 64>}]} {
    %cst = arith.constant 0.000000e+00 : f32
    %0 = vector.broadcast %cst : f32 to vector<16x64xf32>
    %c0 = arith.constant 0 : index
    %c0_0 = arith.constant 0 : index
    %c0_1 = arith.constant 0 : index
    %1 = vector.load %arg3[%c0, %c0_0, %c0_1] : memref<1x24x192xbf16, #tpu.memory_space<vmem>>, vector<1x16x192xbf16>
    %2 = vector.shape_cast %1 : vector<1x16x192xbf16> to vector<16x192xbf16>
    %c0_2 = arith.constant 0 : index
    %c0_3 = arith.constant 0 : index
    %c0_4 = arith.constant 0 : index
    %3 = vector.load %arg4[%c0_2, %c0_3, %c0_4] : memref<3x192x64xbf16, #tpu.memory_space<vmem>>, vector<1x192x64xbf16>
    %4 = vector.shape_cast %3 : vector<1x192x64xbf16> to vector<192x64xbf16>
    %cst_5 = arith.constant dense<0.000000e+00> : vector<16x64xf32>
    %5 = tpu.matmul %2, %4, %cst_5 {dimension_numbers = #tpu.dot_dimension_numbers<[1], [0], [0], [1], [0, 0, 1, 1], [], []>} : vector<16x192xbf16>, vector<192x64xbf16>, vector<16x64xf32> -> vector<16x64xf32>
    %6 = arith.addf %0, %5 : vector<16x64xf32>
    %c0_6 = arith.constant 0 : index
    %c4 = arith.constant 4 : index
    %c0_7 = arith.constant 0 : index
    %7 = vector.load %arg3[%c0_6, %c4, %c0_7] : memref<1x24x192xbf16, #tpu.memory_space<vmem>>, vector<1x16x192xbf16>
    %8 = vector.shape_cast %7 : vector<1x16x192xbf16> to vector<16x192xbf16>
    %c1 = arith.constant 1 : index
    %c0_8 = arith.constant 0 : index
    %c0_9 = arith.constant 0 : index
    %9 = vector.load %arg4[%c1, %c0_8, %c0_9] : memref<3x192x64xbf16, #tpu.memory_space<vmem>>, vector<1x192x64xbf16>
    %10 = vector.shape_cast %9 : vector<1x192x64xbf16> to vector<192x64xbf16>
    %cst_10 = arith.constant dense<0.000000e+00> : vector<16x64xf32>
    %11 = tpu.matmul %8, %10, %cst_10 {dimension_numbers = #tpu.dot_dimension_numbers<[1], [0], [0], [1], [0, 0, 1, 1], [], []>} : vector<16x192xbf16>, vector<192x64xbf16>, vector<16x64xf32> -> vector<16x64xf32>
    %12 = arith.addf %6, %11 : vector<16x64xf32>
    %c0_11 = arith.constant 0 : index
    %c8 = arith.constant 8 : index
    %c0_12 = arith.constant 0 : index
    %13 = vector.load %arg3[%c0_11, %c8, %c0_12] : memref<1x24x192xbf16, #tpu.memory_space<vmem>>, vector<1x16x192xbf16>
    %14 = vector.shape_cast %13 : vector<1x16x192xbf16> to vector<16x192xbf16>
    %c2 = arith.constant 2 : index
    %c0_13 = arith.constant 0 : index
    %c0_14 = arith.constant 0 : index
    %15 = vector.load %arg4[%c2, %c0_13, %c0_14] : memref<3x192x64xbf16, #tpu.memory_space<vmem>>, vector<1x192x64xbf16>
    %16 = vector.shape_cast %15 : vector<1x192x64xbf16> to vector<192x64xbf16>
    %cst_15 = arith.constant dense<0.000000e+00> : vector<16x64xf32>
    %17 = tpu.matmul %14, %16, %cst_15 {dimension_numbers = #tpu.dot_dimension_numbers<[1], [0], [0], [1], [0, 0, 1, 1], [], []>} : vector<16x192xbf16>, vector<192x64xbf16>, vector<16x64xf32> -> vector<16x64xf32>
    %18 = arith.addf %12, %17 : vector<16x64xf32>
    %cst_16 = arith.constant 0.000000e+00 : f32
    %19 = vector.broadcast %cst_16 : f32 to vector<16x64xf32>
    %20 = arith.maximumf %18, %19 : vector<16x64xf32>
    %21 = arith.truncf %20 : vector<16x64xf32> to vector<16x64xbf16>
    %c0_17 = arith.constant 0 : index
    %c0_18 = arith.constant 0 : index
    %c0_19 = arith.constant 0 : index
    %22 = vector.load %arg5[%c0_17, %c0_18, %c0_19] : memref<1x16x64xbf16, #tpu.memory_space<vmem>>, vector<1x16x64xbf16>
    %23 = vector.shape_cast %22 : vector<1x16x64xbf16> to vector<16x64xbf16>
    %24 = vector.shape_cast %21 : vector<16x64xbf16> to vector<1x16x64xbf16>
    tpu.vector_store %arg5[%c0_17, %c0_18, %c0_19], %24 {strides = array<i32>} : memref<1x16x64xbf16, #tpu.memory_space<vmem>>, vector<1x16x64xbf16>,
    return
  }
  func.func @transform_0(%arg0: i32, %arg1: i32, %arg2: i32) -> (i32, i32, i32) {
    %c0_i32 = arith.constant 0 : i32
    %c0_i32_0 = arith.constant 0 : i32
    %c0_i32_1 = arith.constant 0 : i32
    return %arg0, %c0_i32, %c0_i32_0 : i32, i32, i32
  }
  func.func @transform_1(%arg0: i32, %arg1: i32, %arg2: i32) -> (i32, i32, i32) {
    %c0_i32 = arith.constant 0 : i32
    %c0_i32_0 = arith.constant 0 : i32
    %c0_i32_1 = arith.constant 0 : i32
    return %c0_i32, %c0_i32_0, %arg2 : i32, i32, i32
  }
  func.func @transform_2(%arg0: i32, %arg1: i32, %arg2: i32) -> (i32, i32, i32) {
    %c0_i32 = arith.constant 0 : i32
    return %arg0, %arg1, %arg2 : i32, i32, i32
  }
}

module attributes {stable_mosaic.version = 11 : i64} {
  func.func @kernel(%arg0: i32, %arg1: i32, %arg2: i32, %arg3: memref<1x24x192xbf16, #tpu.memory_space<vmem>>, %arg4: memref<3x192x64xbf16, #tpu.memory_space<vmem>>, %arg5: memref<1x16x64xbf16, #tpu.memory_space<vmem>>, %arg6: memref<1x16x64xbf16, #tpu.memory_space<vmem>>) attributes {dimension_semantics = [#tpu.dimension_semantics<parallel>, #tpu.dimension_semantics<parallel>, #tpu.dimension_semantics<parallel>], iteration_bounds = array<i64: 2, 1, 1>, scalar_prefetch = 0 : i64, scratch_operands = 0 : i64, tpu.core_type = #tpu.core_type<tc>, window_params = [{transform_indices = @transform_0, window_bounds = array<i64: 1, 24, 192>}, {transform_indices = @transform_1, window_bounds = array<i64: 3, 192, 64>}, {transform_indices = @transform_2, window_bounds = array<i64: 1, 16, 64>}, {transform_indices = @transform_3, window_bounds = array<i64: 1, 16, 64>}]} {
    %cst = arith.constant 0.000000e+00 : f32
    %0 = vector.broadcast %cst : f32 to vector<16x64xf32>
    %c0 = arith.constant 0 : index
    %c0_0 = arith.constant 0 : index
    %c0_1 = arith.constant 0 : index
    %1 = vector.load %arg3[%c0, %c0_0, %c0_1] : memref<1x24x192xbf16, #tpu.memory_space<vmem>>, vector<1x16x192xbf16>
    %2 = vector.shape_cast %1 : vector<1x16x192xbf16> to vector<16x192xbf16>
    %c0_2 = arith.constant 0 : index
    %c0_3 = arith.constant 0 : index
    %c0_4 = arith.constant 0 : index
    %3 = vector.load %arg4[%c0_2, %c0_3, %c0_4] : memref<3x192x64xbf16, #tpu.memory_space<vmem>>, vector<1x192x64xbf16>
    %4 = vector.shape_cast %3 : vector<1x192x64xbf16> to vector<192x64xbf16>
    %cst_5 = arith.constant dense<0.000000e+00> : vector<16x64xf32>
    %5 = tpu.matmul %2, %4, %cst_5 {dimension_numbers = #tpu.dot_dimension_numbers<[1], [0], [0], [1], [0, 0, 1, 1], [], []>} : vector<16x192xbf16>, vector<192x64xbf16>, vector<16x64xf32> -> vector<16x64xf32>
    %6 = arith.addf %0, %5 : vector<16x64xf32>
    %c0_6 = arith.constant 0 : index
    %c4 = arith.constant 4 : index
    %c0_7 = arith.constant 0 : index
    %7 = vector.load %arg3[%c0_6, %c4, %c0_7] : memref<1x24x192xbf16, #tpu.memory_space<vmem>>, vector<1x16x192xbf16>
    %8 = vector.shape_cast %7 : vector<1x16x192xbf16> to vector<16x192xbf16>
    %c1 = arith.constant 1 : index
    %c0_8 = arith.constant 0 : index
    %c0_9 = arith.constant 0 : index
    %9 = vector.load %arg4[%c1, %c0_8, %c0_9] : memref<3x192x64xbf16, #tpu.memory_space<vmem>>, vector<1x192x64xbf16>
    %10 = vector.shape_cast %9 : vector<1x192x64xbf16> to vector<192x64xbf16>
    %cst_10 = arith.constant dense<0.000000e+00> : vector<16x64xf32>
    %11 = tpu.matmul %8, %10, %cst_10 {dimension_numbers = #tpu.dot_dimension_numbers<[1], [0], [0], [1], [0, 0, 1, 1], [], []>} : vector<16x192xbf16>, vector<192x64xbf16>, vector<16x64xf32> -> vector<16x64xf32>
    %12 = arith.addf %6, %11 : vector<16x64xf32>
    %c0_11 = arith.constant 0 : index
    %c8 = arith.constant 8 : index
    %c0_12 = arith.constant 0 : index
    %13 = vector.load %arg3[%c0_11, %c8, %c0_12] : memref<1x24x192xbf16, #tpu.memory_space<vmem>>, vector<1x16x192xbf16>
    %14 = vector.shape_cast %13 : vector<1x16x192xbf16> to vector<16x192xbf16>
    %c2 = arith.constant 2 : index
    %c0_13 = arith.constant 0 : index
    %c0_14 = arith.constant 0 : index
    %15 = vector.load %arg4[%c2, %c0_13, %c0_14] : memref<3x192x64xbf16, #tpu.memory_space<vmem>>, vector<1x192x64xbf16>
    %16 = vector.shape_cast %15 : vector<1x192x64xbf16> to vector<192x64xbf16>
    %cst_15 = arith.constant dense<0.000000e+00> : vector<16x64xf32>
    %17 = tpu.matmul %14, %16, %cst_15 {dimension_numbers = #tpu.dot_dimension_numbers<[1], [0], [0], [1], [0, 0, 1, 1], [], []>} : vector<16x192xbf16>, vector<192x64xbf16>, vector<16x64xf32> -> vector<16x64xf32>
    %18 = arith.addf %12, %17 : vector<16x64xf32>
    %c0_16 = arith.constant 0 : index
    %c0_17 = arith.constant 0 : index
    %c0_18 = arith.constant 0 : index
    %19 = vector.load %arg5[%c0_16, %c0_17, %c0_18] : memref<1x16x64xbf16, #tpu.memory_space<vmem>>, vector<1x16x64xbf16>
    %20 = vector.shape_cast %19 : vector<1x16x64xbf16> to vector<16x64xbf16>
    %21 = arith.extf %20 : vector<16x64xbf16> to vector<16x64xf32>
    %22 = arith.addf %18, %21 : vector<16x64xf32>
    %23 = arith.truncf %22 : vector<16x64xf32> to vector<16x64xbf16>
    %c0_19 = arith.constant 0 : index
    %c0_20 = arith.constant 0 : index
    %c0_21 = arith.constant 0 : index
    %24 = vector.load %arg6[%c0_19, %c0_20, %c0_21] : memref<1x16x64xbf16, #tpu.memory_space<vmem>>, vector<1x16x64xbf16>
    %25 = vector.shape_cast %24 : vector<1x16x64xbf16> to vector<16x64xbf16>
    %26 = vector.shape_cast %23 : vector<16x64xbf16> to vector<1x16x64xbf16>
    tpu.vector_store %arg6[%c0_19, %c0_20, %c0_21], %26 {strides = array<i32>} : memref<1x16x64xbf16, #tpu.memory_space<vmem>>, vector<1x16x64xbf16>,
    return
  }
  func.func @transform_0(%arg0: i32, %arg1: i32, %arg2: i32) -> (i32, i32, i32) {
    %c0_i32 = arith.constant 0 : i32
    %c0_i32_0 = arith.constant 0 : i32
    %c0_i32_1 = arith.constant 0 : i32
    return %arg0, %c0_i32, %c0_i32_0 : i32, i32, i32
  }
  func.func @transform_1(%arg0: i32, %arg1: i32, %arg2: i32) -> (i32, i32, i32) {
    %c0_i32 = arith.constant 0 : i32
    %c0_i32_0 = arith.constant 0 : i32
    %c0_i32_1 = arith.constant 0 : i32
    return %c0_i32, %c0_i32_0, %arg2 : i32, i32, i32
  }
  func.func @transform_2(%arg0: i32, %arg1: i32, %arg2: i32) -> (i32, i32, i32) {
    %c0_i32 = arith.constant 0 : i32
    return %arg0, %arg1, %arg2 : i32, i32, i32
  }
  func.func @transform_3(%arg0: i32, %arg1: i32, %arg2: i32) -> (i32, i32, i32) {
    %c0_i32 = arith.constant 0 : i32
    return %arg0, %arg1, %arg2 : i32, i32, i32
  }
}

module attributes {stable_mosaic.version = 11 : i64} {
  func.func @kernel(%arg0: i32, %arg1: memref<8x256xbf16, #tpu.memory_space<vmem>>, %arg2: memref<256x128xbf16, #tpu.memory_space<vmem>>, %arg3: memref<8x128xbf16, #tpu.memory_space<vmem>>) attributes {dimension_semantics = [#tpu.dimension_semantics<parallel>], iteration_bounds = array<i64: 1>, scalar_prefetch = 0 : i64, scratch_operands = 0 : i64, tpu.core_type = #tpu.core_type<tc>, window_params = [{transform_indices = @transform_0, window_bounds = array<i64: 8, 256>}, {pipeline_mode = #tpu.pipeline_mode<synchronous>, transform_indices = @transform_1, window_bounds = array<i64: 256, 128>}, {transform_indices = @transform_2, window_bounds = array<i64: 8, 128>}]} {
    %c0 = arith.constant 0 : index
    %c0_0 = arith.constant 0 : index
    %0 = vector.load %arg1[%c0, %c0_0] : memref<8x256xbf16, #tpu.memory_space<vmem>>, vector<8x256xbf16>
    %c0_1 = arith.constant 0 : index
    %c0_2 = arith.constant 0 : index
    %1 = vector.load %arg2[%c0_1, %c0_2] : memref<256x128xbf16, #tpu.memory_space<vmem>>, vector<256x128xbf16>
    %cst = arith.constant dense<0.000000e+00> : vector<8x128xf32>
    %2 = tpu.matmul %0, %1, %cst {dimension_numbers = #tpu.dot_dimension_numbers<[1], [0], [0], [1], [0, 0, 1, 1], [], []>} : vector<8x256xbf16>, vector<256x128xbf16>, vector<8x128xf32> -> vector<8x128xf32>
    %3 = arith.truncf %2 : vector<8x128xf32> to vector<8x128xbf16>
    %c0_3 = arith.constant 0 : index
    %c0_4 = arith.constant 0 : index
    %4 = vector.load %arg3[%c0_3, %c0_4] : memref<8x128xbf16, #tpu.memory_space<vmem>>, vector<8x128xbf16>
    tpu.vector_store %arg3[%c0_3, %c0_4], %3 {strides = array<i32>} : memref<8x128xbf16, #tpu.memory_space<vmem>>, vector<8x128xbf16>,
    return
  }
  func.func @transform_0(%arg0: i32) -> (i32, i32) {
    %c0_i32 = arith.constant 0 : i32
    %c0_i32_0 = arith.constant 0 : i32
    return %arg0, %c0_i32 : i32, i32
  }
  func.func @transform_1(%arg0: i32) -> (i32, i32) {
    %c0_i32 = arith.constant 0 : i32
    %c0_i32_0 = arith.constant 0 : i32
    %c0_i32_1 = arith.constant 0 : i32
    return %c0_i32, %c0_i32_0 : i32, i32
  }
  func.func @transform_2(%arg0: i32) -> (i32, i32) {
    %c0_i32 = arith.constant 0 : i32
    %c0_i32_0 = arith.constant 0 : i32
    return %arg0, %c0_i32 : i32, i32
  }
}

module attributes {stable_mosaic.version = 11 : i64} {
  func.func @kernel(%arg0: i32, %arg1: i32, %arg2: i32, %arg3: memref<1x8x384xbf16, #tpu.memory_space<vmem>>, %arg4: memref<3x384x128xbf16, #tpu.memory_space<vmem>>, %arg5: memref<1x4x128xbf16, #tpu.memory_space<vmem>>) attributes {dimension_semantics = [#tpu.dimension_semantics<parallel>, #tpu.dimension_semantics<parallel>, #tpu.dimension_semantics<parallel>], iteration_bounds = array<i64: 2, 1, 1>, scalar_prefetch = 0 : i64, scratch_operands = 0 : i64, tpu.core_type = #tpu.core_type<tc>, window_params = [{transform_indices = @transform_0, window_bounds = array<i64: 1, 8, 384>}, {transform_indices = @transform_1, window_bounds = array<i64: 3, 384, 128>}, {transform_indices = @transform_2, window_bounds = array<i64: 1, 4, 128>}]} {
    %cst = arith.constant 0.000000e+00 : f32
    %0 = vector.broadcast %cst : f32 to vector<4x128xf32>
    %c0 = arith.constant 0 : index
    %c0_0 = arith.constant 0 : index
    %c0_1 = arith.constant 0 : index
    %1 = vector.load %arg3[%c0, %c0_0, %c0_1] : memref<1x8x384xbf16, #tpu.memory_space<vmem>>, vector<1x4x384xbf16>
    %2 = vector.shape_cast %1 : vector<1x4x384xbf16> to vector<4x384xbf16>
    %c0_2 = arith.constant 0 : index
    %c0_3 = arith.constant 0 : index
    %c0_4 = arith.constant 0 : index
    %3 = vector.load %arg4[%c0_2, %c0_3, %c0_4] : memref<3x384x128xbf16, #tpu.memory_space<vmem>>, vector<1x384x128xbf16>
    %4 = vector.shape_cast %3 : vector<1x384x128xbf16> to vector<384x128xbf16>
    %cst_5 = arith.constant dense<0.000000e+00> : vector<4x128xf32>
    %5 = tpu.matmul %2, %4, %cst_5 {dimension_numbers = #tpu.dot_dimension_numbers<[1], [0], [0], [1], [0, 0, 1, 1], [], []>} : vector<4x384xbf16>, vector<384x128xbf16>, vector<4x128xf32> -> vector<4x128xf32>
    %6 = arith.addf %0, %5 : vector<4x128xf32>
    %c0_6 = arith.constant 0 : index
    %c2 = arith.constant 2 : index
    %c0_7 = arith.constant 0 : index
    %7 = vector.load %arg3[%c0_6, %c2, %c0_7] : memref<1x8x384xbf16, #tpu.memory_space<vmem>>, vector<1x4x384xbf16>
    %8 = vector.shape_cast %7 : vector<1x4x384xbf16> to vector<4x384xbf16>
    %c1 = arith.constant 1 : index
    %c0_8 = arith.constant 0 : index
    %c0_9 = arith.constant 0 : index
    %9 = vector.load %arg4[%c1, %c0_8, %c0_9] : memref<3x384x128xbf16, #tpu.memory_space<vmem>>, vector<1x384x128xbf16>
    %10 = vector.shape_cast %9 : vector<1x384x128xbf16> to vector<384x128xbf16>
    %cst_10 = arith.constant dense<0.000000e+00> : vector<4x128xf32>
    %11 = tpu.matmul %8, %10, %cst_10 {dimension_numbers = #tpu.dot_dimension_numbers<[1], [0], [0], [1], [0, 0, 1, 1], [], []>} : vector<4x384xbf16>, vector<384x128xbf16>, vector<4x128xf32> -> vector<4x128xf32>
    %12 = arith.addf %6, %11 : vector<4x128xf32>
    %c0_11 = arith.constant 0 : index
    %c4 = arith.constant 4 : index
    %c0_12 = arith.constant 0 : index
    %13 = vector.load %arg3[%c0_11, %c4, %c0_12] : memref<1x8x384xbf16, #tpu.memory_space<vmem>>, vector<1x4x384xbf16>
    %14 = vector.shape_cast %13 : vector<1x4x384xbf16> to vector<4x384xbf16>
    %c2_13 = arith.constant 2 : index
    %c0_14 = arith.constant 0 : index
    %c0_15 = arith.constant 0 : index
    %15 = vector.load %arg4[%c2_13, %c0_14, %c0_15] : memref<3x384x128xbf16, #tpu.memory_space<vmem>>, vector<1x384x128xbf16>
    %16 = vector.shape_cast %15 : vector<1x384x128xbf16> to vector<384x128xbf16>
    %cst_16 = arith.constant dense<0.000000e+00> : vector<4x128xf32>
    %17 = tpu.matmul %14, %16, %cst_16 {dimension_numbers = #tpu.dot_dimension_numbers<[1], [0], [0], [1], [0, 0, 1, 1], [], []>} : vector<4x384xbf16>, vector<384x128xbf16>, vector<4x128xf32> -> vector<4x128xf32>
    %18 = arith.addf %12, %17 : vector<4x128xf32>
    %cst_17 = arith.constant 0.000000e+00 : f32
    %19 = vector.broadcast %cst_17 : f32 to vector<4x128xf32>
    %20 = arith.maximumf %18, %19 : vector<4x128xf32>
    %21 = arith.truncf %20 : vector<4x128xf32> to vector<4x128xbf16>
    %c0_18 = arith.constant 0 : index
    %c0_19 = arith.constant 0 : index
    %c0_20 = arith.constant 0 : index
    %22 = vector.load %arg5[%c0_18, %c0_19, %c0_20] : memref<1x4x128xbf16, #tpu.memory_space<vmem>>, vector<1x4x128xbf16>
    %23 = vector.shape_cast %22 : vector<1x4x128xbf16> to vector<4x128xbf16>
    %24 = vector.shape_cast %21 : vector<4x128xbf16> to vector<1x4x128xbf16>
    tpu.vector_store %arg5[%c0_18, %c0_19, %c0_20], %24 {strides = array<i32>} : memref<1x4x128xbf16, #tpu.memory_space<vmem>>, vector<1x4x128xbf16>,
    return
  }
  func.func @transform_0(%arg0: i32, %arg1: i32, %arg2: i32) -> (i32, i32, i32) {
    %c0_i32 = arith.constant 0 : i32
    %c0_i32_0 = arith.constant 0 : i32
    %c0_i32_1 = arith.constant 0 : i32
    return %arg0, %c0_i32, %c0_i32_0 : i32, i32, i32
  }
  func.func @transform_1(%arg0: i32, %arg1: i32, %arg2: i32) -> (i32, i32, i32) {
    %c0_i32 = arith.constant 0 : i32
    %c0_i32_0 = arith.constant 0 : i32
    %c0_i32_1 = arith.constant 0 : i32
    return %c0_i32, %c0_i32_0, %arg2 : i32, i32, i32
  }
  func.func @transform_2(%arg0: i32, %arg1: i32, %arg2: i32) -> (i32, i32, i32) {
    %c0_i32 = arith.constant 0 : i32
    return %arg0, %arg1, %arg2 : i32, i32, i32
  }
}

module attributes {stable_mosaic.version = 11 : i64} {
  func.func @kernel(%arg0: i32, %arg1: i32, %arg2: i32, %arg3: memref<1x8x384xbf16, #tpu.memory_space<vmem>>, %arg4: memref<3x384x128xbf16, #tpu.memory_space<vmem>>, %arg5: memref<1x4x128xbf16, #tpu.memory_space<vmem>>, %arg6: memref<1x4x128xbf16, #tpu.memory_space<vmem>>) attributes {dimension_semantics = [#tpu.dimension_semantics<parallel>, #tpu.dimension_semantics<parallel>, #tpu.dimension_semantics<parallel>], iteration_bounds = array<i64: 2, 1, 1>, scalar_prefetch = 0 : i64, scratch_operands = 0 : i64, tpu.core_type = #tpu.core_type<tc>, window_params = [{transform_indices = @transform_0, window_bounds = array<i64: 1, 8, 384>}, {transform_indices = @transform_1, window_bounds = array<i64: 3, 384, 128>}, {transform_indices = @transform_2, window_bounds = array<i64: 1, 4, 128>}, {transform_indices = @transform_3, window_bounds = array<i64: 1, 4, 128>}]} {
    %cst = arith.constant 0.000000e+00 : f32
    %0 = vector.broadcast %cst : f32 to vector<4x128xf32>
    %c0 = arith.constant 0 : index
    %c0_0 = arith.constant 0 : index
    %c0_1 = arith.constant 0 : index
    %1 = vector.load %arg3[%c0, %c0_0, %c0_1] : memref<1x8x384xbf16, #tpu.memory_space<vmem>>, vector<1x4x384xbf16>
    %2 = vector.shape_cast %1 : vector<1x4x384xbf16> to vector<4x384xbf16>
    %c0_2 = arith.constant 0 : index
    %c0_3 = arith.constant 0 : index
    %c0_4 = arith.constant 0 : index
    %3 = vector.load %arg4[%c0_2, %c0_3, %c0_4] : memref<3x384x128xbf16, #tpu.memory_space<vmem>>, vector<1x384x128xbf16>
    %4 = vector.shape_cast %3 : vector<1x384x128xbf16> to vector<384x128xbf16>
    %cst_5 = arith.constant dense<0.000000e+00> : vector<4x128xf32>
    %5 = tpu.matmul %2, %4, %cst_5 {dimension_numbers = #tpu.dot_dimension_numbers<[1], [0], [0], [1], [0, 0, 1, 1], [], []>} : vector<4x384xbf16>, vector<384x128xbf16>, vector<4x128xf32> -> vector<4x128xf32>
    %6 = arith.addf %0, %5 : vector<4x128xf32>
    %c0_6 = arith.constant 0 : index
    %c2 = arith.constant 2 : index
    %c0_7 = arith.constant 0 : index
    %7 = vector.load %arg3[%c0_6, %c2, %c0_7] : memref<1x8x384xbf16, #tpu.memory_space<vmem>>, vector<1x4x384xbf16>
    %8 = vector.shape_cast %7 : vector<1x4x384xbf16> to vector<4x384xbf16>
    %c1 = arith.constant 1 : index
    %c0_8 = arith.constant 0 : index
    %c0_9 = arith.constant 0 : index
    %9 = vector.load %arg4[%c1, %c0_8, %c0_9] : memref<3x384x128xbf16, #tpu.memory_space<vmem>>, vector<1x384x128xbf16>
    %10 = vector.shape_cast %9 : vector<1x384x128xbf16> to vector<384x128xbf16>
    %cst_10 = arith.constant dense<0.000000e+00> : vector<4x128xf32>
    %11 = tpu.matmul %8, %10, %cst_10 {dimension_numbers = #tpu.dot_dimension_numbers<[1], [0], [0], [1], [0, 0, 1, 1], [], []>} : vector<4x384xbf16>, vector<384x128xbf16>, vector<4x128xf32> -> vector<4x128xf32>
    %12 = arith.addf %6, %11 : vector<4x128xf32>
    %c0_11 = arith.constant 0 : index
    %c4 = arith.constant 4 : index
    %c0_12 = arith.constant 0 : index
    %13 = vector.load %arg3[%c0_11, %c4, %c0_12] : memref<1x8x384xbf16, #tpu.memory_space<vmem>>, vector<1x4x384xbf16>
    %14 = vector.shape_cast %13 : vector<1x4x384xbf16> to vector<4x384xbf16>
    %c2_13 = arith.constant 2 : index
    %c0_14 = arith.constant 0 : index
    %c0_15 = arith.constant 0 : index
    %15 = vector.load %arg4[%c2_13, %c0_14, %c0_15] : memref<3x384x128xbf16, #tpu.memory_space<vmem>>, vector<1x384x128xbf16>
    %16 = vector.shape_cast %15 : vector<1x384x128xbf16> to vector<384x128xbf16>
    %cst_16 = arith.constant dense<0.000000e+00> : vector<4x128xf32>
    %17 = tpu.matmul %14, %16, %cst_16 {dimension_numbers = #tpu.dot_dimension_numbers<[1], [0], [0], [1], [0, 0, 1, 1], [], []>} : vector<4x384xbf16>, vector<384x128xbf16>, vector<4x128xf32> -> vector<4x128xf32>
    %18 = arith.addf %12, %17 : vector<4x128xf32>
    %c0_17 = arith.constant 0 : index
    %c0_18 = arith.constant 0 : index
    %c0_19 = arith.constant 0 : index
    %19 = vector.load %arg5[%c0_17, %c0_18, %c0_19] : memref<1x4x128xbf16, #tpu.memory_space<vmem>>, vector<1x4x128xbf16>
    %20 = vector.shape_cast %19 : vector<1x4x128xbf16> to vector<4x128xbf16>
    %21 = arith.extf %20 : vector<4x128xbf16> to vector<4x128xf32>
    %22 = arith.addf %18, %21 : vector<4x128xf32>
    %23 = arith.truncf %22 : vector<4x128xf32> to vector<4x128xbf16>
    %c0_20 = arith.constant 0 : index
    %c0_21 = arith.constant 0 : index
    %c0_22 = arith.constant 0 : index
    %24 = vector.load %arg6[%c0_20, %c0_21, %c0_22] : memref<1x4x128xbf16, #tpu.memory_space<vmem>>, vector<1x4x128xbf16>
    %25 = vector.shape_cast %24 : vector<1x4x128xbf16> to vector<4x128xbf16>
    %26 = vector.shape_cast %23 : vector<4x128xbf16> to vector<1x4x128xbf16>
    tpu.vector_store %arg6[%c0_20, %c0_21, %c0_22], %26 {strides = array<i32>} : memref<1x4x128xbf16, #tpu.memory_space<vmem>>, vector<1x4x128xbf16>,
    return
  }
  func.func @transform_0(%arg0: i32, %arg1: i32, %arg2: i32) -> (i32, i32, i32) {
    %c0_i32 = arith.constant 0 : i32
    %c0_i32_0 = arith.constant 0 : i32
    %c0_i32_1 = arith.constant 0 : i32
    return %arg0, %c0_i32, %c0_i32_0 : i32, i32, i32
  }
  func.func @transform_1(%arg0: i32, %arg1: i32, %arg2: i32) -> (i32, i32, i32) {
    %c0_i32 = arith.constant 0 : i32
    %c0_i32_0 = arith.constant 0 : i32
    %c0_i32_1 = arith.constant 0 : i32
    return %c0_i32, %c0_i32_0, %arg2 : i32, i32, i32
  }
  func.func @transform_2(%arg0: i32, %arg1: i32, %arg2: i32) -> (i32, i32, i32) {
    %c0_i32 = arith.constant 0 : i32
    return %arg0, %arg1, %arg2 : i32, i32, i32
  }
  func.func @transform_3(%arg0: i32, %arg1: i32, %arg2: i32) -> (i32, i32, i32) {
    %c0_i32 = arith.constant 0 : i32
    return %arg0, %arg1, %arg2 : i32, i32, i32
  }
}

module attributes {stable_mosaic.version = 11 : i64} {
  func.func @kernel(%arg0: i32, %arg1: i32, %arg2: memref<1x4x128xbf16, #tpu.memory_space<vmem>>, %arg3: memref<1x4x128xbf16, #tpu.memory_space<vmem>>, %arg4: memref<2x128x128xbf16, #tpu.memory_space<vmem>>, %arg5: memref<1x2x2x2x128xbf16, #tpu.memory_space<vmem>>) attributes {dimension_semantics = [#tpu.dimension_semantics<parallel>, #tpu.dimension_semantics<parallel>], iteration_bounds = array<i64: 2, 1>, scalar_prefetch = 0 : i64, scratch_operands = 0 : i64, tpu.core_type = #tpu.core_type<tc>, window_params = [{transform_indices = @transform_0, window_bounds = array<i64: 1, 4, 128>}, {transform_indices = @transform_1, window_bounds = array<i64: 1, 4, 128>}, {pipeline_mode = #tpu.pipeline_mode<synchronous>, transform_indices = @transform_2, window_bounds = array<i64: 2, 128, 128>}, {transform_indices = @transform_3, window_bounds = array<i64: 1, 2, 2, 2, 128>}]} {
    %c0 = arith.constant 0 : index
    %c0_0 = arith.constant 0 : index
    %c0_1 = arith.constant 0 : index
    %0 = vector.load %arg2[%c0, %c0_0, %c0_1] : memref<1x4x128xbf16, #tpu.memory_space<vmem>>, vector<1x4x128xbf16>
    %1 = vector.shape_cast %0 : vector<1x4x128xbf16> to vector<4x128xbf16>
    %c0_2 = arith.constant 0 : index
    %c0_3 = arith.constant 0 : index
    %c0_4 = arith.constant 0 : index
    %2 = vector.load %arg3[%c0_2, %c0_3, %c0_4] : memref<1x4x128xbf16, #tpu.memory_space<vmem>>, vector<1x4x128xbf16>
    %3 = vector.shape_cast %2 : vector<1x4x128xbf16> to vector<4x128xbf16>
    %4 = arith.addf %1, %3 : vector<4x128xbf16>
    %c0_5 = arith.constant 0 : index
    %c0_6 = arith.constant 0 : index
    %c0_7 = arith.constant 0 : index
    %5 = vector.load %arg4[%c0_5, %c0_6, %c0_7] : memref<2x128x128xbf16, #tpu.memory_space<vmem>>, vector<1x128x128xbf16>
    %6 = vector.shape_cast %5 : vector<1x128x128xbf16> to vector<128x128xbf16>
    %cst = arith.constant dense<0.000000e+00> : vector<4x128xf32>
    %7 = tpu.matmul %4, %6, %cst {dimension_numbers = #tpu.dot_dimension_numbers<[1], [0], [0], [1], [0, 0, 1, 1], [], []>} : vector<4x128xbf16>, vector<128x128xbf16>, vector<4x128xf32> -> vector<4x128xf32>
    %8 = arith.truncf %7 : vector<4x128xf32> to vector<4x128xbf16>
    %9 = vector.extract_strided_slice %8 {offsets = [0, 0], sizes = [2, 128], strides = [1, 1]} : vector<4x128xbf16> to vector<2x128xbf16>
    %c0_8 = arith.constant 0 : index
    %c0_9 = arith.constant 0 : index
    %c0_10 = arith.constant 0 : index
    %c0_11 = arith.constant 0 : index
    %c0_12 = arith.constant 0 : index
    %10 = vector.load %arg5[%c0_8, %c0_9, %c0_10, %c0_11, %c0_12] : memref<1x2x2x2x128xbf16, #tpu.memory_space<vmem>>, vector<1x1x1x2x128xbf16>
    %11 = vector.shape_cast %10 : vector<1x1x1x2x128xbf16> to vector<2x128xbf16>
    %12 = vector.shape_cast %9 : vector<2x128xbf16> to vector<1x1x1x2x128xbf16>
    tpu.vector_store %arg5[%c0_8, %c0_9, %c0_10, %c0_11, %c0_12], %12 {strides = array<i32>} : memref<1x2x2x2x128xbf16, #tpu.memory_space<vmem>>, vector<1x1x1x2x128xbf16>,
    %13 = vector.extract_strided_slice %8 {offsets = [2, 0], sizes = [2, 128], strides = [1, 1]} : vector<4x128xbf16> to vector<2x128xbf16>
    %c0_13 = arith.constant 0 : index
    %c1 = arith.constant 1 : index
    %c0_14 = arith.constant 0 : index
    %c0_15 = arith.constant 0 : index
    %c0_16 = arith.constant 0 : index
    %14 = vector.load %arg5[%c0_13, %c1, %c0_14, %c0_15, %c0_16] : memref<1x2x2x2x128xbf16, #tpu.memory_space<vmem>>, vector<1x1x1x2x128xbf16>
    %15 = vector.shape_cast %14 : vector<1x1x1x2x128xbf16> to vector<2x128xbf16>
    %16 = vector.shape_cast %13 : vector<2x128xbf16> to vector<1x1x1x2x128xbf16>
    tpu.vector_store %arg5[%c0_13, %c1, %c0_14, %c0_15, %c0_16], %16 {strides = array<i32>} : memref<1x2x2x2x128xbf16, #tpu.memory_space<vmem>>, vector<1x1x1x2x128xbf16>,
    %c1_17 = arith.constant 1 : index
    %c0_18 = arith.constant 0 : index
    %c0_19 = arith.constant 0 : index
    %17 = vector.load %arg4[%c1_17, %c0_18, %c0_19] : memref<2x128x128xbf16, #tpu.memory_space<vmem>>, vector<1x128x128xbf16>
    %18 = vector.shape_cast %17 : vector<1x128x128xbf16> to vector<128x128xbf16>
    %cst_20 = arith.constant dense<0.000000e+00> : vector<4x128xf32>
    %19 = tpu.matmul %4, %18, %cst_20 {dimension_numbers = #tpu.dot_dimension_numbers<[1], [0], [0], [1], [0, 0, 1, 1], [], []>} : vector<4x128xbf16>, vector<128x128xbf16>, vector<4x128xf32> -> vector<4x128xf32>
    %20 = arith.truncf %19 : vector<4x128xf32> to vector<4x128xbf16>
    %21 = vector.extract_strided_slice %20 {offsets = [0, 0], sizes = [2, 128], strides = [1, 1]} : vector<4x128xbf16> to vector<2x128xbf16>
    %c0_21 = arith.constant 0 : index
    %c0_22 = arith.constant 0 : index
    %c1_23 = arith.constant 1 : index
    %c0_24 = arith.constant 0 : index
    %c0_25 = arith.constant 0 : index
    %22 = vector.load %arg5[%c0_21, %c0_22, %c1_23, %c0_24, %c0_25] : memref<1x2x2x2x128xbf16, #tpu.memory_space<vmem>>, vector<1x1x1x2x128xbf16>
    %23 = vector.shape_cast %22 : vector<1x1x1x2x128xbf16> to vector<2x128xbf16>
    %24 = vector.shape_cast %21 : vector<2x128xbf16> to vector<1x1x1x2x128xbf16>
    tpu.vector_store %arg5[%c0_21, %c0_22, %c1_23, %c0_24, %c0_25], %24 {strides = array<i32>} : memref<1x2x2x2x128xbf16, #tpu.memory_space<vmem>>, vector<1x1x1x2x128xbf16>,
    %25 = vector.extract_strided_slice %20 {offsets = [2, 0], sizes = [2, 128], strides = [1, 1]} : vector<4x128xbf16> to vector<2x128xbf16>
    %c0_26 = arith.constant 0 : index
    %c1_27 = arith.constant 1 : index
    %c1_28 = arith.constant 1 : index
    %c0_29 = arith.constant 0 : index
    %c0_30 = arith.constant 0 : index
    %26 = vector.load %arg5[%c0_26, %c1_27, %c1_28, %c0_29, %c0_30] : memref<1x2x2x2x128xbf16, #tpu.memory_space<vmem>>, vector<1x1x1x2x128xbf16>
    %27 = vector.shape_cast %26 : vector<1x1x1x2x128xbf16> to vector<2x128xbf16>
    %28 = vector.shape_cast %25 : vector<2x128xbf16> to vector<1x1x1x2x128xbf16>
    tpu.vector_store %arg5[%c0_26, %c1_27, %c1_28, %c0_29, %c0_30], %28 {strides = array<i32>} : memref<1x2x2x2x128xbf16, #tpu.memory_space<vmem>>, vector<1x1x1x2x128xbf16>,
    return
  }
  func.func @transform_0(%arg0: i32, %arg1: i32) -> (i32, i32, i32) {
    %c0_i32 = arith.constant 0 : i32
    %c0_i32_0 = arith.constant 0 : i32
    return %arg0, %arg1, %c0_i32 : i32, i32, i32
  }
  func.func @transform_1(%arg0: i32, %arg1: i32) -> (i32, i32, i32) {
    %c0_i32 = arith.constant 0 : i32
    %c0_i32_0 = arith.constant 0 : i32
    return %arg0, %arg1, %c0_i32 : i32, i32, i32
  }
  func.func @transform_2(%arg0: i32, %arg1: i32) -> (i32, i32, i32) {
    %c0_i32 = arith.constant 0 : i32
    %c0_i32_0 = arith.constant 0 : i32
    %c0_i32_1 = arith.constant 0 : i32
    %c0_i32_2 = arith.constant 0 : i32
    return %c0_i32, %c0_i32_0, %c0_i32_1 : i32, i32, i32
  }
  func.func @transform_3(%arg0: i32, %arg1: i32) -> (i32, i32, i32, i32, i32) {
    %c0_i32 = arith.constant 0 : i32
    %c0_i32_0 = arith.constant 0 : i32
    %c0_i32_1 = arith.constant 0 : i32
    %c0_i32_2 = arith.constant 0 : i32
    return %arg0, %arg1, %c0_i32, %c0_i32_0, %c0_i32_1 : i32, i32, i32, i32, i32
  }
}

module attributes {stable_mosaic.version = 11 : i64} {
  func.func @kernel(%arg0: i32, %arg1: i32, %arg2: memref<1x16x64xbf16, #tpu.memory_space<vmem>>, %arg3: memref<1x16x64xbf16, #tpu.memory_space<vmem>>, %arg4: memref<2x64x64xbf16, #tpu.memory_space<vmem>>, %arg5: memref<1x4x2x4x64xbf16, #tpu.memory_space<vmem>>) attributes {dimension_semantics = [#tpu.dimension_semantics<parallel>, #tpu.dimension_semantics<parallel>], iteration_bounds = array<i64: 2, 1>, scalar_prefetch = 0 : i64, scratch_operands = 0 : i64, tpu.core_type = #tpu.core_type<tc>, window_params = [{transform_indices = @transform_0, window_bounds = array<i64: 1, 16, 64>}, {transform_indices = @transform_1, window_bounds = array<i64: 1, 16, 64>}, {pipeline_mode = #tpu.pipeline_mode<synchronous>, transform_indices = @transform_2, window_bounds = array<i64: 2, 64, 64>}, {transform_indices = @transform_3, window_bounds = array<i64: 1, 4, 2, 4, 64>}]} {
    %c0 = arith.constant 0 : index
    %c0_0 = arith.constant 0 : index
    %c0_1 = arith.constant 0 : index
    %0 = vector.load %arg2[%c0, %c0_0, %c0_1] : memref<1x16x64xbf16, #tpu.memory_space<vmem>>, vector<1x16x64xbf16>
    %1 = vector.shape_cast %0 : vector<1x16x64xbf16> to vector<16x64xbf16>
    %c0_2 = arith.constant 0 : index
    %c0_3 = arith.constant 0 : index
    %c0_4 = arith.constant 0 : index
    %2 = vector.load %arg3[%c0_2, %c0_3, %c0_4] : memref<1x16x64xbf16, #tpu.memory_space<vmem>>, vector<1x16x64xbf16>
    %3 = vector.shape_cast %2 : vector<1x16x64xbf16> to vector<16x64xbf16>
    %4 = arith.addf %1, %3 : vector<16x64xbf16>
    %c0_5 = arith.constant 0 : index
    %c0_6 = arith.constant 0 : index
    %c0_7 = arith.constant 0 : index
    %5 = vector.load %arg4[%c0_5, %c0_6, %c0_7] : memref<2x64x64xbf16, #tpu.memory_space<vmem>>, vector<1x64x64xbf16>
    %6 = vector.shape_cast %5 : vector<1x64x64xbf16> to vector<64x64xbf16>
    %cst = arith.constant dense<0.000000e+00> : vector<16x64xf32>
    %7 = tpu.matmul %4, %6, %cst {dimension_numbers = #tpu.dot_dimension_numbers<[1], [0], [0], [1], [0, 0, 1, 1], [], []>} : vector<16x64xbf16>, vector<64x64xbf16>, vector<16x64xf32> -> vector<16x64xf32>
    %8 = arith.truncf %7 : vector<16x64xf32> to vector<16x64xbf16>
    %9 = vector.extract_strided_slice %8 {offsets = [0, 0], sizes = [4, 64], strides = [1, 1]} : vector<16x64xbf16> to vector<4x64xbf16>
    %c0_8 = arith.constant 0 : index
    %c0_9 = arith.constant 0 : index
    %c0_10 = arith.constant 0 : index
    %c0_11 = arith.constant 0 : index
    %c0_12 = arith.constant 0 : index
    %10 = vector.load %arg5[%c0_8, %c0_9, %c0_10, %c0_11, %c0_12] : memref<1x4x2x4x64xbf16, #tpu.memory_space<vmem>>, vector<1x1x1x4x64xbf16>
    %11 = vector.shape_cast %10 : vector<1x1x1x4x64xbf16> to vector<4x64xbf16>
    %12 = vector.shape_cast %9 : vector<4x64xbf16> to vector<1x1x1x4x64xbf16>
    tpu.vector_store %arg5[%c0_8, %c0_9, %c0_10, %c0_11, %c0_12], %12 {strides = array<i32>} : memref<1x4x2x4x64xbf16, #tpu.memory_space<vmem>>, vector<1x1x1x4x64xbf16>,
    %13 = vector.extract_strided_slice %8 {offsets = [4, 0], sizes = [4, 64], strides = [1, 1]} : vector<16x64xbf16> to vector<4x64xbf16>
    %c0_13 = arith.constant 0 : index
    %c1 = arith.constant 1 : index
    %c0_14 = arith.constant 0 : index
    %c0_15 = arith.constant 0 : index
    %c0_16 = arith.constant 0 : index
    %14 = vector.load %arg5[%c0_13, %c1, %c0_14, %c0_15, %c0_16] : memref<1x4x2x4x64xbf16, #tpu.memory_space<vmem>>, vector<1x1x1x4x64xbf16>
    %15 = vector.shape_cast %14 : vector<1x1x1x4x64xbf16> to vector<4x64xbf16>
    %16 = vector.shape_cast %13 : vector<4x64xbf16> to vector<1x1x1x4x64xbf16>
    tpu.vector_store %arg5[%c0_13, %c1, %c0_14, %c0_15, %c0_16], %16 {strides = array<i32>} : memref<1x4x2x4x64xbf16, #tpu.memory_space<vmem>>, vector<1x1x1x4x64xbf16>,
    %17 = vector.extract_strided_slice %8 {offsets = [8, 0], sizes = [4, 64], strides = [1, 1]} : vector<16x64xbf16> to vector<4x64xbf16>
    %c0_17 = arith.constant 0 : index
    %c2 = arith.constant 2 : index
    %c0_18 = arith.constant 0 : index
    %c0_19 = arith.constant 0 : index
    %c0_20 = arith.constant 0 : index
    %18 = vector.load %arg5[%c0_17, %c2, %c0_18, %c0_19, %c0_20] : memref<1x4x2x4x64xbf16, #tpu.memory_space<vmem>>, vector<1x1x1x4x64xbf16>
    %19 = vector.shape_cast %18 : vector<1x1x1x4x64xbf16> to vector<4x64xbf16>
    %20 = vector.shape_cast %17 : vector<4x64xbf16> to vector<1x1x1x4x64xbf16>
    tpu.vector_store %arg5[%c0_17, %c2, %c0_18, %c0_19, %c0_20], %20 {strides = array<i32>} : memref<1x4x2x4x64xbf16, #tpu.memory_space<vmem>>, vector<1x1x1x4x64xbf16>,
    %21 = vector.extract_strided_slice %8 {offsets = [12, 0], sizes = [4, 64], strides = [1, 1]} : vector<16x64xbf16> to vector<4x64xbf16>
    %c0_21 = arith.constant 0 : index
    %c3 = arith.constant 3 : index
    %c0_22 = arith.constant 0 : index
    %c0_23 = arith.constant 0 : index
    %c0_24 = arith.constant 0 : index
    %22 = vector.load %arg5[%c0_21, %c3, %c0_22, %c0_23, %c0_24] : memref<1x4x2x4x64xbf16, #tpu.memory_space<vmem>>, vector<1x1x1x4x64xbf16>
    %23 = vector.shape_cast %22 : vector<1x1x1x4x64xbf16> to vector<4x64xbf16>
    %24 = vector.shape_cast %21 : vector<4x64xbf16> to vector<1x1x1x4x64xbf16>
    tpu.vector_store %arg5[%c0_21, %c3, %c0_22, %c0_23, %c0_24], %24 {strides = array<i32>} : memref<1x4x2x4x64xbf16, #tpu.memory_space<vmem>>, vector<1x1x1x4x64xbf16>,
    %c1_25 = arith.constant 1 : index
    %c0_26 = arith.constant 0 : index
    %c0_27 = arith.constant 0 : index
    %25 = vector.load %arg4[%c1_25, %c0_26, %c0_27] : memref<2x64x64xbf16, #tpu.memory_space<vmem>>, vector<1x64x64xbf16>
    %26 = vector.shape_cast %25 : vector<1x64x64xbf16> to vector<64x64xbf16>
    %cst_28 = arith.constant dense<0.000000e+00> : vector<16x64xf32>
    %27 = tpu.matmul %4, %26, %cst_28 {dimension_numbers = #tpu.dot_dimension_numbers<[1], [0], [0], [1], [0, 0, 1, 1], [], []>} : vector<16x64xbf16>, vector<64x64xbf16>, vector<16x64xf32> -> vector<16x64xf32>
    %28 = arith.truncf %27 : vector<16x64xf32> to vector<16x64xbf16>
    %29 = vector.extract_strided_slice %28 {offsets = [0, 0], sizes = [4, 64], strides = [1, 1]} : vector<16x64xbf16> to vector<4x64xbf16>
    %c0_29 = arith.constant 0 : index
    %c0_30 = arith.constant 0 : index
    %c1_31 = arith.constant 1 : index
    %c0_32 = arith.constant 0 : index
    %c0_33 = arith.constant 0 : index
    %30 = vector.load %arg5[%c0_29, %c0_30, %c1_31, %c0_32, %c0_33] : memref<1x4x2x4x64xbf16, #tpu.memory_space<vmem>>, vector<1x1x1x4x64xbf16>
    %31 = vector.shape_cast %30 : vector<1x1x1x4x64xbf16> to vector<4x64xbf16>
    %32 = vector.shape_cast %29 : vector<4x64xbf16> to vector<1x1x1x4x64xbf16>
    tpu.vector_store %arg5[%c0_29, %c0_30, %c1_31, %c0_32, %c0_33], %32 {strides = array<i32>} : memref<1x4x2x4x64xbf16, #tpu.memory_space<vmem>>, vector<1x1x1x4x64xbf16>,
    %33 = vector.extract_strided_slice %28 {offsets = [4, 0], sizes = [4, 64], strides = [1, 1]} : vector<16x64xbf16> to vector<4x64xbf16>
    %c0_34 = arith.constant 0 : index
    %c1_35 = arith.constant 1 : index
    %c1_36 = arith.constant 1 : index
    %c0_37 = arith.constant 0 : index
    %c0_38 = arith.constant 0 : index
    %34 = vector.load %arg5[%c0_34, %c1_35, %c1_36, %c0_37, %c0_38] : memref<1x4x2x4x64xbf16, #tpu.memory_space<vmem>>, vector<1x1x1x4x64xbf16>
    %35 = vector.shape_cast %34 : vector<1x1x1x4x64xbf16> to vector<4x64xbf16>
    %36 = vector.shape_cast %33 : vector<4x64xbf16> to vector<1x1x1x4x64xbf16>
    tpu.vector_store %arg5[%c0_34, %c1_35, %c1_36, %c0_37, %c0_38], %36 {strides = array<i32>} : memref<1x4x2x4x64xbf16, #tpu.memory_space<vmem>>, vector<1x1x1x4x64xbf16>,
    %37 = vector.extract_strided_slice %28 {offsets = [8, 0], sizes = [4, 64], strides = [1, 1]} : vector<16x64xbf16> to vector<4x64xbf16>
    %c0_39 = arith.constant 0 : index
    %c2_40 = arith.constant 2 : index
    %c1_41 = arith.constant 1 : index
    %c0_42 = arith.constant 0 : index
    %c0_43 = arith.constant 0 : index
    %38 = vector.load %arg5[%c0_39, %c2_40, %c1_41, %c0_42, %c0_43] : memref<1x4x2x4x64xbf16, #tpu.memory_space<vmem>>, vector<1x1x1x4x64xbf16>
    %39 = vector.shape_cast %38 : vector<1x1x1x4x64xbf16> to vector<4x64xbf16>
    %40 = vector.shape_cast %37 : vector<4x64xbf16> to vector<1x1x1x4x64xbf16>
    tpu.vector_store %arg5[%c0_39, %c2_40, %c1_41, %c0_42, %c0_43], %40 {strides = array<i32>} : memref<1x4x2x4x64xbf16, #tpu.memory_space<vmem>>, vector<1x1x1x4x64xbf16>,
    %41 = vector.extract_strided_slice %28 {offsets = [12, 0], sizes = [4, 64], strides = [1, 1]} : vector<16x64xbf16> to vector<4x64xbf16>
    %c0_44 = arith.constant 0 : index
    %c3_45 = arith.constant 3 : index
    %c1_46 = arith.constant 1 : index
    %c0_47 = arith.constant 0 : index
    %c0_48 = arith.constant 0 : index
    %42 = vector.load %arg5[%c0_44, %c3_45, %c1_46, %c0_47, %c0_48] : memref<1x4x2x4x64xbf16, #tpu.memory_space<vmem>>, vector<1x1x1x4x64xbf16>
    %43 = vector.shape_cast %42 : vector<1x1x1x4x64xbf16> to vector<4x64xbf16>
    %44 = vector.shape_cast %41 : vector<4x64xbf16> to vector<1x1x1x4x64xbf16>
    tpu.vector_store %arg5[%c0_44, %c3_45, %c1_46, %c0_47, %c0_48], %44 {strides = array<i32>} : memref<1x4x2x4x64xbf16, #tpu.memory_space<vmem>>, vector<1x1x1x4x64xbf16>,
    return
  }
  func.func @transform_0(%arg0: i32, %arg1: i32) -> (i32, i32, i32) {
    %c0_i32 = arith.constant 0 : i32
    %c0_i32_0 = arith.constant 0 : i32
    return %arg0, %arg1, %c0_i32 : i32, i32, i32
  }
  func.func @transform_1(%arg0: i32, %arg1: i32) -> (i32, i32, i32) {
    %c0_i32 = arith.constant 0 : i32
    %c0_i32_0 = arith.constant 0 : i32
    return %arg0, %arg1, %c0_i32 : i32, i32, i32
  }
  func.func @transform_2(%arg0: i32, %arg1: i32) -> (i32, i32, i32) {
    %c0_i32 = arith.constant 0 : i32
    %c0_i32_0 = arith.constant 0 : i32
    %c0_i32_1 = arith.constant 0 : i32
    %c0_i32_2 = arith.constant 0 : i32
    return %c0_i32, %c0_i32_0, %c0_i32_1 : i32, i32, i32
  }
  func.func @transform_3(%arg0: i32, %arg1: i32) -> (i32, i32, i32, i32, i32) {
    %c0_i32 = arith.constant 0 : i32
    %c0_i32_0 = arith.constant 0 : i32
    %c0_i32_1 = arith.constant 0 : i32
    %c0_i32_2 = arith.constant 0 : i32
    return %arg0, %arg1, %c0_i32, %c0_i32_0, %c0_i32_1 : i32, i32, i32, i32, i32
  }
}

module attributes {stable_mosaic.version = 11 : i64} {
  func.func @kernel(%arg0: i32, %arg1: i32, %arg2: memref<1x64x32xbf16, #tpu.memory_space<vmem>>, %arg3: memref<1x64x32xbf16, #tpu.memory_space<vmem>>, %arg4: memref<2x32x32xbf16, #tpu.memory_space<vmem>>, %arg5: memref<1x8x2x8x32xbf16, #tpu.memory_space<vmem>>) attributes {dimension_semantics = [#tpu.dimension_semantics<parallel>, #tpu.dimension_semantics<parallel>], iteration_bounds = array<i64: 2, 1>, scalar_prefetch = 0 : i64, scratch_operands = 0 : i64, tpu.core_type = #tpu.core_type<tc>, window_params = [{transform_indices = @transform_0, window_bounds = array<i64: 1, 64, 32>}, {transform_indices = @transform_1, window_bounds = array<i64: 1, 64, 32>}, {pipeline_mode = #tpu.pipeline_mode<synchronous>, transform_indices = @transform_2, window_bounds = array<i64: 2, 32, 32>}, {transform_indices = @transform_3, window_bounds = array<i64: 1, 8, 2, 8, 32>}]} {
    %c0 = arith.constant 0 : index
    %c0_0 = arith.constant 0 : index
    %c0_1 = arith.constant 0 : index
    %0 = vector.load %arg2[%c0, %c0_0, %c0_1] : memref<1x64x32xbf16, #tpu.memory_space<vmem>>, vector<1x64x32xbf16>
    %1 = vector.shape_cast %0 : vector<1x64x32xbf16> to vector<64x32xbf16>
    %c0_2 = arith.constant 0 : index
    %c0_3 = arith.constant 0 : index
    %c0_4 = arith.constant 0 : index
    %2 = vector.load %arg3[%c0_2, %c0_3, %c0_4] : memref<1x64x32xbf16, #tpu.memory_space<vmem>>, vector<1x64x32xbf16>
    %3 = vector.shape_cast %2 : vector<1x64x32xbf16> to vector<64x32xbf16>
    %4 = arith.addf %1, %3 : vector<64x32xbf16>
    %c0_5 = arith.constant 0 : index
    %c0_6 = arith.constant 0 : index
    %c0_7 = arith.constant 0 : index
    %5 = vector.load %arg4[%c0_5, %c0_6, %c0_7] : memref<2x32x32xbf16, #tpu.memory_space<vmem>>, vector<1x32x32xbf16>
    %6 = vector.shape_cast %5 : vector<1x32x32xbf16> to vector<32x32xbf16>
    %cst = arith.constant dense<0.000000e+00> : vector<64x32xf32>
    %7 = tpu.matmul %4, %6, %cst {dimension_numbers = #tpu.dot_dimension_numbers<[1], [0], [0], [1], [0, 0, 1, 1], [], []>} : vector<64x32xbf16>, vector<32x32xbf16>, vector<64x32xf32> -> vector<64x32xf32>
    %8 = arith.truncf %7 : vector<64x32xf32> to vector<64x32xbf16>
    %9 = vector.extract_strided_slice %8 {offsets = [0, 0], sizes = [8, 32], strides = [1, 1]} : vector<64x32xbf16> to vector<8x32xbf16>
    %c0_8 = arith.constant 0 : index
    %c0_9 = arith.constant 0 : index
    %c0_10 = arith.constant 0 : index
    %c0_11 = arith.constant 0 : index
    %c0_12 = arith.constant 0 : index
    %10 = vector.load %arg5[%c0_8, %c0_9, %c0_10, %c0_11, %c0_12] : memref<1x8x2x8x32xbf16, #tpu.memory_space<vmem>>, vector<1x1x1x8x32xbf16>
    %11 = vector.shape_cast %10 : vector<1x1x1x8x32xbf16> to vector<8x32xbf16>
    %12 = vector.shape_cast %9 : vector<8x32xbf16> to vector<1x1x1x8x32xbf16>
    tpu.vector_store %arg5[%c0_8, %c0_9, %c0_10, %c0_11, %c0_12], %12 {strides = array<i32>} : memref<1x8x2x8x32xbf16, #tpu.memory_space<vmem>>, vector<1x1x1x8x32xbf16>,
    %13 = vector.extract_strided_slice %8 {offsets = [8, 0], sizes = [8, 32], strides = [1, 1]} : vector<64x32xbf16> to vector<8x32xbf16>
    %c0_13 = arith.constant 0 : index
    %c1 = arith.constant 1 : index
    %c0_14 = arith.constant 0 : index
    %c0_15 = arith.constant 0 : index
    %c0_16 = arith.constant 0 : index
    %14 = vector.load %arg5[%c0_13, %c1, %c0_14, %c0_15, %c0_16] : memref<1x8x2x8x32xbf16, #tpu.memory_space<vmem>>, vector<1x1x1x8x32xbf16>
    %15 = vector.shape_cast %14 : vector<1x1x1x8x32xbf16> to vector<8x32xbf16>
    %16 = vector.shape_cast %13 : vector<8x32xbf16> to vector<1x1x1x8x32xbf16>
    tpu.vector_store %arg5[%c0_13, %c1, %c0_14, %c0_15, %c0_16], %16 {strides = array<i32>} : memref<1x8x2x8x32xbf16, #tpu.memory_space<vmem>>, vector<1x1x1x8x32xbf16>,
    %17 = vector.extract_strided_slice %8 {offsets = [16, 0], sizes = [8, 32], strides = [1, 1]} : vector<64x32xbf16> to vector<8x32xbf16>
    %c0_17 = arith.constant 0 : index
    %c2 = arith.constant 2 : index
    %c0_18 = arith.constant 0 : index
    %c0_19 = arith.constant 0 : index
    %c0_20 = arith.constant 0 : index
    %18 = vector.load %arg5[%c0_17, %c2, %c0_18, %c0_19, %c0_20] : memref<1x8x2x8x32xbf16, #tpu.memory_space<vmem>>, vector<1x1x1x8x32xbf16>
    %19 = vector.shape_cast %18 : vector<1x1x1x8x32xbf16> to vector<8x32xbf16>
    %20 = vector.shape_cast %17 : vector<8x32xbf16> to vector<1x1x1x8x32xbf16>
    tpu.vector_store %arg5[%c0_17, %c2, %c0_18, %c0_19, %c0_20], %20 {strides = array<i32>} : memref<1x8x2x8x32xbf16, #tpu.memory_space<vmem>>, vector<1x1x1x8x32xbf16>,
    %21 = vector.extract_strided_slice %8 {offsets = [24, 0], sizes = [8, 32], strides = [1, 1]} : vector<64x32xbf16> to vector<8x32xbf16>
    %c0_21 = arith.constant 0 : index
    %c3 = arith.constant 3 : index
    %c0_22 = arith.constant 0 : index
    %c0_23 = arith.constant 0 : index
    %c0_24 = arith.constant 0 : index
    %22 = vector.load %arg5[%c0_21, %c3, %c0_22, %c0_23, %c0_24] : memref<1x8x2x8x32xbf16, #tpu.memory_space<vmem>>, vector<1x1x1x8x32xbf16>
    %23 = vector.shape_cast %22 : vector<1x1x1x8x32xbf16> to vector<8x32xbf16>
    %24 = vector.shape_cast %21 : vector<8x32xbf16> to vector<1x1x1x8x32xbf16>
    tpu.vector_store %arg5[%c0_21, %c3, %c0_22, %c0_23, %c0_24], %24 {strides = array<i32>} : memref<1x8x2x8x32xbf16, #tpu.memory_space<vmem>>, vector<1x1x1x8x32xbf16>,
    %25 = vector.extract_strided_slice %8 {offsets = [32, 0], sizes = [8, 32], strides = [1, 1]} : vector<64x32xbf16> to vector<8x32xbf16>
    %c0_25 = arith.constant 0 : index
    %c4 = arith.constant 4 : index
    %c0_26 = arith.constant 0 : index
    %c0_27 = arith.constant 0 : index
    %c0_28 = arith.constant 0 : index
    %26 = vector.load %arg5[%c0_25, %c4, %c0_26, %c0_27, %c0_28] : memref<1x8x2x8x32xbf16, #tpu.memory_space<vmem>>, vector<1x1x1x8x32xbf16>
    %27 = vector.shape_cast %26 : vector<1x1x1x8x32xbf16> to vector<8x32xbf16>
    %28 = vector.shape_cast %25 : vector<8x32xbf16> to vector<1x1x1x8x32xbf16>
    tpu.vector_store %arg5[%c0_25, %c4, %c0_26, %c0_27, %c0_28], %28 {strides = array<i32>} : memref<1x8x2x8x32xbf16, #tpu.memory_space<vmem>>, vector<1x1x1x8x32xbf16>,
    %29 = vector.extract_strided_slice %8 {offsets = [40, 0], sizes = [8, 32], strides = [1, 1]} : vector<64x32xbf16> to vector<8x32xbf16>
    %c0_29 = arith.constant 0 : index
    %c5 = arith.constant 5 : index
    %c0_30 = arith.constant 0 : index
    %c0_31 = arith.constant 0 : index
    %c0_32 = arith.constant 0 : index
    %30 = vector.load %arg5[%c0_29, %c5, %c0_30, %c0_31, %c0_32] : memref<1x8x2x8x32xbf16, #tpu.memory_space<vmem>>, vector<1x1x1x8x32xbf16>
    %31 = vector.shape_cast %30 : vector<1x1x1x8x32xbf16> to vector<8x32xbf16>
    %32 = vector.shape_cast %29 : vector<8x32xbf16> to vector<1x1x1x8x32xbf16>
    tpu.vector_store %arg5[%c0_29, %c5, %c0_30, %c0_31, %c0_32], %32 {strides = array<i32>} : memref<1x8x2x8x32xbf16, #tpu.memory_space<vmem>>, vector<1x1x1x8x32xbf16>,
    %33 = vector.extract_strided_slice %8 {offsets = [48, 0], sizes = [8, 32], strides = [1, 1]} : vector<64x32xbf16> to vector<8x32xbf16>
    %c0_33 = arith.constant 0 : index
    %c6 = arith.constant 6 : index
    %c0_34 = arith.constant 0 : index
    %c0_35 = arith.constant 0 : index
    %c0_36 = arith.constant 0 : index
    %34 = vector.load %arg5[%c0_33, %c6, %c0_34, %c0_35, %c0_36] : memref<1x8x2x8x32xbf16, #tpu.memory_space<vmem>>, vector<1x1x1x8x32xbf16>
    %35 = vector.shape_cast %34 : vector<1x1x1x8x32xbf16> to vector<8x32xbf16>
    %36 = vector.shape_cast %33 : vector<8x32xbf16> to vector<1x1x1x8x32xbf16>
    tpu.vector_store %arg5[%c0_33, %c6, %c0_34, %c0_35, %c0_36], %36 {strides = array<i32>} : memref<1x8x2x8x32xbf16, #tpu.memory_space<vmem>>, vector<1x1x1x8x32xbf16>,
    %37 = vector.extract_strided_slice %8 {offsets = [56, 0], sizes = [8, 32], strides = [1, 1]} : vector<64x32xbf16> to vector<8x32xbf16>
    %c0_37 = arith.constant 0 : index
    %c7 = arith.constant 7 : index
    %c0_38 = arith.constant 0 : index
    %c0_39 = arith.constant 0 : index
    %c0_40 = arith.constant 0 : index
    %38 = vector.load %arg5[%c0_37, %c7, %c0_38, %c0_39, %c0_40] : memref<1x8x2x8x32xbf16, #tpu.memory_space<vmem>>, vector<1x1x1x8x32xbf16>
    %39 = vector.shape_cast %38 : vector<1x1x1x8x32xbf16> to vector<8x32xbf16>
    %40 = vector.shape_cast %37 : vector<8x32xbf16> to vector<1x1x1x8x32xbf16>
    tpu.vector_store %arg5[%c0_37, %c7, %c0_38, %c0_39, %c0_40], %40 {strides = array<i32>} : memref<1x8x2x8x32xbf16, #tpu.memory_space<vmem>>, vector<1x1x1x8x32xbf16>,
    %c1_41 = arith.constant 1 : index
    %c0_42 = arith.constant 0 : index
    %c0_43 = arith.constant 0 : index
    %41 = vector.load %arg4[%c1_41, %c0_42, %c0_43] : memref<2x32x32xbf16, #tpu.memory_space<vmem>>, vector<1x32x32xbf16>
    %42 = vector.shape_cast %41 : vector<1x32x32xbf16> to vector<32x32xbf16>
    %cst_44 = arith.constant dense<0.000000e+00> : vector<64x32xf32>
    %43 = tpu.matmul %4, %42, %cst_44 {dimension_numbers = #tpu.dot_dimension_numbers<[1], [0], [0], [1], [0, 0, 1, 1], [], []>} : vector<64x32xbf16>, vector<32x32xbf16>, vector<64x32xf32> -> vector<64x32xf32>
    %44 = arith.truncf %43 : vector<64x32xf32> to vector<64x32xbf16>
    %45 = vector.extract_strided_slice %44 {offsets = [0, 0], sizes = [8, 32], strides = [1, 1]} : vector<64x32xbf16> to vector<8x32xbf16>
    %c0_45 = arith.constant 0 : index
    %c0_46 = arith.constant 0 : index
    %c1_47 = arith.constant 1 : index
    %c0_48 = arith.constant 0 : index
    %c0_49 = arith.constant 0 : index
    %46 = vector.load %arg5[%c0_45, %c0_46, %c1_47, %c0_48, %c0_49] : memref<1x8x2x8x32xbf16, #tpu.memory_space<vmem>>, vector<1x1x1x8x32xbf16>
    %47 = vector.shape_cast %46 : vector<1x1x1x8x32xbf16> to vector<8x32xbf16>
    %48 = vector.shape_cast %45 : vector<8x32xbf16> to vector<1x1x1x8x32xbf16>
    tpu.vector_store %arg5[%c0_45, %c0_46, %c1_47, %c0_48, %c0_49], %48 {strides = array<i32>} : memref<1x8x2x8x32xbf16, #tpu.memory_space<vmem>>, vector<1x1x1x8x32xbf16>,
    %49 = vector.extract_strided_slice %44 {offsets = [8, 0], sizes = [8, 32], strides = [1, 1]} : vector<64x32xbf16> to vector<8x32xbf16>
    %c0_50 = arith.constant 0 : index
    %c1_51 = arith.constant 1 : index
    %c1_52 = arith.constant 1 : index
    %c0_53 = arith.constant 0 : index
    %c0_54 = arith.constant 0 : index
    %50 = vector.load %arg5[%c0_50, %c1_51, %c1_52, %c0_53, %c0_54] : memref<1x8x2x8x32xbf16, #tpu.memory_space<vmem>>, vector<1x1x1x8x32xbf16>
    %51 = vector.shape_cast %50 : vector<1x1x1x8x32xbf16> to vector<8x32xbf16>
    %52 = vector.shape_cast %49 : vector<8x32xbf16> to vector<1x1x1x8x32xbf16>
    tpu.vector_store %arg5[%c0_50, %c1_51, %c1_52, %c0_53, %c0_54], %52 {strides = array<i32>} : memref<1x8x2x8x32xbf16, #tpu.memory_space<vmem>>, vector<1x1x1x8x32xbf16>,
    %53 = vector.extract_strided_slice %44 {offsets = [16, 0], sizes = [8, 32], strides = [1, 1]} : vector<64x32xbf16> to vector<8x32xbf16>
    %c0_55 = arith.constant 0 : index
    %c2_56 = arith.constant 2 : index
    %c1_57 = arith.constant 1 : index
    %c0_58 = arith.constant 0 : index
    %c0_59 = arith.constant 0 : index
    %54 = vector.load %arg5[%c0_55, %c2_56, %c1_57, %c0_58, %c0_59] : memref<1x8x2x8x32xbf16, #tpu.memory_space<vmem>>, vector<1x1x1x8x32xbf16>
    %55 = vector.shape_cast %54 : vector<1x1x1x8x32xbf16> to vector<8x32xbf16>
    %56 = vector.shape_cast %53 : vector<8x32xbf16> to vector<1x1x1x8x32xbf16>
    tpu.vector_store %arg5[%c0_55, %c2_56, %c1_57, %c0_58, %c0_59], %56 {strides = array<i32>} : memref<1x8x2x8x32xbf16, #tpu.memory_space<vmem>>, vector<1x1x1x8x32xbf16>,
    %57 = vector.extract_strided_slice %44 {offsets = [24, 0], sizes = [8, 32], strides = [1, 1]} : vector<64x32xbf16> to vector<8x32xbf16>
    %c0_60 = arith.constant 0 : index
    %c3_61 = arith.constant 3 : index
    %c1_62 = arith.constant 1 : index
    %c0_63 = arith.constant 0 : index
    %c0_64 = arith.constant 0 : index
    %58 = vector.load %arg5[%c0_60, %c3_61, %c1_62, %c0_63, %c0_64] : memref<1x8x2x8x32xbf16, #tpu.memory_space<vmem>>, vector<1x1x1x8x32xbf16>
    %59 = vector.shape_cast %58 : vector<1x1x1x8x32xbf16> to vector<8x32xbf16>
    %60 = vector.shape_cast %57 : vector<8x32xbf16> to vector<1x1x1x8x32xbf16>
    tpu.vector_store %arg5[%c0_60, %c3_61, %c1_62, %c0_63, %c0_64], %60 {strides = array<i32>} : memref<1x8x2x8x32xbf16, #tpu.memory_space<vmem>>, vector<1x1x1x8x32xbf16>,
    %61 = vector.extract_strided_slice %44 {offsets = [32, 0], sizes = [8, 32], strides = [1, 1]} : vector<64x32xbf16> to vector<8x32xbf16>
    %c0_65 = arith.constant 0 : index
    %c4_66 = arith.constant 4 : index
    %c1_67 = arith.constant 1 : index
    %c0_68 = arith.constant 0 : index
    %c0_69 = arith.constant 0 : index
    %62 = vector.load %arg5[%c0_65, %c4_66, %c1_67, %c0_68, %c0_69] : memref<1x8x2x8x32xbf16, #tpu.memory_space<vmem>>, vector<1x1x1x8x32xbf16>
    %63 = vector.shape_cast %62 : vector<1x1x1x8x32xbf16> to vector<8x32xbf16>
    %64 = vector.shape_cast %61 : vector<8x32xbf16> to vector<1x1x1x8x32xbf16>
    tpu.vector_store %arg5[%c0_65, %c4_66, %c1_67, %c0_68, %c0_69], %64 {strides = array<i32>} : memref<1x8x2x8x32xbf16, #tpu.memory_space<vmem>>, vector<1x1x1x8x32xbf16>,
    %65 = vector.extract_strided_slice %44 {offsets = [40, 0], sizes = [8, 32], strides = [1, 1]} : vector<64x32xbf16> to vector<8x32xbf16>
    %c0_70 = arith.constant 0 : index
    %c5_71 = arith.constant 5 : index
    %c1_72 = arith.constant 1 : index
    %c0_73 = arith.constant 0 : index
    %c0_74 = arith.constant 0 : index
    %66 = vector.load %arg5[%c0_70, %c5_71, %c1_72, %c0_73, %c0_74] : memref<1x8x2x8x32xbf16, #tpu.memory_space<vmem>>, vector<1x1x1x8x32xbf16>
    %67 = vector.shape_cast %66 : vector<1x1x1x8x32xbf16> to vector<8x32xbf16>
    %68 = vector.shape_cast %65 : vector<8x32xbf16> to vector<1x1x1x8x32xbf16>
    tpu.vector_store %arg5[%c0_70, %c5_71, %c1_72, %c0_73, %c0_74], %68 {strides = array<i32>} : memref<1x8x2x8x32xbf16, #tpu.memory_space<vmem>>, vector<1x1x1x8x32xbf16>,
    %69 = vector.extract_strided_slice %44 {offsets = [48, 0], sizes = [8, 32], strides = [1, 1]} : vector<64x32xbf16> to vector<8x32xbf16>
    %c0_75 = arith.constant 0 : index
    %c6_76 = arith.constant 6 : index
    %c1_77 = arith.constant 1 : index
    %c0_78 = arith.constant 0 : index
    %c0_79 = arith.constant 0 : index
    %70 = vector.load %arg5[%c0_75, %c6_76, %c1_77, %c0_78, %c0_79] : memref<1x8x2x8x32xbf16, #tpu.memory_space<vmem>>, vector<1x1x1x8x32xbf16>
    %71 = vector.shape_cast %70 : vector<1x1x1x8x32xbf16> to vector<8x32xbf16>
    %72 = vector.shape_cast %69 : vector<8x32xbf16> to vector<1x1x1x8x32xbf16>
    tpu.vector_store %arg5[%c0_75, %c6_76, %c1_77, %c0_78, %c0_79], %72 {strides = array<i32>} : memref<1x8x2x8x32xbf16, #tpu.memory_space<vmem>>, vector<1x1x1x8x32xbf16>,
    %73 = vector.extract_strided_slice %44 {offsets = [56, 0], sizes = [8, 32], strides = [1, 1]} : vector<64x32xbf16> to vector<8x32xbf16>
    %c0_80 = arith.constant 0 : index
    %c7_81 = arith.constant 7 : index
    %c1_82 = arith.constant 1 : index
    %c0_83 = arith.constant 0 : index
    %c0_84 = arith.constant 0 : index
    %74 = vector.load %arg5[%c0_80, %c7_81, %c1_82, %c0_83, %c0_84] : memref<1x8x2x8x32xbf16, #tpu.memory_space<vmem>>, vector<1x1x1x8x32xbf16>
    %75 = vector.shape_cast %74 : vector<1x1x1x8x32xbf16> to vector<8x32xbf16>
    %76 = vector.shape_cast %73 : vector<8x32xbf16> to vector<1x1x1x8x32xbf16>
    tpu.vector_store %arg5[%c0_80, %c7_81, %c1_82, %c0_83, %c0_84], %76 {strides = array<i32>} : memref<1x8x2x8x32xbf16, #tpu.memory_space<vmem>>, vector<1x1x1x8x32xbf16>,
    return
  }
  func.func @transform_0(%arg0: i32, %arg1: i32) -> (i32, i32, i32) {
    %c0_i32 = arith.constant 0 : i32
    %c0_i32_0 = arith.constant 0 : i32
    return %arg0, %arg1, %c0_i32 : i32, i32, i32
  }
  func.func @transform_1(%arg0: i32, %arg1: i32) -> (i32, i32, i32) {
    %c0_i32 = arith.constant 0 : i32
    %c0_i32_0 = arith.constant 0 : i32
    return %arg0, %arg1, %c0_i32 : i32, i32, i32
  }
  func.func @transform_2(%arg0: i32, %arg1: i32) -> (i32, i32, i32) {
    %c0_i32 = arith.constant 0 : i32
    %c0_i32_0 = arith.constant 0 : i32
    %c0_i32_1 = arith.constant 0 : i32
    %c0_i32_2 = arith.constant 0 : i32
    return %c0_i32, %c0_i32_0, %c0_i32_1 : i32, i32, i32
  }
  func.func @transform_3(%arg0: i32, %arg1: i32) -> (i32, i32, i32, i32, i32) {
    %c0_i32 = arith.constant 0 : i32
    %c0_i32_0 = arith.constant 0 : i32
    %c0_i32_1 = arith.constant 0 : i32
    %c0_i32_2 = arith.constant 0 : i32
    return %arg0, %arg1, %c0_i32, %c0_i32_0, %c0_i32_1 : i32, i32, i32, i32, i32
  }
}

module attributes {stable_mosaic.version = 11 : i64} {
  func.func @kernel(%arg0: i32, %arg1: i32, %arg2: i32, %arg3: memref<1x288x48xbf16, #tpu.memory_space<vmem>>, %arg4: memref<3x48x128xbf16, #tpu.memory_space<vmem>>, %arg5: memref<1x256x128xbf16, #tpu.memory_space<vmem>>) attributes {dimension_semantics = [#tpu.dimension_semantics<parallel>, #tpu.dimension_semantics<parallel>, #tpu.dimension_semantics<parallel>], iteration_bounds = array<i64: 2, 1, 1>, scalar_prefetch = 0 : i64, scratch_operands = 0 : i64, tpu.core_type = #tpu.core_type<tc>, window_params = [{transform_indices = @transform_0, window_bounds = array<i64: 1, 288, 48>}, {transform_indices = @transform_1, window_bounds = array<i64: 3, 48, 128>}, {transform_indices = @transform_2, window_bounds = array<i64: 1, 256, 128>}]} {
    %cst = arith.constant 0.000000e+00 : f32
    %0 = vector.broadcast %cst : f32 to vector<256x128xf32>
    %c0 = arith.constant 0 : index
    %c0_0 = arith.constant 0 : index
    %c0_1 = arith.constant 0 : index
    %1 = vector.load %arg3[%c0, %c0_0, %c0_1] : memref<1x288x48xbf16, #tpu.memory_space<vmem>>, vector<1x256x48xbf16>
    %2 = vector.shape_cast %1 : vector<1x256x48xbf16> to vector<256x48xbf16>
    %c0_2 = arith.constant 0 : index
    %c0_3 = arith.constant 0 : index
    %c0_4 = arith.constant 0 : index
    %3 = vector.load %arg4[%c0_2, %c0_3, %c0_4] : memref<3x48x128xbf16, #tpu.memory_space<vmem>>, vector<1x48x128xbf16>
    %4 = vector.shape_cast %3 : vector<1x48x128xbf16> to vector<48x128xbf16>
    %cst_5 = arith.constant dense<0.000000e+00> : vector<256x128xf32>
    %5 = tpu.matmul %2, %4, %cst_5 {dimension_numbers = #tpu.dot_dimension_numbers<[1], [0], [0], [1], [0, 0, 1, 1], [], []>} : vector<256x48xbf16>, vector<48x128xbf16>, vector<256x128xf32> -> vector<256x128xf32>
    %6 = arith.addf %0, %5 : vector<256x128xf32>
    %c0_6 = arith.constant 0 : index
    %c16 = arith.constant 16 : index
    %c0_7 = arith.constant 0 : index
    %7 = vector.load %arg3[%c0_6, %c16, %c0_7] : memref<1x288x48xbf16, #tpu.memory_space<vmem>>, vector<1x256x48xbf16>
    %8 = vector.shape_cast %7 : vector<1x256x48xbf16> to vector<256x48xbf16>
    %c1 = arith.constant 1 : index
    %c0_8 = arith.constant 0 : index
    %c0_9 = arith.constant 0 : index
    %9 = vector.load %arg4[%c1, %c0_8, %c0_9] : memref<3x48x128xbf16, #tpu.memory_space<vmem>>, vector<1x48x128xbf16>
    %10 = vector.shape_cast %9 : vector<1x48x128xbf16> to vector<48x128xbf16>
    %cst_10 = arith.constant dense<0.000000e+00> : vector<256x128xf32>
    %11 = tpu.matmul %8, %10, %cst_10 {dimension_numbers = #tpu.dot_dimension_numbers<[1], [0], [0], [1], [0, 0, 1, 1], [], []>} : vector<256x48xbf16>, vector<48x128xbf16>, vector<256x128xf32> -> vector<256x128xf32>
    %12 = arith.addf %6, %11 : vector<256x128xf32>
    %c0_11 = arith.constant 0 : index
    %c32 = arith.constant 32 : index
    %c0_12 = arith.constant 0 : index
    %13 = vector.load %arg3[%c0_11, %c32, %c0_12] : memref<1x288x48xbf16, #tpu.memory_space<vmem>>, vector<1x256x48xbf16>
    %14 = vector.shape_cast %13 : vector<1x256x48xbf16> to vector<256x48xbf16>
    %c2 = arith.constant 2 : index
    %c0_13 = arith.constant 0 : index
    %c0_14 = arith.constant 0 : index
    %15 = vector.load %arg4[%c2, %c0_13, %c0_14] : memref<3x48x128xbf16, #tpu.memory_space<vmem>>, vector<1x48x128xbf16>
    %16 = vector.shape_cast %15 : vector<1x48x128xbf16> to vector<48x128xbf16>
    %cst_15 = arith.constant dense<0.000000e+00> : vector<256x128xf32>
    %17 = tpu.matmul %14, %16, %cst_15 {dimension_numbers = #tpu.dot_dimension_numbers<[1], [0], [0], [1], [0, 0, 1, 1], [], []>} : vector<256x48xbf16>, vector<48x128xbf16>, vector<256x128xf32> -> vector<256x128xf32>
    %18 = arith.addf %12, %17 : vector<256x128xf32>
    %19 = arith.truncf %18 : vector<256x128xf32> to vector<256x128xbf16>
    %c0_16 = arith.constant 0 : index
    %c0_17 = arith.constant 0 : index
    %c0_18 = arith.constant 0 : index
    %20 = vector.load %arg5[%c0_16, %c0_17, %c0_18] : memref<1x256x128xbf16, #tpu.memory_space<vmem>>, vector<1x256x128xbf16>
    %21 = vector.shape_cast %20 : vector<1x256x128xbf16> to vector<256x128xbf16>
    %22 = vector.shape_cast %19 : vector<256x128xbf16> to vector<1x256x128xbf16>
    tpu.vector_store %arg5[%c0_16, %c0_17, %c0_18], %22 {strides = array<i32>} : memref<1x256x128xbf16, #tpu.memory_space<vmem>>, vector<1x256x128xbf16>,
    return
  }
  func.func @transform_0(%arg0: i32, %arg1: i32, %arg2: i32) -> (i32, i32, i32) {
    %c0_i32 = arith.constant 0 : i32
    %c0_i32_0 = arith.constant 0 : i32
    %c0_i32_1 = arith.constant 0 : i32
    return %arg0, %c0_i32, %c0_i32_0 : i32, i32, i32
  }
  func.func @transform_1(%arg0: i32, %arg1: i32, %arg2: i32) -> (i32, i32, i32) {
    %c0_i32 = arith.constant 0 : i32
    %c0_i32_0 = arith.constant 0 : i32
    %c0_i32_1 = arith.constant 0 : i32
    return %c0_i32, %c0_i32_0, %arg2 : i32, i32, i32
  }
  func.func @transform_2(%arg0: i32, %arg1: i32, %arg2: i32) -> (i32, i32, i32) {
    %c0_i32 = arith.constant 0 : i32
    return %arg0, %arg1, %arg2 : i32, i32, i32
  }
}

</mosaic_0001>

<bundles_post_ra>
// kernel: unetres_forward.36
= control target key start
LH: loop header
LB: loop body
LE: loop exit
PB: predicated region body
PF: predicated region fallthrough
CT: control target
= control target key end

     0   :  { %vm361_vm0 = vcmask 1042432   ;;  %vm264_vm1 = vcmask 441344   ;;  %vm598_vm2 = vcmask 125952   ;;  %s1297_s1 = inlined_call_operand.vmem [shape: bf16[54,16], index: 1, kind: input, shape index: {}]   ;;  %s1298_s0 = inlined_call_operand.vmem [shape: bf16[512,54], index: 0, kind: input, shape index: {}]   ;;  %s1299_s2 = inlined_call_operand.vmem [shape: bf16[512,16], index: 2, kind: output, shape index: {}]  }
   0x1   :  { %v82_v0 = vld [vmem:[%s1297_s1 + $0x18] sm:$0x7]  ;;  %v873_v4 = vld [vmem:[%s1297_s1 + $0x10] sm:$0xff]  ;;  %v872_v5 = vld [vmem:[%s1297_s1 + $0x8] sm:$0xff] }
   0x2   :  { %v256_v1 = vunpack.c.l.b16 %v82_v0  ;;  %v871_v6 = vld [vmem:[%s1297_s1] sm:$0xff]  ;;  %v840_v11 = vld [vmem:[%s1298_s0 + $0x8] sm:$0xff]  ;;  %v841_v15 = vld [vmem:[%s1298_s0 + $0x10] sm:$0xff] }
   0x3   :  { %v839_v7 = vld [vmem:[%s1298_s0] sm:$0xff]  ;;  %v848_v12 = vld [vmem:[%s1298_s0 + $0x48] sm:$0xff]  ;;  %v849_v16 = vld [vmem:[%s1298_s0 + $0x50] sm:$0xff] }
   0x4   :  { %v260_v2 = vpack.c.b16 %v256_v1, %v256_v1  ;;  %v847_v8 = vld [vmem:[%s1298_s0 + $0x40] sm:$0xff]  ;;  %v856_v13 = vld [vmem:[%s1298_s0 + $0x88] sm:$0xff]  ;;  %v857_v17 = vld [vmem:[%s1298_s0 + $0x90] sm:$0xff] }
   0x5   :  { %v855_v9 = vld [vmem:[%s1298_s0 + $0x80] sm:$0xff]  ;;  %v864_v14 = vld [vmem:[%s1298_s0 + $0xc8] sm:$0xff]  ;;  %v865_v18 = vld [vmem:[%s1298_s0 + $0xd0] sm:$0xff] }
   0x6   :  { %v363_v3 = vsel %vm361_vm0, %v260_v2, 0  ;;  %v863_v10 = vld [vmem:[%s1298_s0 + $0xc0] sm:$0xff]  ;;  %v842_v19 = vld [vmem:[%s1298_s0 + $0x18] sm:$0xff]  ;;  %v844_v27 = vld [vmem:[%s1298_s0 + $0x28] sm:$0xff] }
   0x7   :  { %369 = vmatpush.bf16.msra.mxu0 %v363_v3  ;;  %874 = vmatpush.bf16.msra.mxu1 %v363_v3  ;;  %v850_v20 = vld [vmem:[%s1298_s0 + $0x58] sm:$0xff]  ;;  %v843_v23 = vld [vmem:[%s1298_s0 + $0x20] sm:$0xff]  ;;  %v852_v28 = vld [vmem:[%s1298_s0 + $0x68] sm:$0xff] }
   0x8   :  { %875 = vmatpush.bf16.msra.mxu2 %v363_v3  ;;  %876 = vmatpush.bf16.msra.mxu3 %v363_v3  ;;  %v858_v21 = vld [vmem:[%s1298_s0 + $0x98] sm:$0xff]  ;;  %v851_v24 = vld [vmem:[%s1298_s0 + $0x60] sm:$0xff]  ;;  %v860_v29 = vld [vmem:[%s1298_s0 + $0xa8] sm:$0xff] }
   0x9   :  { %v866_v22 = vld [vmem:[%s1298_s0 + $0xd8] sm:$0xff]  ;;  %v859_v25 = vld [vmem:[%s1298_s0 + $0xa0] sm:$0xff]  ;;  %v868_v30 = vld [vmem:[%s1298_s0 + $0xe8] sm:$0xff] }
   0xa   :  { %v867_v26 = vld [vmem:[%s1298_s0 + $0xe0] sm:$0xff]  ;;  %v845_v31 = vld [vmem:[%s1298_s0 + $0x30] sm:$0xff]  ;;  %v846_v35 = vld [vmem:[%s1298_s0 + $0x38] sm:$0xff] }
   0xb   :  { %370 = vmatpush.bf16.msra.mxu0 %v873_v4  ;;  %877 = vmatpush.bf16.msra.mxu1 %v873_v4  ;;  %v853_v32 = vld [vmem:[%s1298_s0 + $0x70] sm:$0xff]  ;;  %v854_v36 = vld [vmem:[%s1298_s0 + $0x78] sm:$0xff] }
   0xc   :  { %878 = vmatpush.bf16.msra.mxu2 %v873_v4  ;;  %879 = vmatpush.bf16.msra.mxu3 %v873_v4  ;;  %v861_v33 = vld [vmem:[%s1298_s0 + $0xb0] sm:$0xff]  ;;  %v862_v37 = vld [vmem:[%s1298_s0 + $0xb8] sm:$0xff] }
   0xd   :  { %v869_v34 = vld [vmem:[%s1298_s0 + $0xf0] sm:$0xff]  ;;  %v870_v38 = vld [vmem:[%s1298_s0 + $0xf8] sm:$0xff] }
   0xf   :  { %371 = vmatpush.bf16.msra.mxu0 %v872_v5  ;;  %880 = vmatpush.bf16.msra.mxu1 %v872_v5 }
  0x10   :  { %881 = vmatpush.bf16.msra.mxu2 %v872_v5  ;;  %882 = vmatpush.bf16.msra.mxu3 %v872_v5 }
  0x13   :  { %372 = vmatpush.bf16.msra.mxu0 %v871_v6  ;;  %883 = vmatpush.bf16.msra.mxu1 %v871_v6 }
  0x14   :  { %884 = vmatpush.bf16.msra.mxu2 %v871_v6  ;;  %885 = vmatpush.bf16.msra.mxu3 %v871_v6 }
  0x16   :  { %807 = vmatmul.msk.bf16.vlgmr.msra.gmra.mxu0 %vm264_vm1, %v839_v7  ;;  %815 = vmatmul.msk.bf16.vlgmr.msra.gmra.mxu1 %vm264_vm1, %v847_v8 }
  0x17   :  { %823 = vmatmul.msk.bf16.vlgmr.msra.gmra.mxu2 %vm264_vm1, %v855_v9  ;;  %831 = vmatmul.msk.bf16.vlgmr.msra.gmra.mxu3 %vm264_vm1, %v863_v10 }
  0x26   :  { %808 = vmatmul.msk.bf16.gmra.mxu0 %vm264_vm1, %v840_v11  ;;  %816 = vmatmul.msk.bf16.gmra.mxu1 %vm264_vm1, %v848_v12 }
  0x27   :  { %824 = vmatmul.msk.bf16.gmra.mxu2 %vm264_vm1, %v856_v13  ;;  %832 = vmatmul.msk.bf16.gmra.mxu3 %vm264_vm1, %v864_v14 }
  0x36   :  { %809 = vmatmul.msk.bf16.gmra.mxu0 %vm264_vm1, %v841_v15  ;;  %817 = vmatmul.msk.bf16.gmra.mxu1 %vm264_vm1, %v849_v16 }
  0x37   :  { %825 = vmatmul.msk.bf16.gmra.mxu2 %vm264_vm1, %v857_v17  ;;  %833 = vmatmul.msk.bf16.gmra.mxu3 %vm264_vm1, %v865_v18 }
  0x46   :  { %810 = vmatmul.msk.bf16.gmra.mxu0 %vm264_vm1, %v842_v19  ;;  %818 = vmatmul.msk.bf16.gmra.mxu1 %vm264_vm1, %v850_v20 }
  0x47   :  { %826 = vmatmul.msk.bf16.gmra.mxu2 %vm264_vm1, %v858_v21  ;;  %834 = vmatmul.msk.bf16.gmra.mxu3 %vm264_vm1, %v866_v22 }
  0x56   :  { %811 = vmatmul.msk.bf16.gmra.mxu0 %vm264_vm1, %v843_v23  ;;  %819 = vmatmul.msk.bf16.gmra.mxu1 %vm264_vm1, %v851_v24 }
  0x57   :  { %827 = vmatmul.msk.bf16.gmra.mxu2 %vm264_vm1, %v859_v25  ;;  %835 = vmatmul.msk.bf16.gmra.mxu3 %vm264_vm1, %v867_v26 }
  0x66   :  { %812 = vmatmul.msk.bf16.gmra.mxu0 %vm264_vm1, %v844_v27  ;;  %820 = vmatmul.msk.bf16.gmra.mxu1 %vm264_vm1, %v852_v28 }
  0x67   :  { %828 = vmatmul.msk.bf16.gmra.mxu2 %vm264_vm1, %v860_v29  ;;  %836 = vmatmul.msk.bf16.gmra.mxu3 %vm264_vm1, %v868_v30 }
  0x76   :  { %813 = vmatmul.msk.bf16.gmra.mxu0 %vm264_vm1, %v845_v31  ;;  %821 = vmatmul.msk.bf16.gmra.mxu1 %vm264_vm1, %v853_v32 }
  0x77   :  { %829 = vmatmul.msk.bf16.gmra.mxu2 %vm264_vm1, %v861_v33  ;;  %837 = vmatmul.msk.bf16.gmra.mxu3 %vm264_vm1, %v869_v34 }
  0x86   :  { %814 = vmatmul.msk.bf16.gmra.mxu0 %vm264_vm1, %v846_v35  ;;  %822 = vmatmul.msk.bf16.gmra.mxu1 %vm264_vm1, %v854_v36 }
  0x87   :  { %830 = vmatmul.msk.bf16.gmra.mxu2 %vm264_vm1, %v862_v37  ;;  %838 = vmatmul.msk.bf16.gmra.mxu3 %vm264_vm1, %v870_v38 }
  0x93   :  { %v374_v39 = vpop.f32.mrf.mxu0  ;;  %v414_v40 = vpop.f32.mrf.mxu1 }
  0x94   :  { %v534_v41 = vpack.c.bf16 %v374_v39, %v374_v39  ;;  %v550_v42 = vpack.c.bf16 %v414_v40, %v414_v40 }
  0x96   :  { %599 = vst.msk [vmem:[%s1299_s2] sm:$0xf] %vm598_vm2, %v534_v41 }
  0x97   :  { %615 = vst.msk [vmem:[%s1299_s2 + $0x40] sm:$0xf] %vm598_vm2, %v550_v42 }
  0x9a   :  { %v454_v43 = vpop.f32.mrf.mxu2  ;;  %v494_v44 = vpop.f32.mrf.mxu3 }
  0x9b   :  { %v566_v45 = vpack.c.bf16 %v454_v43, %v454_v43  ;;  %v582_v46 = vpack.c.bf16 %v494_v44, %v494_v44  ;;  %v376_v47 = vpop.f32.mrf.mxu0  ;;  %v416_v48 = vpop.f32.mrf.mxu1 }
  0x9c   :  { %v535_v49 = vpack.c.bf16 %v376_v47, %v376_v47  ;;  %v551_v50 = vpack.c.bf16 %v416_v48, %v416_v48 }
  0x9d   :  { %631 = vst.msk [vmem:[%s1299_s2 + $0x80] sm:$0xf] %vm598_vm2, %v566_v45 }
  0x9e   :  { %647 = vst.msk [vmem:[%s1299_s2 + $0xc0] sm:$0xf] %vm598_vm2, %v582_v46 }
  0x9f   :  { %600 = vst.msk [vmem:[%s1299_s2 + $0x4] sm:$0xf] %vm598_vm2, %v535_v49 }
  0xa0   :  { %616 = vst.msk [vmem:[%s1299_s2 + $0x44] sm:$0xf] %vm598_vm2, %v551_v50 }
  0xa2   :  { %v456_v51 = vpop.f32.mrf.mxu2  ;;  %v496_v52 = vpop.f32.mrf.mxu3 }
  0xa3   :  { %v567_v53 = vpack.c.bf16 %v456_v51, %v456_v51  ;;  %v583_v54 = vpack.c.bf16 %v496_v52, %v496_v52  ;;  %v379_v55 = vpop.f32.mrf.mxu0  ;;  %v419_v56 = vpop.f32.mrf.mxu1 }
  0xa4   :  { %v536_v57 = vpack.c.bf16 %v379_v55, %v379_v55  ;;  %v552_v58 = vpack.c.bf16 %v419_v56, %v419_v56 }
  0xa5   :  { %632 = vst.msk [vmem:[%s1299_s2 + $0x84] sm:$0xf] %vm598_vm2, %v567_v53 }
  0xa6   :  { %648 = vst.msk [vmem:[%s1299_s2 + $0xc4] sm:$0xf] %vm598_vm2, %v583_v54 }
  0xa7   :  { %601 = vst.msk [vmem:[%s1299_s2 + $0x8] sm:$0xf] %vm598_vm2, %v536_v57 }
  0xa8   :  { %617 = vst.msk [vmem:[%s1299_s2 + $0x48] sm:$0xf] %vm598_vm2, %v552_v58 }
  0xaa   :  { %v459_v59 = vpop.f32.mrf.mxu2  ;;  %v499_v60 = vpop.f32.mrf.mxu3 }
  0xab   :  { %v568_v61 = vpack.c.bf16 %v459_v59, %v459_v59  ;;  %v584_v62 = vpack.c.bf16 %v499_v60, %v499_v60  ;;  %v381_v63 = vpop.f32.mrf.mxu0  ;;  %v421_v0 = vpop.f32.mrf.mxu1 }
  0xac   :  { %v537_v1 = vpack.c.bf16 %v381_v63, %v381_v63  ;;  %v553_v2 = vpack.c.bf16 %v421_v0, %v421_v0 }
  0xad   :  { %633 = vst.msk [vmem:[%s1299_s2 + $0x88] sm:$0xf] %vm598_vm2, %v568_v61 }
  0xae   :  { %649 = vst.msk [vmem:[%s1299_s2 + $0xc8] sm:$0xf] %vm598_vm2, %v584_v62 }
  0xaf   :  { %602 = vst.msk [vmem:[%s1299_s2 + $0xc] sm:$0xf] %vm598_vm2, %v537_v1 }
  0xb0   :  { %618 = vst.msk [vmem:[%s1299_s2 + $0x4c] sm:$0xf] %vm598_vm2, %v553_v2 }
  0xb2   :  { %v461_v3 = vpop.f32.mrf.mxu2  ;;  %v501_v4 = vpop.f32.mrf.mxu3 }
  0xb3   :  { %v569_v5 = vpack.c.bf16 %v461_v3, %v461_v3  ;;  %v585_v6 = vpack.c.bf16 %v501_v4, %v501_v4  ;;  %v384_v7 = vpop.f32.mrf.mxu0  ;;  %v424_v8 = vpop.f32.mrf.mxu1 }
  0xb4   :  { %v538_v9 = vpack.c.bf16 %v384_v7, %v384_v7  ;;  %v554_v10 = vpack.c.bf16 %v424_v8, %v424_v8 }
  0xb5   :  { %634 = vst.msk [vmem:[%s1299_s2 + $0x8c] sm:$0xf] %vm598_vm2, %v569_v5 }
  0xb6   :  { %650 = vst.msk [vmem:[%s1299_s2 + $0xcc] sm:$0xf] %vm598_vm2, %v585_v6 }
  0xb7   :  { %603 = vst.msk [vmem:[%s1299_s2 + $0x10] sm:$0xf] %vm598_vm2, %v538_v9 }
  0xb8   :  { %619 = vst.msk [vmem:[%s1299_s2 + $0x50] sm:$0xf] %vm598_vm2, %v554_v10 }
  0xba   :  { %v464_v11 = vpop.f32.mrf.mxu2  ;;  %v504_v12 = vpop.f32.mrf.mxu3 }
  0xbb   :  { %v570_v13 = vpack.c.bf16 %v464_v11, %v464_v11  ;;  %v586_v14 = vpack.c.bf16 %v504_v12, %v504_v12  ;;  %v386_v15 = vpop.f32.mrf.mxu0  ;;  %v426_v16 = vpop.f32.mrf.mxu1 }
  0xbc   :  { %v539_v17 = vpack.c.bf16 %v386_v15, %v386_v15  ;;  %v555_v18 = vpack.c.bf16 %v426_v16, %v426_v16 }
  0xbd   :  { %635 = vst.msk [vmem:[%s1299_s2 + $0x90] sm:$0xf] %vm598_vm2, %v570_v13 }
  0xbe   :  { %651 = vst.msk [vmem:[%s1299_s2 + $0xd0] sm:$0xf] %vm598_vm2, %v586_v14 }
  0xbf   :  { %604 = vst.msk [vmem:[%s1299_s2 + $0x14] sm:$0xf] %vm598_vm2, %v539_v17 }
  0xc0   :  { %620 = vst.msk [vmem:[%s1299_s2 + $0x54] sm:$0xf] %vm598_vm2, %v555_v18 }
  0xc2   :  { %v466_v19 = vpop.f32.mrf.mxu2  ;;  %v506_v20 = vpop.f32.mrf.mxu3 }
  0xc3   :  { %v571_v21 = vpack.c.bf16 %v466_v19, %v466_v19  ;;  %v587_v22 = vpack.c.bf16 %v506_v20, %v506_v20  ;;  %v389_v23 = vpop.f32.mrf.mxu0  ;;  %v429_v24 = vpop.f32.mrf.mxu1 }
  0xc4   :  { %v540_v25 = vpack.c.bf16 %v389_v23, %v389_v23  ;;  %v556_v26 = vpack.c.bf16 %v429_v24, %v429_v24 }
  0xc5   :  { %636 = vst.msk [vmem:[%s1299_s2 + $0x94] sm:$0xf] %vm598_vm2, %v571_v21 }
  0xc6   :  { %652 = vst.msk [vmem:[%s1299_s2 + $0xd4] sm:$0xf] %vm598_vm2, %v587_v22 }
  0xc7   :  { %605 = vst.msk [vmem:[%s1299_s2 + $0x18] sm:$0xf] %vm598_vm2, %v540_v25 }
  0xc8   :  { %621 = vst.msk [vmem:[%s1299_s2 + $0x58] sm:$0xf] %vm598_vm2, %v556_v26 }
  0xca   :  { %v469_v27 = vpop.f32.mrf.mxu2  ;;  %v509_v28 = vpop.f32.mrf.mxu3 }
  0xcb   :  { %v572_v29 = vpack.c.bf16 %v469_v27, %v469_v27  ;;  %v588_v30 = vpack.c.bf16 %v509_v28, %v509_v28  ;;  %v391_v31 = vpop.f32.mrf.mxu0  ;;  %v431_v32 = vpop.f32.mrf.mxu1 }
  0xcc   :  { %v541_v33 = vpack.c.bf16 %v391_v31, %v391_v31  ;;  %v557_v34 = vpack.c.bf16 %v431_v32, %v431_v32 }
  0xcd   :  { %637 = vst.msk [vmem:[%s1299_s2 + $0x98] sm:$0xf] %vm598_vm2, %v572_v29 }
  0xce   :  { %653 = vst.msk [vmem:[%s1299_s2 + $0xd8] sm:$0xf] %vm598_vm2, %v588_v30 }
  0xcf   :  { %606 = vst.msk [vmem:[%s1299_s2 + $0x1c] sm:$0xf] %vm598_vm2, %v541_v33 }
  0xd0   :  { %622 = vst.msk [vmem:[%s1299_s2 + $0x5c] sm:$0xf] %vm598_vm2, %v557_v34 }
  0xd2   :  { %v471_v35 = vpop.f32.mrf.mxu2  ;;  %v511_v36 = vpop.f32.mrf.mxu3 }
  0xd3   :  { %v573_v37 = vpack.c.bf16 %v471_v35, %v471_v35  ;;  %v589_v38 = vpack.c.bf16 %v511_v36, %v511_v36  ;;  %v394_v39 = vpop.f32.mrf.mxu0  ;;  %v434_v40 = vpop.f32.mrf.mxu1 }
  0xd4   :  { %v542_v41 = vpack.c.bf16 %v394_v39, %v394_v39  ;;  %v558_v42 = vpack.c.bf16 %v434_v40, %v434_v40 }
  0xd5   :  { %638 = vst.msk [vmem:[%s1299_s2 + $0x9c] sm:$0xf] %vm598_vm2, %v573_v37 }
  0xd6   :  { %654 = vst.msk [vmem:[%s1299_s2 + $0xdc] sm:$0xf] %vm598_vm2, %v589_v38 }
  0xd7   :  { %607 = vst.msk [vmem:[%s1299_s2 + $0x20] sm:$0xf] %vm598_vm2, %v542_v41 }
  0xd8   :  { %623 = vst.msk [vmem:[%s1299_s2 + $0x60] sm:$0xf] %vm598_vm2, %v558_v42 }
  0xda   :  { %v474_v43 = vpop.f32.mrf.mxu2  ;;  %v514_v44 = vpop.f32.mrf.mxu3 }
  0xdb   :  { %v574_v45 = vpack.c.bf16 %v474_v43, %v474_v43  ;;  %v590_v46 = vpack.c.bf16 %v514_v44, %v514_v44  ;;  %v396_v47 = vpop.f32.mrf.mxu0  ;;  %v436_v48 = vpop.f32.mrf.mxu1 }
  0xdc   :  { %v543_v49 = vpack.c.bf16 %v396_v47, %v396_v47  ;;  %v559_v50 = vpack.c.bf16 %v436_v48, %v436_v48 }
  0xdd   :  { %639 = vst.msk [vmem:[%s1299_s2 + $0xa0] sm:$0xf] %vm598_vm2, %v574_v45 }
  0xde   :  { %655 = vst.msk [vmem:[%s1299_s2 + $0xe0] sm:$0xf] %vm598_vm2, %v590_v46 }
  0xdf   :  { %608 = vst.msk [vmem:[%s1299_s2 + $0x24] sm:$0xf] %vm598_vm2, %v543_v49 }
  0xe0   :  { %624 = vst.msk [vmem:[%s1299_s2 + $0x64] sm:$0xf] %vm598_vm2, %v559_v50 }
  0xe2   :  { %v476_v51 = vpop.f32.mrf.mxu2  ;;  %v516_v52 = vpop.f32.mrf.mxu3 }
  0xe3   :  { %v575_v53 = vpack.c.bf16 %v476_v51, %v476_v51  ;;  %v591_v54 = vpack.c.bf16 %v516_v52, %v516_v52  ;;  %v399_v55 = vpop.f32.mrf.mxu0  ;;  %v439_v56 = vpop.f32.mrf.mxu1 }
  0xe4   :  { %v544_v57 = vpack.c.bf16 %v399_v55, %v399_v55  ;;  %v560_v58 = vpack.c.bf16 %v439_v56, %v439_v56 }
  0xe5   :  { %640 = vst.msk [vmem:[%s1299_s2 + $0xa4] sm:$0xf] %vm598_vm2, %v575_v53 }
  0xe6   :  { %656 = vst.msk [vmem:[%s1299_s2 + $0xe4] sm:$0xf] %vm598_vm2, %v591_v54 }
  0xe7   :  { %609 = vst.msk [vmem:[%s1299_s2 + $0x28] sm:$0xf] %vm598_vm2, %v544_v57 }
  0xe8   :  { %625 = vst.msk [vmem:[%s1299_s2 + $0x68] sm:$0xf] %vm598_vm2, %v560_v58 }
  0xea   :  { %v479_v59 = vpop.f32.mrf.mxu2  ;;  %v519_v60 = vpop.f32.mrf.mxu3 }
  0xeb   :  { %v576_v61 = vpack.c.bf16 %v479_v59, %v479_v59  ;;  %v592_v62 = vpack.c.bf16 %v519_v60, %v519_v60  ;;  %v401_v63 = vpop.f32.mrf.mxu0  ;;  %v441_v0 = vpop.f32.mrf.mxu1 }
  0xec   :  { %v545_v1 = vpack.c.bf16 %v401_v63, %v401_v63  ;;  %v561_v2 = vpack.c.bf16 %v441_v0, %v441_v0 }
  0xed   :  { %641 = vst.msk [vmem:[%s1299_s2 + $0xa8] sm:$0xf] %vm598_vm2, %v576_v61 }
  0xee   :  { %657 = vst.msk [vmem:[%s1299_s2 + $0xe8] sm:$0xf] %vm598_vm2, %v592_v62 }
  0xef   :  { %610 = vst.msk [vmem:[%s1299_s2 + $0x2c] sm:$0xf] %vm598_vm2, %v545_v1 }
  0xf0   :  { %626 = vst.msk [vmem:[%s1299_s2 + $0x6c] sm:$0xf] %vm598_vm2, %v561_v2 }
  0xf2   :  { %v481_v3 = vpop.f32.mrf.mxu2  ;;  %v521_v4 = vpop.f32.mrf.mxu3 }
  0xf3   :  { %v577_v5 = vpack.c.bf16 %v481_v3, %v481_v3  ;;  %v593_v6 = vpack.c.bf16 %v521_v4, %v521_v4  ;;  %v404_v7 = vpop.f32.mrf.mxu0  ;;  %v444_v8 = vpop.f32.mrf.mxu1 }
  0xf4   :  { %v546_v9 = vpack.c.bf16 %v404_v7, %v404_v7  ;;  %v562_v10 = vpack.c.bf16 %v444_v8, %v444_v8 }
  0xf5   :  { %642 = vst.msk [vmem:[%s1299_s2 + $0xac] sm:$0xf] %vm598_vm2, %v577_v5 }
  0xf6   :  { %658 = vst.msk [vmem:[%s1299_s2 + $0xec] sm:$0xf] %vm598_vm2, %v593_v6 }
  0xf7   :  { %611 = vst.msk [vmem:[%s1299_s2 + $0x30] sm:$0xf] %vm598_vm2, %v546_v9 }
  0xf8   :  { %627 = vst.msk [vmem:[%s1299_s2 + $0x70] sm:$0xf] %vm598_vm2, %v562_v10 }
  0xfa   :  { %v484_v11 = vpop.f32.mrf.mxu2  ;;  %v524_v12 = vpop.f32.mrf.mxu3 }
  0xfb   :  { %v578_v13 = vpack.c.bf16 %v484_v11, %v484_v11  ;;  %v594_v14 = vpack.c.bf16 %v524_v12, %v524_v12  ;;  %v406_v15 = vpop.f32.mrf.mxu0  ;;  %v446_v16 = vpop.f32.mrf.mxu1 }
  0xfc   :  { %v547_v17 = vpack.c.bf16 %v406_v15, %v406_v15  ;;  %v563_v18 = vpack.c.bf16 %v446_v16, %v446_v16 }
  0xfd   :  { %643 = vst.msk [vmem:[%s1299_s2 + $0xb0] sm:$0xf] %vm598_vm2, %v578_v13 }
  0xfe   :  { %659 = vst.msk [vmem:[%s1299_s2 + $0xf0] sm:$0xf] %vm598_vm2, %v594_v14 }
  0xff   :  { %612 = vst.msk [vmem:[%s1299_s2 + $0x34] sm:$0xf] %vm598_vm2, %v547_v17 }
 0x100   :  { %628 = vst.msk [vmem:[%s1299_s2 + $0x74] sm:$0xf] %vm598_vm2, %v563_v18 }
 0x102   :  { %v486_v19 = vpop.f32.mrf.mxu2  ;;  %v526_v20 = vpop.f32.mrf.mxu3 }
 0x103   :  { %v579_v21 = vpack.c.bf16 %v486_v19, %v486_v19  ;;  %v595_v22 = vpack.c.bf16 %v526_v20, %v526_v20  ;;  %v409_v23 = vpop.f32.mrf.mxu0  ;;  %v449_v24 = vpop.f32.mrf.mxu1 }
 0x104   :  { %v548_v25 = vpack.c.bf16 %v409_v23, %v409_v23  ;;  %v564_v26 = vpack.c.bf16 %v449_v24, %v449_v24 }
 0x105   :  { %644 = vst.msk [vmem:[%s1299_s2 + $0xb4] sm:$0xf] %vm598_vm2, %v579_v21 }
 0x106   :  { %660 = vst.msk [vmem:[%s1299_s2 + $0xf4] sm:$0xf] %vm598_vm2, %v595_v22 }
 0x107   :  { %613 = vst.msk [vmem:[%s1299_s2 + $0x38] sm:$0xf] %vm598_vm2, %v548_v25 }
 0x108   :  { %629 = vst.msk [vmem:[%s1299_s2 + $0x78] sm:$0xf] %vm598_vm2, %v564_v26 }
 0x10a   :  { %v489_v27 = vpop.f32.mrf.mxu2  ;;  %v529_v28 = vpop.f32.mrf.mxu3 }
 0x10b   :  { %v580_v29 = vpack.c.bf16 %v489_v27, %v489_v27  ;;  %v596_v30 = vpack.c.bf16 %v529_v28, %v529_v28  ;;  %v411_v31 = vpop.f32.mrf.mxu0  ;;  %v451_v32 = vpop.f32.mrf.mxu1 }
 0x10c   :  { %v549_v33 = vpack.c.bf16 %v411_v31, %v411_v31  ;;  %v565_v34 = vpack.c.bf16 %v451_v32, %v451_v32 }
 0x10d   :  { %645 = vst.msk [vmem:[%s1299_s2 + $0xb8] sm:$0xf] %vm598_vm2, %v580_v29 }
 0x10e   :  { %661 = vst.msk [vmem:[%s1299_s2 + $0xf8] sm:$0xf] %vm598_vm2, %v596_v30 }
 0x10f   :  { %614 = vst.msk [vmem:[%s1299_s2 + $0x3c] sm:$0xf] %vm598_vm2, %v549_v33 }
 0x110   :  { %630 = vst.msk [vmem:[%s1299_s2 + $0x7c] sm:$0xf] %vm598_vm2, %v565_v34 }
 0x112   :  { %v491_v35 = vpop.f32.mrf.mxu2  ;;  %v531_v36 = vpop.f32.mrf.mxu3 }
 0x113   :  { %v581_v37 = vpack.c.bf16 %v491_v35, %v491_v35  ;;  %v597_v38 = vpack.c.bf16 %v531_v36, %v531_v36 }
 0x115   :  { %646 = vst.msk [vmem:[%s1299_s2 + $0xbc] sm:$0xf] %vm598_vm2, %v581_v37 }
 0x116   :  { %662 = vst.msk [vmem:[%s1299_s2 + $0xfc] sm:$0xf] %vm598_vm2, %v597_v38 }

// kernel: unetres_forward.38
= control target key start
LH: loop header
LB: loop body
LE: loop exit
PB: predicated region body
PF: predicated region fallthrough
CT: control target
= control target key end

     0   :  { %s1711_s12 = smov 0   ;;  %s1713_s13 = smov 0   ;;  %s1997_s0 = inlined_call_operand.vmem [shape: bf16[2,288,48], index: 0, kind: input, shape index: {}]   ;;  %s1998_s1 = inlined_call_operand.vmem [shape: bf16[3,48,16], index: 1, kind: input, shape index: {}]   ;;  %s1999_s2 = inlined_call_operand.vmem [shape: bf16[2,256,16], index: 2, kind: input, shape index: {}]   ;;  %s2000_s3 = inlined_call_operand.vmem [shape: bf16[2,256,16], index: 3, kind: output, shape index: {}]  }
   0x1   :  { %s1715_s14 = smov 0  }
   0x2 LB: > { %s32_s15 = sadd.s32 1, %s1685_s13  ;;  %p1274_p0 = scmp.ge.s32.totalorder %s1689_s14, 1  ;;  %s1689_s14 = sphi %s1715_s14, %s13_s14   ;;  %s1685_s13 = sphi %s1713_s13, %s2002_s13   ;;  %s1681_s12 = sphi %s1711_s12, %s2001_s12  }
   0x3   : > { %p34_p1 = scmp.ge.s32.totalorder %s32_s15, 2  ;;  %p191_p2 = scmp.lt.s32.totalorder %s1689_s14, 3 }
   0x5   : > { %s2004_s15 = smov (%p34_p1, %s32_s15), 0  ;;  %p192_p3 = pnand %p1274_p0, %p191_p2 }
   0x6   : > { %p238_p4 = scmp.lt.s32.totalorder (!%p192_p3), %s1681_s12, 1 }
   0x7   : > { %195 = sbr.rel (%p192_p3) target bundleno = 349 (0x15d), region = 32 }
   0xc   : > { %v1534_v0 = vld [vmem:[%s1998_s1 + $0x28] sm:$0xff]  ;;  %v1530_v1 = vld [vmem:[%s1998_s1 + $0x10] sm:$0xff]  ;;  %v1553_v2 = vld [vmem:[%s1998_s1 + $0x40] sm:$0xff]  ;;  %s2006_s12 = smov (!%p238_p4, %s1681_s12), 1  ;;  %vm419_vm0 = vcmask 392192   ;;  %vm1106_vm1 = vcmask 125952  }
   0xd   : > { %473 = vmatpush.bf16.msra.mxu0 %v1534_v0  ;;  %1633 = vmatpush.bf16.msra.mxu3 %v1534_v0  ;;  %v1533_v3 = vld [vmem:[%s1998_s1 + $0x20] sm:$0xff]  ;;  %v1529_v4 = vld [vmem:[%s1998_s1 + $0x8] sm:$0xff]  ;;  %v1552_v5 = vld [vmem:[%s1998_s1 + $0x38] sm:$0xff]  ;;  %s1642_s28 = smul.u32 144, %s2006_s12  ;;  %s1510_s11 = sshll.u32 %s2006_s12, 7 }
   0xe   : > { %588 = vmatpush.bf16.msra.mxu1 %v1530_v1  ;;  %862 = vmatpush.bf16.msra.mxu2 %v1553_v2  ;;  %v1532_v6 = vld [vmem:[%s1998_s1 + $0x18] sm:$0xff]  ;;  %v1528_v7 = vld [vmem:[%s1998_s1] sm:$0xff]  ;;  %v1551_v8 = vld [vmem:[%s1998_s1 + $0x30] sm:$0xff]  ;;  %s1828_s18 = scalar_lea.vmem %s1999_s2, %s1510_s11  ;;  %s1840_s20 = scalar_lea.vmem %s2000_s3, %s1510_s11 }
   0xf   : > { %s1756_s6 = scalar_lea.vmem %s1997_s0, %s1642_s28  ;;  %v1555_v36 = vld [vmem:[%s1828_s18] sm:$0xff]   ;;  %v1618_v57 = vld [vmem:[%s1828_s18 + $0x8] sm:$0xff]  }
  0x10   : > { %v1513_v9 = vld [vmem:[%s1756_s6 + $0x8] sm:$0xff]  ;;  %v1512_v11 = vld [vmem:[%s1756_s6] sm:$0xff]  ;;  %v1535_v12 = vld [vmem:[%s1756_s6 + $0x10] sm:$0xff]  ;;  %v1556_v39 = vunpack.c.l.bf16 %v1555_v36  ;;  %v1557_v48 = vunpack.c.h.bf16 %v1555_v36  ;;  %v1560_v61 = vunpack.c.l.bf16 %v1618_v57 }
  0x11   : > { %474 = vmatpush.bf16.msra.mxu0 %v1533_v3  ;;  %1634 = vmatpush.bf16.msra.mxu3 %v1533_v3  ;;  %v1525_v10 = vld [vmem:[%s1756_s6 + $0x68] sm:$0xff]  ;;  %v1514_v13 = vld [vmem:[%s1756_s6 + $0x10] sm:$0xff]  ;;  %v1536_v15 = vld [vmem:[%s1756_s6 + $0x18] sm:$0xff] }
  0x12   : > { %589 = vmatpush.bf16.msra.mxu1 %v1529_v4  ;;  %863 = vmatpush.bf16.msra.mxu2 %v1552_v5  ;;  %v1526_v14 = vld [vmem:[%s1756_s6 + $0x70] sm:$0xff]  ;;  %v1515_v16 = vld [vmem:[%s1756_s6 + $0x18] sm:$0xff]  ;;  %v1537_v18 = vld [vmem:[%s1756_s6 + $0x20] sm:$0xff] }
  0x13   : > { %v1527_v17 = vld [vmem:[%s1756_s6 + $0x78] sm:$0xff]  ;;  %v1516_v19 = vld [vmem:[%s1756_s6 + $0x20] sm:$0xff]  ;;  %v1538_v21 = vld [vmem:[%s1756_s6 + $0x28] sm:$0xff] }
  0x14   : > { %v1531_v20 = vld [vmem:[%s1756_s6 + $0x80] sm:$0xff]  ;;  %v1517_v22 = vld [vmem:[%s1756_s6 + $0x28] sm:$0xff]  ;;  %v1539_v24 = vld [vmem:[%s1756_s6 + $0x30] sm:$0xff] }
  0x15   : > { %475 = vmatpush.bf16.msra.mxu0 %v1532_v6  ;;  %1635 = vmatpush.bf16.msra.mxu3 %v1532_v6  ;;  %v1795_v23 = vld [vmem:[%s1756_s6 + $0x60] sm:$0xff]  ;;  %v1518_v25 = vld [vmem:[%s1756_s6 + $0x30] sm:$0xff]  ;;  %v1540_v26 = vld [vmem:[%s1756_s6 + $0x38] sm:$0xff]  ;;  %v1561_v6 = vunpack.c.h.bf16 %v1618_v57 }
  0x16   : > { %590 = vmatpush.bf16.msra.mxu1 %v1528_v7  ;;  %864 = vmatpush.bf16.msra.mxu2 %v1551_v8  ;;  %v1519_v27 = vld [vmem:[%s1756_s6 + $0x38] sm:$0xff]  ;;  %v1541_v28 = vld [vmem:[%s1756_s6 + $0x40] sm:$0xff]  ;;  %v1542_v30 = vld [vmem:[%s1756_s6 + $0x48] sm:$0xff] }
  0x17   : > { %v1520_v29 = vld [vmem:[%s1756_s6 + $0x40] sm:$0xff]  ;;  %v1521_v31 = vld [vmem:[%s1756_s6 + $0x48] sm:$0xff]  ;;  %v1547_v32 = vld [vmem:[%s1756_s6 + $0x70] sm:$0xff] }
  0x18   : > { %1362 = vmatmul.msk.bf16.vlgmr.msra.gmra.mxu0 %vm419_vm0, %v1513_v9  ;;  %1374 = vmatmul.msk.bf16.vlgmr.msra.gmra.mxu3 %vm419_vm0, %v1525_v10  ;;  %v1543_v34 = vld [vmem:[%s1756_s6 + $0x50] sm:$0xff]  ;;  %v1548_v51 = vld [vmem:[%s1756_s6 + $0x78] sm:$0xff]  ;;  %v1621_v57 = vld [vmem:[%s1828_s18 + $0x20] sm:$0xff]  }
  0x19   : > { %1636 = vmatpush.bf16.msrb.mxu3 %v1530_v1  ;;  %1394 = vmatmul.msk.bf16.vlgmr.msra.gmra.mxu1 %vm419_vm0, %v1512_v11  ;;  %v1522_v50 = vld [vmem:[%s1756_s6 + $0x50] sm:$0xff]  ;;  %v1544_v54 = vld [vmem:[%s1756_s6 + $0x58] sm:$0xff] }
  0x1a   : > { %1492 = vmatmul.msk.bf16.vlgmr.msra.gmra.mxu2 %vm419_vm0, %v1535_v12  ;;  %v1545_v12 = vld [vmem:[%s1756_s6 + $0x60] sm:$0xff] }
  0x1d   : > { %1637 = vmatpush.bf16.msrb.mxu3 %v1529_v4 }
  0x21   : > { %1638 = vmatpush.bf16.msrb.mxu3 %v1528_v7 }
  0x25   : > { %1639 = vmatpush.bf16.msra.mxu3 %v1553_v2 }
  0x28   : > { %1363 = vmatmul.msk.bf16.gmra.mxu0 %vm419_vm0, %v1514_v13  ;;  %1375 = vmatmul.msk.bf16.gmra.mxu3 %vm419_vm0, %v1526_v14 }
  0x29   : > { %1640 = vmatpush.bf16.msra.mxu3 %v1552_v5  ;;  %1395 = vmatmul.msk.bf16.gmra.mxu1 %vm419_vm0, %v1513_v9  ;;  %v1549_v9 = vld [vmem:[%s1756_s6 + $0x80] sm:$0xff] }
  0x2a   : > { %1493 = vmatmul.msk.bf16.gmra.mxu2 %vm419_vm0, %v1536_v15  ;;  %v1619_v15 = vld [vmem:[%s1828_s18 + $0x10] sm:$0xff]  }
  0x2d   : > { %1641 = vmatpush.bf16.msra.mxu3 %v1551_v8  ;;  %v1523_v8 = vld [vmem:[%s1756_s6 + $0x58] sm:$0xff] }
  0x38   : > { %1364 = vmatmul.msk.bf16.gmra.mxu0 %vm419_vm0, %v1515_v16  ;;  %1376 = vmatmul.msk.bf16.gmra.mxu3 %vm419_vm0, %v1527_v17 }
  0x39   : > { %1396 = vmatmul.msk.bf16.gmra.mxu1 %vm419_vm0, %v1514_v13 }
  0x3a   : > { %1494 = vmatmul.msk.bf16.gmra.mxu2 %vm419_vm0, %v1537_v18 }
  0x48   : > { %1365 = vmatmul.msk.bf16.gmra.mxu0 %vm419_vm0, %v1516_v19  ;;  %1377 = vmatmul.msk.bf16.gmra.mxu3 %vm419_vm0, %v1531_v20 }
  0x49   : > { %1397 = vmatmul.msk.bf16.gmra.mxu1 %vm419_vm0, %v1515_v16 }
  0x4a   : > { %1495 = vmatmul.msk.bf16.gmra.mxu2 %vm419_vm0, %v1538_v21 }
  0x58   : > { %1366 = vmatmul.msk.bf16.gmra.mxu0 %vm419_vm0, %v1517_v22  ;;  %1406 = vmatmul.msk.bf16.vlgmr.msrb.gmra.mxu3 %vm419_vm0, %v1795_v23 }
  0x59   : > { %1398 = vmatmul.msk.bf16.gmra.mxu1 %vm419_vm0, %v1516_v19  ;;  %v1564_v19 = vunpack.c.l.bf16 %v1619_v15 }
  0x5a   : > { %1496 = vmatmul.msk.bf16.gmra.mxu2 %vm419_vm0, %v1539_v24 }
  0x68   : > { %1367 = vmatmul.msk.bf16.gmra.mxu0 %vm419_vm0, %v1518_v25  ;;  %1407 = vmatmul.msk.bf16.gmra.mxu3 %vm419_vm0, %v1525_v10 }
  0x69   : > { %1399 = vmatmul.msk.bf16.gmra.mxu1 %vm419_vm0, %v1517_v22 }
  0x6a   : > { %1497 = vmatmul.msk.bf16.gmra.mxu2 %vm419_vm0, %v1540_v26 }
  0x78   : > { %1368 = vmatmul.msk.bf16.gmra.mxu0 %vm419_vm0, %v1519_v27  ;;  %1408 = vmatmul.msk.bf16.gmra.mxu3 %vm419_vm0, %v1526_v14 }
  0x79   : > { %1400 = vmatmul.msk.bf16.gmra.mxu1 %vm419_vm0, %v1518_v25 }
  0x7a   : > { %1498 = vmatmul.msk.bf16.gmra.mxu2 %vm419_vm0, %v1541_v28 }
  0x88   : > { %1369 = vmatmul.msk.bf16.gmra.mxu0 %vm419_vm0, %v1520_v29  ;;  %1409 = vmatmul.msk.bf16.gmra.mxu3 %vm419_vm0, %v1527_v17 }
  0x89   : > { %1401 = vmatmul.msk.bf16.gmra.mxu1 %vm419_vm0, %v1519_v27 }
  0x8a   : > { %1499 = vmatmul.msk.bf16.gmra.mxu2 %vm419_vm0, %v1542_v30 }
  0x95   : > { %v477_v33 = vpop.f32.mrf.mxu0 }
  0x96   : > { %v592_v35 = vpop.f32.mrf.mxu1 }
  0x97   : > { %v593_v37 = vadd.f32 %v592_v35, %v477_v33 }
  0x98   : > { %1370 = vmatmul.msk.bf16.gmra.mxu0 %vm419_vm0, %v1521_v31  ;;  %1504 = vmatmul.msk.bf16.vlgmr.msra.gmra.mxu3 %vm419_vm0, %v1547_v32 }
  0x99   : > { %1402 = vmatmul.msk.bf16.gmra.mxu1 %vm419_vm0, %v1520_v29  ;;  %v1565_v29 = vunpack.c.h.bf16 %v1619_v15 }
  0x9a   : > { %1500 = vmatmul.msk.bf16.gmra.mxu2 %vm419_vm0, %v1543_v34  ;;  %v1546_v34 = vld [vmem:[%s1756_s6 + $0x68] sm:$0xff] }
  0x9b   : > { %v1835_v38 = vpop.f32.mrf.mxu3 }
  0x9d   : > { %v866_v40 = vpop.f32.mrf.mxu2  ;;  %v479_v42 = vpop.f32.mrf.mxu0 }
  0x9e   : > { %v946_v41 = vadd.f32 %v866_v40, %v593_v37  ;;  %v594_v43 = vpop.f32.mrf.mxu1  ;;  %v1620_v37 = vld [vmem:[%s1828_s18 + $0x18] sm:$0xff]  }
  0x9f   : > { %v595_v46 = vadd.f32 %v594_v43, %v479_v42  ;;  %v1568_v42 = vunpack.c.l.bf16 %v1620_v37 }
  0xa0   : > { %v1042_v44 = vadd.f32 %v1556_v39, %v946_v41 }
  0xa2   : > { %v1074_v45 = vpack.c.bf16 %v1042_v44, %v1042_v44 }
  0xa3   : > { %v1844_v47 = vpop.f32.mrf.mxu3 }
  0xa4   : > { %1107 = vst.msk [vmem:[%s1840_s20] sm:$0xf] %vm1106_vm1, %v1074_v45 }
  0xa5   : > { %v868_v49 = vpop.f32.mrf.mxu2  ;;  %v482_v53 = vpop.f32.mrf.mxu0 }
  0xa6   : > { %v947_v52 = vadd.f32 %v868_v49, %v595_v46  ;;  %v597_v55 = vpop.f32.mrf.mxu1 }
  0xa7   : > { %v598_v59 = vadd.f32 %v597_v55, %v482_v53 }
  0xa8   : > { %v1043_v56 = vadd.f32 %v1557_v48, %v947_v52  ;;  %1371 = vmatmul.msk.bf16.gmra.mxu0 %vm419_vm0, %v1522_v50  ;;  %1505 = vmatmul.msk.bf16.gmra.mxu3 %vm419_vm0, %v1548_v51  ;;  %v1569_v51 = vunpack.c.h.bf16 %v1620_v37 }
  0xa9   : > { %1403 = vmatmul.msk.bf16.gmra.mxu1 %vm419_vm0, %v1521_v31  ;;  %v1550_v31 = vld [vmem:[%s1756_s6 + $0x88] sm:$0xff] }
  0xaa   : > { %v1075_v58 = vpack.c.bf16 %v1043_v56, %v1043_v56  ;;  %1501 = vmatmul.msk.bf16.gmra.mxu2 %vm419_vm0, %v1544_v54 }
  0xab   : > { %v1856_v60 = vpop.f32.mrf.mxu3 }
  0xac   : > { %1108 = vst.msk [vmem:[%s1840_s20 + $0x4] sm:$0xf] %vm1106_vm1, %v1075_v58 }
  0xad   : > { %v871_v62 = vpop.f32.mrf.mxu2  ;;  %v484_v0 = vpop.f32.mrf.mxu0 }
  0xae   : > { %v948_v63 = vadd.f32 %v871_v62, %v598_v59  ;;  %v599_v1 = vpop.f32.mrf.mxu1  ;;  %v1572_v62 = vunpack.c.l.bf16 %v1621_v57 }
  0xaf   : > { %v600_v4 = vadd.f32 %v599_v1, %v484_v0 }
  0xb0   : > { %v1044_v2 = vadd.f32 %v1560_v61, %v948_v63 }
  0xb2   : > { %v1076_v3 = vpack.c.bf16 %v1044_v2, %v1044_v2 }
  0xb3   : > { %v1860_v5 = vpop.f32.mrf.mxu3 }
  0xb4   : > { %1109 = vst.msk [vmem:[%s1840_s20 + $0x8] sm:$0xf] %vm1106_vm1, %v1076_v3 }
  0xb5   : > { %v873_v7 = vpop.f32.mrf.mxu2  ;;  %v487_v11 = vpop.f32.mrf.mxu0 }
  0xb6   : > { %v949_v10 = vadd.f32 %v873_v7, %v600_v4  ;;  %v602_v13 = vpop.f32.mrf.mxu1 }
  0xb7   : > { %v603_v17 = vadd.f32 %v602_v13, %v487_v11 }
  0xb8   : > { %v1045_v14 = vadd.f32 %v1561_v6, %v949_v10  ;;  %1372 = vmatmul.msk.bf16.gmra.mxu0 %vm419_vm0, %v1523_v8  ;;  %1506 = vmatmul.msk.bf16.gmra.mxu3 %vm419_vm0, %v1549_v9 }
  0xb9   : > { %1404 = vmatmul.msk.bf16.gmra.mxu1 %vm419_vm0, %v1522_v50 }
  0xba   : > { %v1077_v16 = vpack.c.bf16 %v1045_v14, %v1045_v14  ;;  %1502 = vmatmul.msk.bf16.gmra.mxu2 %vm419_vm0, %v1545_v12  ;;  %v1622_v14 = vld [vmem:[%s1828_s18 + $0x28] sm:$0xff]  }
  0xbb   : > { %v1872_v18 = vpop.f32.mrf.mxu3 }
  0xbc   : > { %1110 = vst.msk [vmem:[%s1840_s20 + $0xc] sm:$0xf] %vm1106_vm1, %v1077_v16 }
  0xbd   : > { %v876_v20 = vpop.f32.mrf.mxu2  ;;  %v489_v22 = vpop.f32.mrf.mxu0 }
  0xbe   : > { %v950_v21 = vadd.f32 %v876_v20, %v603_v17  ;;  %v604_v24 = vpop.f32.mrf.mxu1 }
  0xbf   : > { %v605_v27 = vadd.f32 %v604_v24, %v489_v22 }
  0xc0   : > { %v1046_v25 = vadd.f32 %v1564_v19, %v950_v21  ;;  %v1576_v19 = vunpack.c.l.bf16 %v1622_v14 }
  0xc2   : > { %v1078_v26 = vpack.c.bf16 %v1046_v25, %v1046_v25 }
  0xc3   : > { %v1876_v28 = vpop.f32.mrf.mxu3 }
  0xc4   : > { %1111 = vst.msk [vmem:[%s1840_s20 + $0x10] sm:$0xf] %vm1106_vm1, %v1078_v26 }
  0xc5   : > { %v878_v30 = vpop.f32.mrf.mxu2  ;;  %v492_v33 = vpop.f32.mrf.mxu0 }
  0xc6   : > { %v951_v32 = vadd.f32 %v878_v30, %v605_v27  ;;  %v607_v35 = vpop.f32.mrf.mxu1  ;;  %v1577_v30 = vunpack.c.h.bf16 %v1622_v14 }
  0xc7   : > { %v608_v40 = vadd.f32 %v607_v35, %v492_v33 }
  0xc8   : > { %v1047_v36 = vadd.f32 %v1565_v29, %v951_v32  ;;  %1373 = vmatmul.msk.bf16.gmra.mxu0 %vm419_vm0, %v1795_v23  ;;  %1507 = vmatmul.msk.bf16.gmra.mxu3 %vm419_vm0, %v1550_v31 }
  0xc9   : > { %1405 = vmatmul.msk.bf16.gmra.mxu1 %vm419_vm0, %v1523_v8  ;;  %v1573_v8 = vunpack.c.h.bf16 %v1621_v57 }
  0xca   : > { %v1079_v39 = vpack.c.bf16 %v1047_v36, %v1047_v36  ;;  %1503 = vmatmul.msk.bf16.gmra.mxu2 %vm419_vm0, %v1546_v34  ;;  %v1623_v36 = vld [vmem:[%s1828_s18 + $0x30] sm:$0xff]  }
  0xcb   : > { %v1888_v41 = vpop.f32.mrf.mxu3 }
  0xcc   : > { %1112 = vst.msk [vmem:[%s1840_s20 + $0x14] sm:$0xf] %vm1106_vm1, %v1079_v39 }
  0xcd   : > { %v881_v43 = vpop.f32.mrf.mxu2  ;;  %v494_v45 = vpop.f32.mrf.mxu0 }
  0xce   : > { %v952_v44 = vadd.f32 %v881_v43, %v608_v40  ;;  %v609_v23 = vpop.f32.mrf.mxu1 }
  0xcf   : > { %v610_v49 = vadd.f32 %v609_v23, %v494_v45 }
  0xd0   : > { %v1048_v46 = vadd.f32 %v1568_v42, %v952_v44  ;;  %v1580_v42 = vunpack.c.l.bf16 %v1623_v36 }
  0xd2   : > { %v1080_v48 = vpack.c.bf16 %v1048_v46, %v1048_v46 }
  0xd3   : > { %v1892_v50 = vpop.f32.mrf.mxu3 }
  0xd4   : > { %1113 = vst.msk [vmem:[%s1840_s20 + $0x18] sm:$0xf] %vm1106_vm1, %v1080_v48 }
  0xd5   : > { %v883_v52 = vpop.f32.mrf.mxu2  ;;  %v497_v54 = vpop.f32.mrf.mxu0 }
  0xd6   : > { %v953_v53 = vadd.f32 %v883_v52, %v610_v49  ;;  %v612_v55 = vpop.f32.mrf.mxu1  ;;  %v1581_v52 = vunpack.c.h.bf16 %v1623_v36 }
  0xd7   : > { %v613_v59 = vadd.f32 %v612_v55, %v497_v54 }
  0xd8   : > { %v1049_v56 = vadd.f32 %v1569_v51, %v953_v53 }
  0xda   : > { %v1081_v58 = vpack.c.bf16 %v1049_v56, %v1049_v56 }
  0xdb   : > { %v1897_v61 = vpop.f32.mrf.mxu3 }
  0xdc   : > { %1114 = vst.msk [vmem:[%s1840_s20 + $0x1c] sm:$0xf] %vm1106_vm1, %v1081_v58  ;;  %v1624_v58 = vld [vmem:[%s1828_s18 + $0x38] sm:$0xff]  }
  0xdd   : > { %v886_v63 = vpop.f32.mrf.mxu2  ;;  %v499_v1 = vpop.f32.mrf.mxu0 }
  0xde   : > { %v954_v0 = vadd.f32 %v886_v63, %v613_v59  ;;  %v614_v2 = vpop.f32.mrf.mxu1 }
  0xdf   : > { %v615_v6 = vadd.f32 %v614_v2, %v499_v1 }
  0xe0   : > { %v1050_v3 = vadd.f32 %v1572_v62, %v954_v0  ;;  %v1584_v0 = vunpack.c.l.bf16 %v1624_v58 }
  0xe2   : > { %v1082_v4 = vpack.c.bf16 %v1050_v3, %v1050_v3 }
  0xe3   : > { %v1901_v7 = vpop.f32.mrf.mxu3 }
  0xe4   : > { %1115 = vst.msk [vmem:[%s1840_s20 + $0x20] sm:$0xf] %vm1106_vm1, %v1082_v4 }
  0xe5   : > { %v888_v9 = vpop.f32.mrf.mxu2  ;;  %v502_v11 = vpop.f32.mrf.mxu0 }
  0xe6   : > { %v955_v10 = vadd.f32 %v888_v9, %v615_v6  ;;  %v617_v12 = vpop.f32.mrf.mxu1 }
  0xe7   : > { %v618_v16 = vadd.f32 %v617_v12, %v502_v11  ;;  %v1585_v11 = vunpack.c.h.bf16 %v1624_v58 }
  0xe8   : > { %v1051_v13 = vadd.f32 %v1573_v8, %v955_v10 }
  0xea   : > { %v1083_v15 = vpack.c.bf16 %v1051_v13, %v1051_v13 }
  0xeb   : > { %v1906_v17 = vpop.f32.mrf.mxu3 }
  0xec   : > { %1116 = vst.msk [vmem:[%s1840_s20 + $0x24] sm:$0xf] %vm1106_vm1, %v1083_v15 }
  0xed   : > { %v891_v20 = vpop.f32.mrf.mxu2  ;;  %v504_v22 = vpop.f32.mrf.mxu0 }
  0xee   : > { %v956_v21 = vadd.f32 %v891_v20, %v618_v16  ;;  %v619_v24 = vpop.f32.mrf.mxu1  ;;  %v1625_v20 = vld [vmem:[%s1828_s18 + $0x40] sm:$0xff]  }
  0xef   : > { %v620_v27 = vadd.f32 %v619_v24, %v504_v22  ;;  %v653_v24 = vadd.f32 %v1897_v61, %v1835_v38 }
  0xf0   : > { %v1052_v25 = vadd.f32 %v1576_v19, %v956_v21  ;;  %v1629_v19 = vld [vmem:[%s1828_s18 + $0x60] sm:$0xff]  }
  0xf1   : > { %v1605_v38 = vunpack.c.h.bf16 %v1629_v19 }
  0xf2   : > { %v1084_v26 = vpack.c.bf16 %v1052_v25, %v1052_v25  ;;  %v1604_v25 = vunpack.c.l.bf16 %v1629_v19 }
  0xf3   : > { %v1910_v29 = vpop.f32.mrf.mxu3 }
  0xf4   : > { %1117 = vst.msk [vmem:[%s1840_s20 + $0x28] sm:$0xf] %vm1106_vm1, %v1084_v26  ;;  %v1588_v26 = vunpack.c.l.bf16 %v1625_v20 }
  0xf5   : > { %v893_v31 = vpop.f32.mrf.mxu2  ;;  %v507_v33 = vpop.f32.mrf.mxu0 }
  0xf6   : > { %v957_v32 = vadd.f32 %v893_v31, %v620_v27  ;;  %v622_v34 = vpop.f32.mrf.mxu1 }
  0xf7   : > { %v623_v39 = vadd.f32 %v622_v34, %v507_v33 }
  0xf8   : > { %v1053_v35 = vadd.f32 %v1577_v30, %v957_v32 }
  0xfa   : > { %v1085_v37 = vpack.c.bf16 %v1053_v35, %v1053_v35 }
  0xfb   : > { %v1915_v40 = vpop.f32.mrf.mxu3 }
  0xfc   : > { %1118 = vst.msk [vmem:[%s1840_s20 + $0x2c] sm:$0xf] %vm1106_vm1, %v1085_v37 }
  0xfd   : > { %v896_v43 = vpop.f32.mrf.mxu2  ;;  %v509_v45 = vpop.f32.mrf.mxu0 }
  0xfe   : > { %v958_v44 = vadd.f32 %v896_v43, %v623_v39  ;;  %v624_v23 = vpop.f32.mrf.mxu1  ;;  %v1589_v43 = vunpack.c.h.bf16 %v1625_v20 }
  0xff   : > { %v625_v49 = vadd.f32 %v624_v23, %v509_v45 }
 0x100   : > { %v1054_v46 = vadd.f32 %v1580_v42, %v958_v44  ;;  %v655_v42 = vadd.f32 %v1901_v7, %v1844_v47  ;;  %v1626_v7 = vld [vmem:[%s1828_s18 + $0x48] sm:$0xff]  }
 0x102   : > { %v1086_v48 = vpack.c.bf16 %v1054_v46, %v1054_v46 }
 0x103   : > { %v1919_v51 = vpop.f32.mrf.mxu3 }
 0x104   : > { %1119 = vst.msk [vmem:[%s1840_s20 + $0x30] sm:$0xf] %vm1106_vm1, %v1086_v48 }
 0x105   : > { %v898_v53 = vpop.f32.mrf.mxu2  ;;  %v512_v55 = vpop.f32.mrf.mxu0 }
 0x106   : > { %v959_v54 = vadd.f32 %v898_v53, %v625_v49  ;;  %v627_v56 = vpop.f32.mrf.mxu1 }
 0x107   : > { %v628_v62 = vadd.f32 %v627_v56, %v512_v55 }
 0x108   : > { %v1055_v57 = vadd.f32 %v1581_v52, %v959_v54  ;;  %v1630_v54 = vld [vmem:[%s1828_s18 + $0x68] sm:$0xff]  }
 0x109   : > { %v1608_v58 = vunpack.c.l.bf16 %v1630_v54 }
 0x10a   : > { %v1087_v59 = vpack.c.bf16 %v1055_v57, %v1055_v57  ;;  %v658_v57 = vadd.f32 %v1906_v17, %v1856_v60  ;;  %v660_v60 = vadd.f32 %v1910_v29, %v1860_v5  ;;  %v1609_v17 = vunpack.c.h.bf16 %v1630_v54  ;;  %v1627_v29 = vld [vmem:[%s1828_s18 + $0x50] sm:$0xff]  }
 0x10b   : > { %v1924_v63 = vpop.f32.mrf.mxu3 }
 0x10c   : > { %1120 = vst.msk [vmem:[%s1840_s20 + $0x34] sm:$0xf] %vm1106_vm1, %v1087_v59  ;;  %v1592_v59 = vunpack.c.l.bf16 %v1626_v7 }
 0x10d   : > { %v901_v1 = vpop.f32.mrf.mxu2  ;;  %v514_v3 = vpop.f32.mrf.mxu0 }
 0x10e   : > { %v960_v2 = vadd.f32 %v901_v1, %v628_v62  ;;  %v629_v4 = vpop.f32.mrf.mxu1 }
 0x10f   : > { %v630_v9 = vadd.f32 %v629_v4, %v514_v3 }
 0x110   : > { %v1056_v6 = vadd.f32 %v1584_v0, %v960_v2 }
 0x112   : > { %v1088_v8 = vpack.c.bf16 %v1056_v6, %v1056_v6 }
 0x113   : > { %v1928_v10 = vpop.f32.mrf.mxu3 }
 0x114   : > { %1121 = vst.msk [vmem:[%s1840_s20 + $0x38] sm:$0xf] %vm1106_vm1, %v1088_v8 }
 0x115   : > { %v903_v12 = vpop.f32.mrf.mxu2  ;;  %v517_v14 = vpop.f32.mrf.mxu0 }
 0x116   : > { %v961_v13 = vadd.f32 %v903_v12, %v630_v9  ;;  %v632_v15 = vpop.f32.mrf.mxu1 }
 0x117   : > { %v633_v22 = vadd.f32 %v632_v15, %v517_v14 }
 0x118   : > { %v1057_v16 = vadd.f32 %v1585_v11, %v961_v13  ;;  %v1593_v13 = vunpack.c.h.bf16 %v1626_v7  ;;  %v1632_v7 = vld [vmem:[%s1828_s18 + $0x78] sm:$0xff]  }
 0x11a   : > { %v1089_v21 = vpack.c.bf16 %v1057_v16, %v1057_v16 }
 0x11b   : > { %v926_v27 = vpop.f32.mrf.mxu3 }
 0x11c   : > { %1122 = vst.msk [vmem:[%s1840_s20 + $0x3c] sm:$0xf] %vm1106_vm1, %v1089_v21  ;;  %v970_v31 = vadd.f32 %v926_v27, %v653_v24 }
 0x11d   : > { %v906_v30 = vpop.f32.mrf.mxu2  ;;  %v519_v33 = vpop.f32.mrf.mxu0 }
 0x11e   : > { %v962_v32 = vadd.f32 %v906_v30, %v633_v22  ;;  %v1066_v34 = vadd.f32 %v1604_v25, %v970_v31  ;;  %v634_v35 = vpop.f32.mrf.mxu1  ;;  %v1631_v25 = vld [vmem:[%s1828_s18 + $0x70] sm:$0xff]   ;;  %v663_v30 = vadd.f32 %v1915_v40, %v1872_v18  ;;  %v665_v18 = vadd.f32 %v1919_v51, %v1876_v28  ;;  %v1628_v51 = vld [vmem:[%s1828_s18 + $0x58] sm:$0xff]  }
 0x11f   : > { %v635_v61 = vadd.f32 %v634_v35, %v519_v33  ;;  %v1612_v31 = vunpack.c.l.bf16 %v1631_v25  ;;  %v1613_v40 = vunpack.c.h.bf16 %v1631_v25 }
 0x120   : > { %v1058_v36 = vadd.f32 %v1588_v26, %v962_v32  ;;  %v1098_v37 = vpack.c.bf16 %v1066_v34, %v1066_v34  ;;  %v1596_v32 = vunpack.c.l.bf16 %v1627_v29 }
 0x122   : > { %v1090_v39 = vpack.c.bf16 %v1058_v36, %v1058_v36  ;;  %1131 = vst.msk [vmem:[%s1840_s20 + $0x60] sm:$0xf] %vm1106_vm1, %v1098_v37 }
 0x123   : > { %v928_v44 = vpop.f32.mrf.mxu3 }
 0x124   : > { %1123 = vst.msk [vmem:[%s1840_s20 + $0x40] sm:$0xf] %vm1106_vm1, %v1090_v39  ;;  %v971_v23 = vadd.f32 %v928_v44, %v655_v42 }
 0x125   : > { %v908_v45 = vpop.f32.mrf.mxu2  ;;  %v522_v48 = vpop.f32.mrf.mxu0 }
 0x126   : > { %v963_v46 = vadd.f32 %v908_v45, %v635_v61  ;;  %v1067_v49 = vadd.f32 %v1605_v38, %v971_v23  ;;  %v637_v52 = vpop.f32.mrf.mxu1  ;;  %v1597_v45 = vunpack.c.h.bf16 %v1627_v29 }
 0x127   : > { %v638_v56 = vadd.f32 %v637_v52, %v522_v48 }
 0x128   : > { %v1059_v53 = vadd.f32 %v1589_v43, %v963_v46  ;;  %v1099_v47 = vpack.c.bf16 %v1067_v49, %v1067_v49 }
 0x12a   : > { %v1091_v55 = vpack.c.bf16 %v1059_v53, %v1059_v53  ;;  %1132 = vst.msk [vmem:[%s1840_s20 + $0x64] sm:$0xf] %vm1106_vm1, %v1099_v47 }
 0x12b   : > { %v931_v62 = vpop.f32.mrf.mxu3 }
 0x12c   : > { %1124 = vst.msk [vmem:[%s1840_s20 + $0x44] sm:$0xf] %vm1106_vm1, %v1091_v55  ;;  %v972_v1 = vadd.f32 %v931_v62, %v658_v57  ;;  %v668_v57 = vadd.f32 %v1924_v63, %v1888_v41  ;;  %v670_v41 = vadd.f32 %v1928_v10, %v1892_v50  ;;  %v1617_v63 = vunpack.c.h.bf16 %v1632_v7 }
 0x12d   : > { %v911_v0 = vpop.f32.mrf.mxu2  ;;  %v524_v3 = vpop.f32.mrf.mxu0 }
 0x12e   : > { %v964_v2 = vadd.f32 %v911_v0, %v638_v56  ;;  %v1068_v4 = vadd.f32 %v1608_v58, %v972_v1  ;;  %v639_v6 = vpop.f32.mrf.mxu1  ;;  %v1616_v58 = vunpack.c.l.bf16 %v1632_v7 }
 0x12f   : > { %v640_v12 = vadd.f32 %v639_v6, %v524_v3 }
 0x130   : > { %v1060_v8 = vadd.f32 %v1592_v59, %v964_v2  ;;  %v1100_v9 = vpack.c.bf16 %v1068_v4, %v1068_v4  ;;  %v1600_v59 = vunpack.c.l.bf16 %v1628_v51 }
 0x132   : > { %v1092_v11 = vpack.c.bf16 %v1060_v8, %v1060_v8  ;;  %1133 = vst.msk [vmem:[%s1840_s20 + $0x68] sm:$0xf] %vm1106_vm1, %v1100_v9 }
 0x133   : > { %v933_v14 = vpop.f32.mrf.mxu3 }
 0x134   : > { %1125 = vst.msk [vmem:[%s1840_s20 + $0x48] sm:$0xf] %vm1106_vm1, %v1092_v11  ;;  %v973_v16 = vadd.f32 %v933_v14, %v660_v60 }
 0x135   : > { %v913_v15 = vpop.f32.mrf.mxu2  ;;  %v527_v20 = vpop.f32.mrf.mxu0 }
 0x136   : > { %v965_v19 = vadd.f32 %v913_v15, %v640_v12  ;;  %v1069_v21 = vadd.f32 %v1609_v17, %v973_v16  ;;  %v642_v22 = vpop.f32.mrf.mxu1  ;;  %v1601_v17 = vunpack.c.h.bf16 %v1628_v51 }
 0x137   : > { %v643_v27 = vadd.f32 %v642_v22, %v527_v20 }
 0x138   : > { %v1061_v24 = vadd.f32 %v1593_v13, %v965_v19  ;;  %v1101_v5 = vpack.c.bf16 %v1069_v21, %v1069_v21 }
 0x13a   : > { %v1093_v26 = vpack.c.bf16 %v1061_v24, %v1061_v24  ;;  %1134 = vst.msk [vmem:[%s1840_s20 + $0x6c] sm:$0xf] %vm1106_vm1, %v1101_v5 }
 0x13b   : > { %v936_v33 = vpop.f32.mrf.mxu3 }
 0x13c   : > { %1126 = vst.msk [vmem:[%s1840_s20 + $0x4c] sm:$0xf] %vm1106_vm1, %v1093_v26  ;;  %v974_v35 = vadd.f32 %v936_v33, %v663_v30 }
 0x13d   : > { %v916_v34 = vpop.f32.mrf.mxu2  ;;  %v529_v37 = vpop.f32.mrf.mxu0 }
 0x13e   : > { %v966_v36 = vadd.f32 %v916_v34, %v643_v27  ;;  %v1070_v39 = vadd.f32 %v1612_v31, %v974_v35  ;;  %v644_v42 = vpop.f32.mrf.mxu1 }
 0x13f   : > { %v645_v44 = vadd.f32 %v644_v42, %v529_v37 }
 0x140   : > { %v1062_v38 = vadd.f32 %v1596_v32, %v966_v36  ;;  %v1102_v61 = vpack.c.bf16 %v1070_v39, %v1070_v39 }
 0x142   : > { %v1094_v43 = vpack.c.bf16 %v1062_v38, %v1062_v38  ;;  %1135 = vst.msk [vmem:[%s1840_s20 + $0x70] sm:$0xf] %vm1106_vm1, %v1102_v61 }
 0x143   : > { %v938_v23 = vpop.f32.mrf.mxu3 }
 0x144   : > { %1127 = vst.msk [vmem:[%s1840_s20 + $0x50] sm:$0xf] %vm1106_vm1, %v1094_v43  ;;  %v975_v48 = vadd.f32 %v938_v23, %v665_v18 }
 0x145   : > { %v918_v46 = vpop.f32.mrf.mxu2  ;;  %v532_v53 = vpop.f32.mrf.mxu0 }
 0x146   : > { %v967_v49 = vadd.f32 %v918_v46, %v645_v44  ;;  %v1071_v52 = vadd.f32 %v1613_v40, %v975_v48  ;;  %v647_v54 = vpop.f32.mrf.mxu1 }
 0x147   : > { %v648_v56 = vadd.f32 %v647_v54, %v532_v53 }
 0x148   : > { %v1063_v47 = vadd.f32 %v1597_v45, %v967_v49  ;;  %v1103_v28 = vpack.c.bf16 %v1071_v52, %v1071_v52 }
 0x14a   : > { %v1095_v55 = vpack.c.bf16 %v1063_v47, %v1063_v47  ;;  %1136 = vst.msk [vmem:[%s1840_s20 + $0x74] sm:$0xf] %vm1106_vm1, %v1103_v28 }
 0x14b   : > { %v941_v62 = vpop.f32.mrf.mxu3 }
 0x14c   : > { %1128 = vst.msk [vmem:[%s1840_s20 + $0x54] sm:$0xf] %vm1106_vm1, %v1095_v55  ;;  %v976_v1 = vadd.f32 %v941_v62, %v668_v57 }
 0x14d   : > { %v921_v0 = vpop.f32.mrf.mxu2  ;;  %v534_v8 = vpop.f32.mrf.mxu0 }
 0x14e   : > { %v968_v2 = vadd.f32 %v921_v0, %v648_v56  ;;  %v1072_v3 = vadd.f32 %v1616_v58, %v976_v1  ;;  %v649_v9 = vpop.f32.mrf.mxu1 }
 0x14f   : > { %v650_v60 = vadd.f32 %v649_v9, %v534_v8 }
 0x150   : > { %v1064_v4 = vadd.f32 %v1600_v59, %v968_v2  ;;  %v1104_v6 = vpack.c.bf16 %v1072_v3, %v1072_v3 }
 0x152   : > { %v1096_v11 = vpack.c.bf16 %v1064_v4, %v1064_v4  ;;  %1137 = vst.msk [vmem:[%s1840_s20 + $0x78] sm:$0xf] %vm1106_vm1, %v1104_v6 }
 0x153   : > { %v943_v12 = vpop.f32.mrf.mxu3 }
 0x154   : > { %1129 = vst.msk [vmem:[%s1840_s20 + $0x58] sm:$0xf] %vm1106_vm1, %v1096_v11  ;;  %v977_v14 = vadd.f32 %v943_v12, %v670_v41 }
 0x155   : > { %v923_v13 = vpop.f32.mrf.mxu2 }
 0x156   : > { %v969_v15 = vadd.f32 %v923_v13, %v650_v60  ;;  %v1073_v16 = vadd.f32 %v1617_v63, %v977_v14 }
 0x158   : > { %v1065_v19 = vadd.f32 %v1601_v17, %v969_v15  ;;  %v1105_v20 = vpack.c.bf16 %v1073_v16, %v1073_v16 }
 0x15a   : > { %v1097_v21 = vpack.c.bf16 %v1065_v19, %v1065_v19  ;;  %1138 = vst.msk [vmem:[%s1840_s20 + $0x7c] sm:$0xf] %vm1106_vm1, %v1105_v20 }
 0x15c   : > { %1130 = vst.msk [vmem:[%s1840_s20 + $0x5c] sm:$0xf] %vm1106_vm1, %v1097_v21 }
 0x15d PF: > { %s13_s14 = sadd.s32 1, %s1689_s14   ;;  %s2001_s12 = smov %s1685_s13 }
 0x15e   : > { %p10_p5 = scmp.ge.s32.totalorder %s13_s14, 4   ;;  %s2002_s13 = smov %s2004_s15 }
 0x160   :  { %12 = sbr.rel (!%p10_p5) target bundleno = 2 (0x2), region = 70 }

// kernel: unetres_forward.37
= control target key start
LH: loop header
LB: loop body
LE: loop exit
PB: predicated region body
PF: predicated region fallthrough
CT: control target
= control target key end

     0   :  { %s1465_s9 = smov 0   ;;  %s1467_s10 = smov 0   ;;  %s1730_s0 = inlined_call_operand.vmem [shape: bf16[2,288,48], index: 0, kind: input, shape index: {}]   ;;  %s1731_s1 = inlined_call_operand.vmem [shape: bf16[3,48,16], index: 1, kind: input, shape index: {}]   ;;  %s1732_s2 = inlined_call_operand.vmem [shape: bf16[2,256,16], index: 2, kind: output, shape index: {}]  }
   0x1   :  { %s1469_s11 = smov 0  }
   0x2 LB: > { %s31_s12 = sadd.s32 1, %s1444_s10  ;;  %p1115_p0 = scmp.ge.s32.totalorder %s1448_s11, 1  ;;  %s1448_s11 = sphi %s1469_s11, %s12_s11   ;;  %s1444_s10 = sphi %s1467_s10, %s1734_s10   ;;  %s1440_s9 = sphi %s1465_s9, %s1733_s9  }
   0x3   : > { %p33_p1 = scmp.ge.s32.totalorder %s31_s12, 2  ;;  %p144_p2 = scmp.lt.s32.totalorder %s1448_s11, 3 }
   0x5   : > { %s1736_s12 = smov (%p33_p1, %s31_s12), 0  ;;  %p145_p3 = pnand %p1115_p0, %p144_p2 }
   0x6   : > { %p177_p4 = scmp.lt.s32.totalorder (!%p145_p3), %s1440_s9, 1 }
   0x7   : > { %148 = sbr.rel (%p145_p3) target bundleno = 349 (0x15d), region = 28 }
   0xc   : > { %v1372_v0 = vld [vmem:[%s1731_s1 + $0x28] sm:$0xff]  ;;  %v1368_v1 = vld [vmem:[%s1731_s1 + $0x10] sm:$0xff]  ;;  %v1391_v2 = vld [vmem:[%s1731_s1 + $0x40] sm:$0xff]  ;;  %s1738_s9 = smov (!%p177_p4, %s1440_s9), 1  ;;  %vm345_vm0 = vcmask 392192   ;;  %vm968_vm1 = vcmask 125952  }
   0xd   : > { %399 = vmatpush.bf16.msra.mxu0 %v1372_v0  ;;  %1392 = vmatpush.bf16.msra.mxu3 %v1372_v0  ;;  %v1371_v3 = vld [vmem:[%s1731_s1 + $0x20] sm:$0xff]  ;;  %v1367_v4 = vld [vmem:[%s1731_s1 + $0x8] sm:$0xff]  ;;  %v1390_v5 = vld [vmem:[%s1731_s1 + $0x38] sm:$0xff]  ;;  %s1401_s25 = smul.u32 144, %s1738_s9  ;;  %s1349_s7 = sshll.u32 %s1738_s9, 7 }
   0xe   : > { %514 = vmatpush.bf16.msra.mxu1 %v1368_v1  ;;  %788 = vmatpush.bf16.msra.mxu2 %v1391_v2  ;;  %v1370_v6 = vld [vmem:[%s1731_s1 + $0x18] sm:$0xff]  ;;  %v1366_v7 = vld [vmem:[%s1731_s1] sm:$0xff]  ;;  %v1389_v8 = vld [vmem:[%s1731_s1 + $0x30] sm:$0xff]  ;;  %s1588_s14 = scalar_lea.vmem %s1732_s2, %s1349_s7 }
   0xf   : > { %s1510_s30 = scalar_lea.vmem %s1730_s0, %s1401_s25 }
  0x10   : > { %v1351_v9 = vld [vmem:[%s1510_s30 + $0x8] sm:$0xff]  ;;  %v1350_v11 = vld [vmem:[%s1510_s30] sm:$0xff]  ;;  %v1373_v12 = vld [vmem:[%s1510_s30 + $0x10] sm:$0xff] }
  0x11   : > { %400 = vmatpush.bf16.msra.mxu0 %v1371_v3  ;;  %1393 = vmatpush.bf16.msra.mxu3 %v1371_v3  ;;  %v1363_v10 = vld [vmem:[%s1510_s30 + $0x68] sm:$0xff]  ;;  %v1352_v13 = vld [vmem:[%s1510_s30 + $0x10] sm:$0xff]  ;;  %v1374_v15 = vld [vmem:[%s1510_s30 + $0x18] sm:$0xff] }
  0x12   : > { %515 = vmatpush.bf16.msra.mxu1 %v1367_v4  ;;  %789 = vmatpush.bf16.msra.mxu2 %v1390_v5  ;;  %v1364_v14 = vld [vmem:[%s1510_s30 + $0x70] sm:$0xff]  ;;  %v1353_v16 = vld [vmem:[%s1510_s30 + $0x18] sm:$0xff]  ;;  %v1375_v18 = vld [vmem:[%s1510_s30 + $0x20] sm:$0xff] }
  0x13   : > { %v1365_v17 = vld [vmem:[%s1510_s30 + $0x78] sm:$0xff]  ;;  %v1354_v19 = vld [vmem:[%s1510_s30 + $0x20] sm:$0xff]  ;;  %v1376_v21 = vld [vmem:[%s1510_s30 + $0x28] sm:$0xff] }
  0x14   : > { %v1369_v20 = vld [vmem:[%s1510_s30 + $0x80] sm:$0xff]  ;;  %v1355_v22 = vld [vmem:[%s1510_s30 + $0x28] sm:$0xff]  ;;  %v1377_v24 = vld [vmem:[%s1510_s30 + $0x30] sm:$0xff] }
  0x15   : > { %401 = vmatpush.bf16.msra.mxu0 %v1370_v6  ;;  %1394 = vmatpush.bf16.msra.mxu3 %v1370_v6  ;;  %v1549_v23 = vld [vmem:[%s1510_s30 + $0x60] sm:$0xff]  ;;  %v1356_v25 = vld [vmem:[%s1510_s30 + $0x30] sm:$0xff]  ;;  %v1378_v26 = vld [vmem:[%s1510_s30 + $0x38] sm:$0xff] }
  0x16   : > { %516 = vmatpush.bf16.msra.mxu1 %v1366_v7  ;;  %790 = vmatpush.bf16.msra.mxu2 %v1389_v8  ;;  %v1357_v27 = vld [vmem:[%s1510_s30 + $0x38] sm:$0xff]  ;;  %v1379_v28 = vld [vmem:[%s1510_s30 + $0x40] sm:$0xff]  ;;  %v1380_v30 = vld [vmem:[%s1510_s30 + $0x48] sm:$0xff] }
  0x17   : > { %v1358_v29 = vld [vmem:[%s1510_s30 + $0x40] sm:$0xff]  ;;  %v1359_v31 = vld [vmem:[%s1510_s30 + $0x48] sm:$0xff]  ;;  %v1385_v32 = vld [vmem:[%s1510_s30 + $0x70] sm:$0xff] }
  0x18   : > { %1201 = vmatmul.msk.bf16.vlgmr.msra.gmra.mxu0 %vm345_vm0, %v1351_v9  ;;  %1213 = vmatmul.msk.bf16.vlgmr.msra.gmra.mxu3 %vm345_vm0, %v1363_v10  ;;  %v1381_v34 = vld [vmem:[%s1510_s30 + $0x50] sm:$0xff]  ;;  %v1386_v48 = vld [vmem:[%s1510_s30 + $0x78] sm:$0xff]  ;;  %v1387_v3 = vld [vmem:[%s1510_s30 + $0x80] sm:$0xff] }
  0x19   : > { %1395 = vmatpush.bf16.msrb.mxu3 %v1368_v1  ;;  %1233 = vmatmul.msk.bf16.vlgmr.msra.gmra.mxu1 %vm345_vm0, %v1350_v11  ;;  %v1360_v47 = vld [vmem:[%s1510_s30 + $0x50] sm:$0xff]  ;;  %v1382_v51 = vld [vmem:[%s1510_s30 + $0x58] sm:$0xff]  ;;  %v1383_v6 = vld [vmem:[%s1510_s30 + $0x60] sm:$0xff] }
  0x1a   : > { %1331 = vmatmul.msk.bf16.vlgmr.msra.gmra.mxu2 %vm345_vm0, %v1373_v12 }
  0x1d   : > { %1396 = vmatpush.bf16.msrb.mxu3 %v1367_v4 }
  0x21   : > { %1397 = vmatpush.bf16.msrb.mxu3 %v1366_v7 }
  0x25   : > { %1398 = vmatpush.bf16.msra.mxu3 %v1391_v2  ;;  %v1361_v2 = vld [vmem:[%s1510_s30 + $0x58] sm:$0xff] }
  0x28   : > { %1202 = vmatmul.msk.bf16.gmra.mxu0 %vm345_vm0, %v1352_v13  ;;  %1214 = vmatmul.msk.bf16.gmra.mxu3 %vm345_vm0, %v1364_v14 }
  0x29   : > { %1399 = vmatpush.bf16.msra.mxu3 %v1390_v5  ;;  %1234 = vmatmul.msk.bf16.gmra.mxu1 %vm345_vm0, %v1351_v9 }
  0x2a   : > { %1332 = vmatmul.msk.bf16.gmra.mxu2 %vm345_vm0, %v1374_v15 }
  0x2d   : > { %1400 = vmatpush.bf16.msra.mxu3 %v1389_v8 }
  0x38   : > { %1203 = vmatmul.msk.bf16.gmra.mxu0 %vm345_vm0, %v1353_v16  ;;  %1215 = vmatmul.msk.bf16.gmra.mxu3 %vm345_vm0, %v1365_v17 }
  0x39   : > { %1235 = vmatmul.msk.bf16.gmra.mxu1 %vm345_vm0, %v1352_v13 }
  0x3a   : > { %1333 = vmatmul.msk.bf16.gmra.mxu2 %vm345_vm0, %v1375_v18 }
  0x48   : > { %1204 = vmatmul.msk.bf16.gmra.mxu0 %vm345_vm0, %v1354_v19  ;;  %1216 = vmatmul.msk.bf16.gmra.mxu3 %vm345_vm0, %v1369_v20 }
  0x49   : > { %1236 = vmatmul.msk.bf16.gmra.mxu1 %vm345_vm0, %v1353_v16 }
  0x4a   : > { %1334 = vmatmul.msk.bf16.gmra.mxu2 %vm345_vm0, %v1376_v21  ;;  %v1388_v21 = vld [vmem:[%s1510_s30 + $0x88] sm:$0xff] }
  0x58   : > { %1205 = vmatmul.msk.bf16.gmra.mxu0 %vm345_vm0, %v1355_v22  ;;  %1245 = vmatmul.msk.bf16.vlgmr.msrb.gmra.mxu3 %vm345_vm0, %v1549_v23 }
  0x59   : > { %1237 = vmatmul.msk.bf16.gmra.mxu1 %vm345_vm0, %v1354_v19 }
  0x5a   : > { %1335 = vmatmul.msk.bf16.gmra.mxu2 %vm345_vm0, %v1377_v24 }
  0x68   : > { %1206 = vmatmul.msk.bf16.gmra.mxu0 %vm345_vm0, %v1356_v25  ;;  %1246 = vmatmul.msk.bf16.gmra.mxu3 %vm345_vm0, %v1363_v10 }
  0x69   : > { %1238 = vmatmul.msk.bf16.gmra.mxu1 %vm345_vm0, %v1355_v22 }
  0x6a   : > { %1336 = vmatmul.msk.bf16.gmra.mxu2 %vm345_vm0, %v1378_v26 }
  0x78   : > { %1207 = vmatmul.msk.bf16.gmra.mxu0 %vm345_vm0, %v1357_v27  ;;  %1247 = vmatmul.msk.bf16.gmra.mxu3 %vm345_vm0, %v1364_v14 }
  0x79   : > { %1239 = vmatmul.msk.bf16.gmra.mxu1 %vm345_vm0, %v1356_v25  ;;  %v1384_v25 = vld [vmem:[%s1510_s30 + $0x68] sm:$0xff] }
  0x7a   : > { %1337 = vmatmul.msk.bf16.gmra.mxu2 %vm345_vm0, %v1379_v28 }
  0x88   : > { %1208 = vmatmul.msk.bf16.gmra.mxu0 %vm345_vm0, %v1358_v29  ;;  %1248 = vmatmul.msk.bf16.gmra.mxu3 %vm345_vm0, %v1365_v17 }
  0x89   : > { %1240 = vmatmul.msk.bf16.gmra.mxu1 %vm345_vm0, %v1357_v27 }
  0x8a   : > { %1338 = vmatmul.msk.bf16.gmra.mxu2 %vm345_vm0, %v1380_v30 }
  0x95   : > { %v403_v33 = vpop.f32.mrf.mxu0 }
  0x96   : > { %v518_v35 = vpop.f32.mrf.mxu1 }
  0x97   : > { %v519_v36 = vadd.f32 %v518_v35, %v403_v33 }
  0x98   : > { %1209 = vmatmul.msk.bf16.gmra.mxu0 %vm345_vm0, %v1359_v31  ;;  %1343 = vmatmul.msk.bf16.vlgmr.msra.gmra.mxu3 %vm345_vm0, %v1385_v32 }
  0x99   : > { %1241 = vmatmul.msk.bf16.gmra.mxu1 %vm345_vm0, %v1358_v29 }
  0x9a   : > { %1339 = vmatmul.msk.bf16.gmra.mxu2 %vm345_vm0, %v1381_v34 }
  0x9b   : > { %v1582_v37 = vpop.f32.mrf.mxu3 }
  0x9d   : > { %v792_v38 = vpop.f32.mrf.mxu2  ;;  %v405_v40 = vpop.f32.mrf.mxu0 }
  0x9e   : > { %v872_v39 = vadd.f32 %v792_v38, %v519_v36  ;;  %v520_v41 = vpop.f32.mrf.mxu1 }
  0x9f   : > { %v521_v44 = vadd.f32 %v520_v41, %v405_v40 }
  0xa0   : > { %v904_v42 = vmax.f32 %v872_v39, 0.0 }
  0xa2   : > { %v936_v43 = vpack.c.bf16 %v904_v42, %v904_v42 }
  0xa3   : > { %v1592_v45 = vpop.f32.mrf.mxu3 }
  0xa4   : > { %969 = vst.msk [vmem:[%s1588_s14] sm:$0xf] %vm968_vm1, %v936_v43 }
  0xa5   : > { %v794_v46 = vpop.f32.mrf.mxu2  ;;  %v408_v50 = vpop.f32.mrf.mxu0 }
  0xa6   : > { %v873_v49 = vadd.f32 %v794_v46, %v521_v44  ;;  %v523_v52 = vpop.f32.mrf.mxu1 }
  0xa7   : > { %v524_v55 = vadd.f32 %v523_v52, %v408_v50 }
  0xa8   : > { %v905_v53 = vmax.f32 %v873_v49, 0.0  ;;  %1210 = vmatmul.msk.bf16.gmra.mxu0 %vm345_vm0, %v1360_v47  ;;  %1344 = vmatmul.msk.bf16.gmra.mxu3 %vm345_vm0, %v1386_v48 }
  0xa9   : > { %1242 = vmatmul.msk.bf16.gmra.mxu1 %vm345_vm0, %v1359_v31 }
  0xaa   : > { %v937_v54 = vpack.c.bf16 %v905_v53, %v905_v53  ;;  %1340 = vmatmul.msk.bf16.gmra.mxu2 %vm345_vm0, %v1382_v51 }
  0xab   : > { %v1603_v56 = vpop.f32.mrf.mxu3 }
  0xac   : > { %970 = vst.msk [vmem:[%s1588_s14 + $0x4] sm:$0xf] %vm968_vm1, %v937_v54 }
  0xad   : > { %v797_v57 = vpop.f32.mrf.mxu2  ;;  %v410_v59 = vpop.f32.mrf.mxu0 }
  0xae   : > { %v874_v58 = vadd.f32 %v797_v57, %v524_v55  ;;  %v525_v60 = vpop.f32.mrf.mxu1 }
  0xaf   : > { %v526_v63 = vadd.f32 %v525_v60, %v410_v59 }
  0xb0   : > { %v906_v61 = vmax.f32 %v874_v58, 0.0 }
  0xb2   : > { %v938_v62 = vpack.c.bf16 %v906_v61, %v906_v61 }
  0xb3   : > { %v1607_v0 = vpop.f32.mrf.mxu3 }
  0xb4   : > { %971 = vst.msk [vmem:[%s1588_s14 + $0x8] sm:$0xf] %vm968_vm1, %v938_v62 }
  0xb5   : > { %v799_v1 = vpop.f32.mrf.mxu2  ;;  %v413_v5 = vpop.f32.mrf.mxu0 }
  0xb6   : > { %v875_v4 = vadd.f32 %v799_v1, %v526_v63  ;;  %v528_v7 = vpop.f32.mrf.mxu1 }
  0xb7   : > { %v529_v10 = vadd.f32 %v528_v7, %v413_v5 }
  0xb8   : > { %v907_v8 = vmax.f32 %v875_v4, 0.0  ;;  %1211 = vmatmul.msk.bf16.gmra.mxu0 %vm345_vm0, %v1361_v2  ;;  %1345 = vmatmul.msk.bf16.gmra.mxu3 %vm345_vm0, %v1387_v3 }
  0xb9   : > { %1243 = vmatmul.msk.bf16.gmra.mxu1 %vm345_vm0, %v1360_v47 }
  0xba   : > { %v939_v9 = vpack.c.bf16 %v907_v8, %v907_v8  ;;  %1341 = vmatmul.msk.bf16.gmra.mxu2 %vm345_vm0, %v1383_v6 }
  0xbb   : > { %v1618_v11 = vpop.f32.mrf.mxu3 }
  0xbc   : > { %972 = vst.msk [vmem:[%s1588_s14 + $0xc] sm:$0xf] %vm968_vm1, %v939_v9 }
  0xbd   : > { %v802_v12 = vpop.f32.mrf.mxu2  ;;  %v415_v14 = vpop.f32.mrf.mxu0 }
  0xbe   : > { %v876_v13 = vadd.f32 %v802_v12, %v529_v10  ;;  %v530_v15 = vpop.f32.mrf.mxu1 }
  0xbf   : > { %v531_v18 = vadd.f32 %v530_v15, %v415_v14 }
  0xc0   : > { %v908_v16 = vmax.f32 %v876_v13, 0.0 }
  0xc2   : > { %v940_v17 = vpack.c.bf16 %v908_v16, %v908_v16 }
  0xc3   : > { %v1622_v19 = vpop.f32.mrf.mxu3 }
  0xc4   : > { %973 = vst.msk [vmem:[%s1588_s14 + $0x10] sm:$0xf] %vm968_vm1, %v940_v17 }
  0xc5   : > { %v804_v20 = vpop.f32.mrf.mxu2  ;;  %v418_v24 = vpop.f32.mrf.mxu0 }
  0xc6   : > { %v877_v22 = vadd.f32 %v804_v20, %v531_v18  ;;  %v533_v26 = vpop.f32.mrf.mxu1 }
  0xc7   : > { %v534_v29 = vadd.f32 %v533_v26, %v418_v24 }
  0xc8   : > { %v909_v27 = vmax.f32 %v877_v22, 0.0  ;;  %1212 = vmatmul.msk.bf16.gmra.mxu0 %vm345_vm0, %v1549_v23  ;;  %1346 = vmatmul.msk.bf16.gmra.mxu3 %vm345_vm0, %v1388_v21 }
  0xc9   : > { %1244 = vmatmul.msk.bf16.gmra.mxu1 %vm345_vm0, %v1361_v2 }
  0xca   : > { %v941_v28 = vpack.c.bf16 %v909_v27, %v909_v27  ;;  %1342 = vmatmul.msk.bf16.gmra.mxu2 %vm345_vm0, %v1384_v25 }
  0xcb   : > { %v1633_v30 = vpop.f32.mrf.mxu3 }
  0xcc   : > { %974 = vst.msk [vmem:[%s1588_s14 + $0x14] sm:$0xf] %vm968_vm1, %v941_v28 }
  0xcd   : > { %v807_v31 = vpop.f32.mrf.mxu2  ;;  %v420_v33 = vpop.f32.mrf.mxu0 }
  0xce   : > { %v878_v32 = vadd.f32 %v807_v31, %v534_v29  ;;  %v535_v34 = vpop.f32.mrf.mxu1 }
  0xcf   : > { %v536_v23 = vadd.f32 %v535_v34, %v420_v33 }
  0xd0   : > { %v910_v35 = vmax.f32 %v878_v32, 0.0 }
  0xd2   : > { %v942_v36 = vpack.c.bf16 %v910_v35, %v910_v35 }
  0xd3   : > { %v1637_v38 = vpop.f32.mrf.mxu3 }
  0xd4   : > { %975 = vst.msk [vmem:[%s1588_s14 + $0x18] sm:$0xf] %vm968_vm1, %v942_v36 }
  0xd5   : > { %v809_v39 = vpop.f32.mrf.mxu2  ;;  %v423_v41 = vpop.f32.mrf.mxu0 }
  0xd6   : > { %v879_v40 = vadd.f32 %v809_v39, %v536_v23  ;;  %v538_v42 = vpop.f32.mrf.mxu1 }
  0xd7   : > { %v539_v46 = vadd.f32 %v538_v42, %v423_v41 }
  0xd8   : > { %v911_v43 = vmax.f32 %v879_v40, 0.0 }
  0xda   : > { %v943_v44 = vpack.c.bf16 %v911_v43, %v911_v43 }
  0xdb   : > { %v1641_v47 = vpop.f32.mrf.mxu3 }
  0xdc   : > { %976 = vst.msk [vmem:[%s1588_s14 + $0x1c] sm:$0xf] %vm968_vm1, %v943_v44 }
  0xdd   : > { %v812_v48 = vpop.f32.mrf.mxu2  ;;  %v425_v50 = vpop.f32.mrf.mxu0 }
  0xde   : > { %v880_v49 = vadd.f32 %v812_v48, %v539_v46  ;;  %v540_v51 = vpop.f32.mrf.mxu1 }
  0xdf   : > { %v541_v54 = vadd.f32 %v540_v51, %v425_v50 }
  0xe0   : > { %v912_v52 = vmax.f32 %v880_v49, 0.0 }
  0xe2   : > { %v944_v53 = vpack.c.bf16 %v912_v52, %v912_v52 }
  0xe3   : > { %v1645_v55 = vpop.f32.mrf.mxu3 }
  0xe4   : > { %977 = vst.msk [vmem:[%s1588_s14 + $0x20] sm:$0xf] %vm968_vm1, %v944_v53 }
  0xe5   : > { %v814_v57 = vpop.f32.mrf.mxu2  ;;  %v428_v59 = vpop.f32.mrf.mxu0 }
  0xe6   : > { %v881_v58 = vadd.f32 %v814_v57, %v541_v54  ;;  %v543_v60 = vpop.f32.mrf.mxu1 }
  0xe7   : > { %v544_v63 = vadd.f32 %v543_v60, %v428_v59 }
  0xe8   : > { %v913_v61 = vmax.f32 %v881_v58, 0.0  ;;  %v579_v58 = vadd.f32 %v1641_v47, %v1582_v37 }
  0xea   : > { %v945_v62 = vpack.c.bf16 %v913_v61, %v913_v61 }
  0xeb   : > { %v1649_v1 = vpop.f32.mrf.mxu3 }
  0xec   : > { %978 = vst.msk [vmem:[%s1588_s14 + $0x24] sm:$0xf] %vm968_vm1, %v945_v62 }
  0xed   : > { %v817_v2 = vpop.f32.mrf.mxu2  ;;  %v430_v4 = vpop.f32.mrf.mxu0 }
  0xee   : > { %v882_v3 = vadd.f32 %v817_v2, %v544_v63  ;;  %v545_v5 = vpop.f32.mrf.mxu1 }
  0xef   : > { %v546_v8 = vadd.f32 %v545_v5, %v430_v4 }
  0xf0   : > { %v914_v6 = vmax.f32 %v882_v3, 0.0 }
  0xf2   : > { %v946_v7 = vpack.c.bf16 %v914_v6, %v914_v6 }
  0xf3   : > { %v1653_v9 = vpop.f32.mrf.mxu3 }
  0xf4   : > { %979 = vst.msk [vmem:[%s1588_s14 + $0x28] sm:$0xf] %vm968_vm1, %v946_v7  ;;  %v581_v7 = vadd.f32 %v1645_v55, %v1592_v45  ;;  %v584_v45 = vadd.f32 %v1649_v1, %v1603_v56 }
  0xf5   : > { %v819_v10 = vpop.f32.mrf.mxu2  ;;  %v433_v13 = vpop.f32.mrf.mxu0 }
  0xf6   : > { %v883_v12 = vadd.f32 %v819_v10, %v546_v8  ;;  %v548_v14 = vpop.f32.mrf.mxu1 }
  0xf7   : > { %v549_v17 = vadd.f32 %v548_v14, %v433_v13 }
  0xf8   : > { %v915_v15 = vmax.f32 %v883_v12, 0.0 }
  0xfa   : > { %v947_v16 = vpack.c.bf16 %v915_v15, %v915_v15 }
  0xfb   : > { %v1657_v18 = vpop.f32.mrf.mxu3 }
  0xfc   : > { %980 = vst.msk [vmem:[%s1588_s14 + $0x2c] sm:$0xf] %vm968_vm1, %v947_v16 }
  0xfd   : > { %v822_v20 = vpop.f32.mrf.mxu2  ;;  %v435_v22 = vpop.f32.mrf.mxu0 }
  0xfe   : > { %v884_v21 = vadd.f32 %v822_v20, %v549_v17  ;;  %v550_v24 = vpop.f32.mrf.mxu1 }
  0xff   : > { %v551_v27 = vadd.f32 %v550_v24, %v435_v22 }
 0x100   : > { %v916_v25 = vmax.f32 %v884_v21, 0.0 }
 0x102   : > { %v948_v26 = vpack.c.bf16 %v916_v25, %v916_v25 }
 0x103   : > { %v1661_v28 = vpop.f32.mrf.mxu3 }
 0x104   : > { %981 = vst.msk [vmem:[%s1588_s14 + $0x30] sm:$0xf] %vm968_vm1, %v948_v26 }
 0x105   : > { %v824_v29 = vpop.f32.mrf.mxu2  ;;  %v438_v32 = vpop.f32.mrf.mxu0 }
 0x106   : > { %v885_v31 = vadd.f32 %v824_v29, %v551_v27  ;;  %v553_v33 = vpop.f32.mrf.mxu1 }
 0x107   : > { %v554_v36 = vadd.f32 %v553_v33, %v438_v32 }
 0x108   : > { %v917_v34 = vmax.f32 %v885_v31, 0.0 }
 0x10a   : > { %v949_v35 = vpack.c.bf16 %v917_v34, %v917_v34  ;;  %v586_v34 = vadd.f32 %v1653_v9, %v1607_v0  ;;  %v589_v0 = vadd.f32 %v1657_v18, %v1618_v11 }
 0x10b   : > { %v1665_v23 = vpop.f32.mrf.mxu3 }
 0x10c   : > { %982 = vst.msk [vmem:[%s1588_s14 + $0x34] sm:$0xf] %vm968_vm1, %v949_v35 }
 0x10d   : > { %v827_v39 = vpop.f32.mrf.mxu2  ;;  %v440_v41 = vpop.f32.mrf.mxu0 }
 0x10e   : > { %v886_v40 = vadd.f32 %v827_v39, %v554_v36  ;;  %v555_v42 = vpop.f32.mrf.mxu1 }
 0x10f   : > { %v556_v46 = vadd.f32 %v555_v42, %v440_v41 }
 0x110   : > { %v918_v43 = vmax.f32 %v886_v40, 0.0 }
 0x112   : > { %v950_v44 = vpack.c.bf16 %v918_v43, %v918_v43 }
 0x113   : > { %v1669_v48 = vpop.f32.mrf.mxu3 }
 0x114   : > { %983 = vst.msk [vmem:[%s1588_s14 + $0x38] sm:$0xf] %vm968_vm1, %v950_v44 }
 0x115   : > { %v829_v49 = vpop.f32.mrf.mxu2  ;;  %v443_v51 = vpop.f32.mrf.mxu0 }
 0x116   : > { %v887_v50 = vadd.f32 %v829_v49, %v556_v46  ;;  %v558_v52 = vpop.f32.mrf.mxu1 }
 0x117   : > { %v559_v57 = vadd.f32 %v558_v52, %v443_v51 }
 0x118   : > { %v919_v53 = vmax.f32 %v887_v50, 0.0 }
 0x11a   : > { %v951_v54 = vpack.c.bf16 %v919_v53, %v919_v53 }
 0x11b   : > { %v852_v59 = vpop.f32.mrf.mxu3 }
 0x11c   : > { %984 = vst.msk [vmem:[%s1588_s14 + $0x3c] sm:$0xf] %vm968_vm1, %v951_v54  ;;  %v896_v61 = vadd.f32 %v852_v59, %v579_v58 }
 0x11d   : > { %v832_v60 = vpop.f32.mrf.mxu2  ;;  %v445_v63 = vpop.f32.mrf.mxu0 }
 0x11e   : > { %v888_v62 = vadd.f32 %v832_v60, %v559_v57  ;;  %v928_v2 = vmax.f32 %v896_v61, 0.0  ;;  %v560_v3 = vpop.f32.mrf.mxu1  ;;  %v591_v61 = vadd.f32 %v1661_v28, %v1622_v19  ;;  %v594_v19 = vadd.f32 %v1665_v23, %v1633_v30 }
 0x11f   : > { %v561_v37 = vadd.f32 %v560_v3, %v445_v63 }
 0x120   : > { %v920_v4 = vmax.f32 %v888_v62, 0.0  ;;  %v960_v5 = vpack.c.bf16 %v928_v2, %v928_v2 }
 0x122   : > { %v952_v6 = vpack.c.bf16 %v920_v4, %v920_v4  ;;  %993 = vst.msk [vmem:[%s1588_s14 + $0x60] sm:$0xf] %vm968_vm1, %v960_v5 }
 0x123   : > { %v854_v47 = vpop.f32.mrf.mxu3 }
 0x124   : > { %985 = vst.msk [vmem:[%s1588_s14 + $0x40] sm:$0xf] %vm968_vm1, %v952_v6  ;;  %v897_v10 = vadd.f32 %v854_v47, %v581_v7 }
 0x125   : > { %v834_v8 = vpop.f32.mrf.mxu2  ;;  %v448_v13 = vpop.f32.mrf.mxu0 }
 0x126   : > { %v889_v12 = vadd.f32 %v834_v8, %v561_v37  ;;  %v929_v14 = vmax.f32 %v897_v10, 0.0  ;;  %v563_v15 = vpop.f32.mrf.mxu1 }
 0x127   : > { %v564_v21 = vadd.f32 %v563_v15, %v448_v13 }
 0x128   : > { %v921_v16 = vmax.f32 %v889_v12, 0.0  ;;  %v961_v17 = vpack.c.bf16 %v929_v14, %v929_v14 }
 0x12a   : > { %v953_v20 = vpack.c.bf16 %v921_v16, %v921_v16  ;;  %994 = vst.msk [vmem:[%s1588_s14 + $0x64] sm:$0xf] %vm968_vm1, %v961_v17 }
 0x12b   : > { %v857_v55 = vpop.f32.mrf.mxu3 }
 0x12c   : > { %986 = vst.msk [vmem:[%s1588_s14 + $0x44] sm:$0xf] %vm968_vm1, %v953_v20  ;;  %v898_v24 = vadd.f32 %v857_v55, %v584_v45 }
 0x12d   : > { %v837_v22 = vpop.f32.mrf.mxu2  ;;  %v450_v26 = vpop.f32.mrf.mxu0 }
 0x12e   : > { %v890_v25 = vadd.f32 %v837_v22, %v564_v21  ;;  %v930_v27 = vmax.f32 %v898_v24, 0.0  ;;  %v565_v29 = vpop.f32.mrf.mxu1  ;;  %v596_v21 = vadd.f32 %v1669_v48, %v1637_v38 }
 0x12f   : > { %v566_v56 = vadd.f32 %v565_v29, %v450_v26 }
 0x130   : > { %v922_v31 = vmax.f32 %v890_v25, 0.0  ;;  %v962_v32 = vpack.c.bf16 %v930_v27, %v930_v27 }
 0x132   : > { %v954_v33 = vpack.c.bf16 %v922_v31, %v922_v31  ;;  %995 = vst.msk [vmem:[%s1588_s14 + $0x68] sm:$0xf] %vm968_vm1, %v962_v32 }
 0x133   : > { %v859_v1 = vpop.f32.mrf.mxu3 }
 0x134   : > { %987 = vst.msk [vmem:[%s1588_s14 + $0x48] sm:$0xf] %vm968_vm1, %v954_v33  ;;  %v899_v36 = vadd.f32 %v859_v1, %v586_v34 }
 0x135   : > { %v839_v35 = vpop.f32.mrf.mxu2  ;;  %v453_v40 = vpop.f32.mrf.mxu0 }
 0x136   : > { %v891_v39 = vadd.f32 %v839_v35, %v566_v56  ;;  %v931_v41 = vmax.f32 %v899_v36, 0.0  ;;  %v568_v42 = vpop.f32.mrf.mxu1 }
 0x137   : > { %v569_v49 = vadd.f32 %v568_v42, %v453_v40 }
 0x138   : > { %v923_v43 = vmax.f32 %v891_v39, 0.0  ;;  %v963_v44 = vpack.c.bf16 %v931_v41, %v931_v41 }
 0x13a   : > { %v955_v46 = vpack.c.bf16 %v923_v43, %v923_v43  ;;  %996 = vst.msk [vmem:[%s1588_s14 + $0x6c] sm:$0xf] %vm968_vm1, %v963_v44 }
 0x13b   : > { %v862_v9 = vpop.f32.mrf.mxu3 }
 0x13c   : > { %988 = vst.msk [vmem:[%s1588_s14 + $0x4c] sm:$0xf] %vm968_vm1, %v955_v46  ;;  %v900_v51 = vadd.f32 %v862_v9, %v589_v0 }
 0x13d   : > { %v842_v50 = vpop.f32.mrf.mxu2  ;;  %v455_v53 = vpop.f32.mrf.mxu0 }
 0x13e   : > { %v892_v52 = vadd.f32 %v842_v50, %v569_v49  ;;  %v932_v54 = vmax.f32 %v900_v51, 0.0  ;;  %v570_v57 = vpop.f32.mrf.mxu1 }
 0x13f   : > { %v571_v11 = vadd.f32 %v570_v57, %v455_v53 }
 0x140   : > { %v924_v58 = vmax.f32 %v892_v52, 0.0  ;;  %v964_v59 = vpack.c.bf16 %v932_v54, %v932_v54 }
 0x142   : > { %v956_v60 = vpack.c.bf16 %v924_v58, %v924_v58  ;;  %997 = vst.msk [vmem:[%s1588_s14 + $0x70] sm:$0xf] %vm968_vm1, %v964_v59 }
 0x143   : > { %v864_v18 = vpop.f32.mrf.mxu3 }
 0x144   : > { %989 = vst.msk [vmem:[%s1588_s14 + $0x50] sm:$0xf] %vm968_vm1, %v956_v60  ;;  %v901_v63 = vadd.f32 %v864_v18, %v591_v61 }
 0x145   : > { %v844_v62 = vpop.f32.mrf.mxu2  ;;  %v458_v4 = vpop.f32.mrf.mxu0 }
 0x146   : > { %v893_v2 = vadd.f32 %v844_v62, %v571_v11  ;;  %v933_v3 = vmax.f32 %v901_v63, 0.0  ;;  %v573_v5 = vpop.f32.mrf.mxu1 }
 0x147   : > { %v574_v47 = vadd.f32 %v573_v5, %v458_v4 }
 0x148   : > { %v925_v6 = vmax.f32 %v893_v2, 0.0  ;;  %v965_v7 = vpack.c.bf16 %v933_v3, %v933_v3 }
 0x14a   : > { %v957_v37 = vpack.c.bf16 %v925_v6, %v925_v6  ;;  %998 = vst.msk [vmem:[%s1588_s14 + $0x74] sm:$0xf] %vm968_vm1, %v965_v7 }
 0x14b   : > { %v867_v28 = vpop.f32.mrf.mxu3 }
 0x14c   : > { %990 = vst.msk [vmem:[%s1588_s14 + $0x54] sm:$0xf] %vm968_vm1, %v957_v37  ;;  %v902_v10 = vadd.f32 %v867_v28, %v594_v19 }
 0x14d   : > { %v847_v8 = vpop.f32.mrf.mxu2  ;;  %v460_v16 = vpop.f32.mrf.mxu0 }
 0x14e   : > { %v894_v12 = vadd.f32 %v847_v8, %v574_v47  ;;  %v934_v13 = vmax.f32 %v902_v10, 0.0  ;;  %v575_v17 = vpop.f32.mrf.mxu1 }
 0x14f   : > { %v576_v30 = vadd.f32 %v575_v17, %v460_v16 }
 0x150   : > { %v926_v14 = vmax.f32 %v894_v12, 0.0  ;;  %v966_v15 = vpack.c.bf16 %v934_v13, %v934_v13 }
 0x152   : > { %v958_v20 = vpack.c.bf16 %v926_v14, %v926_v14  ;;  %999 = vst.msk [vmem:[%s1588_s14 + $0x78] sm:$0xf] %vm968_vm1, %v966_v15 }
 0x153   : > { %v869_v23 = vpop.f32.mrf.mxu3 }
 0x154   : > { %991 = vst.msk [vmem:[%s1588_s14 + $0x58] sm:$0xf] %vm968_vm1, %v958_v20  ;;  %v903_v55 = vadd.f32 %v869_v23, %v596_v21 }
 0x155   : > { %v849_v45 = vpop.f32.mrf.mxu2 }
 0x156   : > { %v895_v22 = vadd.f32 %v849_v45, %v576_v30  ;;  %v935_v24 = vmax.f32 %v903_v55, 0.0 }
 0x158   : > { %v927_v25 = vmax.f32 %v895_v22, 0.0  ;;  %v967_v26 = vpack.c.bf16 %v935_v24, %v935_v24 }
 0x15a   : > { %v959_v27 = vpack.c.bf16 %v927_v25, %v927_v25  ;;  %1000 = vst.msk [vmem:[%s1588_s14 + $0x7c] sm:$0xf] %vm968_vm1, %v967_v26 }
 0x15c   : > { %992 = vst.msk [vmem:[%s1588_s14 + $0x5c] sm:$0xf] %vm968_vm1, %v959_v27 }
 0x15d PF: > { %s12_s11 = sadd.s32 1, %s1448_s11   ;;  %s1733_s9 = smov %s1444_s10 }
 0x15e   : > { %p9_p5 = scmp.ge.s32.totalorder %s12_s11, 4   ;;  %s1734_s10 = smov %s1736_s12 }
 0x160   :  { %11 = sbr.rel (!%p9_p5) target bundleno = 2 (0x2), region = 63 }

// kernel: unetres_forward.41
= control target key start
LH: loop header
LB: loop body
LE: loop exit
PB: predicated region body
PF: predicated region fallthrough
CT: control target
= control target key end

     0   :  { %vm100_vm0 = vcmask 523264   ;;  %vm190_vm1 = vcmask 257024   ;;  %s414_s1 = inlined_call_operand.vmem [shape: bf16[64,32], index: 1, kind: input, shape index: {}]   ;;  %s415_s0 = inlined_call_operand.vmem [shape: bf16[128,64], index: 0, kind: input, shape index: {}]   ;;  %s416_s2 = inlined_call_operand.vmem [shape: bf16[128,32], index: 2, kind: output, shape index: {}]  }
   0x1   :  { %v278_v0 = vld [vmem:[%s414_s1 + $0x18] sm:$0xff]  ;;  %v277_v1 = vld [vmem:[%s414_s1 + $0x10] sm:$0xff]  ;;  %v276_v2 = vld [vmem:[%s414_s1 + $0x8] sm:$0xff] }
   0x2   :  { %129 = vmatpush.bf16.msra.mxu0 %v278_v0  ;;  %279 = vmatpush.bf16.msra.mxu1 %v278_v0  ;;  %v275_v3 = vld [vmem:[%s414_s1] sm:$0xff]  ;;  %v269_v5 = vld [vmem:[%s415_s0 + $0x10] sm:$0xff]  ;;  %v268_v8 = vld [vmem:[%s415_s0 + $0x8] sm:$0xff] }
   0x3   :  { %280 = vmatpush.bf16.msra.mxu2 %v278_v0  ;;  %281 = vmatpush.bf16.msra.mxu3 %v278_v0  ;;  %v267_v4 = vld [vmem:[%s415_s0] sm:$0xff]  ;;  %v273_v7 = vld [vmem:[%s415_s0 + $0x30] sm:$0xff]  ;;  %v270_v9 = vld [vmem:[%s415_s0 + $0x18] sm:$0xff] }
   0x4   :  { %v271_v6 = vld [vmem:[%s415_s0 + $0x20] sm:$0xff]  ;;  %v272_v10 = vld [vmem:[%s415_s0 + $0x28] sm:$0xff]  ;;  %v274_v11 = vld [vmem:[%s415_s0 + $0x38] sm:$0xff] }
   0x6   :  { %130 = vmatpush.bf16.msra.mxu0 %v277_v1  ;;  %282 = vmatpush.bf16.msra.mxu1 %v277_v1 }
   0x7   :  { %283 = vmatpush.bf16.msra.mxu2 %v277_v1  ;;  %284 = vmatpush.bf16.msra.mxu3 %v277_v1 }
   0xa   :  { %131 = vmatpush.bf16.msra.mxu0 %v276_v2  ;;  %285 = vmatpush.bf16.msra.mxu1 %v276_v2 }
   0xb   :  { %286 = vmatpush.bf16.msra.mxu2 %v276_v2  ;;  %287 = vmatpush.bf16.msra.mxu3 %v276_v2 }
   0xe   :  { %132 = vmatpush.bf16.msra.mxu0 %v275_v3  ;;  %288 = vmatpush.bf16.msra.mxu1 %v275_v3 }
   0xf   :  { %289 = vmatpush.bf16.msra.mxu2 %v275_v3  ;;  %290 = vmatpush.bf16.msra.mxu3 %v275_v3 }
  0x11   :  { %259 = vmatmul.msk.bf16.vlgmr.msra.gmra.mxu0 %vm100_vm0, %v267_v4  ;;  %261 = vmatmul.msk.bf16.vlgmr.msra.gmra.mxu1 %vm100_vm0, %v269_v5 }
  0x12   :  { %263 = vmatmul.msk.bf16.vlgmr.msra.gmra.mxu2 %vm100_vm0, %v271_v6  ;;  %265 = vmatmul.msk.bf16.vlgmr.msra.gmra.mxu3 %vm100_vm0, %v273_v7 }
  0x21   :  { %260 = vmatmul.msk.bf16.gmra.mxu0 %vm100_vm0, %v268_v8  ;;  %262 = vmatmul.msk.bf16.gmra.mxu1 %vm100_vm0, %v270_v9 }
  0x22   :  { %264 = vmatmul.msk.bf16.gmra.mxu2 %vm100_vm0, %v272_v10  ;;  %266 = vmatmul.msk.bf16.gmra.mxu3 %vm100_vm0, %v274_v11 }
  0x8e   :  { %v134_v12 = vpop.f32.mrf.mxu0  ;;  %v144_v13 = vpop.f32.mrf.mxu1 }
  0x8f   :  { %v174_v14 = vpack.c.bf16 %v134_v12, %v134_v12  ;;  %v178_v15 = vpack.c.bf16 %v144_v13, %v144_v13 }
  0x91   :  { %191 = vst.msk [vmem:[%s416_s2] sm:$0xf] %vm190_vm1, %v174_v14 }
  0x92   :  { %195 = vst.msk [vmem:[%s416_s2 + $0x10] sm:$0xf] %vm190_vm1, %v178_v15 }
  0x95   :  { %v154_v16 = vpop.f32.mrf.mxu2  ;;  %v164_v17 = vpop.f32.mrf.mxu3 }
  0x96   :  { %v182_v18 = vpack.c.bf16 %v154_v16, %v154_v16  ;;  %v186_v19 = vpack.c.bf16 %v164_v17, %v164_v17  ;;  %v136_v20 = vpop.f32.mrf.mxu0  ;;  %v146_v21 = vpop.f32.mrf.mxu1 }
  0x97   :  { %v175_v22 = vpack.c.bf16 %v136_v20, %v136_v20  ;;  %v179_v23 = vpack.c.bf16 %v146_v21, %v146_v21 }
  0x98   :  { %199 = vst.msk [vmem:[%s416_s2 + $0x20] sm:$0xf] %vm190_vm1, %v182_v18 }
  0x99   :  { %203 = vst.msk [vmem:[%s416_s2 + $0x30] sm:$0xf] %vm190_vm1, %v186_v19 }
  0x9a   :  { %192 = vst.msk [vmem:[%s416_s2 + $0x4] sm:$0xf] %vm190_vm1, %v175_v22 }
  0x9b   :  { %196 = vst.msk [vmem:[%s416_s2 + $0x14] sm:$0xf] %vm190_vm1, %v179_v23 }
  0x9d   :  { %v156_v24 = vpop.f32.mrf.mxu2  ;;  %v166_v25 = vpop.f32.mrf.mxu3 }
  0x9e   :  { %v183_v26 = vpack.c.bf16 %v156_v24, %v156_v24  ;;  %v187_v27 = vpack.c.bf16 %v166_v25, %v166_v25  ;;  %v139_v28 = vpop.f32.mrf.mxu0  ;;  %v149_v29 = vpop.f32.mrf.mxu1 }
  0x9f   :  { %v176_v30 = vpack.c.bf16 %v139_v28, %v139_v28  ;;  %v180_v31 = vpack.c.bf16 %v149_v29, %v149_v29 }
  0xa0   :  { %200 = vst.msk [vmem:[%s416_s2 + $0x24] sm:$0xf] %vm190_vm1, %v183_v26 }
  0xa1   :  { %204 = vst.msk [vmem:[%s416_s2 + $0x34] sm:$0xf] %vm190_vm1, %v187_v27 }
  0xa2   :  { %193 = vst.msk [vmem:[%s416_s2 + $0x8] sm:$0xf] %vm190_vm1, %v176_v30 }
  0xa3   :  { %197 = vst.msk [vmem:[%s416_s2 + $0x18] sm:$0xf] %vm190_vm1, %v180_v31 }
  0xa5   :  { %v159_v32 = vpop.f32.mrf.mxu2  ;;  %v169_v33 = vpop.f32.mrf.mxu3 }
  0xa6   :  { %v184_v34 = vpack.c.bf16 %v159_v32, %v159_v32  ;;  %v188_v35 = vpack.c.bf16 %v169_v33, %v169_v33  ;;  %v141_v36 = vpop.f32.mrf.mxu0  ;;  %v151_v37 = vpop.f32.mrf.mxu1 }
  0xa7   :  { %v177_v38 = vpack.c.bf16 %v141_v36, %v141_v36  ;;  %v181_v39 = vpack.c.bf16 %v151_v37, %v151_v37 }
  0xa8   :  { %201 = vst.msk [vmem:[%s416_s2 + $0x28] sm:$0xf] %vm190_vm1, %v184_v34 }
  0xa9   :  { %205 = vst.msk [vmem:[%s416_s2 + $0x38] sm:$0xf] %vm190_vm1, %v188_v35 }
  0xaa   :  { %194 = vst.msk [vmem:[%s416_s2 + $0xc] sm:$0xf] %vm190_vm1, %v177_v38 }
  0xab   :  { %198 = vst.msk [vmem:[%s416_s2 + $0x1c] sm:$0xf] %vm190_vm1, %v181_v39 }
  0xad   :  { %v161_v40 = vpop.f32.mrf.mxu2  ;;  %v171_v41 = vpop.f32.mrf.mxu3 }
  0xae   :  { %v185_v42 = vpack.c.bf16 %v161_v40, %v161_v40  ;;  %v189_v43 = vpack.c.bf16 %v171_v41, %v171_v41 }
  0xb0   :  { %202 = vst.msk [vmem:[%s416_s2 + $0x2c] sm:$0xf] %vm190_vm1, %v185_v42 }
  0xb1   :  { %206 = vst.msk [vmem:[%s416_s2 + $0x3c] sm:$0xf] %vm190_vm1, %v189_v43 }

// kernel: unetres_forward.42
= control target key start
LH: loop header
LB: loop body
LE: loop exit
PB: predicated region body
PF: predicated region fallthrough
CT: control target
= control target key end

     0   :  { %s950_s9 = smov 0   ;;  %s952_s10 = smov 0   ;;  %s1075_s0 = inlined_call_operand.vmem [shape: bf16[2,80,96], index: 0, kind: input, shape index: {}]   ;;  %s1076_s1 = inlined_call_operand.vmem [shape: bf16[3,96,32], index: 1, kind: input, shape index: {}]   ;;  %s1077_s2 = inlined_call_operand.vmem [shape: bf16[2,64,32], index: 2, kind: output, shape index: {}]  }
   0x1   :  { %s954_s11 = smov 0  }
   0x2 LB: > { %s31_s12 = sadd.s32 1, %s929_s10  ;;  %p680_p0 = scmp.ge.s32.totalorder %s933_s11, 1  ;;  %s933_s11 = sphi %s954_s11, %s12_s11   ;;  %s929_s10 = sphi %s952_s10, %s1079_s10   ;;  %s925_s9 = sphi %s950_s9, %s1078_s9  }
   0x3   : > { %p33_p1 = scmp.ge.s32.totalorder %s31_s12, 2  ;;  %p144_p2 = scmp.lt.s32.totalorder %s933_s11, 3 }
   0x5   : > { %s1081_s12 = smov (%p33_p1, %s31_s12), 0  ;;  %p145_p3 = pnand %p680_p0, %p144_p2 }
   0x6   : > { %p177_p4 = scmp.lt.s32.totalorder (!%p145_p3), %s925_s9, 1 }
   0x7   : > { %148 = sbr.rel (%p145_p3) target bundleno = 232 (0xe8), region = 28 }
   0xc   : > { %v822_v0 = vld [vmem:[%s1076_s1 + $0x58] sm:$0xff]  ;;  %v816_v1 = vld [vmem:[%s1076_s1 + $0x28] sm:$0xff]  ;;  %v821_v3 = vld [vmem:[%s1076_s1 + $0x50] sm:$0xff]  ;;  %s1083_s9 = smov (!%p177_p4, %s925_s9), 1  ;;  %vm290_vm0 = vcmask 785408   ;;  %vm557_vm1 = vcmask 257024  }
   0xd   : > { %v832_v2 = vld [vmem:[%s1076_s1 + $0x88] sm:$0xff]  ;;  %305 = vmatpush.bf16.msra.mxu0 %v822_v0  ;;  %388 = vmatpush.bf16.msra.mxu1 %v816_v1  ;;  %v815_v4 = vld [vmem:[%s1076_s1 + $0x20] sm:$0xff]  ;;  %v814_v7 = vld [vmem:[%s1076_s1 + $0x18] sm:$0xff]  ;;  %s886_s17 = smul.u32 40, %s1083_s9  ;;  %s810_s29 = sshll.u32 %s1083_s9, 5 }
   0xe   : > { %506 = vmatpush.bf16.msra.mxu2 %v832_v2  ;;  %v831_v5 = vld [vmem:[%s1076_s1 + $0x80] sm:$0xff]  ;;  %872 = vmatpush.bf16.msra.mxu3 %v822_v0  ;;  %v820_v6 = vld [vmem:[%s1076_s1 + $0x48] sm:$0xff]  ;;  %v830_v8 = vld [vmem:[%s1076_s1 + $0x78] sm:$0xff]  ;;  %s1048_s4 = scalar_lea.vmem %s1077_s2, %s810_s29 }
   0xf   : > { %v819_v9 = vld [vmem:[%s1076_s1 + $0x40] sm:$0xff]  ;;  %v813_v10 = vld [vmem:[%s1076_s1 + $0x10] sm:$0xff]  ;;  %v818_v12 = vld [vmem:[%s1076_s1 + $0x38] sm:$0xff]  ;;  %s181_s26 = scalar_lea.vmem %s1075_s0, %s886_s17 }
  0x10   : > { %v829_v11 = vld [vmem:[%s1076_s1 + $0x70] sm:$0xff]  ;;  %v812_v13 = vld [vmem:[%s1076_s1 + $0x8] sm:$0xff]  ;;  %v811_v16 = vld [vmem:[%s1076_s1] sm:$0xff] }
  0x11   : > { %306 = vmatpush.bf16.msra.mxu0 %v821_v3  ;;  %389 = vmatpush.bf16.msra.mxu1 %v815_v4  ;;  %v828_v14 = vld [vmem:[%s1076_s1 + $0x68] sm:$0xff]  ;;  %v817_v15 = vld [vmem:[%s1076_s1 + $0x30] sm:$0xff]  ;;  %v827_v17 = vld [vmem:[%s1076_s1 + $0x60] sm:$0xff] }
  0x12   : > { %507 = vmatpush.bf16.msra.mxu2 %v831_v5  ;;  %873 = vmatpush.bf16.msra.mxu3 %v821_v3  ;;  %v880_v18 = vld [vmem:[%s181_s26 + $0x4] sm:$0xff]   ;;  %v882_v21 = vld [vmem:[%s181_s26 + $0xc] sm:$0xff]   ;;  %v884_v24 = vld [vmem:[%s181_s26 + $0x14] sm:$0xff]  }
  0x13   : > { %v834_v19 = vld [vmem:[%s181_s26] sm:$0xff]   ;;  %v823_v20 = vld [vmem:[%s181_s26 + $0x8] sm:$0xff]  ;;  %v824_v23 = vld [vmem:[%s181_s26 + $0x10] sm:$0xff] }
  0x14   : > { %v849_v22 = vld [vmem:[%s181_s26 + $0x8] sm:$0xff]   ;;  %v850_v25 = vld [vmem:[%s181_s26 + $0x10] sm:$0xff]   ;;  %v825_v26 = vld [vmem:[%s181_s26 + $0x18] sm:$0xff] }
  0x15   : > { %307 = vmatpush.bf16.msra.mxu0 %v820_v6  ;;  %390 = vmatpush.bf16.msra.mxu1 %v814_v7  ;;  %v885_v27 = vld [vmem:[%s181_s26 + $0x1c] sm:$0xff] }
  0x16   : > { %508 = vmatpush.bf16.msra.mxu2 %v830_v8  ;;  %874 = vmatpush.bf16.msra.mxu3 %v820_v6  ;;  %v851_v28 = vld [vmem:[%s181_s26 + $0x18] sm:$0xff]   ;;  %v826_v29 = vld [vmem:[%s181_s26 + $0x20] sm:$0xff] }
  0x19   : > { %308 = vmatpush.bf16.msra.mxu0 %v819_v9  ;;  %391 = vmatpush.bf16.msra.mxu1 %v813_v10 }
  0x1a   : > { %509 = vmatpush.bf16.msra.mxu2 %v829_v11  ;;  %875 = vmatpush.bf16.msra.mxu3 %v819_v9 }
  0x1d   : > { %309 = vmatpush.bf16.msra.mxu0 %v818_v12  ;;  %392 = vmatpush.bf16.msra.mxu1 %v812_v13 }
  0x1e   : > { %510 = vmatpush.bf16.msra.mxu2 %v828_v14  ;;  %876 = vmatpush.bf16.msra.mxu3 %v818_v12 }
  0x21   : > { %310 = vmatpush.bf16.msra.mxu0 %v817_v15  ;;  %393 = vmatpush.bf16.msra.mxu1 %v811_v16 }
  0x22   : > { %511 = vmatpush.bf16.msra.mxu2 %v827_v17  ;;  %877 = vmatpush.bf16.msra.mxu3 %v817_v15 }
  0x24   : > { %720 = vmatmul.msk.bf16.vlgmr.msra.gmra.mxu0 %vm290_vm0, %v880_v18  ;;  %748 = vmatmul.msk.bf16.vlgmr.msra.gmra.mxu1 %vm290_vm0, %v834_v19 }
  0x25   : > { %804 = vmatmul.msk.bf16.vlgmr.msra.gmra.mxu2 %vm290_vm0, %v823_v20  ;;  %721 = vmatmul.msk.bf16.vlgmr.msra.gmra.mxu3 %vm290_vm0, %v882_v21 }
  0x34   : > { %749 = vmatmul.msk.bf16.gmra.mxu1 %vm290_vm0, %v849_v22 }
  0x35   : > { %805 = vmatmul.msk.bf16.gmra.mxu2 %vm290_vm0, %v824_v23  ;;  %722 = vmatmul.msk.bf16.gmra.mxu3 %vm290_vm0, %v884_v24 }
  0x44   : > { %750 = vmatmul.msk.bf16.gmra.mxu1 %vm290_vm0, %v850_v25 }
  0x45   : > { %806 = vmatmul.msk.bf16.gmra.mxu2 %vm290_vm0, %v825_v26  ;;  %723 = vmatmul.msk.bf16.gmra.mxu3 %vm290_vm0, %v885_v27 }
  0x54   : > { %751 = vmatmul.msk.bf16.gmra.mxu1 %vm290_vm0, %v851_v28 }
  0x55   : > { %807 = vmatmul.msk.bf16.gmra.mxu2 %vm290_vm0, %v826_v29 }
  0xa1   : > { %v395_v30 = vpop.f32.mrf.mxu1  ;;  %v312_v31 = vpop.f32.mrf.mxu0 }
  0xa2   : > { %v396_v32 = vadd.f32 %v395_v30, %v312_v31 }
  0xa8   : > { %v513_v33 = vpop.f32.mrf.mxu2  ;;  %v317_v38 = vpop.f32.mrf.mxu3 }
  0xa9   : > { %v533_v34 = vadd.f32 %v513_v33, %v396_v32  ;;  %v397_v35 = vpop.f32.mrf.mxu1  ;;  %v314_v37 = vpop.f32.mrf.mxu0 }
  0xaa   : > { %v398_v40 = vadd.f32 %v397_v35, %v314_v37 }
  0xab   : > { %v541_v36 = vmax.f32 %v533_v34, 0.0 }
  0xad   : > { %v549_v39 = vpack.c.bf16 %v541_v36, %v541_v36 }
  0xaf   : > { %558 = vst.msk [vmem:[%s1048_s4] sm:$0xf] %vm557_vm1, %v549_v39 }
  0xb0   : > { %v515_v41 = vpop.f32.mrf.mxu2  ;;  %v319_v47 = vpop.f32.mrf.mxu3 }
  0xb1   : > { %v534_v42 = vadd.f32 %v515_v41, %v398_v40  ;;  %v400_v43 = vpop.f32.mrf.mxu1 }
  0xb2   : > { %v401_v46 = vadd.f32 %v400_v43, %v317_v38 }
  0xb3   : > { %v542_v44 = vmax.f32 %v534_v42, 0.0 }
  0xb5   : > { %v550_v45 = vpack.c.bf16 %v542_v44, %v542_v44 }
  0xb7   : > { %559 = vst.msk [vmem:[%s1048_s4 + $0x4] sm:$0xf] %vm557_vm1, %v550_v45 }
  0xb8   : > { %v518_v48 = vpop.f32.mrf.mxu2  ;;  %v322_v54 = vpop.f32.mrf.mxu3 }
  0xb9   : > { %v535_v49 = vadd.f32 %v518_v48, %v401_v46  ;;  %v402_v50 = vpop.f32.mrf.mxu1 }
  0xba   : > { %v403_v53 = vadd.f32 %v402_v50, %v319_v47 }
  0xbb   : > { %v543_v51 = vmax.f32 %v535_v49, 0.0 }
  0xbd   : > { %v551_v52 = vpack.c.bf16 %v543_v51, %v543_v51 }
  0xbf   : > { %560 = vst.msk [vmem:[%s1048_s4 + $0x8] sm:$0xf] %vm557_vm1, %v551_v52 }
  0xc0   : > { %v520_v55 = vpop.f32.mrf.mxu2  ;;  %v324_v0 = vpop.f32.mrf.mxu3 }
  0xc1   : > { %v536_v56 = vadd.f32 %v520_v55, %v403_v53  ;;  %v405_v57 = vpop.f32.mrf.mxu1 }
  0xc2   : > { %v406_v60 = vadd.f32 %v405_v57, %v322_v54 }
  0xc3   : > { %v544_v58 = vmax.f32 %v536_v56, 0.0 }
  0xc5   : > { %v552_v59 = vpack.c.bf16 %v544_v58, %v544_v58 }
  0xc7   : > { %561 = vst.msk [vmem:[%s1048_s4 + $0xc] sm:$0xf] %vm557_vm1, %v552_v59 }
  0xc8   : > { %v523_v61 = vpop.f32.mrf.mxu2  ;;  %v327_v8 = vpop.f32.mrf.mxu3 }
  0xc9   : > { %v537_v62 = vadd.f32 %v523_v61, %v406_v60  ;;  %v407_v63 = vpop.f32.mrf.mxu1 }
  0xca   : > { %v408_v3 = vadd.f32 %v407_v63, %v324_v0 }
  0xcb   : > { %v545_v1 = vmax.f32 %v537_v62, 0.0 }
  0xcd   : > { %v553_v2 = vpack.c.bf16 %v545_v1, %v545_v1 }
  0xcf   : > { %562 = vst.msk [vmem:[%s1048_s4 + $0x10] sm:$0xf] %vm557_vm1, %v553_v2 }
  0xd0   : > { %v525_v4 = vpop.f32.mrf.mxu2  ;;  %v329_v16 = vpop.f32.mrf.mxu3 }
  0xd1   : > { %v538_v5 = vadd.f32 %v525_v4, %v408_v3  ;;  %v410_v6 = vpop.f32.mrf.mxu1 }
  0xd2   : > { %v411_v10 = vadd.f32 %v410_v6, %v327_v8 }
  0xd3   : > { %v546_v7 = vmax.f32 %v538_v5, 0.0 }
  0xd5   : > { %v554_v9 = vpack.c.bf16 %v546_v7, %v546_v7 }
  0xd7   : > { %563 = vst.msk [vmem:[%s1048_s4 + $0x14] sm:$0xf] %vm557_vm1, %v554_v9 }
  0xd8   : > { %v528_v11 = vpop.f32.mrf.mxu2 }
  0xd9   : > { %v539_v12 = vadd.f32 %v528_v11, %v411_v10  ;;  %v412_v14 = vpop.f32.mrf.mxu1 }
  0xda   : > { %v413_v17 = vadd.f32 %v412_v14, %v329_v16 }
  0xdb   : > { %v547_v13 = vmax.f32 %v539_v12, 0.0 }
  0xdd   : > { %v555_v15 = vpack.c.bf16 %v547_v13, %v547_v13 }
  0xdf   : > { %564 = vst.msk [vmem:[%s1048_s4 + $0x18] sm:$0xf] %vm557_vm1, %v555_v15 }
  0xe0   : > { %v530_v18 = vpop.f32.mrf.mxu2 }
  0xe1   : > { %v540_v19 = vadd.f32 %v530_v18, %v413_v17 }
  0xe3   : > { %v548_v20 = vmax.f32 %v540_v19, 0.0 }
  0xe5   : > { %v556_v21 = vpack.c.bf16 %v548_v20, %v548_v20 }
  0xe7   : > { %565 = vst.msk [vmem:[%s1048_s4 + $0x1c] sm:$0xf] %vm557_vm1, %v556_v21 }
  0xe8 PF: > { %s12_s11 = sadd.s32 1, %s933_s11   ;;  %s1078_s9 = smov %s929_s10 }
  0xe9   : > { %p9_p5 = scmp.ge.s32.totalorder %s12_s11, 4   ;;  %s1079_s10 = smov %s1081_s12 }
  0xeb   :  { %11 = sbr.rel (!%p9_p5) target bundleno = 2 (0x2), region = 63 }

// kernel: unetres_forward.43
= control target key start
LH: loop header
LB: loop body
LE: loop exit
PB: predicated region body
PF: predicated region fallthrough
CT: control target
= control target key end

     0   :  { %s1088_s12 = smov 0   ;;  %s1090_s13 = smov 0   ;;  %s1222_s0 = inlined_call_operand.vmem [shape: bf16[2,80,96], index: 0, kind: input, shape index: {}]   ;;  %s1223_s1 = inlined_call_operand.vmem [shape: bf16[3,96,32], index: 1, kind: input, shape index: {}]   ;;  %s1224_s2 = inlined_call_operand.vmem [shape: bf16[2,64,32], index: 2, kind: input, shape index: {}]   ;;  %s1225_s3 = inlined_call_operand.vmem [shape: bf16[2,64,32], index: 3, kind: output, shape index: {}]  }
   0x1   :  { %s1092_s14 = smov 0  }
   0x2 LB: > { %s32_s15 = sadd.s32 1, %s1062_s13  ;;  %p791_p0 = scmp.ge.s32.totalorder %s1066_s14, 1  ;;  %s1066_s14 = sphi %s1092_s14, %s13_s14   ;;  %s1062_s13 = sphi %s1090_s13, %s1227_s13   ;;  %s1058_s12 = sphi %s1088_s12, %s1226_s12  }
   0x3   : > { %p34_p1 = scmp.ge.s32.totalorder %s32_s15, 2  ;;  %p191_p2 = scmp.lt.s32.totalorder %s1066_s14, 3 }
   0x5   : > { %s1229_s15 = smov (%p34_p1, %s32_s15), 0  ;;  %p192_p3 = pnand %p791_p0, %p191_p2 }
   0x6   : > { %p238_p4 = scmp.lt.s32.totalorder (!%p192_p3), %s1058_s12, 1 }
   0x7   : > { %195 = sbr.rel (%p192_p3) target bundleno = 232 (0xe8), region = 32 }
   0xc   : > { %v936_v0 = vld [vmem:[%s1223_s1 + $0x58] sm:$0xff]  ;;  %v930_v1 = vld [vmem:[%s1223_s1 + $0x28] sm:$0xff]  ;;  %v935_v3 = vld [vmem:[%s1223_s1 + $0x50] sm:$0xff]  ;;  %s1231_s12 = smov (!%p238_p4, %s1058_s12), 1  ;;  %vm364_vm0 = vcmask 785408   ;;  %vm647_vm1 = vcmask 257024  }
   0xd   : > { %v946_v2 = vld [vmem:[%s1223_s1 + $0x88] sm:$0xff]  ;;  %379 = vmatpush.bf16.msra.mxu0 %v936_v0  ;;  %462 = vmatpush.bf16.msra.mxu1 %v930_v1  ;;  %v929_v4 = vld [vmem:[%s1223_s1 + $0x20] sm:$0xff]  ;;  %v928_v7 = vld [vmem:[%s1223_s1 + $0x18] sm:$0xff]  ;;  %s1019_s21 = smul.u32 40, %s1231_s12  ;;  %s923_s6 = sshll.u32 %s1231_s12, 5 }
   0xe   : > { %580 = vmatpush.bf16.msra.mxu2 %v946_v2  ;;  %v945_v5 = vld [vmem:[%s1223_s1 + $0x80] sm:$0xff]  ;;  %1005 = vmatpush.bf16.msra.mxu3 %v936_v0  ;;  %v934_v6 = vld [vmem:[%s1223_s1 + $0x48] sm:$0xff]  ;;  %v944_v8 = vld [vmem:[%s1223_s1 + $0x78] sm:$0xff]  ;;  %s1186_s9 = scalar_lea.vmem %s1224_s2, %s923_s6  ;;  %s1192_s12 = scalar_lea.vmem %s1225_s3, %s923_s6 }
   0xf   : > { %v933_v9 = vld [vmem:[%s1223_s1 + $0x40] sm:$0xff]  ;;  %v927_v10 = vld [vmem:[%s1223_s1 + $0x10] sm:$0xff]  ;;  %v932_v12 = vld [vmem:[%s1223_s1 + $0x38] sm:$0xff]  ;;  %s242_s30 = scalar_lea.vmem %s1222_s0, %s1019_s21 }
  0x10   : > { %v943_v11 = vld [vmem:[%s1223_s1 + $0x70] sm:$0xff]  ;;  %v926_v13 = vld [vmem:[%s1223_s1 + $0x8] sm:$0xff]  ;;  %v925_v16 = vld [vmem:[%s1223_s1] sm:$0xff] }
  0x11   : > { %380 = vmatpush.bf16.msra.mxu0 %v935_v3  ;;  %463 = vmatpush.bf16.msra.mxu1 %v929_v4  ;;  %v942_v14 = vld [vmem:[%s1223_s1 + $0x68] sm:$0xff]  ;;  %v931_v15 = vld [vmem:[%s1223_s1 + $0x30] sm:$0xff]  ;;  %v941_v17 = vld [vmem:[%s1223_s1 + $0x60] sm:$0xff] }
  0x12   : > { %581 = vmatpush.bf16.msra.mxu2 %v945_v5  ;;  %1006 = vmatpush.bf16.msra.mxu3 %v935_v3  ;;  %v1013_v18 = vld [vmem:[%s242_s30 + $0x4] sm:$0xff]   ;;  %v1015_v21 = vld [vmem:[%s242_s30 + $0xc] sm:$0xff]   ;;  %v1017_v24 = vld [vmem:[%s242_s30 + $0x14] sm:$0xff]  }
  0x13   : > { %v948_v19 = vld [vmem:[%s242_s30] sm:$0xff]   ;;  %v937_v20 = vld [vmem:[%s242_s30 + $0x8] sm:$0xff]  ;;  %v938_v23 = vld [vmem:[%s242_s30 + $0x10] sm:$0xff] }
  0x14   : > { %v979_v22 = vld [vmem:[%s242_s30 + $0x8] sm:$0xff]   ;;  %v980_v25 = vld [vmem:[%s242_s30 + $0x10] sm:$0xff]   ;;  %v939_v26 = vld [vmem:[%s242_s30 + $0x18] sm:$0xff] }
  0x15   : > { %381 = vmatpush.bf16.msra.mxu0 %v934_v6  ;;  %464 = vmatpush.bf16.msra.mxu1 %v928_v7  ;;  %v1018_v27 = vld [vmem:[%s242_s30 + $0x1c] sm:$0xff]  ;;  %v982_v48 = vld [vmem:[%s1186_s9 + $0x8] sm:$0xff]   ;;  %v983_v1 = vld [vmem:[%s1186_s9 + $0x10] sm:$0xff]  }
  0x16   : > { %582 = vmatpush.bf16.msra.mxu2 %v944_v8  ;;  %1007 = vmatpush.bf16.msra.mxu3 %v934_v6  ;;  %v981_v28 = vld [vmem:[%s242_s30 + $0x18] sm:$0xff]   ;;  %v940_v29 = vld [vmem:[%s242_s30 + $0x20] sm:$0xff]  ;;  %v969_v52 = vunpack.c.l.bf16 %v982_v48  ;;  %v970_v59 = vunpack.c.h.bf16 %v982_v48  ;;  %v973_v4 = vunpack.c.l.bf16 %v983_v1 }
  0x17   : > { %v964_v32 = vld [vmem:[%s1186_s9] sm:$0xff]  }
  0x18   : > { %v965_v34 = vunpack.c.l.bf16 %v964_v32  ;;  %v966_v43 = vunpack.c.h.bf16 %v964_v32 }
  0x19   : > { %382 = vmatpush.bf16.msra.mxu0 %v933_v9  ;;  %465 = vmatpush.bf16.msra.mxu1 %v927_v10 }
  0x1a   : > { %583 = vmatpush.bf16.msra.mxu2 %v943_v11  ;;  %1008 = vmatpush.bf16.msra.mxu3 %v933_v9 }
  0x1d   : > { %383 = vmatpush.bf16.msra.mxu0 %v932_v12  ;;  %466 = vmatpush.bf16.msra.mxu1 %v926_v13 }
  0x1e   : > { %584 = vmatpush.bf16.msra.mxu2 %v942_v14  ;;  %1009 = vmatpush.bf16.msra.mxu3 %v932_v12  ;;  %v974_v12 = vunpack.c.h.bf16 %v983_v1 }
  0x21   : > { %384 = vmatpush.bf16.msra.mxu0 %v931_v15  ;;  %467 = vmatpush.bf16.msra.mxu1 %v925_v16 }
  0x22   : > { %585 = vmatpush.bf16.msra.mxu2 %v941_v17  ;;  %1010 = vmatpush.bf16.msra.mxu3 %v931_v15 }
  0x24   : > { %833 = vmatmul.msk.bf16.vlgmr.msra.gmra.mxu0 %vm364_vm0, %v1013_v18  ;;  %861 = vmatmul.msk.bf16.vlgmr.msra.gmra.mxu1 %vm364_vm0, %v948_v19  ;;  %v984_v18 = vld [vmem:[%s1186_s9 + $0x18] sm:$0xff]  }
  0x25   : > { %917 = vmatmul.msk.bf16.vlgmr.msra.gmra.mxu2 %vm364_vm0, %v937_v20  ;;  %834 = vmatmul.msk.bf16.vlgmr.msra.gmra.mxu3 %vm364_vm0, %v1015_v21  ;;  %v977_v21 = vunpack.c.l.bf16 %v984_v18 }
  0x34   : > { %862 = vmatmul.msk.bf16.gmra.mxu1 %vm364_vm0, %v979_v22 }
  0x35   : > { %918 = vmatmul.msk.bf16.gmra.mxu2 %vm364_vm0, %v938_v23  ;;  %835 = vmatmul.msk.bf16.gmra.mxu3 %vm364_vm0, %v1017_v24 }
  0x44   : > { %863 = vmatmul.msk.bf16.gmra.mxu1 %vm364_vm0, %v980_v25 }
  0x45   : > { %919 = vmatmul.msk.bf16.gmra.mxu2 %vm364_vm0, %v939_v26  ;;  %836 = vmatmul.msk.bf16.gmra.mxu3 %vm364_vm0, %v1018_v27 }
  0x54   : > { %864 = vmatmul.msk.bf16.gmra.mxu1 %vm364_vm0, %v981_v28 }
  0x55   : > { %920 = vmatmul.msk.bf16.gmra.mxu2 %vm364_vm0, %v940_v29  ;;  %v978_v29 = vunpack.c.h.bf16 %v984_v18 }
  0xa1   : > { %v469_v30 = vpop.f32.mrf.mxu1  ;;  %v386_v31 = vpop.f32.mrf.mxu0 }
  0xa2   : > { %v470_v33 = vadd.f32 %v469_v30, %v386_v31 }
  0xa8   : > { %v587_v35 = vpop.f32.mrf.mxu2  ;;  %v391_v40 = vpop.f32.mrf.mxu3 }
  0xa9   : > { %v607_v36 = vadd.f32 %v587_v35, %v470_v33  ;;  %v471_v37 = vpop.f32.mrf.mxu1  ;;  %v388_v39 = vpop.f32.mrf.mxu0 }
  0xaa   : > { %v472_v42 = vadd.f32 %v471_v37, %v388_v39 }
  0xab   : > { %v631_v38 = vadd.f32 %v965_v34, %v607_v36 }
  0xad   : > { %v639_v41 = vpack.c.bf16 %v631_v38, %v631_v38 }
  0xaf   : > { %648 = vst.msk [vmem:[%s1192_s12] sm:$0xf] %vm647_vm1, %v639_v41 }
  0xb0   : > { %v589_v44 = vpop.f32.mrf.mxu2  ;;  %v393_v51 = vpop.f32.mrf.mxu3 }
  0xb1   : > { %v608_v45 = vadd.f32 %v589_v44, %v472_v42  ;;  %v474_v46 = vpop.f32.mrf.mxu1 }
  0xb2   : > { %v475_v50 = vadd.f32 %v474_v46, %v391_v40 }
  0xb3   : > { %v632_v47 = vadd.f32 %v966_v43, %v608_v45 }
  0xb5   : > { %v640_v49 = vpack.c.bf16 %v632_v47, %v632_v47 }
  0xb7   : > { %649 = vst.msk [vmem:[%s1192_s12 + $0x4] sm:$0xf] %vm647_vm1, %v640_v49 }
  0xb8   : > { %v592_v53 = vpop.f32.mrf.mxu2  ;;  %v396_v60 = vpop.f32.mrf.mxu3 }
  0xb9   : > { %v609_v54 = vadd.f32 %v592_v53, %v475_v50  ;;  %v476_v55 = vpop.f32.mrf.mxu1 }
  0xba   : > { %v477_v58 = vadd.f32 %v476_v55, %v393_v51 }
  0xbb   : > { %v633_v56 = vadd.f32 %v969_v52, %v609_v54 }
  0xbd   : > { %v641_v57 = vpack.c.bf16 %v633_v56, %v633_v56 }
  0xbf   : > { %650 = vst.msk [vmem:[%s1192_s12 + $0x8] sm:$0xf] %vm647_vm1, %v641_v57 }
  0xc0   : > { %v594_v61 = vpop.f32.mrf.mxu2  ;;  %v398_v8 = vpop.f32.mrf.mxu3 }
  0xc1   : > { %v610_v62 = vadd.f32 %v594_v61, %v477_v58  ;;  %v479_v63 = vpop.f32.mrf.mxu1 }
  0xc2   : > { %v480_v3 = vadd.f32 %v479_v63, %v396_v60 }
  0xc3   : > { %v634_v0 = vadd.f32 %v970_v59, %v610_v62 }
  0xc5   : > { %v642_v2 = vpack.c.bf16 %v634_v0, %v634_v0 }
  0xc7   : > { %651 = vst.msk [vmem:[%s1192_s12 + $0xc] sm:$0xf] %vm647_vm1, %v642_v2 }
  0xc8   : > { %v597_v5 = vpop.f32.mrf.mxu2  ;;  %v401_v17 = vpop.f32.mrf.mxu3 }
  0xc9   : > { %v611_v6 = vadd.f32 %v597_v5, %v480_v3  ;;  %v481_v7 = vpop.f32.mrf.mxu1 }
  0xca   : > { %v482_v11 = vadd.f32 %v481_v7, %v398_v8 }
  0xcb   : > { %v635_v9 = vadd.f32 %v973_v4, %v611_v6 }
  0xcd   : > { %v643_v10 = vpack.c.bf16 %v635_v9, %v635_v9 }
  0xcf   : > { %652 = vst.msk [vmem:[%s1192_s12 + $0x10] sm:$0xf] %vm647_vm1, %v643_v10 }
  0xd0   : > { %v599_v13 = vpop.f32.mrf.mxu2  ;;  %v403_v27 = vpop.f32.mrf.mxu3 }
  0xd1   : > { %v612_v14 = vadd.f32 %v599_v13, %v482_v11  ;;  %v484_v15 = vpop.f32.mrf.mxu1 }
  0xd2   : > { %v485_v20 = vadd.f32 %v484_v15, %v401_v17 }
  0xd3   : > { %v636_v16 = vadd.f32 %v974_v12, %v612_v14 }
  0xd5   : > { %v644_v19 = vpack.c.bf16 %v636_v16, %v636_v16 }
  0xd7   : > { %653 = vst.msk [vmem:[%s1192_s12 + $0x14] sm:$0xf] %vm647_vm1, %v644_v19 }
  0xd8   : > { %v602_v22 = vpop.f32.mrf.mxu2 }
  0xd9   : > { %v613_v23 = vadd.f32 %v602_v22, %v485_v20  ;;  %v486_v25 = vpop.f32.mrf.mxu1 }
  0xda   : > { %v487_v28 = vadd.f32 %v486_v25, %v403_v27 }
  0xdb   : > { %v637_v24 = vadd.f32 %v977_v21, %v613_v23 }
  0xdd   : > { %v645_v26 = vpack.c.bf16 %v637_v24, %v637_v24 }
  0xdf   : > { %654 = vst.msk [vmem:[%s1192_s12 + $0x18] sm:$0xf] %vm647_vm1, %v645_v26 }
  0xe0   : > { %v604_v30 = vpop.f32.mrf.mxu2 }
  0xe1   : > { %v614_v31 = vadd.f32 %v604_v30, %v487_v28 }
  0xe3   : > { %v638_v32 = vadd.f32 %v978_v29, %v614_v31 }
  0xe5   : > { %v646_v33 = vpack.c.bf16 %v638_v32, %v638_v32 }
  0xe7   : > { %655 = vst.msk [vmem:[%s1192_s12 + $0x1c] sm:$0xf] %vm647_vm1, %v646_v33 }
  0xe8 PF: > { %s13_s14 = sadd.s32 1, %s1066_s14   ;;  %s1226_s12 = smov %s1062_s13 }
  0xe9   : > { %p10_p5 = scmp.ge.s32.totalorder %s13_s14, 4   ;;  %s1227_s13 = smov %s1229_s15 }
  0xeb   :  { %12 = sbr.rel (!%p10_p5) target bundleno = 2 (0x2), region = 70 }

// kernel: unetres_forward.46
= control target key start
LH: loop header
LB: loop body
LE: loop exit
PB: predicated region body
PF: predicated region fallthrough
CT: control target
= control target key end

     0   :  { %vm114_vm0 = vcmask 519168   ;;  %s238_s1 = inlined_call_operand.vmem [shape: bf16[128,64], index: 1, kind: input, shape index: {}]   ;;  %s239_s0 = inlined_call_operand.vmem [shape: bf16[32,128], index: 0, kind: input, shape index: {}]   ;;  %s240_s2 = inlined_call_operand.vmem [shape: bf16[32,64], index: 2, kind: output, shape index: {}]  }
   0x1   :  { %v172_v0 = vld [vmem:[%s238_s1 + $0x38] sm:$0xff]  ;;  %v171_v1 = vld [vmem:[%s238_s1 + $0x30] sm:$0xff]  ;;  %v170_v2 = vld [vmem:[%s238_s1 + $0x28] sm:$0xff] }
   0x2   :  { %91 = vmatpush.bf16.msra.mxu0 %v172_v0  ;;  %173 = vmatpush.bf16.msra.mxu1 %v172_v0  ;;  %v169_v3 = vld [vmem:[%s238_s1 + $0x20] sm:$0xff]  ;;  %v168_v4 = vld [vmem:[%s238_s1 + $0x18] sm:$0xff]  ;;  %v167_v5 = vld [vmem:[%s238_s1 + $0x10] sm:$0xff] }
   0x3   :  { %v166_v6 = vld [vmem:[%s238_s1 + $0x8] sm:$0xff]  ;;  %v165_v7 = vld [vmem:[%s238_s1] sm:$0xff] }
   0x4   :  { %v163_v8 = vld [vmem:[%s239_s0] sm:$0xff]  ;;  %v164_v9 = vld [vmem:[%s239_s0 + $0x8] sm:$0xff] }
   0x6   :  { %92 = vmatpush.bf16.msra.mxu0 %v171_v1  ;;  %174 = vmatpush.bf16.msra.mxu1 %v171_v1 }
   0xa   :  { %93 = vmatpush.bf16.msra.mxu0 %v170_v2  ;;  %175 = vmatpush.bf16.msra.mxu1 %v170_v2 }
   0xe   :  { %94 = vmatpush.bf16.msra.mxu0 %v169_v3  ;;  %176 = vmatpush.bf16.msra.mxu1 %v169_v3 }
  0x12   :  { %95 = vmatpush.bf16.msra.mxu0 %v168_v4  ;;  %177 = vmatpush.bf16.msra.mxu1 %v168_v4 }
  0x16   :  { %96 = vmatpush.bf16.msra.mxu0 %v167_v5  ;;  %178 = vmatpush.bf16.msra.mxu1 %v167_v5 }
  0x1a   :  { %97 = vmatpush.bf16.msra.mxu0 %v166_v6  ;;  %179 = vmatpush.bf16.msra.mxu1 %v166_v6 }
  0x1e   :  { %98 = vmatpush.bf16.msra.mxu0 %v165_v7  ;;  %180 = vmatpush.bf16.msra.mxu1 %v165_v7 }
  0x21   :  { %99 = vmatmul.bf16.vlgmr.msra.gmra.mxu0 %v163_v8  ;;  %104 = vmatmul.bf16.vlgmr.msra.gmra.mxu1 %v164_v9 }
  0x9e   :  { %v100_v10 = vpop.f32.mrf.mxu0  ;;  %v105_v11 = vpop.f32.mrf.mxu1 }
  0x9f   :  { %v110_v12 = vpack.c.bf16 %v100_v10, %v100_v10  ;;  %v112_v13 = vpack.c.bf16 %v105_v11, %v105_v11 }
  0xa1   :  { %115 = vst.msk [vmem:[%s240_s2] sm:$0xf] %vm114_vm0, %v110_v12 }
  0xa2   :  { %117 = vst.msk [vmem:[%s240_s2 + $0x8] sm:$0xf] %vm114_vm0, %v112_v13 }
  0xa6   :  { %v102_v14 = vpop.f32.mrf.mxu0  ;;  %v107_v15 = vpop.f32.mrf.mxu1 }
  0xa7   :  { %v111_v16 = vpack.c.bf16 %v102_v14, %v102_v14  ;;  %v113_v17 = vpack.c.bf16 %v107_v15, %v107_v15 }
  0xa9   :  { %116 = vst.msk [vmem:[%s240_s2 + $0x4] sm:$0xf] %vm114_vm0, %v111_v16 }
  0xaa   :  { %118 = vst.msk [vmem:[%s240_s2 + $0xc] sm:$0xf] %vm114_vm0, %v113_v17 }

// kernel: unetres_forward.47
= control target key start
LH: loop header
LB: loop body
LE: loop exit
PB: predicated region body
PF: predicated region fallthrough
CT: control target
= control target key end

     0   :  { %s1047_s9 = smov 0   ;;  %s1049_s10 = smov 0   ;;  %s1213_s0 = inlined_call_operand.vmem [shape: bf16[2,24,192], index: 0, kind: input, shape index: {}]   ;;  %s1214_s1 = inlined_call_operand.vmem [shape: bf16[3,192,64], index: 1, kind: input, shape index: {}]   ;;  %s1215_s2 = inlined_call_operand.vmem [shape: bf16[2,16,64], index: 2, kind: output, shape index: {}]  }
   0x1   :  { %s1051_s11 = smov 0  }
   0x2 LB: > { %s31_s12 = sadd.s32 1, %s1026_s10  ;;  %p745_p0 = scmp.ge.s32.totalorder %s1030_s11, 1  ;;  %s1030_s11 = sphi %s1051_s11, %s12_s11   ;;  %s1026_s10 = sphi %s1049_s10, %s1217_s10   ;;  %s1022_s9 = sphi %s1047_s9, %s1216_s9  }
   0x3   : > { %p33_p1 = scmp.ge.s32.totalorder %s31_s12, 2  ;;  %p144_p2 = scmp.lt.s32.totalorder %s1030_s11, 3 }
   0x5   : > { %s1219_s12 = smov (%p33_p1, %s31_s12), 0  ;;  %p145_p3 = pnand %p745_p0, %p144_p2 }
   0x6   : > { %p177_p4 = scmp.lt.s32.totalorder (!%p145_p3), %s1022_s9, 1 }
   0x7   : > { %148 = sbr.rel (%p145_p3) target bundleno = 204 (0xcc), region = 28 }
   0xc   : > { %v966_v0 = vld [vmem:[%s1214_s1 + $0x98] sm:$0xff]  ;;  %v965_v4 = vld [vmem:[%s1214_s1 + $0x90] sm:$0xff]  ;;  %s1221_s9 = smov (!%p177_p4, %s1022_s9), 1  ;;  %v964_v8 = vld [vmem:[%s1214_s1 + $0x88] sm:$0xff]  ;;  %vm266_vm0 = vcmask 1045504   ;;  %vm346_vm1 = vcmask 523264  }
   0xd   : > { %v970_v1 = vld [vmem:[%s1214_s1 + $0xb8] sm:$0xff]  ;;  %350 = vmatpush.bf16.msra.mxu0 %v966_v0  ;;  %v969_v5 = vld [vmem:[%s1214_s1 + $0xb0] sm:$0xff]  ;;  %s983_s29 = smul.u32 24, %s1221_s9  ;;  %v968_v9 = vld [vmem:[%s1214_s1 + $0xa8] sm:$0xff]  ;;  %s946_s18 = sshll.u32 %s1221_s9, 3  ;;  %vm628_vm2 = vcmask 519168  }
   0xe   : > { %v954_v2 = vld [vmem:[%s1214_s1 + $0x38] sm:$0xff]  ;;  %368 = vmatpush.bf16.msra.mxu1 %v970_v1  ;;  %v953_v6 = vld [vmem:[%s1214_s1 + $0x30] sm:$0xff]  ;;  %v952_v10 = vld [vmem:[%s1214_s1 + $0x28] sm:$0xff]  ;;  %s197_s21 = scalar_lea.vmem %s1215_s2, %s946_s18 }
   0xf   : > { %v958_v3 = vld [vmem:[%s1214_s1 + $0x58] sm:$0xff]  ;;  %459 = vmatpush.bf16.msra.mxu2 %v954_v2  ;;  %v957_v7 = vld [vmem:[%s1214_s1 + $0x50] sm:$0xff]  ;;  %s1104_s14 = scalar_lea.vmem %s1213_s0, %s983_s29  ;;  %v956_v11 = vld [vmem:[%s1214_s1 + $0x48] sm:$0xff] }
  0x10   : > { %477 = vmatpush.bf16.msra.mxu3 %v958_v3  ;;  %v1110_v12 = vld [vmem:[%s1104_s14] sm:$0xff]  ;;  %v201_v13 = vld [vmem:[%s1104_s14 + $0x8] sm:$0xff]  ;;  %v227_v15 = vld [vmem:[%s1104_s14 + $0x10] sm:$0x33] }
  0x11   : > { %351 = vmatpush.bf16.msra.mxu0 %v965_v4  ;;  %v226_v14 = vld [vmem:[%s1104_s14] sm:$0xcc]  ;;  %v1115_v16 = vunpack.c.h.b16 %v201_v13  ;;  %v261_v18 = vunpack.c.h.b16 %v227_v15  ;;  %v380_v21 = vunpack.c.h.b16 %v1110_v12  ;;  %v978_v26 = vld [vmem:[%s1214_s1 + $0xf8] sm:$0xff]  ;;  %v977_v34 = vld [vmem:[%s1214_s1 + $0xf0] sm:$0xff]  ;;  %v258_v38 = vunpack.c.l.b16 %v201_v13 }
  0x12   : > { %369 = vmatpush.bf16.msra.mxu1 %v969_v5  ;;  %v257_v17 = vunpack.c.h.b16 %v226_v14  ;;  %v963_v19 = vld [vmem:[%s1214_s1 + $0x80] sm:$0xff]  ;;  %v982_v27 = vld [vmem:[%s1214_s1 + $0x118] sm:$0xff]  ;;  %v981_v35 = vld [vmem:[%s1214_s1 + $0x110] sm:$0xff]  ;;  %v256_v37 = vunpack.c.l.b16 %v226_v14  ;;  %v260_v39 = vunpack.c.l.b16 %v227_v15  ;;  %v379_v53 = vunpack.c.l.b16 %v1110_v12 }
  0x13   : > { %460 = vmatpush.bf16.msra.mxu2 %v953_v6  ;;  %v967_v20 = vld [vmem:[%s1214_s1 + $0xa0] sm:$0xff]  ;;  %v265_v25 = vpack.c.b16 %v261_v18, %v261_v18  ;;  %v382_v30 = vpack.c.b16 %v1115_v16, %v380_v21  ;;  %v962_v31 = vld [vmem:[%s1214_s1 + $0x78] sm:$0xff]  ;;  %v961_v36 = vld [vmem:[%s1214_s1 + $0x70] sm:$0xff] }
  0x14   : > { %478 = vmatpush.bf16.msra.mxu3 %v957_v7  ;;  %v951_v22 = vld [vmem:[%s1214_s1 + $0x20] sm:$0xff]  ;;  %v263_v24 = vpack.c.b16 %v1115_v16, %v257_v17  ;;  %v950_v32 = vld [vmem:[%s1214_s1 + $0x18] sm:$0xff]  ;;  %v949_v40 = vld [vmem:[%s1214_s1 + $0x10] sm:$0xff]  ;;  %v262_v44 = vpack.c.b16 %v258_v38, %v256_v37  ;;  %v264_v45 = vpack.c.b16 %v260_v39, %v260_v39  ;;  %v381_v58 = vpack.c.b16 %v258_v38, %v379_v53 }
  0x15   : > { %352 = vmatpush.bf16.msra.mxu0 %v964_v8  ;;  %v955_v23 = vld [vmem:[%s1214_s1 + $0x40] sm:$0xff]  ;;  %v271_v29 = vrot.slane %v265_v25, 2  ;;  %v976_v41 = vld [vmem:[%s1214_s1 + $0xe8] sm:$0xff]  ;;  %v487_v47 = vld [vmem:[%s1104_s14 + $0x10] sm:$0xff] }
  0x16   : > { %370 = vmatpush.bf16.msra.mxu1 %v968_v9  ;;  %v270_v28 = vrot.slane %v263_v24, 2  ;;  %v980_v42 = vld [vmem:[%s1214_s1 + $0x108] sm:$0xff]  ;;  %v975_v48 = vld [vmem:[%s1214_s1 + $0xe0] sm:$0xff]  ;;  %v267_v51 = vrot.slane %v262_v44, 2  ;;  %v268_v52 = vrot.slane %v264_v45, 2  ;;  %v515_v54 = vunpack.c.h.b16 %v487_v47  ;;  %v974_v56 = vld [vmem:[%s1214_s1 + $0xd8] sm:$0xff] }
  0x17   : > { %461 = vmatpush.bf16.msra.mxu2 %v952_v10  ;;  %v960_v43 = vld [vmem:[%s1214_s1 + $0x68] sm:$0xff]  ;;  %v979_v49 = vld [vmem:[%s1214_s1 + $0x100] sm:$0xff]  ;;  %v973_v60 = vld [vmem:[%s1214_s1 + $0xd0] sm:$0xff]  ;;  %v514_v62 = vunpack.c.l.b16 %v487_v47 }
  0x18   : > { %479 = vmatpush.bf16.msra.mxu3 %v956_v11  ;;  %v272_v33 = vsel %vm266_vm0, %v270_v28, %v271_v29  ;;  %v948_v46 = vld [vmem:[%s1214_s1 + $0x8] sm:$0xff]  ;;  %v959_v50 = vld [vmem:[%s1214_s1 + $0x60] sm:$0xff]  ;;  %v269_v57 = vsel %vm266_vm0, %v267_v51, %v268_v52  ;;  %v517_v59 = vpack.c.b16 %v515_v54, %v1115_v16 }
  0x19   : > { %353 = vmatpush.bf16.msra.mxu0 %v963_v19  ;;  %v947_v55 = vld [vmem:[%s1214_s1] sm:$0xff]  ;;  %v972_v61 = vld [vmem:[%s1214_s1 + $0xc8] sm:$0xff]  ;;  %v516_v0 = vpack.c.b16 %v514_v62, %v258_v38 }
  0x1a   : > { %371 = vmatpush.bf16.msra.mxu1 %v967_v20  ;;  %v971_v63 = vld [vmem:[%s1214_s1 + $0xc0] sm:$0xff] }
  0x1b   : > { %462 = vmatpush.bf16.msra.mxu2 %v951_v22 }
  0x1c   : > { %480 = vmatpush.bf16.msra.mxu3 %v955_v23 }
  0x1d   : > { %821 = vmatmul.msk.bf16.vlgmr.msra.gmra.mxu1 %vm346_vm1, %v272_v33  ;;  %354 = vmatpush.bf16.msra.mxu0 %v962_v31 }
  0x1e   : > { %594 = vmatpush.bf16.msrb.mxu1 %v978_v26 }
  0x1f   : > { %870 = vmatmul.msk.bf16.vlgmr.msra.gmra.mxu3 %vm346_vm1, %v382_v30  ;;  %463 = vmatpush.bf16.msra.mxu2 %v950_v32 }
  0x20   : > { %612 = vmatpush.bf16.msrb.mxu3 %v982_v27 }
  0x21   : > { %355 = vmatpush.bf16.msra.mxu0 %v961_v36 }
  0x22   : > { %595 = vmatpush.bf16.msrb.mxu1 %v977_v34 }
  0x23   : > { %464 = vmatpush.bf16.msra.mxu2 %v949_v40 }
  0x24   : > { %613 = vmatpush.bf16.msrb.mxu3 %v981_v35 }
  0x25   : > { %356 = vmatpush.bf16.msra.mxu0 %v960_v43 }
  0x26   : > { %596 = vmatpush.bf16.msrb.mxu1 %v976_v41 }
  0x27   : > { %465 = vmatpush.bf16.msra.mxu2 %v948_v46 }
  0x28   : > { %614 = vmatpush.bf16.msrb.mxu3 %v980_v42 }
  0x29   : > { %357 = vmatpush.bf16.msra.mxu0 %v959_v50 }
  0x2a   : > { %597 = vmatpush.bf16.msrb.mxu1 %v975_v48 }
  0x2b   : > { %466 = vmatpush.bf16.msra.mxu2 %v947_v55 }
  0x2c   : > { %615 = vmatpush.bf16.msrb.mxu3 %v979_v49  ;;  %358 = vmatmul.bf16.vlgmr.msra.gmra.mxu0 %v269_v57 }
  0x2e   : > { %598 = vmatpush.bf16.msrb.mxu1 %v974_v56  ;;  %467 = vmatmul.bf16.vlgmr.msra.gmra.mxu2 %v381_v58 }
  0x2f   : > { %943 = vmatmul.msk.bf16.vlgmr.msrb.gmra.mxu3 %vm346_vm1, %v517_v59 }
  0x32   : > { %599 = vmatpush.bf16.msrb.mxu1 %v973_v60 }
  0x36   : > { %600 = vmatpush.bf16.msrb.mxu1 %v972_v61 }
  0x3a   : > { %601 = vmatpush.bf16.msrb.mxu1 %v971_v63 }
  0x3d   : > { %602 = vmatmul.bf16.vlgmr.msrb.gmra.mxu1 %v516_v0 }
  0x9a   : > { %v373_v2 = vpop.f32.mrf.mxu1 }
  0xa2   : > { %v482_v1 = vpop.f32.mrf.mxu3  ;;  %v375_v5 = vpop.f32.mrf.mxu1 }
  0xa9   : > { %v359_v4 = vpop.f32.mrf.mxu0 }
  0xaa   : > { %v484_v3 = vpop.f32.mrf.mxu3  ;;  %v374_v7 = vadd.f32 %v373_v2, %v359_v4 }
  0xb1   : > { %v468_v6 = vpop.f32.mrf.mxu2  ;;  %v361_v10 = vpop.f32.mrf.mxu0 }
  0xb2   : > { %v469_v8 = vadd.f32 %v468_v6, %v374_v7  ;;  %v617_v9 = vpop.f32.mrf.mxu3  ;;  %v376_v15 = vadd.f32 %v375_v5, %v361_v10 }
  0xb4   : > { %v483_v12 = vadd.f32 %v482_v1, %v469_v8 }
  0xb9   : > { %v470_v14 = vpop.f32.mrf.mxu2 }
  0xba   : > { %v603_v11 = vpop.f32.mrf.mxu1  ;;  %v471_v18 = vadd.f32 %v470_v14, %v376_v15  ;;  %v619_v20 = vpop.f32.mrf.mxu3 }
  0xbb   : > { %v618_v13 = vadd.f32 %v617_v9, %v603_v11 }
  0xbc   : > { %v485_v22 = vadd.f32 %v484_v3, %v471_v18 }
  0xbd   : > { %v622_v16 = vadd.f32 %v618_v13, %v483_v12 }
  0xbf   : > { %v624_v17 = vmax.f32 %v622_v16, 0.0 }
  0xc1   : > { %v626_v19 = vpack.c.bf16 %v624_v17, %v624_v17 }
  0xc2   : > { %v605_v21 = vpop.f32.mrf.mxu1 }
  0xc3   : > { %629 = vst.msk [vmem:[%s197_s21] sm:$0xf] %vm628_vm2, %v626_v19  ;;  %v620_v23 = vadd.f32 %v619_v20, %v605_v21 }
  0xc5   : > { %v623_v24 = vadd.f32 %v620_v23, %v485_v22 }
  0xc7   : > { %v625_v25 = vmax.f32 %v623_v24, 0.0 }
  0xc9   : > { %v627_v26 = vpack.c.bf16 %v625_v25, %v625_v25 }
  0xcb   : > { %630 = vst.msk [vmem:[%s197_s21 + $0x4] sm:$0xf] %vm628_vm2, %v627_v26 }
  0xcc PF: > { %s12_s11 = sadd.s32 1, %s1030_s11   ;;  %s1216_s9 = smov %s1026_s10 }
  0xcd   : > { %p9_p5 = scmp.ge.s32.totalorder %s12_s11, 4   ;;  %s1217_s10 = smov %s1219_s12 }
  0xcf   :  { %11 = sbr.rel (!%p9_p5) target bundleno = 2 (0x2), region = 63 }

// kernel: unetres_forward.51
= control target key start
LH: loop header
LB: loop body
LE: loop exit
PB: predicated region body
PF: predicated region fallthrough
CT: control target
= control target key end

     0   :  { %s328_s1 = inlined_call_operand.vmem [shape: bf16[256,128], index: 1, kind: input, shape index: {}]   ;;  %s329_s0 = inlined_call_operand.vmem [shape: bf16[8,256], index: 0, kind: input, shape index: {}]   ;;  %s330_s2 = inlined_call_operand.vmem [shape: bf16[8,128], index: 2, kind: output, shape index: {}]  }
   0x1   :  { %v250_v0 = vld [vmem:[%s328_s1 + $0x38] sm:$0xff]  ;;  %v249_v2 = vld [vmem:[%s328_s1 + $0x30] sm:$0xff]  ;;  %v248_v4 = vld [vmem:[%s328_s1 + $0x28] sm:$0xff] }
   0x2   :  { %v258_v1 = vld [vmem:[%s328_s1 + $0x78] sm:$0xff]  ;;  %147 = vmatpush.bf16.msra.mxu0 %v250_v0  ;;  %v257_v3 = vld [vmem:[%s328_s1 + $0x70] sm:$0xff]  ;;  %v256_v5 = vld [vmem:[%s328_s1 + $0x68] sm:$0xff] }
   0x3   :  { %160 = vmatpush.bf16.msra.mxu1 %v258_v1  ;;  %v247_v6 = vld [vmem:[%s328_s1 + $0x20] sm:$0xff]  ;;  %v246_v8 = vld [vmem:[%s328_s1 + $0x18] sm:$0xff]  ;;  %v245_v10 = vld [vmem:[%s328_s1 + $0x10] sm:$0xff] }
   0x4   :  { %v255_v7 = vld [vmem:[%s328_s1 + $0x60] sm:$0xff]  ;;  %v254_v9 = vld [vmem:[%s328_s1 + $0x58] sm:$0xff]  ;;  %v253_v11 = vld [vmem:[%s328_s1 + $0x50] sm:$0xff] }
   0x5   :  { %v244_v12 = vld [vmem:[%s328_s1 + $0x8] sm:$0xff]  ;;  %v11_v14 = vld [vmem:[%s329_s0] sm:$0xff] }
   0x6   :  { %148 = vmatpush.bf16.msra.mxu0 %v249_v2  ;;  %v252_v13 = vld [vmem:[%s328_s1 + $0x48] sm:$0xff]  ;;  %v45_v15 = vunpack.c.l.b16 %v11_v14  ;;  %v46_v16 = vunpack.c.h.b16 %v11_v14  ;;  %v243_v17 = vld [vmem:[%s328_s1] sm:$0xff] }
   0x7   :  { %161 = vmatpush.bf16.msra.mxu1 %v257_v3  ;;  %v251_v18 = vld [vmem:[%s328_s1 + $0x40] sm:$0xff] }
   0x8   :  { %v47_v19 = vpack.c.b16 %v45_v15, %v45_v15  ;;  %v48_v20 = vpack.c.b16 %v46_v16, %v46_v16 }
   0xa   :  { %149 = vmatpush.bf16.msra.mxu0 %v248_v4 }
   0xb   :  { %162 = vmatpush.bf16.msra.mxu1 %v256_v5 }
   0xe   :  { %150 = vmatpush.bf16.msra.mxu0 %v247_v6 }
   0xf   :  { %163 = vmatpush.bf16.msra.mxu1 %v255_v7 }
  0x12   :  { %151 = vmatpush.bf16.msra.mxu0 %v246_v8 }
  0x13   :  { %164 = vmatpush.bf16.msra.mxu1 %v254_v9 }
  0x16   :  { %152 = vmatpush.bf16.msra.mxu0 %v245_v10 }
  0x17   :  { %165 = vmatpush.bf16.msra.mxu1 %v253_v11 }
  0x1a   :  { %153 = vmatpush.bf16.msra.mxu0 %v244_v12 }
  0x1b   :  { %166 = vmatpush.bf16.msra.mxu1 %v252_v13 }
  0x1e   :  { %154 = vmatpush.bf16.msra.mxu0 %v243_v17 }
  0x1f   :  { %167 = vmatpush.bf16.msra.mxu1 %v251_v18 }
  0x21   :  { %155 = vmatmul.bf16.vlgmr.msra.gmra.mxu0 %v47_v19 }
  0x22   :  { %168 = vmatmul.bf16.vlgmr.msra.gmra.mxu1 %v48_v20 }
  0x9e   :  { %v156_v21 = vpop.f32.mrf.mxu0 }
  0x9f   :  { %v169_v22 = vpop.f32.mrf.mxu1 }
  0xa0   :  { %v170_v23 = vadd.f32 %v169_v22, %v156_v21 }
  0xa2   :  { %v173_v24 = vpack.c.bf16 %v170_v23, %v170_v23 }
  0xa4   :  { %174 = vst [vmem:[%s330_s2] sm:$0xf] %v173_v24 }
  0xa6   :  { %v158_v25 = vpop.f32.mrf.mxu0 }
  0xa7   :  { %v171_v26 = vpop.f32.mrf.mxu1 }

// kernel: unetres_forward.48
= control target key start
LH: loop header
LB: loop body
LE: loop exit
PB: predicated region body
PF: predicated region fallthrough
CT: control target
= control target key end

     0   :  { %s1158_s12 = smov 0   ;;  %s1160_s13 = smov 0   ;;  %s1327_s0 = inlined_call_operand.vmem [shape: bf16[2,24,192], index: 0, kind: input, shape index: {}]   ;;  %s1328_s1 = inlined_call_operand.vmem [shape: bf16[3,192,64], index: 1, kind: input, shape index: {}]   ;;  %s1329_s2 = inlined_call_operand.vmem [shape: bf16[2,16,64], index: 2, kind: input, shape index: {}]   ;;  %s1330_s3 = inlined_call_operand.vmem [shape: bf16[2,16,64], index: 3, kind: output, shape index: {}]  }
   0x1   :  { %s1162_s14 = smov 0  }
   0x2 LB: > { %s32_s15 = sadd.s32 1, %s1132_s13  ;;  %p844_p0 = scmp.ge.s32.totalorder %s1136_s14, 1  ;;  %s1136_s14 = sphi %s1162_s14, %s13_s14   ;;  %s1132_s13 = sphi %s1160_s13, %s1332_s13   ;;  %s1128_s12 = sphi %s1158_s12, %s1331_s12  }
   0x3   : > { %p34_p1 = scmp.ge.s32.totalorder %s32_s15, 2  ;;  %p191_p2 = scmp.lt.s32.totalorder %s1136_s14, 3 }
   0x5   : > { %s1334_s15 = smov (%p34_p1, %s32_s15), 0  ;;  %p192_p3 = pnand %p844_p0, %p191_p2 }
   0x6   : > { %p238_p4 = scmp.lt.s32.totalorder (!%p192_p3), %s1128_s12, 1 }
   0x7   : > { %195 = sbr.rel (%p192_p3) target bundleno = 204 (0xcc), region = 32 }
   0xc   : > { %v1068_v0 = vld [vmem:[%s1328_s1 + $0x98] sm:$0xff]  ;;  %v1067_v4 = vld [vmem:[%s1328_s1 + $0x90] sm:$0xff]  ;;  %s1336_s12 = smov (!%p238_p4, %s1128_s12), 1  ;;  %v1066_v8 = vld [vmem:[%s1328_s1 + $0x88] sm:$0xff]  ;;  %vm340_vm0 = vcmask 1045504   ;;  %vm420_vm1 = vcmask 523264  }
   0xd   : > { %v1072_v1 = vld [vmem:[%s1328_s1 + $0xb8] sm:$0xff]  ;;  %424 = vmatpush.bf16.msra.mxu0 %v1068_v0  ;;  %v1071_v5 = vld [vmem:[%s1328_s1 + $0xb0] sm:$0xff]  ;;  %s1089_s5 = smul.u32 24, %s1336_s12  ;;  %v1070_v9 = vld [vmem:[%s1328_s1 + $0xa8] sm:$0xff]  ;;  %s1047_s24 = sshll.u32 %s1336_s12, 3  ;;  %vm706_vm2 = vcmask 519168  }
   0xe   : > { %v1056_v2 = vld [vmem:[%s1328_s1 + $0x38] sm:$0xff]  ;;  %442 = vmatpush.bf16.msra.mxu1 %v1072_v1  ;;  %v1055_v6 = vld [vmem:[%s1328_s1 + $0x30] sm:$0xff]  ;;  %v1054_v10 = vld [vmem:[%s1328_s1 + $0x28] sm:$0xff]  ;;  %s258_s27 = scalar_lea.vmem %s1329_s2, %s1047_s24  ;;  %s271_s29 = scalar_lea.vmem %s1330_s3, %s1047_s24 }
   0xf   : > { %v1060_v3 = vld [vmem:[%s1328_s1 + $0x58] sm:$0xff]  ;;  %533 = vmatpush.bf16.msra.mxu2 %v1056_v2  ;;  %v1059_v7 = vld [vmem:[%s1328_s1 + $0x50] sm:$0xff]  ;;  %s1215_s18 = scalar_lea.vmem %s1327_s0, %s1089_s5  ;;  %v1058_v11 = vld [vmem:[%s1328_s1 + $0x48] sm:$0xff] }
  0x10   : > { %551 = vmatpush.bf16.msra.mxu3 %v1060_v3  ;;  %v1221_v12 = vld [vmem:[%s1215_s18] sm:$0xff]  ;;  %v275_v13 = vld [vmem:[%s1215_s18 + $0x8] sm:$0xff]  ;;  %v301_v15 = vld [vmem:[%s1215_s18 + $0x10] sm:$0x33] }
  0x11   : > { %425 = vmatpush.bf16.msra.mxu0 %v1067_v4  ;;  %v300_v14 = vld [vmem:[%s1215_s18] sm:$0xcc]  ;;  %v1226_v16 = vunpack.c.h.b16 %v275_v13  ;;  %v335_v18 = vunpack.c.h.b16 %v301_v15  ;;  %v454_v21 = vunpack.c.h.b16 %v1221_v12  ;;  %v1080_v26 = vld [vmem:[%s1328_s1 + $0xf8] sm:$0xff]  ;;  %v1079_v34 = vld [vmem:[%s1328_s1 + $0xf0] sm:$0xff]  ;;  %v332_v38 = vunpack.c.l.b16 %v275_v13 }
  0x12   : > { %443 = vmatpush.bf16.msra.mxu1 %v1071_v5  ;;  %v331_v17 = vunpack.c.h.b16 %v300_v14  ;;  %v1065_v19 = vld [vmem:[%s1328_s1 + $0x80] sm:$0xff]  ;;  %v1084_v27 = vld [vmem:[%s1328_s1 + $0x118] sm:$0xff]  ;;  %v1083_v35 = vld [vmem:[%s1328_s1 + $0x110] sm:$0xff]  ;;  %v330_v37 = vunpack.c.l.b16 %v300_v14  ;;  %v334_v39 = vunpack.c.l.b16 %v301_v15  ;;  %v453_v53 = vunpack.c.l.b16 %v1221_v12 }
  0x13   : > { %534 = vmatpush.bf16.msra.mxu2 %v1055_v6  ;;  %v1069_v20 = vld [vmem:[%s1328_s1 + $0xa0] sm:$0xff]  ;;  %v339_v25 = vpack.c.b16 %v335_v18, %v335_v18  ;;  %v456_v30 = vpack.c.b16 %v1226_v16, %v454_v21  ;;  %v1064_v31 = vld [vmem:[%s1328_s1 + $0x78] sm:$0xff]  ;;  %v1063_v36 = vld [vmem:[%s1328_s1 + $0x70] sm:$0xff] }
  0x14   : > { %552 = vmatpush.bf16.msra.mxu3 %v1059_v7  ;;  %v1053_v22 = vld [vmem:[%s1328_s1 + $0x20] sm:$0xff]  ;;  %v337_v24 = vpack.c.b16 %v1226_v16, %v331_v17  ;;  %v1052_v32 = vld [vmem:[%s1328_s1 + $0x18] sm:$0xff]  ;;  %v1051_v40 = vld [vmem:[%s1328_s1 + $0x10] sm:$0xff]  ;;  %v336_v44 = vpack.c.b16 %v332_v38, %v330_v37  ;;  %v338_v45 = vpack.c.b16 %v334_v39, %v334_v39  ;;  %v455_v58 = vpack.c.b16 %v332_v38, %v453_v53 }
  0x15   : > { %426 = vmatpush.bf16.msra.mxu0 %v1066_v8  ;;  %v1057_v23 = vld [vmem:[%s1328_s1 + $0x40] sm:$0xff]  ;;  %v345_v29 = vrot.slane %v339_v25, 2  ;;  %v1078_v41 = vld [vmem:[%s1328_s1 + $0xe8] sm:$0xff]  ;;  %v561_v47 = vld [vmem:[%s1215_s18 + $0x10] sm:$0xff] }
  0x16   : > { %444 = vmatpush.bf16.msra.mxu1 %v1070_v9  ;;  %v344_v28 = vrot.slane %v337_v24, 2  ;;  %v1082_v42 = vld [vmem:[%s1328_s1 + $0x108] sm:$0xff]  ;;  %v1077_v48 = vld [vmem:[%s1328_s1 + $0xe0] sm:$0xff]  ;;  %v341_v51 = vrot.slane %v336_v44, 2  ;;  %v342_v52 = vrot.slane %v338_v45, 2  ;;  %v589_v54 = vunpack.c.h.b16 %v561_v47  ;;  %v1076_v56 = vld [vmem:[%s1328_s1 + $0xd8] sm:$0xff] }
  0x17   : > { %535 = vmatpush.bf16.msra.mxu2 %v1054_v10  ;;  %v1062_v43 = vld [vmem:[%s1328_s1 + $0x68] sm:$0xff]  ;;  %v1081_v49 = vld [vmem:[%s1328_s1 + $0x100] sm:$0xff]  ;;  %v1075_v60 = vld [vmem:[%s1328_s1 + $0xd0] sm:$0xff]  ;;  %v588_v62 = vunpack.c.l.b16 %v561_v47 }
  0x18   : > { %553 = vmatpush.bf16.msra.mxu3 %v1058_v11  ;;  %v346_v33 = vsel %vm340_vm0, %v344_v28, %v345_v29  ;;  %v1050_v46 = vld [vmem:[%s1328_s1 + $0x8] sm:$0xff]  ;;  %v1061_v50 = vld [vmem:[%s1328_s1 + $0x60] sm:$0xff]  ;;  %v343_v57 = vsel %vm340_vm0, %v341_v51, %v342_v52  ;;  %v591_v59 = vpack.c.b16 %v589_v54, %v1226_v16 }
  0x19   : > { %427 = vmatpush.bf16.msra.mxu0 %v1065_v19  ;;  %v1049_v55 = vld [vmem:[%s1328_s1] sm:$0xff]  ;;  %v1074_v61 = vld [vmem:[%s1328_s1 + $0xc8] sm:$0xff]  ;;  %v590_v0 = vpack.c.b16 %v588_v62, %v332_v38 }
  0x1a   : > { %445 = vmatpush.bf16.msra.mxu1 %v1069_v20  ;;  %v1073_v63 = vld [vmem:[%s1328_s1 + $0xc0] sm:$0xff] }
  0x1b   : > { %536 = vmatpush.bf16.msra.mxu2 %v1053_v22  ;;  %v1086_v10 = vld [vmem:[%s258_s27] sm:$0xff]  }
  0x1c   : > { %554 = vmatpush.bf16.msra.mxu3 %v1057_v23  ;;  %v1087_v15 = vunpack.c.l.bf16 %v1086_v10 }
  0x1d   : > { %922 = vmatmul.msk.bf16.vlgmr.msra.gmra.mxu1 %vm420_vm1, %v346_v33  ;;  %428 = vmatpush.bf16.msra.mxu0 %v1064_v31 }
  0x1e   : > { %668 = vmatpush.bf16.msrb.mxu1 %v1080_v26  ;;  %v1088_v26 = vunpack.c.h.bf16 %v1086_v10 }
  0x1f   : > { %971 = vmatmul.msk.bf16.vlgmr.msra.gmra.mxu3 %vm420_vm1, %v456_v30  ;;  %537 = vmatpush.bf16.msra.mxu2 %v1052_v32 }
  0x20   : > { %686 = vmatpush.bf16.msrb.mxu3 %v1084_v27 }
  0x21   : > { %429 = vmatpush.bf16.msra.mxu0 %v1063_v36 }
  0x22   : > { %669 = vmatpush.bf16.msrb.mxu1 %v1079_v34 }
  0x23   : > { %538 = vmatpush.bf16.msra.mxu2 %v1051_v40 }
  0x24   : > { %687 = vmatpush.bf16.msrb.mxu3 %v1083_v35 }
  0x25   : > { %430 = vmatpush.bf16.msra.mxu0 %v1062_v43 }
  0x26   : > { %670 = vmatpush.bf16.msrb.mxu1 %v1078_v41 }
  0x27   : > { %539 = vmatpush.bf16.msra.mxu2 %v1050_v46 }
  0x28   : > { %688 = vmatpush.bf16.msrb.mxu3 %v1082_v42 }
  0x29   : > { %431 = vmatpush.bf16.msra.mxu0 %v1061_v50 }
  0x2a   : > { %671 = vmatpush.bf16.msrb.mxu1 %v1077_v48 }
  0x2b   : > { %540 = vmatpush.bf16.msra.mxu2 %v1049_v55 }
  0x2c   : > { %689 = vmatpush.bf16.msrb.mxu3 %v1081_v49  ;;  %432 = vmatmul.bf16.vlgmr.msra.gmra.mxu0 %v343_v57 }
  0x2e   : > { %672 = vmatpush.bf16.msrb.mxu1 %v1076_v56  ;;  %541 = vmatmul.bf16.vlgmr.msra.gmra.mxu2 %v455_v58 }
  0x2f   : > { %1044 = vmatmul.msk.bf16.vlgmr.msrb.gmra.mxu3 %vm420_vm1, %v591_v59 }
  0x32   : > { %673 = vmatpush.bf16.msrb.mxu1 %v1075_v60 }
  0x36   : > { %674 = vmatpush.bf16.msrb.mxu1 %v1074_v61 }
  0x3a   : > { %675 = vmatpush.bf16.msrb.mxu1 %v1073_v63 }
  0x3d   : > { %676 = vmatmul.bf16.vlgmr.msrb.gmra.mxu1 %v590_v0 }
  0x9a   : > { %v447_v2 = vpop.f32.mrf.mxu1 }
  0xa2   : > { %v556_v1 = vpop.f32.mrf.mxu3  ;;  %v449_v5 = vpop.f32.mrf.mxu1 }
  0xa9   : > { %v433_v4 = vpop.f32.mrf.mxu0 }
  0xaa   : > { %v558_v3 = vpop.f32.mrf.mxu3  ;;  %v448_v7 = vadd.f32 %v447_v2, %v433_v4 }
  0xb1   : > { %v542_v6 = vpop.f32.mrf.mxu2  ;;  %v435_v11 = vpop.f32.mrf.mxu0 }
  0xb2   : > { %v543_v8 = vadd.f32 %v542_v6, %v448_v7  ;;  %v691_v9 = vpop.f32.mrf.mxu3  ;;  %v450_v17 = vadd.f32 %v449_v5, %v435_v11 }
  0xb4   : > { %v557_v13 = vadd.f32 %v556_v1, %v543_v8 }
  0xb9   : > { %v544_v16 = vpop.f32.mrf.mxu2 }
  0xba   : > { %v677_v12 = vpop.f32.mrf.mxu1  ;;  %v545_v20 = vadd.f32 %v544_v16, %v450_v17  ;;  %v693_v22 = vpop.f32.mrf.mxu3 }
  0xbb   : > { %v692_v14 = vadd.f32 %v691_v9, %v677_v12 }
  0xbc   : > { %v559_v24 = vadd.f32 %v558_v3, %v545_v20 }
  0xbd   : > { %v696_v18 = vadd.f32 %v692_v14, %v557_v13 }
  0xbf   : > { %v702_v19 = vadd.f32 %v1087_v15, %v696_v18 }
  0xc1   : > { %v704_v21 = vpack.c.bf16 %v702_v19, %v702_v19 }
  0xc2   : > { %v679_v23 = vpop.f32.mrf.mxu1 }
  0xc3   : > { %707 = vst.msk [vmem:[%s271_s29] sm:$0xf] %vm706_vm2, %v704_v21  ;;  %v694_v25 = vadd.f32 %v693_v22, %v679_v23 }
  0xc5   : > { %v697_v27 = vadd.f32 %v694_v25, %v559_v24 }
  0xc7   : > { %v703_v28 = vadd.f32 %v1088_v26, %v697_v27 }
  0xc9   : > { %v705_v29 = vpack.c.bf16 %v703_v28, %v703_v28 }
  0xcb   : > { %708 = vst.msk [vmem:[%s271_s29 + $0x4] sm:$0xf] %vm706_vm2, %v705_v29 }
  0xcc PF: > { %s13_s14 = sadd.s32 1, %s1136_s14   ;;  %s1331_s12 = smov %s1132_s13 }
  0xcd   : > { %p10_p5 = scmp.ge.s32.totalorder %s13_s14, 4   ;;  %s1332_s13 = smov %s1334_s15 }
  0xcf   :  { %12 = sbr.rel (!%p10_p5) target bundleno = 2 (0x2), region = 70 }

// kernel: unetres_forward.56
= control target key start
LH: loop header
LB: loop body
LE: loop exit
PB: predicated region body
PF: predicated region fallthrough
CT: control target
= control target key end

     0   :  { %s686_s12 = smov 0   ;;  %s688_s13 = smov 0   ;;  %s774_s0 = inlined_call_operand.vmem [shape: bf16[2,4,128], index: 0, kind: input, shape index: {}]   ;;  %s775_s1 = inlined_call_operand.vmem [shape: bf16[2,4,128], index: 1, kind: input, shape index: {}]   ;;  %s776_s2 = inlined_call_operand.vmem [shape: bf16[2,128,128], index: 2, kind: input, shape index: {}]   ;;  %s777_s3 = inlined_call_operand.vmem [shape: bf16[2,2,2,2,128], index: 3, kind: output, shape index: {}]  }
   0x1   :  { %s690_s14 = smov 0  }
   0x2 LB: > { %s25_s15 = sadd.s32 1, %s660_s13  ;;  %p513_p0 = scmp.ge.s32.totalorder %s664_s14, 1  ;;  %s664_s14 = sphi %s690_s14, %s13_s14   ;;  %s660_s13 = sphi %s688_s13, %s779_s13   ;;  %s656_s12 = sphi %s686_s12, %s778_s12  }
   0x3   : > { %p27_p1 = scmp.ge.s32.totalorder %s25_s15, 2  ;;  %p169_p2 = scmp.lt.s32.totalorder %s664_s14, 3 }
   0x5   : > { %s781_s15 = smov (%p27_p1, %s25_s15), 0  ;;  %p170_p3 = pnand %p513_p0, %p169_p2 }
   0x6   : > { %p206_p4 = scmp.lt.s32.totalorder (!%p170_p3), %s656_s12, 1 }
   0x7   : > { %173 = sbr.rel (%p170_p3) target bundleno = 191 (0xbf), region = 32 }
   0xc   : > { %v609_v0 = vld [vmem:[%s776_s2 + $0x38] sm:$0xff]  ;;  %v608_v2 = vld [vmem:[%s776_s2 + $0x30] sm:$0xff]  ;;  %v607_v4 = vld [vmem:[%s776_s2 + $0x28] sm:$0xff]  ;;  %s783_s12 = smov (!%p206_p4, %s656_s12), 1 }
   0xd   : > { %v617_v1 = vld [vmem:[%s776_s2 + $0x78] sm:$0xff]  ;;  %300 = vmatpush.bf16.msra.mxu0 %v609_v0  ;;  %v616_v3 = vld [vmem:[%s776_s2 + $0x70] sm:$0xff]  ;;  %v615_v5 = vld [vmem:[%s776_s2 + $0x68] sm:$0xff]  ;;  %s514_s5 = sshll.u32 %s783_s12, 1 }
   0xe   : > { %387 = vmatpush.bf16.msra.mxu1 %v617_v1  ;;  %v606_v6 = vld [vmem:[%s776_s2 + $0x20] sm:$0xff]  ;;  %v605_v8 = vld [vmem:[%s776_s2 + $0x18] sm:$0xff]  ;;  %s212_s16 = scalar_lea.vmem %s774_s0, %s514_s5  ;;  %s219_s19 = scalar_lea.vmem %s775_s1, %s514_s5  ;;  %v604_v10 = vld [vmem:[%s776_s2 + $0x10] sm:$0xff] }
   0xf   : > { %v614_v7 = vld [vmem:[%s776_s2 + $0x60] sm:$0xff]  ;;  %v613_v9 = vld [vmem:[%s776_s2 + $0x58] sm:$0xff]  ;;  %v612_v11 = vld [vmem:[%s776_s2 + $0x50] sm:$0xff]  ;;  %s516_s5 = sshll.u32 %s783_s12, 2 }
  0x10   : > { %v230_v12 = vld [vmem:[%s212_s16] sm:$0x3]  ;;  %v603_v16 = vld [vmem:[%s776_s2 + $0x8] sm:$0xff]  ;;  %s228_s8 = scalar_lea.vmem %s777_s3, %s516_s5 }
  0x11   : > { %301 = vmatpush.bf16.msra.mxu0 %v608_v2  ;;  %v231_v13 = vld [vmem:[%s219_s19] sm:$0x3]  ;;  %v232_v14 = vunpack.c.l.bf16 %v230_v12  ;;  %v611_v17 = vld [vmem:[%s776_s2 + $0x48] sm:$0xff] }
  0x12   : > { %388 = vmatpush.bf16.msra.mxu1 %v616_v3  ;;  %v233_v15 = vunpack.c.l.bf16 %v231_v13  ;;  %v602_v19 = vld [vmem:[%s776_s2] sm:$0xff] }
  0x13   : > { %v610_v20 = vld [vmem:[%s776_s2 + $0x40] sm:$0xff] }
  0x14   : > { %v234_v18 = vadd.f32 %v233_v15, %v232_v14 }
  0x15   : > { %302 = vmatpush.bf16.msra.mxu0 %v607_v4 }
  0x16   : > { %389 = vmatpush.bf16.msra.mxu1 %v615_v5  ;;  %v235_v21 = vpack.c.bf16 %v234_v18, %v234_v18 }
  0x19   : > { %303 = vmatpush.bf16.msra.mxu0 %v606_v6 }
  0x1a   : > { %390 = vmatpush.bf16.msra.mxu1 %v614_v7 }
  0x1d   : > { %304 = vmatpush.bf16.msra.mxu0 %v605_v8 }
  0x1e   : > { %391 = vmatpush.bf16.msra.mxu1 %v613_v9 }
  0x21   : > { %305 = vmatpush.bf16.msra.mxu0 %v604_v10 }
  0x22   : > { %392 = vmatpush.bf16.msra.mxu1 %v612_v11 }
  0x25   : > { %306 = vmatpush.bf16.msra.mxu0 %v603_v16 }
  0x26   : > { %393 = vmatpush.bf16.msra.mxu1 %v611_v17 }
  0x29   : > { %307 = vmatpush.bf16.msra.mxu0 %v602_v19 }
  0x2a   : > { %394 = vmatpush.bf16.msra.mxu1 %v610_v20 }
  0x2c   : > { %308 = vmatmul.bf16.vlgmr.msra.gmra.mxu0 %v235_v21 }
  0x2d   : > { %395 = vmatmul.bf16.vlgmr.msra.gmra.mxu1 %v235_v21 }
  0xa9   : > { %v309_v22 = vpop.f32.mrf.mxu0 }
  0xaa   : > { %v396_v23 = vpop.f32.mrf.mxu1  ;;  %v313_v24 = vpack.c.bf16 %v309_v22, %v309_v22 }
  0xab   : > { %v400_v25 = vpack.c.bf16 %v396_v23, %v396_v23 }
  0xac   : > { %314 = vst [vmem:[%s228_s8] sm:$0x1] %v313_v24 }
  0xad   : > { %316 = vst [vmem:[#allocation1] sm:$0xff] %v313_v24 }
  0xae   : > { %598 = vst [vmem:[%s228_s8 + $0x1] sm:$0x1] %v400_v25 }
  0xb1   : > { %v311_v26 = vpop.f32.mrf.mxu0 }
  0xb2   : > { %v398_v27 = vpop.f32.mrf.mxu1 }
  0xb4   : > { %v318_v28 = vld [vmem:[#allocation1 + $0x1] ss:$4 sm:$0xff] }
  0xb5   : > { %549 = vst [vmem:[%s228_s8 + $0x2] sm:$0x1] %v318_v28 }
  0xb6   : > { %404 = vst [vmem:[#allocation1] sm:$0xff] %v400_v25 }
  0xbd   : > { %v406_v29 = vld [vmem:[#allocation1 + $0x1] ss:$4 sm:$0xff] }
  0xbe   : > { %599 = vst [vmem:[%s228_s8 + $0x3] sm:$0x1] %v406_v29 }
  0xbf PF: > { %s13_s14 = sadd.s32 1, %s664_s14   ;;  %s778_s12 = smov %s660_s13 }
  0xc0   : > { %p10_p5 = scmp.ge.s32.totalorder %s13_s14, 4   ;;  %s779_s13 = smov %s781_s15 }
  0xc2   :  { %12 = sbr.rel (!%p10_p5) target bundleno = 2 (0x2), region = 71 }

// kernel: unetres_forward.52
= control target key start
LH: loop header
LB: loop body
LE: loop exit
PB: predicated region body
PF: predicated region fallthrough
CT: control target
= control target key end

     0   :  { %s1568_s9 = smov 0   ;;  %s1570_s10 = smov 0   ;;  %s1837_s0 = inlined_call_operand.vmem [shape: bf16[2,8,384], index: 0, kind: input, shape index: {}]   ;;  %s1838_s1 = inlined_call_operand.vmem [shape: bf16[3,384,128], index: 1, kind: input, shape index: {}]   ;;  %s1839_s2 = inlined_call_operand.vmem [shape: bf16[2,4,128], index: 2, kind: output, shape index: {}]  }
   0x1   :  { %s1572_s11 = smov 0  }
   0x2 LB: > { %s31_s12 = sadd.s32 1, %s1547_s10  ;;  %p1043_p0 = scmp.ge.s32.totalorder %s1551_s11, 1  ;;  %s1551_s11 = sphi %s1572_s11, %s12_s11   ;;  %s1547_s10 = sphi %s1570_s10, %s1841_s10   ;;  %s1543_s9 = sphi %s1568_s9, %s1840_s9  }
   0x3   : > { %p33_p1 = scmp.ge.s32.totalorder %s31_s12, 2  ;;  %p144_p2 = scmp.lt.s32.totalorder %s1551_s11, 3 }
   0x5   : > { %s1843_s12 = smov (%p33_p1, %s31_s12), 0  ;;  %p145_p3 = pnand %p1043_p0, %p144_p2 }
   0x6   : > { %p175_p4 = scmp.lt.s32.totalorder (!%p145_p3), %s1543_s9, 1 }
   0x7   : > { %148 = sbr.rel (%p145_p3) target bundleno = 243 (0xf3), region = 28 }
   0xc   : > { %v1463_v0 = vld [vmem:[%s1838_s1 + $0xf8] sm:$0xff]  ;;  %v1462_v2 = vld [vmem:[%s1838_s1 + $0xf0] sm:$0xff]  ;;  %v1461_v8 = vld [vmem:[%s1838_s1 + $0xe8] sm:$0xff]  ;;  %s1845_s9 = smov (!%p175_p4, %s1543_s9), 1 }
   0xd   : > { %v1471_v1 = vld [vmem:[%s1838_s1 + $0x138] sm:$0xff]  ;;  %453 = vmatpush.bf16.msra.mxu0 %v1463_v0  ;;  %v1470_v3 = vld [vmem:[%s1838_s1 + $0x130] sm:$0xff]  ;;  %v1469_v9 = vld [vmem:[%s1838_s1 + $0x128] sm:$0xff]  ;;  %s1504_s21 = smul.u32 12, %s1845_s9 }
   0xe   : > { %466 = vmatpush.bf16.msra.mxu1 %v1471_v1  ;;  %v1479_v4 = vld [vmem:[%s1838_s1 + $0x178] sm:$0xff]  ;;  %v1478_v6 = vld [vmem:[%s1838_s1 + $0x170] sm:$0xff]  ;;  %v1477_v10 = vld [vmem:[%s1838_s1 + $0x168] sm:$0xff] }
   0xf   : > { %v1439_v5 = vld [vmem:[%s1838_s1 + $0x38] sm:$0xff]  ;;  %479 = vmatpush.bf16.msra.mxu2 %v1479_v4  ;;  %v1438_v7 = vld [vmem:[%s1838_s1 + $0x30] sm:$0xff]  ;;  %v1437_v11 = vld [vmem:[%s1838_s1 + $0x28] sm:$0xff]  ;;  %s1656_s4 = scalar_lea.vmem %s1837_s0, %s1504_s21 }
  0x10   : > { %647 = vmatpush.bf16.msra.mxu3 %v1439_v5  ;;  %v1460_v12 = vld [vmem:[%s1838_s1 + $0xe0] sm:$0xff]  ;;  %v1459_v16 = vld [vmem:[%s1838_s1 + $0xd8] sm:$0xff]  ;;  %v1458_v20 = vld [vmem:[%s1838_s1 + $0xd0] sm:$0xff] }
  0x11   : > { %454 = vmatpush.bf16.msra.mxu0 %v1462_v2  ;;  %v1468_v13 = vld [vmem:[%s1838_s1 + $0x120] sm:$0xff]  ;;  %v1467_v17 = vld [vmem:[%s1838_s1 + $0x118] sm:$0xff]  ;;  %v1466_v21 = vld [vmem:[%s1838_s1 + $0x110] sm:$0xff] }
  0x12   : > { %467 = vmatpush.bf16.msra.mxu1 %v1470_v3  ;;  %v1476_v14 = vld [vmem:[%s1838_s1 + $0x160] sm:$0xff]  ;;  %v1475_v18 = vld [vmem:[%s1838_s1 + $0x158] sm:$0xff]  ;;  %v1474_v23 = vld [vmem:[%s1838_s1 + $0x150] sm:$0xff] }
  0x13   : > { %480 = vmatpush.bf16.msra.mxu2 %v1478_v6  ;;  %v1436_v15 = vld [vmem:[%s1838_s1 + $0x20] sm:$0xff]  ;;  %v1435_v19 = vld [vmem:[%s1838_s1 + $0x18] sm:$0xff]  ;;  %v1434_v24 = vld [vmem:[%s1838_s1 + $0x10] sm:$0xff] }
  0x14   : > { %648 = vmatpush.bf16.msra.mxu3 %v1438_v7  ;;  %v244_v22 = vld [vmem:[%s1656_s4] sm:$0x66]  ;;  %v245_v25 = vld [vmem:[%s1656_s4 + $0x8] sm:$0x6]  ;;  %v1447_v38 = vld [vmem:[%s1838_s1 + $0x78] sm:$0xff] }
  0x15   : > { %455 = vmatpush.bf16.msra.mxu0 %v1461_v8  ;;  %v1457_v26 = vld [vmem:[%s1838_s1 + $0xc8] sm:$0xff]  ;;  %v297_v28 = vunpack.c.l.b16 %v244_v22  ;;  %v298_v29 = vunpack.c.h.b16 %v244_v22  ;;  %v299_v32 = vunpack.c.l.b16 %v245_v25  ;;  %v1685_v33 = vld [vmem:[%s1656_s4] sm:$0x33]  ;;  %v1455_v39 = vld [vmem:[%s1838_s1 + $0xb8] sm:$0xff] }
  0x16   : > { %468 = vmatpush.bf16.msra.mxu1 %v1469_v9  ;;  %v1465_v27 = vld [vmem:[%s1838_s1 + $0x108] sm:$0xff]  ;;  %v1456_v34 = vld [vmem:[%s1838_s1 + $0xc0] sm:$0xff]  ;;  %v494_v43 = vunpack.c.l.b16 %v1685_v33  ;;  %v1487_v44 = vld [vmem:[%s1838_s1 + $0x1b8] sm:$0xff] }
  0x17   : > { %481 = vmatpush.bf16.msra.mxu2 %v1477_v10  ;;  %v1473_v30 = vld [vmem:[%s1838_s1 + $0x148] sm:$0xff]  ;;  %v1464_v35 = vld [vmem:[%s1838_s1 + $0x100] sm:$0xff]  ;;  %v300_v36 = vpack.c.b16 %v297_v28, %v297_v28  ;;  %v301_v37 = vpack.c.b16 %v298_v29, %v298_v29  ;;  %v302_v42 = vpack.c.b16 %v299_v32, %v299_v32  ;;  %v1495_v45 = vld [vmem:[%s1838_s1 + $0x1f8] sm:$0xff] }
  0x18   : > { %649 = vmatpush.bf16.msra.mxu3 %v1437_v11  ;;  %v1433_v31 = vld [vmem:[%s1838_s1 + $0x8] sm:$0xff]  ;;  %v1472_v40 = vld [vmem:[%s1838_s1 + $0x140] sm:$0xff]  ;;  %v1446_v48 = vld [vmem:[%s1838_s1 + $0x70] sm:$0xff]  ;;  %v497_v51 = vpack.c.b16 %v494_v43, %v494_v43 }
  0x19   : > { %456 = vmatpush.bf16.msra.mxu0 %v1460_v12  ;;  %v1432_v41 = vld [vmem:[%s1838_s1] sm:$0xff]  ;;  %v303_v46 = vrot.slane %v300_v36, 1  ;;  %v304_v47 = vrot.slane %v301_v37, 1  ;;  %v1454_v49 = vld [vmem:[%s1838_s1 + $0xb0] sm:$0xff]  ;;  %v305_v50 = vrot.slane %v302_v42, 1  ;;  %v1445_v54 = vld [vmem:[%s1838_s1 + $0x68] sm:$0xff] }
  0x1a   : > { %469 = vmatpush.bf16.msra.mxu1 %v1468_v13  ;;  %v1486_v52 = vld [vmem:[%s1838_s1 + $0x1b0] sm:$0xff]  ;;  %v1453_v55 = vld [vmem:[%s1838_s1 + $0xa8] sm:$0xff]  ;;  %v1444_v58 = vld [vmem:[%s1838_s1 + $0x60] sm:$0xff] }
  0x1b   : > { %482 = vmatpush.bf16.msra.mxu2 %v1476_v14  ;;  %v1494_v53 = vld [vmem:[%s1838_s1 + $0x1f0] sm:$0xff]  ;;  %v1485_v56 = vld [vmem:[%s1838_s1 + $0x1a8] sm:$0xff]  ;;  %v1452_v59 = vld [vmem:[%s1838_s1 + $0xa0] sm:$0xff]  ;;  %v495_v14 = vunpack.c.h.b16 %v1685_v33 }
  0x1c   : > { %650 = vmatpush.bf16.msra.mxu3 %v1436_v15  ;;  %v1493_v57 = vld [vmem:[%s1838_s1 + $0x1e8] sm:$0xff]  ;;  %v1484_v60 = vld [vmem:[%s1838_s1 + $0x1a0] sm:$0xff]  ;;  %v1443_v62 = vld [vmem:[%s1838_s1 + $0x58] sm:$0xff] }
  0x1d   : > { %457 = vmatpush.bf16.msra.mxu0 %v1459_v16  ;;  %v1492_v61 = vld [vmem:[%s1838_s1 + $0x1e0] sm:$0xff]  ;;  %v1451_v63 = vld [vmem:[%s1838_s1 + $0x98] sm:$0xff]  ;;  %v1442_v2 = vld [vmem:[%s1838_s1 + $0x50] sm:$0xff] }
  0x1e   : > { %470 = vmatpush.bf16.msra.mxu1 %v1467_v17  ;;  %v1483_v0 = vld [vmem:[%s1838_s1 + $0x198] sm:$0xff]  ;;  %v1450_v3 = vld [vmem:[%s1838_s1 + $0x90] sm:$0xff]  ;;  %v686_v6 = vld [vmem:[%s1656_s4] sm:$0xcc] }
  0x1f   : > { %483 = vmatpush.bf16.msra.mxu2 %v1475_v18  ;;  %v1491_v1 = vld [vmem:[%s1838_s1 + $0x1d8] sm:$0xff]  ;;  %v1482_v4 = vld [vmem:[%s1838_s1 + $0x190] sm:$0xff]  ;;  %v1441_v7 = vld [vmem:[%s1838_s1 + $0x48] sm:$0xff]  ;;  %v739_v10 = vunpack.c.l.b16 %v686_v6  ;;  %v740_v13 = vunpack.c.h.b16 %v686_v6 }
  0x20   : > { %651 = vmatpush.bf16.msra.mxu3 %v1435_v19  ;;  %v1490_v5 = vld [vmem:[%s1838_s1 + $0x1d0] sm:$0xff]  ;;  %v1449_v8 = vld [vmem:[%s1838_s1 + $0x88] sm:$0xff]  ;;  %v1440_v16 = vld [vmem:[%s1838_s1 + $0x40] sm:$0xff] }
  0x21   : > { %458 = vmatpush.bf16.msra.mxu0 %v1458_v20  ;;  %v195_v9 = vld [vmem:[%s1656_s4 + $0x8] sm:$0x3]  ;;  %v1448_v17 = vld [vmem:[%s1838_s1 + $0x80] sm:$0xff]  ;;  %v1503_v18 = vld [vmem:[%s1838_s1 + $0x238] sm:$0xff]  ;;  %v742_v19 = vpack.c.b16 %v739_v10, %v739_v10  ;;  %v743_v22 = vpack.c.b16 %v740_v13, %v740_v13 }
  0x22   : > { %471 = vmatpush.bf16.msra.mxu1 %v1466_v21  ;;  %v1481_v11 = vld [vmem:[%s1838_s1 + $0x188] sm:$0xff]  ;;  %v496_v15 = vunpack.c.l.b16 %v195_v9  ;;  %v1480_v20 = vld [vmem:[%s1838_s1 + $0x180] sm:$0xff]  ;;  %v1502_v25 = vld [vmem:[%s1838_s1 + $0x230] sm:$0xff] }
  0x23   : > { %484 = vmatpush.bf16.msra.mxu2 %v1474_v23  ;;  %v1489_v12 = vld [vmem:[%s1838_s1 + $0x1c8] sm:$0xff]  ;;  %v1488_v21 = vld [vmem:[%s1838_s1 + $0x1c0] sm:$0xff]  ;;  %v498_v23 = vpack.c.b16 %v495_v14, %v495_v14 }
  0x24   : > { %652 = vmatpush.bf16.msra.mxu3 %v1434_v24  ;;  %v499_v24 = vpack.c.b16 %v496_v15, %v496_v15  ;;  %v1501_v28 = vld [vmem:[%s1838_s1 + $0x228] sm:$0xff]  ;;  %v1500_v29 = vld [vmem:[%s1838_s1 + $0x220] sm:$0xff] }
  0x25   : > { %459 = vmatpush.bf16.msra.mxu0 %v1457_v26  ;;  %v745_v26 = vrot.slane %v742_v19, 2  ;;  %v687_v32 = vld [vmem:[%s1656_s4 + $0x8] sm:$0xc]  ;;  %v1496_v36 = vld [vmem:[%s1838_s1 + $0x200] sm:$0xff]  ;;  %s1045_s4 = sshll.u32 %s1845_s9, 1 }
  0x26   : > { %472 = vmatpush.bf16.msra.mxu1 %v1465_v27  ;;  %v746_v27 = vrot.slane %v743_v22, 2  ;;  %v741_v33 = vunpack.c.l.b16 %v687_v32  ;;  %s193_s23 = scalar_lea.vmem %s1839_s2, %s1045_s4 }
  0x27   : > { %485 = vmatpush.bf16.msra.mxu2 %v1473_v30  ;;  %v1499_v30 = vld [vmem:[%s1838_s1 + $0x218] sm:$0xff] }
  0x28   : > { %653 = vmatpush.bf16.msra.mxu3 %v1433_v31  ;;  %v1498_v31 = vld [vmem:[%s1838_s1 + $0x210] sm:$0xff] }
  0x29   : > { %460 = vmatpush.bf16.msra.mxu0 %v1456_v34  ;;  %v1497_v34 = vld [vmem:[%s1838_s1 + $0x208] sm:$0xff] }
  0x2a   : > { %473 = vmatpush.bf16.msra.mxu1 %v1464_v35  ;;  %v744_v35 = vpack.c.b16 %v741_v33, %v741_v33 }
  0x2b   : > { %486 = vmatpush.bf16.msra.mxu2 %v1472_v40 }
  0x2c   : > { %654 = vmatpush.bf16.msra.mxu3 %v1432_v41  ;;  %461 = vmatmul.bf16.vlgmr.msra.gmra.mxu0 %v303_v46  ;;  %v747_v37 = vrot.slane %v744_v35, 2 }
  0x2d   : > { %660 = vmatpush.bf16.msrb.mxu0 %v1447_v38  ;;  %474 = vmatmul.bf16.vlgmr.msra.gmra.mxu1 %v304_v47 }
  0x2e   : > { %673 = vmatpush.bf16.msrb.mxu1 %v1455_v39  ;;  %487 = vmatmul.bf16.vlgmr.msra.gmra.mxu2 %v305_v50 }
  0x2f   : > { %895 = vmatpush.bf16.msrb.mxu2 %v1487_v44  ;;  %655 = vmatmul.bf16.vlgmr.msra.gmra.mxu3 %v497_v51 }
  0x30   : > { %908 = vmatpush.bf16.msrb.mxu3 %v1495_v45 }
  0x31   : > { %661 = vmatpush.bf16.msrb.mxu0 %v1446_v48 }
  0x32   : > { %674 = vmatpush.bf16.msrb.mxu1 %v1454_v49 }
  0x33   : > { %896 = vmatpush.bf16.msrb.mxu2 %v1486_v52 }
  0x34   : > { %909 = vmatpush.bf16.msrb.mxu3 %v1494_v53 }
  0x35   : > { %662 = vmatpush.bf16.msrb.mxu0 %v1445_v54 }
  0x36   : > { %675 = vmatpush.bf16.msrb.mxu1 %v1453_v55 }
  0x37   : > { %897 = vmatpush.bf16.msrb.mxu2 %v1485_v56 }
  0x38   : > { %910 = vmatpush.bf16.msrb.mxu3 %v1493_v57 }
  0x39   : > { %663 = vmatpush.bf16.msrb.mxu0 %v1444_v58 }
  0x3a   : > { %676 = vmatpush.bf16.msrb.mxu1 %v1452_v59 }
  0x3b   : > { %898 = vmatpush.bf16.msrb.mxu2 %v1484_v60 }
  0x3c   : > { %911 = vmatpush.bf16.msrb.mxu3 %v1492_v61 }
  0x3d   : > { %664 = vmatpush.bf16.msrb.mxu0 %v1443_v62 }
  0x3e   : > { %677 = vmatpush.bf16.msrb.mxu1 %v1451_v63 }
  0x3f   : > { %899 = vmatpush.bf16.msrb.mxu2 %v1483_v0 }
  0x40   : > { %912 = vmatpush.bf16.msrb.mxu3 %v1491_v1 }
  0x41   : > { %665 = vmatpush.bf16.msrb.mxu0 %v1442_v2 }
  0x42   : > { %678 = vmatpush.bf16.msrb.mxu1 %v1450_v3 }
  0x43   : > { %900 = vmatpush.bf16.msrb.mxu2 %v1482_v4 }
  0x44   : > { %913 = vmatpush.bf16.msrb.mxu3 %v1490_v5 }
  0x45   : > { %666 = vmatpush.bf16.msrb.mxu0 %v1441_v7 }
  0x46   : > { %679 = vmatpush.bf16.msrb.mxu1 %v1449_v8 }
  0x47   : > { %901 = vmatpush.bf16.msrb.mxu2 %v1481_v11 }
  0x48   : > { %914 = vmatpush.bf16.msrb.mxu3 %v1489_v12 }
  0x49   : > { %667 = vmatpush.bf16.msrb.mxu0 %v1440_v16 }
  0x4a   : > { %680 = vmatpush.bf16.msrb.mxu1 %v1448_v17 }
  0x4b   : > { %902 = vmatpush.bf16.msrb.mxu2 %v1480_v20 }
  0x4c   : > { %915 = vmatpush.bf16.msrb.mxu3 %v1488_v21  ;;  %668 = vmatmul.bf16.vlgmr.msrb.gmra.mxu0 %v498_v23 }
  0x4d   : > { %921 = vmatpush.bf16.msra.mxu0 %v1503_v18  ;;  %681 = vmatmul.bf16.vlgmr.msrb.gmra.mxu1 %v499_v24 }
  0x4e   : > { %903 = vmatmul.bf16.vlgmr.msrb.gmra.mxu2 %v745_v26 }
  0x4f   : > { %916 = vmatmul.bf16.vlgmr.msrb.gmra.mxu3 %v746_v27 }
  0x51   : > { %922 = vmatpush.bf16.msra.mxu0 %v1502_v25 }
  0x55   : > { %923 = vmatpush.bf16.msra.mxu0 %v1501_v28 }
  0x59   : > { %924 = vmatpush.bf16.msra.mxu0 %v1500_v29 }
  0x5d   : > { %925 = vmatpush.bf16.msra.mxu0 %v1499_v30 }
  0x61   : > { %926 = vmatpush.bf16.msra.mxu0 %v1498_v31 }
  0x65   : > { %927 = vmatpush.bf16.msra.mxu0 %v1497_v34 }
  0x69   : > { %928 = vmatpush.bf16.msra.mxu0 %v1496_v36 }
  0x6c   : > { %929 = vmatmul.bf16.vlgmr.msra.gmra.mxu0 %v747_v37 }
  0xa9   : > { %v462_v38 = vpop.f32.mrf.mxu0 }
  0xaa   : > { %v475_v39 = vpop.f32.mrf.mxu1 }
  0xab   : > { %v476_v52 = vadd.f32 %v475_v39, %v462_v38 }
  0xb1   : > { %v464_v40 = vpop.f32.mrf.mxu0  ;;  %v488_v42 = vpop.f32.mrf.mxu2 }
  0xb2   : > { %v477_v41 = vpop.f32.mrf.mxu1  ;;  %v656_v43 = vpop.f32.mrf.mxu3  ;;  %v489_v55 = vadd.f32 %v488_v42, %v476_v52 }
  0xb4   : > { %v657_v56 = vadd.f32 %v656_v43, %v489_v55 }
  0xb9   : > { %v490_v44 = vpop.f32.mrf.mxu2 }
  0xba   : > { %v658_v45 = vpop.f32.mrf.mxu3 }
  0xc9   : > { %v669_v46 = vpop.f32.mrf.mxu0 }
  0xca   : > { %v682_v47 = vpop.f32.mrf.mxu1  ;;  %v670_v57 = vadd.f32 %v669_v46, %v657_v56 }
  0xcc   : > { %v683_v60 = vadd.f32 %v682_v47, %v670_v57 }
  0xd1   : > { %v671_v48 = vpop.f32.mrf.mxu0  ;;  %v904_v49 = vpop.f32.mrf.mxu2 }
  0xd2   : > { %v917_v50 = vpop.f32.mrf.mxu3  ;;  %v684_v51 = vpop.f32.mrf.mxu1 }
  0xd3   : > { %v918_v58 = vadd.f32 %v917_v50, %v904_v49 }
  0xd9   : > { %v906_v53 = vpop.f32.mrf.mxu2 }
  0xda   : > { %v919_v54 = vpop.f32.mrf.mxu3 }
  0xe9   : > { %v930_v59 = vpop.f32.mrf.mxu0 }
  0xea   : > { %v931_v61 = vadd.f32 %v930_v59, %v918_v58 }
  0xec   : > { %v934_v62 = vadd.f32 %v931_v61, %v683_v60 }
  0xee   : > { %v935_v63 = vmax.f32 %v934_v62, 0.0 }
  0xf0   : > { %v936_v0 = vpack.c.bf16 %v935_v63, %v935_v63 }
  0xf1   : > { %v932_v1 = vpop.f32.mrf.mxu0 }
  0xf2   : > { %937 = vst [vmem:[%s193_s23] sm:$0x3] %v936_v0 }
  0xf3 PF: > { %s12_s11 = sadd.s32 1, %s1551_s11   ;;  %s1840_s9 = smov %s1547_s10 }
  0xf4   : > { %p9_p5 = scmp.ge.s32.totalorder %s12_s11, 4   ;;  %s1841_s10 = smov %s1843_s12 }
  0xf6   :  { %11 = sbr.rel (!%p9_p5) target bundleno = 2 (0x2), region = 63 }

// kernel: unetres_forward.53
= control target key start
LH: loop header
LB: loop body
LE: loop exit
PB: predicated region body
PF: predicated region fallthrough
CT: control target
= control target key end

     0   :  { %s1660_s12 = smov 0   ;;  %s1662_s13 = smov 0   ;;  %s1932_s0 = inlined_call_operand.vmem [shape: bf16[2,8,384], index: 0, kind: input, shape index: {}]   ;;  %s1933_s1 = inlined_call_operand.vmem [shape: bf16[3,384,128], index: 1, kind: input, shape index: {}]   ;;  %s1934_s2 = inlined_call_operand.vmem [shape: bf16[2,4,128], index: 2, kind: input, shape index: {}]   ;;  %s1935_s3 = inlined_call_operand.vmem [shape: bf16[2,4,128], index: 3, kind: output, shape index: {}]  }
   0x1   :  { %s1664_s14 = smov 0  }
   0x2 LB: > { %s32_s15 = sadd.s32 1, %s1634_s13  ;;  %p1129_p0 = scmp.ge.s32.totalorder %s1638_s14, 1  ;;  %s1638_s14 = sphi %s1664_s14, %s13_s14   ;;  %s1634_s13 = sphi %s1662_s13, %s1937_s13   ;;  %s1630_s12 = sphi %s1660_s12, %s1936_s12  }
   0x3   : > { %p34_p1 = scmp.ge.s32.totalorder %s32_s15, 2  ;;  %p188_p2 = scmp.lt.s32.totalorder %s1638_s14, 3 }
   0x5   : > { %s1939_s15 = smov (%p34_p1, %s32_s15), 0  ;;  %p189_p3 = pnand %p1129_p0, %p188_p2 }
   0x6   : > { %p231_p4 = scmp.lt.s32.totalorder (!%p189_p3), %s1630_s12, 1 }
   0x7   : > { %192 = sbr.rel (%p189_p3) target bundleno = 243 (0xf3), region = 32 }
   0xc   : > { %v1550_v0 = vld [vmem:[%s1933_s1 + $0xf8] sm:$0xff]  ;;  %v1549_v2 = vld [vmem:[%s1933_s1 + $0xf0] sm:$0xff]  ;;  %v1548_v8 = vld [vmem:[%s1933_s1 + $0xe8] sm:$0xff]  ;;  %s1941_s12 = smov (!%p231_p4, %s1630_s12), 1 }
   0xd   : > { %v1558_v1 = vld [vmem:[%s1933_s1 + $0x138] sm:$0xff]  ;;  %519 = vmatpush.bf16.msra.mxu0 %v1550_v0  ;;  %v1557_v3 = vld [vmem:[%s1933_s1 + $0x130] sm:$0xff]  ;;  %v1556_v9 = vld [vmem:[%s1933_s1 + $0x128] sm:$0xff]  ;;  %s1591_s25 = smul.u32 12, %s1941_s12 }
   0xe   : > { %532 = vmatpush.bf16.msra.mxu1 %v1558_v1  ;;  %v1566_v4 = vld [vmem:[%s1933_s1 + $0x178] sm:$0xff]  ;;  %v1565_v6 = vld [vmem:[%s1933_s1 + $0x170] sm:$0xff]  ;;  %v1564_v10 = vld [vmem:[%s1933_s1 + $0x168] sm:$0xff] }
   0xf   : > { %v1526_v5 = vld [vmem:[%s1933_s1 + $0x38] sm:$0xff]  ;;  %545 = vmatpush.bf16.msra.mxu2 %v1566_v4  ;;  %v1525_v7 = vld [vmem:[%s1933_s1 + $0x30] sm:$0xff]  ;;  %v1524_v11 = vld [vmem:[%s1933_s1 + $0x28] sm:$0xff]  ;;  %s1748_s9 = scalar_lea.vmem %s1932_s0, %s1591_s25 }
  0x10   : > { %713 = vmatpush.bf16.msra.mxu3 %v1526_v5  ;;  %v1547_v12 = vld [vmem:[%s1933_s1 + $0xe0] sm:$0xff]  ;;  %v1546_v16 = vld [vmem:[%s1933_s1 + $0xd8] sm:$0xff]  ;;  %v1545_v20 = vld [vmem:[%s1933_s1 + $0xd0] sm:$0xff] }
  0x11   : > { %520 = vmatpush.bf16.msra.mxu0 %v1549_v2  ;;  %v1555_v13 = vld [vmem:[%s1933_s1 + $0x120] sm:$0xff]  ;;  %v1554_v17 = vld [vmem:[%s1933_s1 + $0x118] sm:$0xff]  ;;  %v1553_v21 = vld [vmem:[%s1933_s1 + $0x110] sm:$0xff] }
  0x12   : > { %533 = vmatpush.bf16.msra.mxu1 %v1557_v3  ;;  %v1563_v14 = vld [vmem:[%s1933_s1 + $0x160] sm:$0xff]  ;;  %v1562_v18 = vld [vmem:[%s1933_s1 + $0x158] sm:$0xff]  ;;  %v1561_v23 = vld [vmem:[%s1933_s1 + $0x150] sm:$0xff] }
  0x13   : > { %546 = vmatpush.bf16.msra.mxu2 %v1565_v6  ;;  %v1523_v15 = vld [vmem:[%s1933_s1 + $0x20] sm:$0xff]  ;;  %v1522_v19 = vld [vmem:[%s1933_s1 + $0x18] sm:$0xff]  ;;  %v1521_v24 = vld [vmem:[%s1933_s1 + $0x10] sm:$0xff] }
  0x14   : > { %714 = vmatpush.bf16.msra.mxu3 %v1525_v7  ;;  %v310_v22 = vld [vmem:[%s1748_s9] sm:$0x66]  ;;  %v311_v25 = vld [vmem:[%s1748_s9 + $0x8] sm:$0x6]  ;;  %v1534_v38 = vld [vmem:[%s1933_s1 + $0x78] sm:$0xff] }
  0x15   : > { %521 = vmatpush.bf16.msra.mxu0 %v1548_v8  ;;  %v1544_v26 = vld [vmem:[%s1933_s1 + $0xc8] sm:$0xff]  ;;  %v363_v28 = vunpack.c.l.b16 %v310_v22  ;;  %v364_v29 = vunpack.c.h.b16 %v310_v22  ;;  %v365_v32 = vunpack.c.l.b16 %v311_v25  ;;  %v1777_v33 = vld [vmem:[%s1748_s9] sm:$0x33]  ;;  %v1542_v39 = vld [vmem:[%s1933_s1 + $0xb8] sm:$0xff] }
  0x16   : > { %534 = vmatpush.bf16.msra.mxu1 %v1556_v9  ;;  %v1552_v27 = vld [vmem:[%s1933_s1 + $0x108] sm:$0xff]  ;;  %v1543_v34 = vld [vmem:[%s1933_s1 + $0xc0] sm:$0xff]  ;;  %v560_v43 = vunpack.c.l.b16 %v1777_v33  ;;  %v1574_v44 = vld [vmem:[%s1933_s1 + $0x1b8] sm:$0xff] }
  0x17   : > { %547 = vmatpush.bf16.msra.mxu2 %v1564_v10  ;;  %v1560_v30 = vld [vmem:[%s1933_s1 + $0x148] sm:$0xff]  ;;  %v1551_v35 = vld [vmem:[%s1933_s1 + $0x100] sm:$0xff]  ;;  %v366_v36 = vpack.c.b16 %v363_v28, %v363_v28  ;;  %v367_v37 = vpack.c.b16 %v364_v29, %v364_v29  ;;  %v368_v42 = vpack.c.b16 %v365_v32, %v365_v32  ;;  %v1582_v45 = vld [vmem:[%s1933_s1 + $0x1f8] sm:$0xff] }
  0x18   : > { %715 = vmatpush.bf16.msra.mxu3 %v1524_v11  ;;  %v1520_v31 = vld [vmem:[%s1933_s1 + $0x8] sm:$0xff]  ;;  %v1559_v40 = vld [vmem:[%s1933_s1 + $0x140] sm:$0xff]  ;;  %v1533_v48 = vld [vmem:[%s1933_s1 + $0x70] sm:$0xff]  ;;  %v563_v51 = vpack.c.b16 %v560_v43, %v560_v43 }
  0x19   : > { %522 = vmatpush.bf16.msra.mxu0 %v1547_v12  ;;  %v1519_v41 = vld [vmem:[%s1933_s1] sm:$0xff]  ;;  %v369_v46 = vrot.slane %v366_v36, 1  ;;  %v370_v47 = vrot.slane %v367_v37, 1  ;;  %v1541_v49 = vld [vmem:[%s1933_s1 + $0xb0] sm:$0xff]  ;;  %v371_v50 = vrot.slane %v368_v42, 1  ;;  %v1532_v54 = vld [vmem:[%s1933_s1 + $0x68] sm:$0xff] }
  0x1a   : > { %535 = vmatpush.bf16.msra.mxu1 %v1555_v13  ;;  %v1573_v52 = vld [vmem:[%s1933_s1 + $0x1b0] sm:$0xff]  ;;  %v1540_v55 = vld [vmem:[%s1933_s1 + $0xa8] sm:$0xff]  ;;  %v1531_v58 = vld [vmem:[%s1933_s1 + $0x60] sm:$0xff] }
  0x1b   : > { %548 = vmatpush.bf16.msra.mxu2 %v1563_v14  ;;  %v1581_v53 = vld [vmem:[%s1933_s1 + $0x1f0] sm:$0xff]  ;;  %v1572_v56 = vld [vmem:[%s1933_s1 + $0x1a8] sm:$0xff]  ;;  %v1539_v59 = vld [vmem:[%s1933_s1 + $0xa0] sm:$0xff]  ;;  %v561_v14 = vunpack.c.h.b16 %v1777_v33 }
  0x1c   : > { %716 = vmatpush.bf16.msra.mxu3 %v1523_v15  ;;  %v1580_v57 = vld [vmem:[%s1933_s1 + $0x1e8] sm:$0xff]  ;;  %v1571_v60 = vld [vmem:[%s1933_s1 + $0x1a0] sm:$0xff]  ;;  %v1530_v62 = vld [vmem:[%s1933_s1 + $0x58] sm:$0xff] }
  0x1d   : > { %523 = vmatpush.bf16.msra.mxu0 %v1546_v16  ;;  %v1579_v61 = vld [vmem:[%s1933_s1 + $0x1e0] sm:$0xff]  ;;  %v1538_v63 = vld [vmem:[%s1933_s1 + $0x98] sm:$0xff]  ;;  %v1529_v2 = vld [vmem:[%s1933_s1 + $0x50] sm:$0xff] }
  0x1e   : > { %536 = vmatpush.bf16.msra.mxu1 %v1554_v17  ;;  %v1570_v0 = vld [vmem:[%s1933_s1 + $0x198] sm:$0xff]  ;;  %v1537_v3 = vld [vmem:[%s1933_s1 + $0x90] sm:$0xff]  ;;  %v752_v6 = vld [vmem:[%s1748_s9] sm:$0xcc] }
  0x1f   : > { %549 = vmatpush.bf16.msra.mxu2 %v1562_v18  ;;  %v1578_v1 = vld [vmem:[%s1933_s1 + $0x1d8] sm:$0xff]  ;;  %v1569_v4 = vld [vmem:[%s1933_s1 + $0x190] sm:$0xff]  ;;  %v1528_v7 = vld [vmem:[%s1933_s1 + $0x48] sm:$0xff]  ;;  %v805_v10 = vunpack.c.l.b16 %v752_v6  ;;  %v806_v13 = vunpack.c.h.b16 %v752_v6 }
  0x20   : > { %717 = vmatpush.bf16.msra.mxu3 %v1522_v19  ;;  %v1577_v5 = vld [vmem:[%s1933_s1 + $0x1d0] sm:$0xff]  ;;  %v1536_v8 = vld [vmem:[%s1933_s1 + $0x88] sm:$0xff]  ;;  %v1527_v16 = vld [vmem:[%s1933_s1 + $0x40] sm:$0xff] }
  0x21   : > { %524 = vmatpush.bf16.msra.mxu0 %v1545_v20  ;;  %v261_v9 = vld [vmem:[%s1748_s9 + $0x8] sm:$0x3]  ;;  %v1535_v17 = vld [vmem:[%s1933_s1 + $0x80] sm:$0xff]  ;;  %v1590_v18 = vld [vmem:[%s1933_s1 + $0x238] sm:$0xff]  ;;  %v808_v19 = vpack.c.b16 %v805_v10, %v805_v10  ;;  %v809_v22 = vpack.c.b16 %v806_v13, %v806_v13 }
  0x22   : > { %537 = vmatpush.bf16.msra.mxu1 %v1553_v21  ;;  %v1568_v11 = vld [vmem:[%s1933_s1 + $0x188] sm:$0xff]  ;;  %v562_v15 = vunpack.c.l.b16 %v261_v9  ;;  %v1567_v20 = vld [vmem:[%s1933_s1 + $0x180] sm:$0xff]  ;;  %v1589_v25 = vld [vmem:[%s1933_s1 + $0x230] sm:$0xff] }
  0x23   : > { %550 = vmatpush.bf16.msra.mxu2 %v1561_v23  ;;  %v1576_v12 = vld [vmem:[%s1933_s1 + $0x1c8] sm:$0xff]  ;;  %v1575_v21 = vld [vmem:[%s1933_s1 + $0x1c0] sm:$0xff]  ;;  %v564_v23 = vpack.c.b16 %v561_v14, %v561_v14 }
  0x24   : > { %718 = vmatpush.bf16.msra.mxu3 %v1521_v24  ;;  %v565_v24 = vpack.c.b16 %v562_v15, %v562_v15  ;;  %v1588_v28 = vld [vmem:[%s1933_s1 + $0x228] sm:$0xff]  ;;  %v1587_v29 = vld [vmem:[%s1933_s1 + $0x220] sm:$0xff] }
  0x25   : > { %525 = vmatpush.bf16.msra.mxu0 %v1544_v26  ;;  %v811_v26 = vrot.slane %v808_v19, 2  ;;  %v753_v32 = vld [vmem:[%s1748_s9 + $0x8] sm:$0xc]  ;;  %v1583_v36 = vld [vmem:[%s1933_s1 + $0x200] sm:$0xff]  ;;  %s1131_s9 = sshll.u32 %s1941_s12, 1 }
  0x26   : > { %538 = vmatpush.bf16.msra.mxu1 %v1552_v27  ;;  %v812_v27 = vrot.slane %v809_v22, 2  ;;  %v807_v33 = vunpack.c.l.b16 %v753_v32  ;;  %s249_s5 = scalar_lea.vmem %s1934_s2, %s1131_s9  ;;  %s259_s8 = scalar_lea.vmem %s1935_s3, %s1131_s9 }
  0x27   : > { %551 = vmatpush.bf16.msra.mxu2 %v1560_v30  ;;  %v1586_v30 = vld [vmem:[%s1933_s1 + $0x218] sm:$0xff] }
  0x28   : > { %719 = vmatpush.bf16.msra.mxu3 %v1520_v31  ;;  %v1585_v31 = vld [vmem:[%s1933_s1 + $0x210] sm:$0xff] }
  0x29   : > { %526 = vmatpush.bf16.msra.mxu0 %v1543_v34  ;;  %v1584_v34 = vld [vmem:[%s1933_s1 + $0x208] sm:$0xff] }
  0x2a   : > { %539 = vmatpush.bf16.msra.mxu1 %v1551_v35  ;;  %v810_v35 = vpack.c.b16 %v807_v33, %v807_v33 }
  0x2b   : > { %552 = vmatpush.bf16.msra.mxu2 %v1559_v40 }
  0x2c   : > { %720 = vmatpush.bf16.msra.mxu3 %v1519_v41  ;;  %527 = vmatmul.bf16.vlgmr.msra.gmra.mxu0 %v369_v46  ;;  %v813_v37 = vrot.slane %v810_v35, 2 }
  0x2d   : > { %726 = vmatpush.bf16.msrb.mxu0 %v1534_v38  ;;  %540 = vmatmul.bf16.vlgmr.msra.gmra.mxu1 %v370_v47 }
  0x2e   : > { %739 = vmatpush.bf16.msrb.mxu1 %v1542_v39  ;;  %553 = vmatmul.bf16.vlgmr.msra.gmra.mxu2 %v371_v50 }
  0x2f   : > { %961 = vmatpush.bf16.msrb.mxu2 %v1574_v44  ;;  %721 = vmatmul.bf16.vlgmr.msra.gmra.mxu3 %v563_v51 }
  0x30   : > { %974 = vmatpush.bf16.msrb.mxu3 %v1582_v45 }
  0x31   : > { %727 = vmatpush.bf16.msrb.mxu0 %v1533_v48 }
  0x32   : > { %740 = vmatpush.bf16.msrb.mxu1 %v1541_v49 }
  0x33   : > { %962 = vmatpush.bf16.msrb.mxu2 %v1573_v52 }
  0x34   : > { %975 = vmatpush.bf16.msrb.mxu3 %v1581_v53 }
  0x35   : > { %728 = vmatpush.bf16.msrb.mxu0 %v1532_v54 }
  0x36   : > { %741 = vmatpush.bf16.msrb.mxu1 %v1540_v55 }
  0x37   : > { %963 = vmatpush.bf16.msrb.mxu2 %v1572_v56 }
  0x38   : > { %976 = vmatpush.bf16.msrb.mxu3 %v1580_v57 }
  0x39   : > { %729 = vmatpush.bf16.msrb.mxu0 %v1531_v58 }
  0x3a   : > { %742 = vmatpush.bf16.msrb.mxu1 %v1539_v59  ;;  %v1001_v59 = vld [vmem:[%s249_s5] sm:$0x3] }
  0x3b   : > { %964 = vmatpush.bf16.msrb.mxu2 %v1571_v60 }
  0x3c   : > { %977 = vmatpush.bf16.msrb.mxu3 %v1579_v61 }
  0x3d   : > { %730 = vmatpush.bf16.msrb.mxu0 %v1530_v62 }
  0x3e   : > { %743 = vmatpush.bf16.msrb.mxu1 %v1538_v63  ;;  %v1002_v63 = vunpack.c.l.bf16 %v1001_v59 }
  0x3f   : > { %965 = vmatpush.bf16.msrb.mxu2 %v1570_v0 }
  0x40   : > { %978 = vmatpush.bf16.msrb.mxu3 %v1578_v1 }
  0x41   : > { %731 = vmatpush.bf16.msrb.mxu0 %v1529_v2 }
  0x42   : > { %744 = vmatpush.bf16.msrb.mxu1 %v1537_v3 }
  0x43   : > { %966 = vmatpush.bf16.msrb.mxu2 %v1569_v4 }
  0x44   : > { %979 = vmatpush.bf16.msrb.mxu3 %v1577_v5 }
  0x45   : > { %732 = vmatpush.bf16.msrb.mxu0 %v1528_v7 }
  0x46   : > { %745 = vmatpush.bf16.msrb.mxu1 %v1536_v8 }
  0x47   : > { %967 = vmatpush.bf16.msrb.mxu2 %v1568_v11 }
  0x48   : > { %980 = vmatpush.bf16.msrb.mxu3 %v1576_v12 }
  0x49   : > { %733 = vmatpush.bf16.msrb.mxu0 %v1527_v16 }
  0x4a   : > { %746 = vmatpush.bf16.msrb.mxu1 %v1535_v17 }
  0x4b   : > { %968 = vmatpush.bf16.msrb.mxu2 %v1567_v20 }
  0x4c   : > { %981 = vmatpush.bf16.msrb.mxu3 %v1575_v21  ;;  %734 = vmatmul.bf16.vlgmr.msrb.gmra.mxu0 %v564_v23 }
  0x4d   : > { %987 = vmatpush.bf16.msra.mxu0 %v1590_v18  ;;  %747 = vmatmul.bf16.vlgmr.msrb.gmra.mxu1 %v565_v24 }
  0x4e   : > { %969 = vmatmul.bf16.vlgmr.msrb.gmra.mxu2 %v811_v26 }
  0x4f   : > { %982 = vmatmul.bf16.vlgmr.msrb.gmra.mxu3 %v812_v27 }
  0x51   : > { %988 = vmatpush.bf16.msra.mxu0 %v1589_v25 }
  0x55   : > { %989 = vmatpush.bf16.msra.mxu0 %v1588_v28 }
  0x59   : > { %990 = vmatpush.bf16.msra.mxu0 %v1587_v29 }
  0x5d   : > { %991 = vmatpush.bf16.msra.mxu0 %v1586_v30 }
  0x61   : > { %992 = vmatpush.bf16.msra.mxu0 %v1585_v31 }
  0x65   : > { %993 = vmatpush.bf16.msra.mxu0 %v1584_v34 }
  0x69   : > { %994 = vmatpush.bf16.msra.mxu0 %v1583_v36 }
  0x6c   : > { %995 = vmatmul.bf16.vlgmr.msra.gmra.mxu0 %v813_v37 }
  0xa9   : > { %v528_v38 = vpop.f32.mrf.mxu0 }
  0xaa   : > { %v541_v39 = vpop.f32.mrf.mxu1 }
  0xab   : > { %v542_v52 = vadd.f32 %v541_v39, %v528_v38 }
  0xb1   : > { %v530_v40 = vpop.f32.mrf.mxu0  ;;  %v554_v42 = vpop.f32.mrf.mxu2 }
  0xb2   : > { %v543_v41 = vpop.f32.mrf.mxu1  ;;  %v722_v43 = vpop.f32.mrf.mxu3  ;;  %v555_v55 = vadd.f32 %v554_v42, %v542_v52 }
  0xb4   : > { %v723_v56 = vadd.f32 %v722_v43, %v555_v55 }
  0xb9   : > { %v556_v44 = vpop.f32.mrf.mxu2 }
  0xba   : > { %v724_v45 = vpop.f32.mrf.mxu3 }
  0xc9   : > { %v735_v46 = vpop.f32.mrf.mxu0 }
  0xca   : > { %v748_v47 = vpop.f32.mrf.mxu1  ;;  %v736_v57 = vadd.f32 %v735_v46, %v723_v56 }
  0xcc   : > { %v749_v61 = vadd.f32 %v748_v47, %v736_v57 }
  0xd1   : > { %v737_v48 = vpop.f32.mrf.mxu0  ;;  %v970_v49 = vpop.f32.mrf.mxu2 }
  0xd2   : > { %v983_v50 = vpop.f32.mrf.mxu3  ;;  %v750_v51 = vpop.f32.mrf.mxu1 }
  0xd3   : > { %v984_v58 = vadd.f32 %v983_v50, %v970_v49 }
  0xd9   : > { %v972_v53 = vpop.f32.mrf.mxu2 }
  0xda   : > { %v985_v54 = vpop.f32.mrf.mxu3 }
  0xe9   : > { %v996_v60 = vpop.f32.mrf.mxu0 }
  0xea   : > { %v997_v62 = vadd.f32 %v996_v60, %v984_v58 }
  0xec   : > { %v1000_v0 = vadd.f32 %v997_v62, %v749_v61 }
  0xee   : > { %v1003_v1 = vadd.f32 %v1002_v63, %v1000_v0 }
  0xf0   : > { %v1004_v2 = vpack.c.bf16 %v1003_v1, %v1003_v1 }
  0xf1   : > { %v998_v3 = vpop.f32.mrf.mxu0 }
  0xf2   : > { %1005 = vst [vmem:[%s259_s8] sm:$0x3] %v1004_v2 }
  0xf3 PF: > { %s13_s14 = sadd.s32 1, %s1638_s14   ;;  %s1936_s12 = smov %s1634_s13 }
  0xf4   : > { %p10_p5 = scmp.ge.s32.totalorder %s13_s14, 4   ;;  %s1937_s13 = smov %s1939_s15 }
  0xf6   :  { %12 = sbr.rel (!%p10_p5) target bundleno = 2 (0x2), region = 70 }

// kernel: unetres_forward.61
= control target key start
LH: loop header
LB: loop body
LE: loop exit
PB: predicated region body
PF: predicated region fallthrough
CT: control target
= control target key end

     0   :  { %s657_s12 = smov 0   ;;  %s659_s13 = smov 0   ;;  %s729_s0 = inlined_call_operand.vmem [shape: bf16[2,16,64], index: 0, kind: input, shape index: {}]   ;;  %s730_s1 = inlined_call_operand.vmem [shape: bf16[2,16,64], index: 1, kind: input, shape index: {}]   ;;  %s731_s2 = inlined_call_operand.vmem [shape: bf16[2,64,64], index: 2, kind: input, shape index: {}]   ;;  %s732_s3 = inlined_call_operand.vmem [shape: bf16[2,4,2,4,64], index: 3, kind: output, shape index: {}]  }
   0x1   :  { %s661_s14 = smov 0  }
   0x2 LB: > { %s25_s15 = sadd.s32 1, %s631_s13  ;;  %p512_p0 = scmp.ge.s32.totalorder %s635_s14, 1  ;;  %s635_s14 = sphi %s661_s14, %s13_s14   ;;  %s631_s13 = sphi %s659_s13, %s734_s13   ;;  %s627_s12 = sphi %s657_s12, %s733_s12  }
   0x3   : > { %p27_p1 = scmp.ge.s32.totalorder %s25_s15, 2  ;;  %p175_p2 = scmp.lt.s32.totalorder %s635_s14, 3 }
   0x5   : > { %s736_s15 = smov (%p27_p1, %s25_s15), 0  ;;  %p176_p3 = pnand %p512_p0, %p175_p2 }
   0x6   : > { %p218_p4 = scmp.lt.s32.totalorder (!%p176_p3), %s627_s12, 1 }
   0x7   : > { %179 = sbr.rel (%p176_p3) target bundleno = 193 (0xc1), region = 32 }
   0xc   : > { %v576_v0 = vld [vmem:[%s731_s2 + $0x18] sm:$0xff]  ;;  %v575_v2 = vld [vmem:[%s731_s2 + $0x10] sm:$0xff]  ;;  %s738_s12 = smov (!%p218_p4, %s627_s12), 1  ;;  %v574_v4 = vld [vmem:[%s731_s2 + $0x8] sm:$0xff]  ;;  %vm292_vm0 = vcmask 523264   ;;  %vm312_vm1 = vcmask 517120  }
   0xd   : > { %v580_v1 = vld [vmem:[%s731_s2 + $0x38] sm:$0xff]  ;;  %300 = vmatpush.bf16.msra.mxu0 %v576_v0  ;;  %v579_v3 = vld [vmem:[%s731_s2 + $0x30] sm:$0xff]  ;;  %s570_s24 = sshll.u32 %s738_s12, 3  ;;  %v578_v11 = vld [vmem:[%s731_s2 + $0x28] sm:$0xff]  ;;  %s572_s16 = sshll.u32 %s738_s12, 4 }
   0xe   : > { %367 = vmatpush.bf16.msra.mxu1 %v580_v1  ;;  %s225_s27 = scalar_lea.vmem %s729_s0, %s570_s24  ;;  %s235_s30 = scalar_lea.vmem %s730_s1, %s570_s24  ;;  %v573_v14 = vld [vmem:[%s731_s2] sm:$0xff] }
   0xf   : > { %v582_v5 = vld [vmem:[%s225_s27] sm:$0xff]   ;;  %s246_s19 = scalar_lea.vmem %s732_s3, %s572_s16 }
  0x10   : > { %v586_v6 = vld [vmem:[%s235_s30] sm:$0xff]   ;;  %v583_v7 = vunpack.c.l.bf16 %v582_v5  ;;  %v584_v8 = vunpack.c.h.bf16 %v582_v5 }
  0x11   : > { %301 = vmatpush.bf16.msra.mxu0 %v575_v2  ;;  %v587_v9 = vunpack.c.l.bf16 %v586_v6  ;;  %v588_v10 = vunpack.c.h.bf16 %v586_v6  ;;  %v577_v15 = vld [vmem:[%s731_s2 + $0x20] sm:$0xff] }
  0x12   : > { %368 = vmatpush.bf16.msra.mxu1 %v579_v3 }
  0x13   : > { %v257_v12 = vadd.f32 %v587_v9, %v583_v7  ;;  %v258_v13 = vadd.f32 %v588_v10, %v584_v8 }
  0x15   : > { %302 = vmatpush.bf16.msra.mxu0 %v574_v4  ;;  %v259_v16 = vpack.c.bf16 %v258_v13, %v257_v12 }
  0x16   : > { %369 = vmatpush.bf16.msra.mxu1 %v578_v11 }
  0x19   : > { %303 = vmatpush.bf16.msra.mxu0 %v573_v14 }
  0x1a   : > { %370 = vmatpush.bf16.msra.mxu1 %v577_v15 }
  0x1c   : > { %535 = vmatmul.msk.bf16.vlgmr.msra.gmra.mxu0 %vm292_vm0, %v259_v16 }
  0x1d   : > { %563 = vmatmul.msk.bf16.vlgmr.msra.gmra.mxu1 %vm292_vm0, %v259_v16 }
  0x99   : > { %v305_v17 = vpop.f32.mrf.mxu0 }
  0x9a   : > { %v310_v18 = vpack.c.bf16 %v305_v17, %v305_v17  ;;  %v372_v19 = vpop.f32.mrf.mxu1 }
  0x9b   : > { %v377_v20 = vpack.c.bf16 %v372_v19, %v372_v19 }
  0x9c   : > { %313 = vst.msk [vmem:[%s246_s19] sm:$0x3] %vm312_vm1, %v310_v18 }
  0x9d   : > { %315 = vst.sshfl [vmem:[#allocation1] sm:$0xff pattern:$0x75643120] %v310_v18 }
  0x9e   : > { %564 = vst.msk [vmem:[%s246_s19 + $0x2] sm:$0x3] %vm312_vm1, %v377_v20 }
  0xa1   : > { %v307_v21 = vpop.f32.mrf.mxu0 }
  0xa2   : > { %v311_v22 = vpack.c.bf16 %v307_v21, %v307_v21  ;;  %v374_v23 = vpop.f32.mrf.mxu1 }
  0xa3   : > { %v378_v24 = vpack.c.bf16 %v374_v23, %v374_v23 }
  0xa4   : > { %v317_v25 = vld [vmem:[#allocation1 + $0x1] ss:$2 sm:$0xff]  ;;  %537 = vst.msk [vmem:[%s246_s19 + $0x8] sm:$0x3] %vm312_vm1, %v311_v22 }
  0xa5   : > { %536 = vst.msk [vmem:[%s246_s19 + $0x4] sm:$0x3] %vm312_vm1, %v317_v25 }
  0xa6   : > { %324 = vst.sshfl [vmem:[#allocation1] sm:$0xff pattern:$0x75643120] %v311_v22 }
  0xa7   : > { %566 = vst.msk [vmem:[%s246_s19 + $0xa] sm:$0x3] %vm312_vm1, %v378_v24 }
  0xad   : > { %v326_v26 = vld [vmem:[#allocation1 + $0x1] ss:$2 sm:$0xff] }
  0xae   : > { %538 = vst.msk [vmem:[%s246_s19 + $0xc] sm:$0x3] %vm312_vm1, %v326_v26 }
  0xaf   : > { %382 = vst.sshfl [vmem:[#allocation1] sm:$0xff pattern:$0x75643120] %v377_v20 }
  0xb6   : > { %v384_v27 = vld [vmem:[#allocation1 + $0x1] ss:$2 sm:$0xff] }
  0xb7   : > { %565 = vst.msk [vmem:[%s246_s19 + $0x6] sm:$0x3] %vm312_vm1, %v384_v27 }
  0xb8   : > { %391 = vst.sshfl [vmem:[#allocation1] sm:$0xff pattern:$0x75643120] %v378_v24 }
  0xbf   : > { %v393_v28 = vld [vmem:[#allocation1 + $0x1] ss:$2 sm:$0xff] }
  0xc0   : > { %567 = vst.msk [vmem:[%s246_s19 + $0xe] sm:$0x3] %vm312_vm1, %v393_v28 }
  0xc1 PF: > { %s13_s14 = sadd.s32 1, %s635_s14   ;;  %s733_s12 = smov %s631_s13 }
  0xc2   : > { %p10_p5 = scmp.ge.s32.totalorder %s13_s14, 4   ;;  %s734_s13 = smov %s736_s15 }
  0xc4   :  { %12 = sbr.rel (!%p10_p5) target bundleno = 2 (0x2), region = 77 }

// kernel: unetres_forward.66
= control target key start
LH: loop header
LB: loop body
LE: loop exit
PB: predicated region body
PF: predicated region fallthrough
CT: control target
= control target key end

     0   :  { %s729_s12 = smov 0   ;;  %s731_s13 = smov 0   ;;  %s835_s0 = inlined_call_operand.vmem [shape: bf16[2,64,32], index: 0, kind: input, shape index: {}]   ;;  %s836_s1 = inlined_call_operand.vmem [shape: bf16[2,64,32], index: 1, kind: input, shape index: {}]   ;;  %s837_s2 = inlined_call_operand.vmem [shape: bf16[2,32,32], index: 2, kind: input, shape index: {}]   ;;  %s838_s3 = inlined_call_operand.vmem [shape: bf16[2,8,2,8,32], index: 3, kind: output, shape index: {}]  }
   0x1   :  { %s733_s14 = smov 0  }
   0x2 LB: > { %s25_s15 = sadd.s32 1, %s703_s13  ;;  %p560_p0 = scmp.ge.s32.totalorder %s707_s14, 1  ;;  %s707_s14 = sphi %s733_s14, %s13_s14   ;;  %s703_s13 = sphi %s731_s13, %s840_s13   ;;  %s699_s12 = sphi %s729_s12, %s839_s12  }
   0x3   : > { %p27_p1 = scmp.ge.s32.totalorder %s25_s15, 2  ;;  %p175_p2 = scmp.lt.s32.totalorder %s707_s14, 3 }
   0x5   : > { %s842_s15 = smov (%p27_p1, %s25_s15), 0  ;;  %p176_p3 = pnand %p560_p0, %p175_p2 }
   0x6   : > { %p218_p4 = scmp.lt.s32.totalorder (!%p176_p3), %s699_s12, 1 }
   0x7   : > { %179 = sbr.rel (%p176_p3) target bundleno = 184 (0xb8), region = 32 }
   0xc   : > { %v616_v0 = vld [vmem:[%s837_s2 + $0x8] sm:$0xff]  ;;  %v618_v1 = vld [vmem:[%s837_s2 + $0x18] sm:$0xff]  ;;  %v615_v2 = vld [vmem:[%s837_s2] sm:$0xff]  ;;  %s844_s12 = smov (!%p218_p4, %s699_s12), 1  ;;  %vm309_vm0 = vcmask 261120   ;;  %vm359_vm1 = vcmask 257024  }
   0xd   : > { %328 = vmatpush.bf16.msra.mxu0 %v616_v0  ;;  %657 = vmatpush.bf16.msra.mxu2 %v616_v0  ;;  %v617_v3 = vld [vmem:[%s837_s2 + $0x10] sm:$0xff]  ;;  %s612_s24 = sshll.u32 %s844_s12, 5  ;;  %s614_s4 = sshll.u32 %s844_s12, 6 }
   0xe   : > { %398 = vmatpush.bf16.msra.mxu1 %v618_v1  ;;  %659 = vmatpush.bf16.msra.mxu3 %v618_v1  ;;  %s765_s27 = scalar_lea.vmem %s835_s0, %s612_s24  ;;  %s770_s30 = scalar_lea.vmem %s836_s1, %s612_s24 }
   0xf   : > { %v620_v4 = vld [vmem:[%s765_s27] sm:$0xff]   ;;  %v652_v6 = vld [vmem:[%s765_s27 + $0x10] sm:$0xff]   ;;  %v651_v22 = vld [vmem:[%s765_s27 + $0x8] sm:$0xff]   ;;  %s792_s7 = scalar_lea.vmem %s838_s3, %s614_s4 }
  0x10   : > { %v636_v5 = vld [vmem:[%s770_s30] sm:$0xff]   ;;  %v621_v7 = vunpack.c.l.bf16 %v620_v4  ;;  %v622_v8 = vunpack.c.h.bf16 %v620_v4  ;;  %v655_v11 = vld [vmem:[%s770_s30 + $0x10] sm:$0xff]   ;;  %v629_v12 = vunpack.c.l.bf16 %v652_v6  ;;  %v630_v13 = vunpack.c.h.bf16 %v652_v6  ;;  %v654_v23 = vld [vmem:[%s770_s30 + $0x8] sm:$0xff]  }
  0x11   : > { %329 = vmatpush.bf16.msra.mxu0 %v615_v2  ;;  %658 = vmatpush.bf16.msra.mxu2 %v615_v2  ;;  %v637_v9 = vunpack.c.l.bf16 %v636_v5  ;;  %v638_v10 = vunpack.c.h.bf16 %v636_v5  ;;  %v645_v14 = vunpack.c.l.bf16 %v655_v11  ;;  %v646_v15 = vunpack.c.h.bf16 %v655_v11  ;;  %v653_v24 = vld [vmem:[%s765_s27 + $0x18] sm:$0xff]  }
  0x12   : > { %399 = vmatpush.bf16.msra.mxu1 %v617_v3  ;;  %660 = vmatpush.bf16.msra.mxu3 %v617_v3  ;;  %v656_v25 = vld [vmem:[%s770_s30 + $0x18] sm:$0xff]   ;;  %v625_v26 = vunpack.c.l.bf16 %v651_v22  ;;  %v626_v27 = vunpack.c.h.bf16 %v651_v22  ;;  %v641_v28 = vunpack.c.l.bf16 %v654_v23  ;;  %v642_v29 = vunpack.c.h.bf16 %v654_v23 }
  0x13   : > { %v281_v16 = vadd.f32 %v637_v9, %v621_v7  ;;  %v282_v17 = vadd.f32 %v638_v10, %v622_v8  ;;  %v285_v18 = vadd.f32 %v645_v14, %v629_v12  ;;  %v286_v19 = vadd.f32 %v646_v15, %v630_v13 }
  0x14   : > { %v633_v30 = vunpack.c.l.bf16 %v653_v24  ;;  %v634_v31 = vunpack.c.h.bf16 %v653_v24  ;;  %v649_v32 = vunpack.c.l.bf16 %v656_v25  ;;  %v650_v33 = vunpack.c.h.bf16 %v656_v25 }
  0x15   : > { %v289_v20 = vpack.c.bf16 %v282_v17, %v281_v16  ;;  %v291_v21 = vpack.c.bf16 %v286_v19, %v285_v18  ;;  %v283_v34 = vadd.f32 %v641_v28, %v625_v26  ;;  %v284_v35 = vadd.f32 %v642_v29, %v626_v27 }
  0x16   : > { %v287_v36 = vadd.f32 %v649_v32, %v633_v30  ;;  %v288_v37 = vadd.f32 %v650_v33, %v634_v31 }
  0x17   : > { %575 = vmatmul.msk.bf16.vlgmr.msra.gmra.mxu0 %vm309_vm0, %v289_v20  ;;  %598 = vmatmul.msk.bf16.vlgmr.msra.gmra.mxu1 %vm309_vm0, %v289_v20  ;;  %v290_v38 = vpack.c.bf16 %v284_v35, %v283_v34 }
  0x18   : > { %577 = vmatmul.msk.bf16.vlgmr.msra.gmra.mxu2 %vm309_vm0, %v291_v21  ;;  %600 = vmatmul.msk.bf16.vlgmr.msra.gmra.mxu3 %vm309_vm0, %v291_v21  ;;  %v292_v39 = vpack.c.bf16 %v288_v37, %v287_v36 }
  0x27   : > { %576 = vmatmul.msk.bf16.gmra.mxu0 %vm309_vm0, %v290_v38  ;;  %599 = vmatmul.msk.bf16.gmra.mxu1 %vm309_vm0, %v290_v38 }
  0x28   : > { %578 = vmatmul.msk.bf16.gmra.mxu2 %vm309_vm0, %v292_v39  ;;  %601 = vmatmul.msk.bf16.gmra.mxu3 %vm309_vm0, %v292_v39 }
  0x94   : > { %v331_v40 = vpop.f32.mrf.mxu0  ;;  %v401_v41 = vpop.f32.mrf.mxu1 }
  0x95   : > { %v351_v42 = vpack.c.bf16 %v331_v40, %v331_v40  ;;  %v421_v43 = vpack.c.bf16 %v401_v41, %v401_v41 }
  0x97   : > { %360 = vst.msk [vmem:[%s792_s7] sm:$0xf] %vm359_vm1, %v351_v42 }
  0x98   : > { %602 = vst.msk [vmem:[%s792_s7 + $0x4] sm:$0xf] %vm359_vm1, %v421_v43 }
  0x9b   : > { %v341_v44 = vpop.f32.mrf.mxu2  ;;  %v411_v45 = vpop.f32.mrf.mxu3 }
  0x9c   : > { %v355_v46 = vpack.c.bf16 %v341_v44, %v341_v44  ;;  %v425_v47 = vpack.c.bf16 %v411_v45, %v411_v45  ;;  %v333_v48 = vpop.f32.mrf.mxu0  ;;  %v403_v49 = vpop.f32.mrf.mxu1 }
  0x9d   : > { %v352_v50 = vpack.c.bf16 %v333_v48, %v333_v48  ;;  %v422_v51 = vpack.c.bf16 %v403_v49, %v403_v49 }
  0x9e   : > { %582 = vst.msk [vmem:[%s792_s7 + $0x20] sm:$0xf] %vm359_vm1, %v355_v46 }
  0x9f   : > { %606 = vst.msk [vmem:[%s792_s7 + $0x24] sm:$0xf] %vm359_vm1, %v425_v47 }
  0xa0   : > { %579 = vst.msk [vmem:[%s792_s7 + $0x8] sm:$0xf] %vm359_vm1, %v352_v50 }
  0xa1   : > { %603 = vst.msk [vmem:[%s792_s7 + $0xc] sm:$0xf] %vm359_vm1, %v422_v51 }
  0xa3   : > { %v343_v52 = vpop.f32.mrf.mxu2  ;;  %v413_v53 = vpop.f32.mrf.mxu3 }
  0xa4   : > { %v356_v54 = vpack.c.bf16 %v343_v52, %v343_v52  ;;  %v426_v55 = vpack.c.bf16 %v413_v53, %v413_v53  ;;  %v336_v56 = vpop.f32.mrf.mxu0  ;;  %v406_v57 = vpop.f32.mrf.mxu1 }
  0xa5   : > { %v353_v58 = vpack.c.bf16 %v336_v56, %v336_v56  ;;  %v423_v59 = vpack.c.bf16 %v406_v57, %v406_v57 }
  0xa6   : > { %583 = vst.msk [vmem:[%s792_s7 + $0x28] sm:$0xf] %vm359_vm1, %v356_v54 }
  0xa7   : > { %607 = vst.msk [vmem:[%s792_s7 + $0x2c] sm:$0xf] %vm359_vm1, %v426_v55 }
  0xa8   : > { %580 = vst.msk [vmem:[%s792_s7 + $0x10] sm:$0xf] %vm359_vm1, %v353_v58 }
  0xa9   : > { %604 = vst.msk [vmem:[%s792_s7 + $0x14] sm:$0xf] %vm359_vm1, %v423_v59 }
  0xab   : > { %v346_v60 = vpop.f32.mrf.mxu2  ;;  %v416_v61 = vpop.f32.mrf.mxu3 }
  0xac   : > { %v357_v62 = vpack.c.bf16 %v346_v60, %v346_v60  ;;  %v427_v63 = vpack.c.bf16 %v416_v61, %v416_v61  ;;  %v338_v0 = vpop.f32.mrf.mxu0  ;;  %v408_v1 = vpop.f32.mrf.mxu1 }
  0xad   : > { %v354_v2 = vpack.c.bf16 %v338_v0, %v338_v0  ;;  %v424_v3 = vpack.c.bf16 %v408_v1, %v408_v1 }
  0xae   : > { %584 = vst.msk [vmem:[%s792_s7 + $0x30] sm:$0xf] %vm359_vm1, %v357_v62 }
  0xaf   : > { %608 = vst.msk [vmem:[%s792_s7 + $0x34] sm:$0xf] %vm359_vm1, %v427_v63 }
  0xb0   : > { %581 = vst.msk [vmem:[%s792_s7 + $0x18] sm:$0xf] %vm359_vm1, %v354_v2 }
  0xb1   : > { %605 = vst.msk [vmem:[%s792_s7 + $0x1c] sm:$0xf] %vm359_vm1, %v424_v3 }
  0xb3   : > { %v348_v4 = vpop.f32.mrf.mxu2  ;;  %v418_v5 = vpop.f32.mrf.mxu3 }
  0xb4   : > { %v358_v6 = vpack.c.bf16 %v348_v4, %v348_v4  ;;  %v428_v7 = vpack.c.bf16 %v418_v5, %v418_v5 }
  0xb6   : > { %585 = vst.msk [vmem:[%s792_s7 + $0x38] sm:$0xf] %vm359_vm1, %v358_v6 }
  0xb7   : > { %609 = vst.msk [vmem:[%s792_s7 + $0x3c] sm:$0xf] %vm359_vm1, %v428_v7 }
  0xb8 PF: > { %s13_s14 = sadd.s32 1, %s707_s14   ;;  %s839_s12 = smov %s703_s13 }
  0xb9   : > { %p10_p5 = scmp.ge.s32.totalorder %s13_s14, 4   ;;  %s840_s13 = smov %s842_s15 }
  0xbb   :  { %12 = sbr.rel (!%p10_p5) target bundleno = 2 (0x2), region = 81 }

// kernel: unetres_forward.71
= control target key start
LH: loop header
LB: loop body
LE: loop exit
PB: predicated region body
PF: predicated region fallthrough
CT: control target
= control target key end

     0   :  { %s1527_s9 = smov 0   ;;  %s1529_s10 = smov 0   ;;  %s1735_s0 = inlined_call_operand.vmem [shape: bf16[2,288,48], index: 0, kind: input, shape index: {}]   ;;  %s1736_s1 = inlined_call_operand.vmem [shape: bf16[3,48,128], index: 1, kind: input, shape index: {}]   ;;  %s1737_s2 = inlined_call_operand.vmem [shape: bf16[2,256,128], index: 2, kind: output, shape index: {}]  }
   0x1   :  { %s1531_s11 = smov 0  }
   0x2 LB: > { %s31_s12 = sadd.s32 1, %s1506_s10  ;;  %p1082_p0 = scmp.ge.s32.totalorder %s1510_s11, 1  ;;  %s1510_s11 = sphi %s1531_s11, %s12_s11   ;;  %s1506_s10 = sphi %s1529_s10, %s1739_s10   ;;  %s1502_s9 = sphi %s1527_s9, %s1738_s9  }
   0x3   : > { %p33_p1 = scmp.ge.s32.totalorder %s31_s12, 2  ;;  %p144_p2 = scmp.lt.s32.totalorder %s1510_s11, 3 }
   0x5   : > { %s1741_s12 = smov (%p33_p1, %s31_s12), 0  ;;  %p145_p3 = pnand %p1082_p0, %p144_p2 }
   0x6   : > { %p177_p4 = scmp.lt.s32.totalorder (!%p145_p3), %s1502_s9, 1 }
   0x7   : > { %148 = sbr.rel (%p145_p3) target bundleno = 347 (0x15b), region = 28 }
   0xc   : > { %v1339_v0 = vld [vmem:[%s1736_s1 + $0x28] sm:$0xff]  ;;  %v1335_v1 = vld [vmem:[%s1736_s1 + $0x10] sm:$0xff]  ;;  %v1358_v2 = vld [vmem:[%s1736_s1 + $0x40] sm:$0xff]  ;;  %s1743_s9 = smov (!%p177_p4, %s1502_s9), 1  ;;  %vm345_vm0 = vcmask 392192  }
   0xd   : > { %399 = vmatpush.bf16.msra.mxu0 %v1339_v0  ;;  %1454 = vmatpush.bf16.msra.mxu3 %v1339_v0  ;;  %v1338_v3 = vld [vmem:[%s1736_s1 + $0x20] sm:$0xff]  ;;  %v1334_v4 = vld [vmem:[%s1736_s1 + $0x8] sm:$0xff]  ;;  %v1357_v5 = vld [vmem:[%s1736_s1 + $0x38] sm:$0xff]  ;;  %s1463_s25 = smul.u32 144, %s1743_s9  ;;  %s1316_s7 = sshll.u32 %s1743_s9, 7 }
   0xe   : > { %514 = vmatpush.bf16.msra.mxu1 %v1335_v1  ;;  %788 = vmatpush.bf16.msra.mxu2 %v1358_v2  ;;  %v1337_v6 = vld [vmem:[%s1736_s1 + $0x18] sm:$0xff]  ;;  %v1333_v7 = vld [vmem:[%s1736_s1] sm:$0xff]  ;;  %v1356_v8 = vld [vmem:[%s1736_s1 + $0x30] sm:$0xff]  ;;  %s1655_s14 = scalar_lea.vmem %s1737_s2, %s1316_s7 }
   0xf   : > { %s1572_s30 = scalar_lea.vmem %s1735_s0, %s1463_s25 }
  0x10   : > { %v1318_v9 = vld [vmem:[%s1572_s30 + $0x8] sm:$0xff]  ;;  %v1317_v11 = vld [vmem:[%s1572_s30] sm:$0xff]  ;;  %v1340_v12 = vld [vmem:[%s1572_s30 + $0x10] sm:$0xff] }
  0x11   : > { %400 = vmatpush.bf16.msra.mxu0 %v1338_v3  ;;  %1455 = vmatpush.bf16.msra.mxu3 %v1338_v3  ;;  %v1330_v10 = vld [vmem:[%s1572_s30 + $0x68] sm:$0xff]  ;;  %v1319_v13 = vld [vmem:[%s1572_s30 + $0x10] sm:$0xff]  ;;  %v1341_v15 = vld [vmem:[%s1572_s30 + $0x18] sm:$0xff] }
  0x12   : > { %515 = vmatpush.bf16.msra.mxu1 %v1334_v4  ;;  %789 = vmatpush.bf16.msra.mxu2 %v1357_v5  ;;  %v1331_v14 = vld [vmem:[%s1572_s30 + $0x70] sm:$0xff]  ;;  %v1320_v16 = vld [vmem:[%s1572_s30 + $0x18] sm:$0xff]  ;;  %v1342_v18 = vld [vmem:[%s1572_s30 + $0x20] sm:$0xff] }
  0x13   : > { %v1332_v17 = vld [vmem:[%s1572_s30 + $0x78] sm:$0xff]  ;;  %v1321_v19 = vld [vmem:[%s1572_s30 + $0x20] sm:$0xff]  ;;  %v1343_v21 = vld [vmem:[%s1572_s30 + $0x28] sm:$0xff] }
  0x14   : > { %v1336_v20 = vld [vmem:[%s1572_s30 + $0x80] sm:$0xff]  ;;  %v1322_v22 = vld [vmem:[%s1572_s30 + $0x28] sm:$0xff]  ;;  %v1344_v24 = vld [vmem:[%s1572_s30 + $0x30] sm:$0xff] }
  0x15   : > { %401 = vmatpush.bf16.msra.mxu0 %v1337_v6  ;;  %1456 = vmatpush.bf16.msra.mxu3 %v1337_v6  ;;  %v1611_v23 = vld [vmem:[%s1572_s30 + $0x60] sm:$0xff]  ;;  %v1323_v25 = vld [vmem:[%s1572_s30 + $0x30] sm:$0xff]  ;;  %v1345_v26 = vld [vmem:[%s1572_s30 + $0x38] sm:$0xff] }
  0x16   : > { %516 = vmatpush.bf16.msra.mxu1 %v1333_v7  ;;  %790 = vmatpush.bf16.msra.mxu2 %v1356_v8  ;;  %v1324_v27 = vld [vmem:[%s1572_s30 + $0x38] sm:$0xff]  ;;  %v1346_v28 = vld [vmem:[%s1572_s30 + $0x40] sm:$0xff]  ;;  %v1347_v30 = vld [vmem:[%s1572_s30 + $0x48] sm:$0xff] }
  0x17   : > { %v1325_v29 = vld [vmem:[%s1572_s30 + $0x40] sm:$0xff]  ;;  %v1326_v31 = vld [vmem:[%s1572_s30 + $0x48] sm:$0xff]  ;;  %v1352_v32 = vld [vmem:[%s1572_s30 + $0x70] sm:$0xff] }
  0x18   : > { %1168 = vmatmul.msk.bf16.vlgmr.msra.gmra.mxu0 %vm345_vm0, %v1318_v9  ;;  %1180 = vmatmul.msk.bf16.vlgmr.msra.gmra.mxu3 %vm345_vm0, %v1330_v10  ;;  %v1348_v34 = vld [vmem:[%s1572_s30 + $0x50] sm:$0xff]  ;;  %v1353_v45 = vld [vmem:[%s1572_s30 + $0x78] sm:$0xff]  ;;  %v1354_v61 = vld [vmem:[%s1572_s30 + $0x80] sm:$0xff] }
  0x19   : > { %1457 = vmatpush.bf16.msrb.mxu3 %v1335_v1  ;;  %1200 = vmatmul.msk.bf16.vlgmr.msra.gmra.mxu1 %vm345_vm0, %v1317_v11  ;;  %v1327_v44 = vld [vmem:[%s1572_s30 + $0x50] sm:$0xff]  ;;  %v1349_v49 = vld [vmem:[%s1572_s30 + $0x58] sm:$0xff]  ;;  %v1350_v1 = vld [vmem:[%s1572_s30 + $0x60] sm:$0xff] }
  0x1a   : > { %1298 = vmatmul.msk.bf16.vlgmr.msra.gmra.mxu2 %vm345_vm0, %v1340_v12  ;;  %v1328_v60 = vld [vmem:[%s1572_s30 + $0x58] sm:$0xff]  ;;  %v1355_v12 = vld [vmem:[%s1572_s30 + $0x88] sm:$0xff] }
  0x1d   : > { %1458 = vmatpush.bf16.msrb.mxu3 %v1334_v4 }
  0x21   : > { %1459 = vmatpush.bf16.msrb.mxu3 %v1333_v7 }
  0x25   : > { %1460 = vmatpush.bf16.msra.mxu3 %v1358_v2 }
  0x28   : > { %1169 = vmatmul.msk.bf16.gmra.mxu0 %vm345_vm0, %v1319_v13  ;;  %1181 = vmatmul.msk.bf16.gmra.mxu3 %vm345_vm0, %v1331_v14 }
  0x29   : > { %1461 = vmatpush.bf16.msra.mxu3 %v1357_v5  ;;  %1201 = vmatmul.msk.bf16.gmra.mxu1 %vm345_vm0, %v1318_v9 }
  0x2a   : > { %1299 = vmatmul.msk.bf16.gmra.mxu2 %vm345_vm0, %v1341_v15 }
  0x2d   : > { %1462 = vmatpush.bf16.msra.mxu3 %v1356_v8 }
  0x38   : > { %1170 = vmatmul.msk.bf16.gmra.mxu0 %vm345_vm0, %v1320_v16  ;;  %1182 = vmatmul.msk.bf16.gmra.mxu3 %vm345_vm0, %v1332_v17 }
  0x39   : > { %1202 = vmatmul.msk.bf16.gmra.mxu1 %vm345_vm0, %v1319_v13 }
  0x3a   : > { %1300 = vmatmul.msk.bf16.gmra.mxu2 %vm345_vm0, %v1342_v18 }
  0x48   : > { %1171 = vmatmul.msk.bf16.gmra.mxu0 %vm345_vm0, %v1321_v19  ;;  %1183 = vmatmul.msk.bf16.gmra.mxu3 %vm345_vm0, %v1336_v20 }
  0x49   : > { %1203 = vmatmul.msk.bf16.gmra.mxu1 %vm345_vm0, %v1320_v16  ;;  %v1351_v16 = vld [vmem:[%s1572_s30 + $0x68] sm:$0xff] }
  0x4a   : > { %1301 = vmatmul.msk.bf16.gmra.mxu2 %vm345_vm0, %v1343_v21 }
  0x58   : > { %1172 = vmatmul.msk.bf16.gmra.mxu0 %vm345_vm0, %v1322_v22  ;;  %1212 = vmatmul.msk.bf16.vlgmr.msrb.gmra.mxu3 %vm345_vm0, %v1611_v23 }
  0x59   : > { %1204 = vmatmul.msk.bf16.gmra.mxu1 %vm345_vm0, %v1321_v19 }
  0x5a   : > { %1302 = vmatmul.msk.bf16.gmra.mxu2 %vm345_vm0, %v1344_v24 }
  0x68   : > { %1173 = vmatmul.msk.bf16.gmra.mxu0 %vm345_vm0, %v1323_v25  ;;  %1213 = vmatmul.msk.bf16.gmra.mxu3 %vm345_vm0, %v1330_v10 }
  0x69   : > { %1205 = vmatmul.msk.bf16.gmra.mxu1 %vm345_vm0, %v1322_v22 }
  0x6a   : > { %1303 = vmatmul.msk.bf16.gmra.mxu2 %vm345_vm0, %v1345_v26 }
  0x78   : > { %1174 = vmatmul.msk.bf16.gmra.mxu0 %vm345_vm0, %v1324_v27  ;;  %1214 = vmatmul.msk.bf16.gmra.mxu3 %vm345_vm0, %v1331_v14 }
  0x79   : > { %1206 = vmatmul.msk.bf16.gmra.mxu1 %vm345_vm0, %v1323_v25 }
  0x7a   : > { %1304 = vmatmul.msk.bf16.gmra.mxu2 %vm345_vm0, %v1346_v28 }
  0x88   : > { %1175 = vmatmul.msk.bf16.gmra.mxu0 %vm345_vm0, %v1325_v29  ;;  %1215 = vmatmul.msk.bf16.gmra.mxu3 %vm345_vm0, %v1332_v17 }
  0x89   : > { %1207 = vmatmul.msk.bf16.gmra.mxu1 %vm345_vm0, %v1324_v27 }
  0x8a   : > { %1305 = vmatmul.msk.bf16.gmra.mxu2 %vm345_vm0, %v1347_v30 }
  0x95   : > { %v403_v33 = vpop.f32.mrf.mxu0 }
  0x96   : > { %v518_v35 = vpop.f32.mrf.mxu1 }
  0x97   : > { %v519_v40 = vadd.f32 %v518_v35, %v403_v33 }
  0x98   : > { %1176 = vmatmul.msk.bf16.gmra.mxu0 %vm345_vm0, %v1326_v31  ;;  %1310 = vmatmul.msk.bf16.vlgmr.msra.gmra.mxu3 %vm345_vm0, %v1352_v32 }
  0x99   : > { %1208 = vmatmul.msk.bf16.gmra.mxu1 %vm345_vm0, %v1325_v29 }
  0x9a   : > { %1306 = vmatmul.msk.bf16.gmra.mxu2 %vm345_vm0, %v1348_v34 }
  0x9b   : > { %v1644_v36 = vpop.f32.mrf.mxu3 }
  0x9d   : > { %v792_v37 = vpop.f32.mrf.mxu2  ;;  %v405_v38 = vpop.f32.mrf.mxu0 }
  0x9e   : > { %v520_v39 = vpop.f32.mrf.mxu1  ;;  %v872_v46 = vadd.f32 %v792_v37, %v519_v40 }
  0x9f   : > { %v521_v41 = vadd.f32 %v520_v39, %v405_v38 }
  0xa3   : > { %v1646_v42 = vpop.f32.mrf.mxu3 }
  0xa5   : > { %v794_v43 = vpop.f32.mrf.mxu2  ;;  %v408_v48 = vpop.f32.mrf.mxu0 }
  0xa6   : > { %v873_v47 = vadd.f32 %v794_v43, %v521_v41  ;;  %v523_v50 = vpop.f32.mrf.mxu1 }
  0xa7   : > { %v524_v56 = vadd.f32 %v523_v50, %v408_v48 }
  0xa8   : > { %v1362_v51 = vpack.c.bf16 %v873_v47, %v872_v46  ;;  %1177 = vmatmul.msk.bf16.gmra.mxu0 %vm345_vm0, %v1327_v44  ;;  %1311 = vmatmul.msk.bf16.gmra.mxu3 %vm345_vm0, %v1353_v45 }
  0xa9   : > { %1209 = vmatmul.msk.bf16.gmra.mxu1 %vm345_vm0, %v1326_v31 }
  0xaa   : > { %1363 = vst [vmem:[%s1655_s14] sm:$0xff] %v1362_v51   ;;  %1307 = vmatmul.msk.bf16.gmra.mxu2 %vm345_vm0, %v1349_v49 }
  0xab   : > { %v1662_v52 = vpop.f32.mrf.mxu3 }
  0xad   : > { %v797_v53 = vpop.f32.mrf.mxu2  ;;  %v410_v54 = vpop.f32.mrf.mxu0 }
  0xae   : > { %v525_v55 = vpop.f32.mrf.mxu1  ;;  %v874_v62 = vadd.f32 %v797_v53, %v524_v56 }
  0xaf   : > { %v526_v57 = vadd.f32 %v525_v55, %v410_v54 }
  0xb3   : > { %v1664_v58 = vpop.f32.mrf.mxu3 }
  0xb5   : > { %v799_v59 = vpop.f32.mrf.mxu2  ;;  %v413_v0 = vpop.f32.mrf.mxu0 }
  0xb6   : > { %v875_v63 = vadd.f32 %v799_v59, %v526_v57  ;;  %v528_v2 = vpop.f32.mrf.mxu1 }
  0xb7   : > { %v529_v8 = vadd.f32 %v528_v2, %v413_v0 }
  0xb8   : > { %v1367_v3 = vpack.c.bf16 %v875_v63, %v874_v62  ;;  %1178 = vmatmul.msk.bf16.gmra.mxu0 %vm345_vm0, %v1328_v60  ;;  %1312 = vmatmul.msk.bf16.gmra.mxu3 %vm345_vm0, %v1354_v61 }
  0xb9   : > { %1210 = vmatmul.msk.bf16.gmra.mxu1 %vm345_vm0, %v1327_v44 }
  0xba   : > { %1439 = vst [vmem:[%s1655_s14 + $0x8] sm:$0xff] %v1367_v3   ;;  %1308 = vmatmul.msk.bf16.gmra.mxu2 %vm345_vm0, %v1350_v1 }
  0xbb   : > { %v1674_v4 = vpop.f32.mrf.mxu3 }
  0xbd   : > { %v802_v5 = vpop.f32.mrf.mxu2  ;;  %v415_v6 = vpop.f32.mrf.mxu0 }
  0xbe   : > { %v530_v7 = vpop.f32.mrf.mxu1  ;;  %v876_v13 = vadd.f32 %v802_v5, %v529_v8 }
  0xbf   : > { %v531_v9 = vadd.f32 %v530_v7, %v415_v6 }
  0xc3   : > { %v1676_v10 = vpop.f32.mrf.mxu3 }
  0xc5   : > { %v804_v11 = vpop.f32.mrf.mxu2  ;;  %v418_v15 = vpop.f32.mrf.mxu0 }
  0xc6   : > { %v877_v14 = vadd.f32 %v804_v11, %v531_v9  ;;  %v533_v17 = vpop.f32.mrf.mxu1 }
  0xc7   : > { %v534_v24 = vadd.f32 %v533_v17, %v418_v15 }
  0xc8   : > { %v1372_v18 = vpack.c.bf16 %v877_v14, %v876_v13  ;;  %1179 = vmatmul.msk.bf16.gmra.mxu0 %vm345_vm0, %v1611_v23  ;;  %1313 = vmatmul.msk.bf16.gmra.mxu3 %vm345_vm0, %v1355_v12 }
  0xc9   : > { %1211 = vmatmul.msk.bf16.gmra.mxu1 %vm345_vm0, %v1328_v60 }
  0xca   : > { %1440 = vst [vmem:[%s1655_s14 + $0x10] sm:$0xff] %v1372_v18   ;;  %1309 = vmatmul.msk.bf16.gmra.mxu2 %vm345_vm0, %v1351_v16 }
  0xcb   : > { %v478_v19 = vpop.f32.mrf.mxu3 }
  0xcd   : > { %v807_v20 = vpop.f32.mrf.mxu2  ;;  %v420_v21 = vpop.f32.mrf.mxu0 }
  0xce   : > { %v535_v22 = vpop.f32.mrf.mxu1  ;;  %v878_v28 = vadd.f32 %v807_v20, %v534_v24 }
  0xcf   : > { %v536_v25 = vadd.f32 %v535_v22, %v420_v21 }
  0xd3   : > { %v1686_v26 = vpop.f32.mrf.mxu3 }
  0xd5   : > { %v809_v27 = vpop.f32.mrf.mxu2  ;;  %v423_v23 = vpop.f32.mrf.mxu0 }
  0xd6   : > { %v879_v29 = vadd.f32 %v809_v27, %v536_v25  ;;  %v538_v30 = vpop.f32.mrf.mxu1 }
  0xd7   : > { %v539_v38 = vadd.f32 %v538_v30, %v423_v23 }
  0xd8   : > { %v1377_v31 = vpack.c.bf16 %v879_v29, %v878_v28 }
  0xda   : > { %1441 = vst [vmem:[%s1655_s14 + $0x18] sm:$0xff] %v1377_v31  }
  0xdb   : > { %v578_v32 = vpop.f32.mrf.mxu3 }
  0xdc   : > { %v1690_v33 = vadd.f32 %v578_v32, %v1644_v36 }
  0xdd   : > { %v812_v34 = vpop.f32.mrf.mxu2  ;;  %v425_v35 = vpop.f32.mrf.mxu0 }
  0xde   : > { %v540_v37 = vpop.f32.mrf.mxu1  ;;  %v880_v43 = vadd.f32 %v812_v34, %v539_v38 }
  0xdf   : > { %v541_v39 = vadd.f32 %v540_v37, %v425_v35 }
  0xe3   : > { %v580_v40 = vpop.f32.mrf.mxu3 }
  0xe4   : > { %v581_v34 = vadd.f32 %v580_v40, %v1646_v42 }
  0xe5   : > { %v814_v41 = vpop.f32.mrf.mxu2  ;;  %v428_v45 = vpop.f32.mrf.mxu0 }
  0xe6   : > { %v881_v44 = vadd.f32 %v814_v41, %v541_v39  ;;  %v543_v46 = vpop.f32.mrf.mxu1 }
  0xe7   : > { %v544_v53 = vadd.f32 %v543_v46, %v428_v45 }
  0xe8   : > { %v1382_v47 = vpack.c.bf16 %v881_v44, %v880_v43 }
  0xea   : > { %1442 = vst [vmem:[%s1655_s14 + $0x20] sm:$0xff] %v1382_v47  }
  0xeb   : > { %v583_v48 = vpop.f32.mrf.mxu3 }
  0xec   : > { %v1694_v49 = vadd.f32 %v583_v48, %v1662_v52 }
  0xed   : > { %v817_v36 = vpop.f32.mrf.mxu2  ;;  %v430_v50 = vpop.f32.mrf.mxu0 }
  0xee   : > { %v545_v51 = vpop.f32.mrf.mxu1  ;;  %v882_v57 = vadd.f32 %v817_v36, %v544_v53 }
  0xef   : > { %v546_v54 = vadd.f32 %v545_v51, %v430_v50 }
  0xf3   : > { %v585_v55 = vpop.f32.mrf.mxu3 }
  0xf4   : > { %v586_v53 = vadd.f32 %v585_v55, %v1664_v58 }
  0xf5   : > { %v819_v56 = vpop.f32.mrf.mxu2  ;;  %v433_v60 = vpop.f32.mrf.mxu0 }
  0xf6   : > { %v883_v59 = vadd.f32 %v819_v56, %v546_v54  ;;  %v548_v61 = vpop.f32.mrf.mxu1 }
  0xf7   : > { %v549_v3 = vadd.f32 %v548_v61, %v433_v60 }
  0xf8   : > { %v1387_v62 = vpack.c.bf16 %v883_v59, %v882_v57 }
  0xfa   : > { %1443 = vst [vmem:[%s1655_s14 + $0x28] sm:$0xff] %v1387_v62  }
  0xfb   : > { %v588_v63 = vpop.f32.mrf.mxu3 }
  0xfc   : > { %v1698_v0 = vadd.f32 %v588_v63, %v1674_v4 }
  0xfd   : > { %v822_v52 = vpop.f32.mrf.mxu2  ;;  %v435_v1 = vpop.f32.mrf.mxu0 }
  0xfe   : > { %v550_v2 = vpop.f32.mrf.mxu1  ;;  %v884_v8 = vadd.f32 %v822_v52, %v549_v3 }
  0xff   : > { %v551_v5 = vadd.f32 %v550_v2, %v435_v1 }
 0x103   : > { %v1700_v6 = vpop.f32.mrf.mxu3 }
 0x105   : > { %v824_v7 = vpop.f32.mrf.mxu2  ;;  %v438_v11 = vpop.f32.mrf.mxu0 }
 0x106   : > { %v885_v9 = vadd.f32 %v824_v7, %v551_v5  ;;  %v553_v12 = vpop.f32.mrf.mxu1 }
 0x107   : > { %v554_v18 = vadd.f32 %v553_v12, %v438_v11 }
 0x108   : > { %v1392_v13 = vpack.c.bf16 %v885_v9, %v884_v8 }
 0x10a   : > { %1444 = vst [vmem:[%s1655_s14 + $0x30] sm:$0xff] %v1392_v13  }
 0x10b   : > { %v593_v14 = vpop.f32.mrf.mxu3 }
 0x10c   : > { %v1703_v15 = vadd.f32 %v593_v14, %v478_v19 }
 0x10d   : > { %v827_v4 = vpop.f32.mrf.mxu2  ;;  %v440_v16 = vpop.f32.mrf.mxu0 }
 0x10e   : > { %v555_v17 = vpop.f32.mrf.mxu1  ;;  %v886_v24 = vadd.f32 %v827_v4, %v554_v18 }
 0x10f   : > { %v556_v20 = vadd.f32 %v555_v17, %v440_v16 }
 0x113   : > { %v1705_v21 = vpop.f32.mrf.mxu3 }
 0x115   : > { %v829_v22 = vpop.f32.mrf.mxu2  ;;  %v443_v27 = vpop.f32.mrf.mxu0 }
 0x116   : > { %v887_v25 = vadd.f32 %v829_v22, %v556_v20  ;;  %v558_v28 = vpop.f32.mrf.mxu1 }
 0x117   : > { %v559_v32 = vadd.f32 %v558_v28, %v443_v27 }
 0x118   : > { %v1397_v29 = vpack.c.bf16 %v887_v25, %v886_v24 }
 0x11a   : > { %1445 = vst [vmem:[%s1655_s14 + $0x38] sm:$0xff] %v1397_v29  }
 0x11b   : > { %v852_v23 = vpop.f32.mrf.mxu3 }
 0x11c   : > { %v896_v38 = vadd.f32 %v852_v23, %v1690_v33 }
 0x11d   : > { %v832_v30 = vpop.f32.mrf.mxu2  ;;  %v445_v31 = vpop.f32.mrf.mxu0 }
 0x11e   : > { %v560_v19 = vpop.f32.mrf.mxu1  ;;  %v888_v43 = vadd.f32 %v832_v30, %v559_v32 }
 0x11f   : > { %v561_v35 = vadd.f32 %v560_v19, %v445_v31 }
 0x123   : > { %v854_v37 = vpop.f32.mrf.mxu3 }
 0x124   : > { %v897_v41 = vadd.f32 %v854_v37, %v581_v34 }
 0x125   : > { %v834_v39 = vpop.f32.mrf.mxu2  ;;  %v448_v45 = vpop.f32.mrf.mxu0 }
 0x126   : > { %v889_v44 = vadd.f32 %v834_v39, %v561_v35  ;;  %v1422_v46 = vpack.c.bf16 %v897_v41, %v896_v38  ;;  %v563_v47 = vpop.f32.mrf.mxu1 }
 0x127   : > { %v564_v40 = vadd.f32 %v563_v47, %v448_v45 }
 0x128   : > { %v1402_v48 = vpack.c.bf16 %v889_v44, %v888_v43  ;;  %1450 = vst [vmem:[%s1655_s14 + $0x60] sm:$0xff] %v1422_v46  }
 0x12a   : > { %1446 = vst [vmem:[%s1655_s14 + $0x40] sm:$0xff] %v1402_v48  }
 0x12b   : > { %v857_v36 = vpop.f32.mrf.mxu3 }
 0x12c   : > { %v898_v56 = vadd.f32 %v857_v36, %v1694_v49  ;;  %v591_v49 = vadd.f32 %v1700_v6, %v1676_v10 }
 0x12d   : > { %v837_v50 = vpop.f32.mrf.mxu2  ;;  %v450_v51 = vpop.f32.mrf.mxu0 }
 0x12e   : > { %v565_v42 = vpop.f32.mrf.mxu1  ;;  %v890_v60 = vadd.f32 %v837_v50, %v564_v40 }
 0x12f   : > { %v566_v33 = vadd.f32 %v565_v42, %v450_v51 }
 0x133   : > { %v859_v54 = vpop.f32.mrf.mxu3 }
 0x134   : > { %v899_v59 = vadd.f32 %v859_v54, %v586_v53 }
 0x135   : > { %v839_v57 = vpop.f32.mrf.mxu2  ;;  %v453_v62 = vpop.f32.mrf.mxu0 }
 0x136   : > { %v891_v61 = vadd.f32 %v839_v57, %v566_v33  ;;  %v1427_v63 = vpack.c.bf16 %v899_v59, %v898_v56  ;;  %v568_v52 = vpop.f32.mrf.mxu1 }
 0x137   : > { %v569_v55 = vadd.f32 %v568_v52, %v453_v62 }
 0x138   : > { %v1407_v1 = vpack.c.bf16 %v891_v61, %v890_v60  ;;  %1451 = vst [vmem:[%s1655_s14 + $0x68] sm:$0xff] %v1427_v63  }
 0x13a   : > { %1447 = vst [vmem:[%s1655_s14 + $0x48] sm:$0xff] %v1407_v1  }
 0x13b   : > { %v862_v2 = vpop.f32.mrf.mxu3 }
 0x13c   : > { %v900_v9 = vadd.f32 %v862_v2, %v1698_v0  ;;  %v596_v0 = vadd.f32 %v1705_v21, %v1686_v26 }
 0x13d   : > { %v842_v3 = vpop.f32.mrf.mxu2  ;;  %v455_v5 = vpop.f32.mrf.mxu0 }
 0x13e   : > { %v570_v58 = vpop.f32.mrf.mxu1  ;;  %v892_v13 = vadd.f32 %v842_v3, %v569_v55 }
 0x13f   : > { %v571_v7 = vadd.f32 %v570_v58, %v455_v5 }
 0x143   : > { %v864_v8 = vpop.f32.mrf.mxu3 }
 0x144   : > { %v901_v12 = vadd.f32 %v864_v8, %v591_v49 }
 0x145   : > { %v844_v11 = vpop.f32.mrf.mxu2  ;;  %v458_v16 = vpop.f32.mrf.mxu0 }
 0x146   : > { %v893_v14 = vadd.f32 %v844_v11, %v571_v7  ;;  %v1432_v4 = vpack.c.bf16 %v901_v12, %v900_v9  ;;  %v573_v17 = vpop.f32.mrf.mxu1 }
 0x147   : > { %v574_v6 = vadd.f32 %v573_v17, %v458_v16 }
 0x148   : > { %v1412_v18 = vpack.c.bf16 %v893_v14, %v892_v13  ;;  %1452 = vst [vmem:[%s1655_s14 + $0x70] sm:$0xff] %v1432_v4  }
 0x14a   : > { %1448 = vst [vmem:[%s1655_s14 + $0x50] sm:$0xff] %v1412_v18  }
 0x14b   : > { %v867_v20 = vpop.f32.mrf.mxu3 }
 0x14c   : > { %v902_v28 = vadd.f32 %v867_v20, %v1703_v15 }
 0x14d   : > { %v847_v22 = vpop.f32.mrf.mxu2  ;;  %v460_v24 = vpop.f32.mrf.mxu0 }
 0x14e   : > { %v575_v10 = vpop.f32.mrf.mxu1  ;;  %v894_v30 = vadd.f32 %v847_v22, %v574_v6 }
 0x14f   : > { %v576_v25 = vadd.f32 %v575_v10, %v460_v24 }
 0x153   : > { %v869_v27 = vpop.f32.mrf.mxu3 }
 0x154   : > { %v903_v23 = vadd.f32 %v869_v27, %v596_v0 }
 0x155   : > { %v849_v29 = vpop.f32.mrf.mxu2 }
 0x156   : > { %v895_v31 = vadd.f32 %v849_v29, %v576_v25  ;;  %v1437_v19 = vpack.c.bf16 %v903_v23, %v902_v28 }
 0x158   : > { %v1417_v32 = vpack.c.bf16 %v895_v31, %v894_v30  ;;  %1453 = vst [vmem:[%s1655_s14 + $0x78] sm:$0xff] %v1437_v19  }
 0x15a   : > { %1449 = vst [vmem:[%s1655_s14 + $0x58] sm:$0xff] %v1417_v32  }
 0x15b PF: > { %s12_s11 = sadd.s32 1, %s1510_s11   ;;  %s1738_s9 = smov %s1506_s10 }
 0x15c   : > { %p9_p5 = scmp.ge.s32.totalorder %s12_s11, 4   ;;  %s1739_s10 = smov %s1741_s12 }
 0x15e   :  { %11 = sbr.rel (!%p9_p5) target bundleno = 2 (0x2), region = 63 }

</bundles_post_ra>
